<compile_context>
chip_gen: v7x
topology: tpu7x:2x2x1
jax: 0.10.0
libtpu: 0.0.40
codegen_flags: <defaults>
</compile_context>

<pallas_src>
import functools

import jax
import jax.numpy as jnp
from jax import lax
from jax.experimental import pallas as pl
from jax.experimental.pallas import tpu as pltpu


# --------------------------- Pallas kernels ---------------------------------

def conv_caps_kernel(a_ref, w_ref, b_ref, o_ref, acc_ref, *, dim_caps,
                     fuse_squash):
    """Grid = (n_col_tiles, n_k_tiles).  o = [squash](A @ W^T + bias).

    a_ref : (M, TK)  bf16   patches K-tile
    w_ref : (TN, TK) bf16   weight K-tile, row-major (C_out, K) -> no transpose
    b_ref : (1, TN)  f32    bias column tile
    o_ref : (M, TN)  f32    output column tile (lane-dense)
    acc_ref: (M, TN) f32    VMEM accumulator, resident across K tiles
    """
    k = pl.program_id(1)

    @pl.when(k == 0)
    def _init():
        # Start the accumulator at the broadcast bias (saves an epilogue add).
        acc_ref[...] = jnp.broadcast_to(b_ref[...], acc_ref.shape)

    # Contract K of both operands (transposed-RHS handled natively by the MXU).
    acc_ref[...] += lax.dot_general(
        a_ref[...], w_ref[...],
        dimension_numbers=(((1,), (1,)), ((), ())),
        preferred_element_type=jnp.float32)

    @pl.when(k == pl.num_programs(1) - 1)
    def _finalize():
        acc = acc_ref[...]
        if fuse_squash:
            m, tn = acc.shape
            # A capsule = dim_caps consecutive rows of one column -> sublane
            # reduce; lanes stay dense.
            g = acc.reshape(m // dim_caps, dim_caps, tn)
            sq = jnp.sum(g * g, axis=1, keepdims=True)        # |v|^2
            norm = jnp.sqrt(sq)
            scale = sq * pl.reciprocal((1.0 + sq) * (norm + 1e-8), approx=True)
            acc = (g * scale).reshape(m, tn)
        o_ref[...] = acc.astype(o_ref.dtype)


def squash_kernel(x_ref, o_ref):
    """Fallback squash. x: (dim_caps, N) -- capsule dim on sublanes, capsules
    packed along lanes (lane-dense), reduce over axis 0."""
    x = x_ref[...]
    sq = jnp.sum(x * x, axis=0, keepdims=True)
    norm = jnp.sqrt(sq)
    scale = sq * pl.reciprocal((1.0 + sq) * (norm + 1e-8), approx=True)
    o_ref[...] = (scale * x).astype(o_ref.dtype)


# --------------------------- JAX glue ----------------------------------------

def im2col_nchw(x, ksize, stride):
    """Conv patches, feature order (C, kh, kw). Returns ((B*Ho*Wo, C*k*k), Ho, Wo)."""
    B, C, H, W = x.shape
    Ho = (H - ksize) // stride + 1
    Wo = (W - ksize) // stride + 1
    cols = []
    for i in range(ksize):
        for j in range(ksize):
            cols.append(x[:, :, i:i + stride * Ho:stride, j:j + stride * Wo:stride])
    patches = jnp.stack(cols, axis=2)                  # (B, C, k*k, Ho, Wo)
    patches = patches.reshape(B, C, ksize, ksize, Ho, Wo)
    patches = patches.transpose(0, 4, 5, 1, 2, 3)      # (B, Ho, Wo, C, kh, kw)
    return patches.reshape(B * Ho * Wo, C * ksize * ksize), Ho, Wo


def _pick_k_tile(K, max_tk):
    """Largest multiple of 128 dividing K and <= max_tk; fallback: full K."""
    best = None
    m = 1
    while 128 * m <= min(K, max_tk):
        if K % (128 * m) == 0:
            best = 128 * m
        m += 1
    return best if best is not None else K


def primary_caps_forward(x, weight, bias, *, dim_caps=8, stride=2):
    """Equivalent of PrimaryCaps.forward: conv -> view(B, -1, dim_caps) -> squash."""
    B, C_in, H, W = x.shape
    C_out, C_in_w, ksz, _ = weight.shape
    assert C_in == C_in_w

    # bf16 patches (halves the patch stream; bf16 is the native MXU input).
    patches, Ho, Wo = im2col_nchw(x.astype(jnp.bfloat16), ksz, stride)  # (M, K)
    M, K = patches.shape

    # Row-major (C_out, K) weight: reshape is a free view (no HBM transpose);
    # bf16 halves the dominant weight HBM stream (hoist the cast out of the hot
    # path when weights are static).
    w_mat = weight.reshape(C_out, K).astype(jnp.bfloat16)
    bias2d = bias.reshape(1, C_out).astype(jnp.float32)

    # Column tile: 128-wide so C_out=256 splits across v7x's two TensorCores.
    TN = 128 if C_out % 128 == 0 else C_out
    # K tile: biggest 128-multiple divisor whose double-buffered bf16 blocks fit
    # comfortably inside the default 32 MiB scoped-VMEM limit.
    budget = 24 << 20
    max_tk = max(128, budget // (2 * 2 * (M + TN)))
    TK = _pick_k_tile(K, max_tk)

    fuse_squash = (Ho * Wo) % dim_caps == 0 and M % dim_caps == 0

    kernel = functools.partial(conv_caps_kernel, dim_caps=dim_caps,
                               fuse_squash=fuse_squash)

    conv_flat = pl.pallas_call(
        kernel,
        out_shape=jax.ShapeDtypeStruct((M, C_out), jnp.float32),
        grid_spec=pltpu.PrefetchScalarGridSpec(
            num_scalar_prefetch=0,
            grid=(C_out // TN, K // TK),
            in_specs=[
                pl.BlockSpec((M, TK), lambda n, kk: (0, kk)),    # patches
                pl.BlockSpec((TN, TK), lambda n, kk: (n, kk)),   # weight (row-major)
                pl.BlockSpec((1, TN), lambda n, kk: (0, n)),     # bias
            ],
            out_specs=pl.BlockSpec((M, TN), lambda n, kk: (0, n)),
            scratch_shapes=[pltpu.VMEM((M, TN), jnp.float32)],
        ),
        compiler_params=pltpu.CompilerParams(
            dimension_semantics=("parallel", "arbitrary")),
    )(patches, w_mat, bias2d)

    # PyTorch-order view(B, -1, dim_caps) over the NCHW flatten.
    caps = (conv_flat.reshape(B, Ho, Wo, C_out)
            .transpose(0, 3, 1, 2)
            .reshape(B, -1, dim_caps))

    if fuse_squash:
        # Values were squashed in the matmul epilogue; `caps` is just a reorder.
        return caps

    # Fallback: separate squash kernel with a lane-dense layout
    # (dim_caps on sublanes, capsules along lanes).
    n_caps = caps.shape[1]
    caps_t = caps.reshape(B * n_caps, dim_caps).T            # (dim_caps, B*n_caps)
    squashed_t = pl.pallas_call(
        squash_kernel,
        out_shape=jax.ShapeDtypeStruct(caps_t.shape, jnp.float32),
    )(caps_t)
    return squashed_t.T.reshape(B, n_caps, dim_caps)


# --------------------------- main --------------------------------------------

if __name__ == "__main__":
    # Conv2d(256, 256, kernel_size=9, stride=2), dim_caps=8; 16x16 spatial -> 4x4.
    B, C_IN, C_OUT, KSIZE, STRIDE, H, W, DIM_CAPS = 2, 256, 256, 9, 2, 16, 16, 8

    key = jax.random.PRNGKey(0)
    kw, kb, kx = jax.random.split(key, 3)

    fan_in = C_IN * KSIZE * KSIZE
    bound = 1.0 / (fan_in ** 0.5)
    weight = jax.random.uniform(kw, (C_OUT, C_IN, KSIZE, KSIZE), jnp.float32,
                                minval=-bound, maxval=bound)
    bias = jax.random.uniform(kb, (C_OUT,), jnp.float32,
                              minval=-bound, maxval=bound)
    x = jax.random.normal(kx, (B, C_IN, H, W), jnp.float32)

    fwd = jax.jit(functools.partial(primary_caps_forward,
                                    dim_caps=DIM_CAPS, stride=STRIDE))
    out = jax.block_until_ready(fwd(x, weight, bias))

    Ho = (H - KSIZE) // STRIDE + 1
    Wo = (W - KSIZE) // STRIDE + 1
    assert out.shape == (B, C_OUT * Ho * Wo // DIM_CAPS, DIM_CAPS), out.shape

    # Pure-JAX f32 reference: conv -> view -> squash (loose tol for bf16 MXU inputs).
    conv_ref = lax.conv_general_dilated(
        x, weight, window_strides=(STRIDE, STRIDE), padding="VALID",
        dimension_numbers=("NCHW", "OIHW", "NCHW"),
        precision=lax.Precision.HIGHEST) + bias.reshape(1, C_OUT, 1, 1)
    caps_ref = conv_ref.reshape(B, -1, DIM_CAPS)
    sq_ref = jnp.sum(caps_ref * caps_ref, axis=-1, keepdims=True)
    nrm = jnp.sqrt(sq_ref)
    ref = caps_ref * (sq_ref / (1.0 + sq_ref) / (nrm + 1e-8))
    err = float(jnp.max(jnp.abs(out - ref)))
    assert err < 5e-2, f"max abs err {err}"

    print("KERNEL_OK")
</pallas_src>

<mosaic_0001>
module attributes {stable_mosaic.version = 11 : i64} {
  func.func @conv_caps_kernel(%arg0: i32, %arg1: i32, %arg2: memref<32x20736xbf16, #tpu.memory_space<vmem>>, %arg3: memref<128x20736xbf16, #tpu.memory_space<vmem>>, %arg4: memref<1x128xf32, #tpu.memory_space<vmem>>, %arg5: memref<32x128xf32, #tpu.memory_space<vmem>>, %arg6: memref<32x128xf32, #tpu.memory_space<vmem>>) attributes {dimension_semantics = [#tpu.dimension_semantics<parallel>, #tpu.dimension_semantics<arbitrary>], iteration_bounds = array<i64: 2, 1>, scalar_prefetch = 0 : i64, scratch_operands = 1 : i64, tpu.core_type = #tpu.core_type<tc>, window_params = [{transform_indices = @transform_0, window_bounds = array<i64: 32, 20736>}, {transform_indices = @transform_1, window_bounds = array<i64: 128, 20736>}, {transform_indices = @transform_2, window_bounds = array<i64: 1, 128>}, {transform_indices = @transform_3, window_bounds = array<i64: 32, 128>}]} {
    %c0_i32 = arith.constant 0 : i32
    %0 = arith.cmpi eq, %arg1, %c0_i32 : i32
    %1 = arith.extui %0 : i1 to i32
    %c0_i32_0 = arith.constant 0 : i32
    %2 = arith.cmpi ne, %1, %c0_i32_0 : i32
    scf.if %2 {
      %c0_10 = arith.constant 0 : index
      %c0_11 = arith.constant 0 : index
      %12 = vector.load %arg4[%c0_10, %c0_11] : memref<1x128xf32, #tpu.memory_space<vmem>>, vector<1x128xf32>
      %13 = vector.shape_cast %12 : vector<1x128xf32> to vector<1x128xf32>
      %14 = vector.broadcast %13 : vector<1x128xf32> to vector<32x128xf32>
      %c0_12 = arith.constant 0 : index
      %c0_13 = arith.constant 0 : index
      %15 = vector.load %arg6[%c0_12, %c0_13] : memref<32x128xf32, #tpu.memory_space<vmem>>, vector<32x128xf32>
      tpu.vector_store %arg6[%c0_12, %c0_13], %14 {strides = array<i32>} : memref<32x128xf32, #tpu.memory_space<vmem>>, vector<32x128xf32>,
    } else {
    }
    %c0 = arith.constant 0 : index
    %c0_1 = arith.constant 0 : index
    %3 = vector.load %arg6[%c0, %c0_1] : memref<32x128xf32, #tpu.memory_space<vmem>>, vector<32x128xf32>
    %c0_2 = arith.constant 0 : index
    %c0_3 = arith.constant 0 : index
    %4 = vector.load %arg2[%c0_2, %c0_3] : memref<32x20736xbf16, #tpu.memory_space<vmem>>, vector<32x20736xbf16>
    %c0_4 = arith.constant 0 : index
    %c0_5 = arith.constant 0 : index
    %5 = vector.load %arg3[%c0_4, %c0_5] : memref<128x20736xbf16, #tpu.memory_space<vmem>>, vector<128x20736xbf16>
    %cst = arith.constant dense<0.000000e+00> : vector<32x128xf32>
    %6 = tpu.matmul %4, %5, %cst {dimension_numbers = #tpu.dot_dimension_numbers<[1], [1], [0], [0], [0, 0, 1, 0], [], []>} : vector<32x20736xbf16>, vector<128x20736xbf16>, vector<32x128xf32> -> vector<32x128xf32>
    %7 = arith.addf %3, %6 : vector<32x128xf32>
    %c0_6 = arith.constant 0 : index
    %c0_7 = arith.constant 0 : index
    %8 = vector.load %arg6[%c0_6, %c0_7] : memref<32x128xf32, #tpu.memory_space<vmem>>, vector<32x128xf32>
    tpu.vector_store %arg6[%c0_6, %c0_7], %7 {strides = array<i32>} : memref<32x128xf32, #tpu.memory_space<vmem>>, vector<32x128xf32>,
    %c0_i32_8 = arith.constant 0 : i32
    %9 = arith.cmpi eq, %arg1, %c0_i32_8 : i32
    %10 = arith.extui %9 : i1 to i32
    %c0_i32_9 = arith.constant 0 : i32
    %11 = arith.cmpi ne, %10, %c0_i32_9 : i32
    scf.if %11 {
      %c0_10 = arith.constant 0 : index
      %c0_11 = arith.constant 0 : index
      %12 = vector.load %arg6[%c0_10, %c0_11] : memref<32x128xf32, #tpu.memory_space<vmem>>, vector<32x128xf32>
      %13 = vector.shape_cast %12 : vector<32x128xf32> to vector<4x8x128xf32>
      %14 = arith.mulf %13, %13 : vector<4x8x128xf32>
      %cst_12 = arith.constant dense<0.000000e+00> : vector<4x128xf32>
      %15 = vector.multi_reduction <add>, %14, %cst_12 [1] : vector<4x8x128xf32> to vector<4x128xf32>
      %16 = vector.shape_cast %15 : vector<4x128xf32> to vector<4x1x128xf32>
      %17 = math.sqrt %16 : vector<4x1x128xf32>
      %cst_13 = arith.constant 1.000000e+00 : f32
      %18 = vector.broadcast %cst_13 : f32 to vector<4x1x128xf32>
      %19 = arith.addf %18, %16 : vector<4x1x128xf32>
      %cst_14 = arith.constant 9.99999993E-9 : f32
      %20 = vector.broadcast %cst_14 : f32 to vector<4x1x128xf32>
      %21 = arith.addf %17, %20 : vector<4x1x128xf32>
      %22 = arith.mulf %19, %21 : vector<4x1x128xf32>
      %23 = tpu.reciprocal %22 {approx = true} : vector<4x1x128xf32> -> vector<4x1x128xf32>
      %24 = arith.mulf %16, %23 : vector<4x1x128xf32>
      %25 = vector.broadcast %24 : vector<4x1x128xf32> to vector<4x8x128xf32>
      %26 = arith.mulf %13, %25 : vector<4x8x128xf32>
      %27 = vector.shape_cast %26 : vector<4x8x128xf32> to vector<32x128xf32>
      %c0_15 = arith.constant 0 : index
      %c0_16 = arith.constant 0 : index
      %28 = vector.load %arg5[%c0_15, %c0_16] : memref<32x128xf32, #tpu.memory_space<vmem>>, vector<32x128xf32>
      tpu.vector_store %arg5[%c0_15, %c0_16], %27 {strides = array<i32>} : memref<32x128xf32, #tpu.memory_space<vmem>>, vector<32x128xf32>,
    } else {
    }
    return
  }
  func.func @transform_0(%arg0: i32, %arg1: i32) -> (i32, i32) {
    %c0_i32 = arith.constant 0 : i32
    %c0_i32_0 = arith.constant 0 : i32
    return %c0_i32, %arg1 : i32, i32
  }
  func.func @transform_1(%arg0: i32, %arg1: i32) -> (i32, i32) {
    %c0_i32 = arith.constant 0 : i32
    return %arg0, %arg1 : i32, i32
  }
  func.func @transform_2(%arg0: i32, %arg1: i32) -> (i32, i32) {
    %c0_i32 = arith.constant 0 : i32
    %c0_i32_0 = arith.constant 0 : i32
    return %c0_i32, %arg0 : i32, i32
  }
  func.func @transform_3(%arg0: i32, %arg1: i32) -> (i32, i32) {
    %c0_i32 = arith.constant 0 : i32
    %c0_i32_0 = arith.constant 0 : i32
    return %c0_i32, %arg0 : i32, i32
  }
}

</mosaic_0001>

<bundles_post_ra>
// kernel: primary_caps_forward.1
= control target key start
LH: loop header
LB: loop body
LE: loop exit
PB: predicated region body
PF: predicated region fallthrough
CT: control target
= control target key end

     0   :  { %s18381_s12 = smov 0   ;;  %s18383_s13 = smov 0   ;;  %s21177_s0 = inlined_call_operand.vmem [shape: bf16[32,20736], index: 0, kind: input, shape index: {}]   ;;  %s21178_s1 = inlined_call_operand.vmem [shape: bf16[256,20736], index: 1, kind: input, shape index: {}]   ;;  %s21179_s2 = inlined_call_operand.vmem [shape: f32[1,256], index: 2, kind: input, shape index: {}]   ;;  %s21180_s3 = inlined_call_operand.vmem [shape: f32[32,256], index: 3, kind: output, shape index: {}]  }
   0x1   :  { %s18385_s14 = smov 0   ;;  %s18387_s15 = smov 0  }
   0x2   :  { %s18389_s16 = smov 0  }
   0x3 LB: > { %s14184_s17 = sadd.s32 4294967295, %s18359_s16   ;;  %s25_s18 = sadd.s32 1, %s18355_s15  ;;  %s18359_s16 = sphi %s18389_s16, %s13_s16   ;;  %s18355_s15 = sphi %s18387_s15, %s21185_s15   ;;  %s18351_s14 = sphi %s18385_s14, %s21184_s14   ;;  %s18347_s13 = sphi %s18383_s13, %s21183_s13   ;;  %s18343_s12 = sphi %s18381_s12, %s21182_s12  }
   0x4   : > { %p27_p0 = scmp.ge.s32.totalorder %s25_s18, 2  ;;  %s112_s19 = sadd.s32 1, %s18347_s13 }
   0x5   : > { %p122_p1 = scmp.ne.s32.totalorder %s18347_s13, %s18343_s12  ;;  %p123_p2 = scmp.eq.s32.totalorder %s14184_s17, 1 }
   0x6   : > { %s21187_s18 = smov (%p27_p0, %s25_s18), 0  ;;  %p14189_p4 = scmp.ge.s32.totalorder %s18359_s16, 1 }
   0x7   : > { %p18413_p3 = por %p123_p2, %p122_p1  ;;  %s109_s21 = ssub.s32 %s18355_s15, %s21187_s18 }
   0x8   : > { %p177_p5 = scmp.lt.s32.totalorder %s18359_s16, 3  ;;  %p110_p6 = scmp.eq.s32.totalorder %s109_s21, 0 }
   0xa   : > { %p178_p7 = pnand %p14189_p4, %p177_p5 }
   0xb   : > { %s18422_s22 = scalar_select %p110_p6, %s18347_s13, %s112_s19  }
   0xc   : > { %181 = sbr.rel (%p178_p7) target bundleno = 2924 (0xb6c), region = 32  ;;  %s14191_s23 = sshll.u32 (!%p178_p7), %s18351_s14, 4  ;;  %v15925_v0 = vld [vmem:[%s21177_s0 + $0x4] ss:$648 sps:$4 sm:$0xff] (!%p178_p7)   ;;  %v15923_v36 = vld [vmem:[%s21177_s0] ss:$648 sps:$4 sm:$0xff] (!%p178_p7)  }
   0xd   : > { %p221_p8 = scmp.lt.s32.totalorder (!%p178_p7), %s14191_s23, 31  ;;  %v15928_v1 = vld [vmem:[%s21177_s0 + $0xc] ss:$648 sps:$4 sm:$0xff] (!%p178_p7)   ;;  %10006 = vmatprep.mubr.bf16.mxu0 (!%p178_p7), %v15925_v0  ;;  %v15926_v37 = vld [vmem:[%s21177_s0 + $0x8] ss:$648 sps:$4 sm:$0xff] (!%p178_p7)   ;;  %p231_p9 = scmp.lt.s32.totalorder (!%p178_p7), %s18351_s14, 1 }
   0xe   : > { %10055 = vmatprep.mubr.bf16.mxu1 (!%p178_p7), %v15928_v1  ;;  %v15971_v42 = vld [vmem:[%s21177_s0 + $0x514] ss:$648 sps:$4 sm:$0xff] (!%p178_p7)   ;;  %v15975_v44 = vld [vmem:[%s21177_s0 + $0x510] ss:$648 sps:$4 sm:$0xff] (!%p178_p7)   ;;  %s210_s30 = sand.u32 (!%p178_p7), 1, %s18343_s12  }
   0xf   : > { %v15973_v43 = vld [vmem:[%s21177_s0 + $0x51c] ss:$648 sps:$4 sm:$0xff] (!%p178_p7)   ;;  %v15976_v45 = vld [vmem:[%s21177_s0 + $0x518] ss:$648 sps:$4 sm:$0xff] (!%p178_p7)   ;;  %s14190_s5 = sshll.u32 (!%p178_p7), %s210_s30, 5 }
  0x10   : > { %v15985_v50 = vld [vmem:[%s21177_s0 + $0x14] ss:$648 sps:$4 sm:$0xff] (!%p178_p7)   ;;  %s212_s6 = scalar_lea.vmem (!%p178_p7), [#allocation3], %s14190_s5 }
  0x11   : > { %v15988_v51 = vld [vmem:[%s21177_s0 + $0x1c] ss:$648 sps:$4 sm:$0xff] (!%p178_p7)  }
  0x13   : > { %s21189_s23 = smov (!%p221_p8, %s14191_s23), 31  ;;  %s15815_s12 = sshll.u32 (%p18413_p3), %s18351_s14, 3 }
  0x14   : > { %s15834_s28 = smul.u32 648, %s21189_s23  ;;  %s14050_s9 = scalar_lea.vmem (%p18413_p3), %s21180_s3, %s15815_s12 }
  0x16   : > { %s18434_s4 = scalar_lea.vmem %s21178_s1, %s15834_s28 }
  0x17   : > { %v15875_v2 = vld [vmem:[%s18434_s4 + $0x4] ss:$648 sps:$4 sm:$0xff]   ;;  %v15879_v4 = vld [vmem:[%s18434_s4] ss:$648 sps:$4 sm:$0xff]   ;;  %v15881_v6 = vld [vmem:[%s18434_s4 + $0x514] ss:$648 sps:$4 sm:$0xff]  }
  0x18   : > { %v15877_v3 = vld [vmem:[%s18434_s4 + $0xc] ss:$648 sps:$4 sm:$0xff]   ;;  %9974 = vmatprep.subr.bf16.mxu0 %v15875_v2  ;;  %v15880_v5 = vld [vmem:[%s18434_s4 + $0x8] ss:$648 sps:$4 sm:$0xff]   ;;  %v15883_v7 = vld [vmem:[%s18434_s4 + $0x51c] ss:$648 sps:$4 sm:$0xff]  }
  0x19   : > { %10023 = vmatprep.subr.bf16.mxu1 %v15877_v3  ;;  %9975 = vmatpush1.bf16.xpose.msra.mxu0 %v15879_v4  ;;  %v15885_v8 = vld [vmem:[%s18434_s4 + $0x510] ss:$648 sps:$4 sm:$0xff]   ;;  %v15887_v10 = vld [vmem:[%s18434_s4 + $0xa24] ss:$648 sps:$4 sm:$0xff]   ;;  %v15891_v12 = vld [vmem:[%s18434_s4 + $0xa20] ss:$648 sps:$4 sm:$0xff]  }
  0x1a   : > { %10024 = vmatpush1.bf16.xpose.msra.mxu1 %v15880_v5  ;;  %9976 = vmatprep.subr.bf16.mxu0 %v15881_v6  ;;  %v15886_v9 = vld [vmem:[%s18434_s4 + $0x518] ss:$648 sps:$4 sm:$0xff]   ;;  %v15889_v11 = vld [vmem:[%s18434_s4 + $0xa2c] ss:$648 sps:$4 sm:$0xff]   ;;  %v15892_v13 = vld [vmem:[%s18434_s4 + $0xa28] ss:$648 sps:$4 sm:$0xff]  }
  0x1b   : > { %10025 = vmatprep.subr.bf16.mxu1 %v15883_v7  ;;  %v15893_v14 = vld [vmem:[%s18434_s4 + $0xf34] ss:$648 sps:$4 sm:$0xff]   ;;  %v15897_v16 = vld [vmem:[%s18434_s4 + $0xf30] ss:$648 sps:$4 sm:$0xff]   ;;  %v15899_v18 = vld [vmem:[%s18434_s4 + $0x1444] ss:$648 sps:$4 sm:$0xff]  }
  0x1c   : > { %v15895_v15 = vld [vmem:[%s18434_s4 + $0xf3c] ss:$648 sps:$4 sm:$0xff]   ;;  %v15898_v17 = vld [vmem:[%s18434_s4 + $0xf38] ss:$648 sps:$4 sm:$0xff]   ;;  %v15901_v19 = vld [vmem:[%s18434_s4 + $0x144c] ss:$648 sps:$4 sm:$0xff]  }
  0x1d   : > { %v15903_v20 = vld [vmem:[%s18434_s4 + $0x1440] ss:$648 sps:$4 sm:$0xff]   ;;  %v15905_v22 = vld [vmem:[%s18434_s4 + $0x1954] ss:$648 sps:$4 sm:$0xff]   ;;  %v15909_v24 = vld [vmem:[%s18434_s4 + $0x1950] ss:$648 sps:$4 sm:$0xff]  }
  0x1e   : > { %v15904_v21 = vld [vmem:[%s18434_s4 + $0x1448] ss:$648 sps:$4 sm:$0xff]   ;;  %v15907_v23 = vld [vmem:[%s18434_s4 + $0x195c] ss:$648 sps:$4 sm:$0xff]   ;;  %v15910_v25 = vld [vmem:[%s18434_s4 + $0x1958] ss:$648 sps:$4 sm:$0xff]  }
  0x1f   : > { %v15911_v26 = vld [vmem:[%s18434_s4 + $0x1e64] ss:$648 sps:$4 sm:$0xff]   ;;  %v15915_v28 = vld [vmem:[%s18434_s4 + $0x1e60] ss:$648 sps:$4 sm:$0xff]   ;;  %v15917_v30 = vld [vmem:[%s18434_s4 + $0x2374] ss:$648 sps:$4 sm:$0xff]  }
  0x20   : > { %v15913_v27 = vld [vmem:[%s18434_s4 + $0x1e6c] ss:$648 sps:$4 sm:$0xff]   ;;  %v15916_v29 = vld [vmem:[%s18434_s4 + $0x1e68] ss:$648 sps:$4 sm:$0xff]   ;;  %v15919_v31 = vld [vmem:[%s18434_s4 + $0x237c] ss:$648 sps:$4 sm:$0xff]  }
  0x21   : > { %9977 = vmatpush1.bf16.xpose.msra.mxu0 %v15885_v8  ;;  %v15921_v32 = vld [vmem:[%s18434_s4 + $0x2370] ss:$648 sps:$4 sm:$0xff]   ;;  %v15931_v34 = vld [vmem:[%s18434_s4 + $0x14] ss:$648 sps:$4 sm:$0xff]   ;;  %v15937_v40 = vld [vmem:[%s18434_s4 + $0x524] ss:$648 sps:$4 sm:$0xff]  }
  0x22   : > { %10026 = vmatpush1.bf16.xpose.msra.mxu1 %v15886_v9  ;;  %9978 = vmatprep.subr.bf16.mxu0 %v15887_v10  ;;  %v15922_v33 = vld [vmem:[%s18434_s4 + $0x2378] ss:$648 sps:$4 sm:$0xff]   ;;  %v15934_v35 = vld [vmem:[%s18434_s4 + $0x1c] ss:$648 sps:$4 sm:$0xff]   ;;  %v15940_v41 = vld [vmem:[%s18434_s4 + $0x52c] ss:$648 sps:$4 sm:$0xff]  }
  0x23   : > { %10027 = vmatprep.subr.bf16.mxu1 %v15889_v11  ;;  %v15929_v38 = vld [vmem:[%s18434_s4 + $0x10] ss:$648 sps:$4 sm:$0xff]   ;;  %v15935_v46 = vld [vmem:[%s18434_s4 + $0x520] ss:$648 sps:$4 sm:$0xff]   ;;  %v15943_v48 = vld [vmem:[%s18434_s4 + $0xa34] ss:$648 sps:$4 sm:$0xff]  }
  0x24   : > { %v15932_v39 = vld [vmem:[%s18434_s4 + $0x18] ss:$648 sps:$4 sm:$0xff]   ;;  %v15938_v47 = vld [vmem:[%s18434_s4 + $0x528] ss:$648 sps:$4 sm:$0xff]   ;;  %v15946_v49 = vld [vmem:[%s18434_s4 + $0xa3c] ss:$648 sps:$4 sm:$0xff]  }
  0x25   : > { %v15941_v52 = vld [vmem:[%s18434_s4 + $0xa30] ss:$648 sps:$4 sm:$0xff]   ;;  %v15949_v54 = vld [vmem:[%s18434_s4 + $0xf44] ss:$648 sps:$4 sm:$0xff]   ;;  %v15947_v56 = vld [vmem:[%s18434_s4 + $0xf40] ss:$648 sps:$4 sm:$0xff]  }
  0x26   : > { %v15944_v53 = vld [vmem:[%s18434_s4 + $0xa38] ss:$648 sps:$4 sm:$0xff]   ;;  %v15952_v55 = vld [vmem:[%s18434_s4 + $0xf4c] ss:$648 sps:$4 sm:$0xff]   ;;  %v15950_v57 = vld [vmem:[%s18434_s4 + $0xf48] ss:$648 sps:$4 sm:$0xff]  }
  0x27   : > { %v15955_v58 = vld [vmem:[%s18434_s4 + $0x1454] ss:$648 sps:$4 sm:$0xff]   ;;  %v15953_v60 = vld [vmem:[%s18434_s4 + $0x1450] ss:$648 sps:$4 sm:$0xff]   ;;  %v15961_v62 = vld [vmem:[%s18434_s4 + $0x1964] ss:$648 sps:$4 sm:$0xff]  }
  0x28   : > { %v15958_v59 = vld [vmem:[%s18434_s4 + $0x145c] ss:$648 sps:$4 sm:$0xff]   ;;  %v15956_v61 = vld [vmem:[%s18434_s4 + $0x1458] ss:$648 sps:$4 sm:$0xff]   ;;  %v15964_v63 = vld [vmem:[%s18434_s4 + $0x196c] ss:$648 sps:$4 sm:$0xff]  }
  0x29   : > { %9979 = vmatpush1.bf16.xpose.msra.mxu0 %v15891_v12  ;;  %v15959_v0 = vld [vmem:[%s18434_s4 + $0x1960] ss:$648 sps:$4 sm:$0xff]   ;;  %v15967_v2 = vld [vmem:[%s18434_s4 + $0x1e74] ss:$648 sps:$4 sm:$0xff]   ;;  %v15965_v4 = vld [vmem:[%s18434_s4 + $0x1e70] ss:$648 sps:$4 sm:$0xff]  }
  0x2a   : > { %10028 = vmatpush1.bf16.xpose.msra.mxu1 %v15892_v13  ;;  %9980 = vmatprep.subr.bf16.mxu0 %v15893_v14  ;;  %v15962_v1 = vld [vmem:[%s18434_s4 + $0x1968] ss:$648 sps:$4 sm:$0xff]   ;;  %v15970_v3 = vld [vmem:[%s18434_s4 + $0x1e7c] ss:$648 sps:$4 sm:$0xff]   ;;  %v15968_v5 = vld [vmem:[%s18434_s4 + $0x1e78] ss:$648 sps:$4 sm:$0xff]  }
  0x2b   : > { %10029 = vmatprep.subr.bf16.mxu1 %v15895_v15  ;;  %v15979_v6 = vld [vmem:[%s18434_s4 + $0x2384] ss:$648 sps:$4 sm:$0xff]   ;;  %v15977_v8 = vld [vmem:[%s18434_s4 + $0x2380] ss:$648 sps:$4 sm:$0xff]   ;;  %v15983_v12 = vld [vmem:[%s21177_s0 + $0x10] ss:$648 sps:$4 sm:$0xff]  }
  0x2c   : > { %v15982_v7 = vld [vmem:[%s18434_s4 + $0x238c] ss:$648 sps:$4 sm:$0xff]   ;;  %v15980_v9 = vld [vmem:[%s18434_s4 + $0x2388] ss:$648 sps:$4 sm:$0xff]   ;;  %v15986_v13 = vld [vmem:[%s21177_s0 + $0x18] ss:$648 sps:$4 sm:$0xff]  }
  0x2d   : > { %v15991_v10 = vld [vmem:[%s18434_s4 + $0x24] ss:$648 sps:$4 sm:$0xff]   ;;  %v15989_v14 = vld [vmem:[%s18434_s4 + $0x20] ss:$648 sps:$4 sm:$0xff]  }
  0x2e   : > { %v15994_v11 = vld [vmem:[%s18434_s4 + $0x2c] ss:$648 sps:$4 sm:$0xff]   ;;  %v15992_v15 = vld [vmem:[%s18434_s4 + $0x28] ss:$648 sps:$4 sm:$0xff]  }
  0x31   : > { %9981 = vmatpush1.bf16.xpose.msra.mxu0 %v15897_v16  ;;  %v15995_v16 = vld [vmem:[%s21177_s0 + $0x524] ss:$648 sps:$4 sm:$0xff]  }
  0x32   : > { %10030 = vmatpush1.bf16.xpose.msra.mxu1 %v15898_v17  ;;  %9982 = vmatprep.subr.bf16.mxu0 %v15899_v18  ;;  %v16000_v17 = vld [vmem:[%s18434_s4 + $0x534] ss:$648 sps:$4 sm:$0xff]  }
  0x33   : > { %10031 = vmatprep.subr.bf16.mxu1 %v15901_v19  ;;  %v16003_v18 = vld [vmem:[%s18434_s4 + $0x53c] ss:$648 sps:$4 sm:$0xff]   ;;  %v16004_v19 = vld [vmem:[%s21177_s0 + $0x52c] ss:$648 sps:$4 sm:$0xff]  }
  0x39   : > { %9983 = vmatpush1.bf16.xpose.msra.mxu0 %v15903_v20  ;;  %v15997_v20 = vld [vmem:[%s21177_s0 + $0x520] ss:$648 sps:$4 sm:$0xff]  }
  0x3a   : > { %10032 = vmatpush1.bf16.xpose.msra.mxu1 %v15904_v21  ;;  %9984 = vmatprep.subr.bf16.mxu0 %v15905_v22  ;;  %v16006_v21 = vld [vmem:[%s21177_s0 + $0x528] ss:$648 sps:$4 sm:$0xff]  }
  0x3b   : > { %10033 = vmatprep.subr.bf16.mxu1 %v15907_v23  ;;  %v15998_v22 = vld [vmem:[%s18434_s4 + $0x530] ss:$648 sps:$4 sm:$0xff]  }
  0x3c   : > { %v16001_v23 = vld [vmem:[%s18434_s4 + $0x538] ss:$648 sps:$4 sm:$0xff]  }
  0x41   : > { %9985 = vmatpush1.bf16.xpose.msra.mxu0 %v15909_v24  ;;  %v16009_v24 = vld [vmem:[%s18434_s4 + $0xa44] ss:$648 sps:$4 sm:$0xff]  }
  0x42   : > { %10034 = vmatpush1.bf16.xpose.msra.mxu1 %v15910_v25  ;;  %9986 = vmatprep.subr.bf16.mxu0 %v15911_v26  ;;  %v16012_v25 = vld [vmem:[%s18434_s4 + $0xa4c] ss:$648 sps:$4 sm:$0xff]  }
  0x43   : > { %10035 = vmatprep.subr.bf16.mxu1 %v15913_v27  ;;  %v16045_v26 = vld [vmem:[%s21177_s0 + $0x24] ss:$648 sps:$4 sm:$0xff]  }
  0x44   : > { %v16048_v27 = vld [vmem:[%s21177_s0 + $0x2c] ss:$648 sps:$4 sm:$0xff]  }
  0x49   : > { %9987 = vmatpush1.bf16.xpose.msra.mxu0 %v15915_v28  ;;  %v16007_v28 = vld [vmem:[%s18434_s4 + $0xa40] ss:$648 sps:$4 sm:$0xff]  }
  0x4a   : > { %10036 = vmatpush1.bf16.xpose.msra.mxu1 %v15916_v29  ;;  %9988 = vmatprep.subr.bf16.mxu0 %v15917_v30  ;;  %v16010_v29 = vld [vmem:[%s18434_s4 + $0xa48] ss:$648 sps:$4 sm:$0xff]   ;;  %v16015_v30 = vld [vmem:[%s18434_s4 + $0xf54] ss:$648 sps:$4 sm:$0xff]  }
  0x4b   : > { %10037 = vmatprep.subr.bf16.mxu1 %v15919_v31  ;;  %v16018_v31 = vld [vmem:[%s18434_s4 + $0xf5c] ss:$648 sps:$4 sm:$0xff]  }
  0x51   : > { %9989 = vmatpush1.bf16.xpose.msra.mxu0 %v15921_v32  ;;  %v16013_v32 = vld [vmem:[%s18434_s4 + $0xf50] ss:$648 sps:$4 sm:$0xff]  }
  0x52   : > { %10038 = vmatpush1.bf16.xpose.msra.mxu1 %v15922_v33  ;;  %10072 = vmatprep.subr.bf16.mxu0 %v15931_v34  ;;  %v16016_v33 = vld [vmem:[%s18434_s4 + $0xf58] ss:$648 sps:$4 sm:$0xff]   ;;  %v16021_v34 = vld [vmem:[%s18434_s4 + $0x1464] ss:$648 sps:$4 sm:$0xff]  }
  0x53   : > { %10121 = vmatprep.subr.bf16.mxu1 %v15934_v35  ;;  %v16024_v35 = vld [vmem:[%s18434_s4 + $0x146c] ss:$648 sps:$4 sm:$0xff]  }
  0x58   : > { %10007 = vmatmul.mubr.bf16.vlgmr.msra.gmra.mrb[0].mxu0 %v15923_v36  ;;  %v16019_v36 = vld [vmem:[%s18434_s4 + $0x1460] ss:$648 sps:$4 sm:$0xff]  }
  0x59   : > { %10056 = vmatmul.mubr.bf16.vlgmr.msra.gmra.mrb[0].mxu1 %v15926_v37  ;;  %10073 = vmatpush1.bf16.xpose.msra.mxu0 %v15929_v38  ;;  %v16022_v37 = vld [vmem:[%s18434_s4 + $0x1468] ss:$648 sps:$4 sm:$0xff]   ;;  %v16027_v38 = vld [vmem:[%s18434_s4 + $0x1974] ss:$648 sps:$4 sm:$0xff]  }
  0x5a   : > { %10122 = vmatpush1.bf16.xpose.msra.mxu1 %v15932_v39  ;;  %10074 = vmatprep.subr.bf16.mxu0 %v15937_v40  ;;  %v16030_v39 = vld [vmem:[%s18434_s4 + $0x197c] ss:$648 sps:$4 sm:$0xff]   ;;  %v16025_v40 = vld [vmem:[%s18434_s4 + $0x1970] ss:$648 sps:$4 sm:$0xff]  }
  0x5b   : > { %10123 = vmatprep.subr.bf16.mxu1 %v15940_v41  ;;  %10014 = vmatprep.mubr.bf16.mxu0 %v15971_v42  ;;  %v16028_v41 = vld [vmem:[%s18434_s4 + $0x1978] ss:$648 sps:$4 sm:$0xff]   ;;  %v16033_v42 = vld [vmem:[%s18434_s4 + $0x1e84] ss:$648 sps:$4 sm:$0xff]  }
  0x5c   : > { %10063 = vmatprep.mubr.bf16.mxu1 %v15973_v43  ;;  %v16036_v43 = vld [vmem:[%s18434_s4 + $0x1e8c] ss:$648 sps:$4 sm:$0xff]  }
  0x60   : > { %10015 = vmatmul.mubr.bf16.gmra.mrb[4].mxu0 %v15975_v44  ;;  %v16031_v44 = vld [vmem:[%s18434_s4 + $0x1e80] ss:$648 sps:$4 sm:$0xff]  }
  0x61   : > { %10064 = vmatmul.mubr.bf16.gmra.mrb[4].mxu1 %v15976_v45  ;;  %10075 = vmatpush1.bf16.xpose.msra.mxu0 %v15935_v46  ;;  %v16034_v45 = vld [vmem:[%s18434_s4 + $0x1e88] ss:$648 sps:$4 sm:$0xff]   ;;  %v16039_v46 = vld [vmem:[%s18434_s4 + $0x2394] ss:$648 sps:$4 sm:$0xff]  }
  0x62   : > { %10124 = vmatpush1.bf16.xpose.msra.mxu1 %v15938_v47  ;;  %10076 = vmatprep.subr.bf16.mxu0 %v15943_v48  ;;  %v16042_v47 = vld [vmem:[%s18434_s4 + $0x239c] ss:$648 sps:$4 sm:$0xff]   ;;  %v16037_v48 = vld [vmem:[%s18434_s4 + $0x2390] ss:$648 sps:$4 sm:$0xff]  }
  0x63   : > { %10125 = vmatprep.subr.bf16.mxu1 %v15946_v49  ;;  %10104 = vmatprep.mubr.bf16.mxu0 %v15985_v50  ;;  %v16040_v49 = vld [vmem:[%s18434_s4 + $0x2398] ss:$648 sps:$4 sm:$0xff]   ;;  %v16051_v50 = vld [vmem:[%s18434_s4 + $0x34] ss:$648 sps:$4 sm:$0xff]  }
  0x64   : > { %10153 = vmatprep.mubr.bf16.mxu1 %v15988_v51  ;;  %v16054_v51 = vld [vmem:[%s18434_s4 + $0x3c] ss:$648 sps:$4 sm:$0xff]  }
  0x69   : > { %10077 = vmatpush1.bf16.xpose.msra.mxu0 %v15941_v52  ;;  %v16043_v52 = vld [vmem:[%s21177_s0 + $0x20] ss:$648 sps:$4 sm:$0xff]  }
  0x6a   : > { %10126 = vmatpush1.bf16.xpose.msra.mxu1 %v15944_v53  ;;  %10078 = vmatprep.subr.bf16.mxu0 %v15949_v54  ;;  %v16046_v53 = vld [vmem:[%s21177_s0 + $0x28] ss:$648 sps:$4 sm:$0xff]  }
  0x6b   : > { %10127 = vmatprep.subr.bf16.mxu1 %v15952_v55  ;;  %v16049_v54 = vld [vmem:[%s18434_s4 + $0x30] ss:$648 sps:$4 sm:$0xff]  }
  0x6c   : > { %v16052_v55 = vld [vmem:[%s18434_s4 + $0x38] ss:$648 sps:$4 sm:$0xff]  }
  0x71   : > { %10079 = vmatpush1.bf16.xpose.msra.mxu0 %v15947_v56  ;;  %v16055_v56 = vld [vmem:[%s21177_s0 + $0x534] ss:$648 sps:$4 sm:$0xff]  }
  0x72   : > { %10128 = vmatpush1.bf16.xpose.msra.mxu1 %v15950_v57  ;;  %10080 = vmatprep.subr.bf16.mxu0 %v15955_v58  ;;  %v16060_v57 = vld [vmem:[%s18434_s4 + $0x544] ss:$648 sps:$4 sm:$0xff]  }
  0x73   : > { %10129 = vmatprep.subr.bf16.mxu1 %v15958_v59  ;;  %v16063_v58 = vld [vmem:[%s18434_s4 + $0x54c] ss:$648 sps:$4 sm:$0xff]   ;;  %v16064_v59 = vld [vmem:[%s21177_s0 + $0x53c] ss:$648 sps:$4 sm:$0xff]  }
  0x79   : > { %10081 = vmatpush1.bf16.xpose.msra.mxu0 %v15953_v60  ;;  %v16057_v60 = vld [vmem:[%s21177_s0 + $0x530] ss:$648 sps:$4 sm:$0xff]  }
  0x7a   : > { %10130 = vmatpush1.bf16.xpose.msra.mxu1 %v15956_v61  ;;  %10082 = vmatprep.subr.bf16.mxu0 %v15961_v62  ;;  %v16066_v61 = vld [vmem:[%s21177_s0 + $0x538] ss:$648 sps:$4 sm:$0xff]  }
  0x7b   : > { %10131 = vmatprep.subr.bf16.mxu1 %v15964_v63  ;;  %v16058_v62 = vld [vmem:[%s18434_s4 + $0x540] ss:$648 sps:$4 sm:$0xff]  }
  0x7c   : > { %v16061_v63 = vld [vmem:[%s18434_s4 + $0x548] ss:$648 sps:$4 sm:$0xff]  }
  0x81   : > { %10083 = vmatpush1.bf16.xpose.msra.mxu0 %v15959_v0  ;;  %v16069_v0 = vld [vmem:[%s18434_s4 + $0xa54] ss:$648 sps:$4 sm:$0xff]  }
  0x82   : > { %10132 = vmatpush1.bf16.xpose.msra.mxu1 %v15962_v1  ;;  %10084 = vmatprep.subr.bf16.mxu0 %v15967_v2  ;;  %v16072_v1 = vld [vmem:[%s18434_s4 + $0xa5c] ss:$648 sps:$4 sm:$0xff]  }
  0x83   : > { %10133 = vmatprep.subr.bf16.mxu1 %v15970_v3  ;;  %v16105_v2 = vld [vmem:[%s21177_s0 + $0x34] ss:$648 sps:$4 sm:$0xff]  }
  0x84   : > { %v16108_v3 = vld [vmem:[%s21177_s0 + $0x3c] ss:$648 sps:$4 sm:$0xff]  }
  0x89   : > { %10085 = vmatpush1.bf16.xpose.msra.mxu0 %v15965_v4  ;;  %v16067_v4 = vld [vmem:[%s18434_s4 + $0xa50] ss:$648 sps:$4 sm:$0xff]  }
  0x8a   : > { %10134 = vmatpush1.bf16.xpose.msra.mxu1 %v15968_v5  ;;  %10086 = vmatprep.subr.bf16.mxu0 %v15979_v6  ;;  %v16070_v5 = vld [vmem:[%s18434_s4 + $0xa58] ss:$648 sps:$4 sm:$0xff]   ;;  %v16075_v6 = vld [vmem:[%s18434_s4 + $0xf64] ss:$648 sps:$4 sm:$0xff]  }
  0x8b   : > { %10135 = vmatprep.subr.bf16.mxu1 %v15982_v7  ;;  %v16078_v7 = vld [vmem:[%s18434_s4 + $0xf6c] ss:$648 sps:$4 sm:$0xff]  }
  0x91   : > { %10087 = vmatpush1.bf16.xpose.msra.mxu0 %v15977_v8  ;;  %v16073_v8 = vld [vmem:[%s18434_s4 + $0xf60] ss:$648 sps:$4 sm:$0xff]  }
  0x92   : > { %10136 = vmatpush1.bf16.xpose.msra.mxu1 %v15980_v9  ;;  %10170 = vmatprep.subr.bf16.mxu0 %v15991_v10  ;;  %v16076_v9 = vld [vmem:[%s18434_s4 + $0xf68] ss:$648 sps:$4 sm:$0xff]   ;;  %v16081_v10 = vld [vmem:[%s18434_s4 + $0x1474] ss:$648 sps:$4 sm:$0xff]  }
  0x93   : > { %10219 = vmatprep.subr.bf16.mxu1 %v15994_v11  ;;  %v16084_v11 = vld [vmem:[%s18434_s4 + $0x147c] ss:$648 sps:$4 sm:$0xff]  }
  0x98   : > { %10105 = vmatmul.mubr.bf16.vlgmr.msra.gmra.mrb[8].mxu0 %v15983_v12  ;;  %v16079_v12 = vld [vmem:[%s18434_s4 + $0x1470] ss:$648 sps:$4 sm:$0xff]  }
  0x99   : > { %10154 = vmatmul.mubr.bf16.vlgmr.msra.gmra.mrb[8].mxu1 %v15986_v13  ;;  %10171 = vmatpush1.bf16.xpose.msra.mxu0 %v15989_v14  ;;  %v16082_v13 = vld [vmem:[%s18434_s4 + $0x1478] ss:$648 sps:$4 sm:$0xff]   ;;  %v16087_v14 = vld [vmem:[%s18434_s4 + $0x1984] ss:$648 sps:$4 sm:$0xff]  }
  0x9a   : > { %10220 = vmatpush1.bf16.xpose.msra.mxu1 %v15992_v15  ;;  %10112 = vmatprep.mubr.bf16.mxu0 %v15995_v16  ;;  %v16090_v15 = vld [vmem:[%s18434_s4 + $0x198c] ss:$648 sps:$4 sm:$0xff]   ;;  %v16085_v16 = vld [vmem:[%s18434_s4 + $0x1980] ss:$648 sps:$4 sm:$0xff]  }
  0x9b   : > { %10172 = vmatprep.subr.bf16.mxu0 %v16000_v17  ;;  %10221 = vmatprep.subr.bf16.mxu1 %v16003_v18  ;;  %v16088_v17 = vld [vmem:[%s18434_s4 + $0x1988] ss:$648 sps:$4 sm:$0xff]   ;;  %v16093_v18 = vld [vmem:[%s18434_s4 + $0x1e94] ss:$648 sps:$4 sm:$0xff]  }
  0x9c   : > { %10161 = vmatprep.mubr.bf16.mxu1 %v16004_v19  ;;  %v16096_v19 = vld [vmem:[%s18434_s4 + $0x1e9c] ss:$648 sps:$4 sm:$0xff]  }
  0xa0   : > { %10113 = vmatmul.mubr.bf16.gmra.mrb[12].mxu0 %v15997_v20  ;;  %v16091_v20 = vld [vmem:[%s18434_s4 + $0x1e90] ss:$648 sps:$4 sm:$0xff]  }
  0xa1   : > { %10162 = vmatmul.mubr.bf16.gmra.mrb[12].mxu1 %v16006_v21  ;;  %10173 = vmatpush1.bf16.xpose.msra.mxu0 %v15998_v22  ;;  %v16094_v21 = vld [vmem:[%s18434_s4 + $0x1e98] ss:$648 sps:$4 sm:$0xff]   ;;  %v16099_v22 = vld [vmem:[%s18434_s4 + $0x23a4] ss:$648 sps:$4 sm:$0xff]  }
  0xa2   : > { %10222 = vmatpush1.bf16.xpose.msra.mxu1 %v16001_v23  ;;  %10174 = vmatprep.subr.bf16.mxu0 %v16009_v24  ;;  %v16102_v23 = vld [vmem:[%s18434_s4 + $0x23ac] ss:$648 sps:$4 sm:$0xff]   ;;  %v16097_v24 = vld [vmem:[%s18434_s4 + $0x23a0] ss:$648 sps:$4 sm:$0xff]  }
  0xa3   : > { %10223 = vmatprep.subr.bf16.mxu1 %v16012_v25  ;;  %10202 = vmatprep.mubr.bf16.mxu0 %v16045_v26  ;;  %v16100_v25 = vld [vmem:[%s18434_s4 + $0x23a8] ss:$648 sps:$4 sm:$0xff]   ;;  %v16111_v26 = vld [vmem:[%s18434_s4 + $0x44] ss:$648 sps:$4 sm:$0xff]  }
  0xa4   : > { %10251 = vmatprep.mubr.bf16.mxu1 %v16048_v27  ;;  %v16114_v27 = vld [vmem:[%s18434_s4 + $0x4c] ss:$648 sps:$4 sm:$0xff]  }
  0xa9   : > { %10175 = vmatpush1.bf16.xpose.msra.mxu0 %v16007_v28  ;;  %v16103_v28 = vld [vmem:[%s21177_s0 + $0x30] ss:$648 sps:$4 sm:$0xff]  }
  0xaa   : > { %10224 = vmatpush1.bf16.xpose.msra.mxu1 %v16010_v29  ;;  %10176 = vmatprep.subr.bf16.mxu0 %v16015_v30  ;;  %v16106_v29 = vld [vmem:[%s21177_s0 + $0x38] ss:$648 sps:$4 sm:$0xff]  }
  0xab   : > { %10225 = vmatprep.subr.bf16.mxu1 %v16018_v31  ;;  %v16109_v30 = vld [vmem:[%s18434_s4 + $0x40] ss:$648 sps:$4 sm:$0xff]  }
  0xac   : > { %v16112_v31 = vld [vmem:[%s18434_s4 + $0x48] ss:$648 sps:$4 sm:$0xff]  }
  0xb1   : > { %10177 = vmatpush1.bf16.xpose.msra.mxu0 %v16013_v32  ;;  %v16115_v32 = vld [vmem:[%s21177_s0 + $0x544] ss:$648 sps:$4 sm:$0xff]  }
  0xb2   : > { %10226 = vmatpush1.bf16.xpose.msra.mxu1 %v16016_v33  ;;  %10178 = vmatprep.subr.bf16.mxu0 %v16021_v34  ;;  %v16120_v33 = vld [vmem:[%s18434_s4 + $0x554] ss:$648 sps:$4 sm:$0xff]  }
  0xb3   : > { %10227 = vmatprep.subr.bf16.mxu1 %v16024_v35  ;;  %v16123_v34 = vld [vmem:[%s18434_s4 + $0x55c] ss:$648 sps:$4 sm:$0xff]   ;;  %v16124_v35 = vld [vmem:[%s21177_s0 + $0x54c] ss:$648 sps:$4 sm:$0xff]  }
  0xb9   : > { %10179 = vmatpush1.bf16.xpose.msra.mxu0 %v16019_v36  ;;  %v16117_v36 = vld [vmem:[%s21177_s0 + $0x540] ss:$648 sps:$4 sm:$0xff]  }
  0xba   : > { %10228 = vmatpush1.bf16.xpose.msra.mxu1 %v16022_v37  ;;  %10180 = vmatprep.subr.bf16.mxu0 %v16027_v38  ;;  %v16126_v37 = vld [vmem:[%s21177_s0 + $0x548] ss:$648 sps:$4 sm:$0xff]  }
  0xbb   : > { %10229 = vmatprep.subr.bf16.mxu1 %v16030_v39  ;;  %v16118_v38 = vld [vmem:[%s18434_s4 + $0x550] ss:$648 sps:$4 sm:$0xff]  }
  0xbc   : > { %v16121_v39 = vld [vmem:[%s18434_s4 + $0x558] ss:$648 sps:$4 sm:$0xff]  }
  0xc1   : > { %10181 = vmatpush1.bf16.xpose.msra.mxu0 %v16025_v40  ;;  %v16129_v40 = vld [vmem:[%s18434_s4 + $0xa64] ss:$648 sps:$4 sm:$0xff]  }
  0xc2   : > { %10230 = vmatpush1.bf16.xpose.msra.mxu1 %v16028_v41  ;;  %10182 = vmatprep.subr.bf16.mxu0 %v16033_v42  ;;  %v16132_v41 = vld [vmem:[%s18434_s4 + $0xa6c] ss:$648 sps:$4 sm:$0xff]  }
  0xc3   : > { %10231 = vmatprep.subr.bf16.mxu1 %v16036_v43  ;;  %v16165_v42 = vld [vmem:[%s21177_s0 + $0x44] ss:$648 sps:$4 sm:$0xff]  }
  0xc4   : > { %v16168_v43 = vld [vmem:[%s21177_s0 + $0x4c] ss:$648 sps:$4 sm:$0xff]  }
  0xc9   : > { %10183 = vmatpush1.bf16.xpose.msra.mxu0 %v16031_v44  ;;  %v16127_v44 = vld [vmem:[%s18434_s4 + $0xa60] ss:$648 sps:$4 sm:$0xff]  }
  0xca   : > { %10232 = vmatpush1.bf16.xpose.msra.mxu1 %v16034_v45  ;;  %10184 = vmatprep.subr.bf16.mxu0 %v16039_v46  ;;  %v16130_v45 = vld [vmem:[%s18434_s4 + $0xa68] ss:$648 sps:$4 sm:$0xff]   ;;  %v16135_v46 = vld [vmem:[%s18434_s4 + $0xf74] ss:$648 sps:$4 sm:$0xff]  }
  0xcb   : > { %10233 = vmatprep.subr.bf16.mxu1 %v16042_v47  ;;  %v16138_v47 = vld [vmem:[%s18434_s4 + $0xf7c] ss:$648 sps:$4 sm:$0xff]  }
  0xd1   : > { %10185 = vmatpush1.bf16.xpose.msra.mxu0 %v16037_v48 }
  0xd2   : > { %10234 = vmatpush1.bf16.xpose.msra.mxu1 %v16040_v49  ;;  %10268 = vmatprep.subr.bf16.mxu0 %v16051_v50  ;;  %v16133_v50 = vld [vmem:[%s18434_s4 + $0xf70] ss:$648 sps:$4 sm:$0xff]  }
  0xd3   : > { %10317 = vmatprep.subr.bf16.mxu1 %v16054_v51  ;;  %v16136_v51 = vld [vmem:[%s18434_s4 + $0xf78] ss:$648 sps:$4 sm:$0xff]  }
  0xd8   : > { %10203 = vmatmul.mubr.bf16.vlgmr.msra.gmra.mrb[16].mxu0 %v16043_v52 }
  0xd9   : > { %10252 = vmatmul.mubr.bf16.vlgmr.msra.gmra.mrb[16].mxu1 %v16046_v53  ;;  %10269 = vmatpush1.bf16.xpose.msra.mxu0 %v16049_v54 }
  0xda   : > { %10318 = vmatpush1.bf16.xpose.msra.mxu1 %v16052_v55  ;;  %10210 = vmatprep.mubr.bf16.mxu0 %v16055_v56 }
  0xdb   : > { %10270 = vmatprep.subr.bf16.mxu0 %v16060_v57  ;;  %10319 = vmatprep.subr.bf16.mxu1 %v16063_v58 }
  0xdc   : > { %10259 = vmatprep.mubr.bf16.mxu1 %v16064_v59 }
  0xe0   : > { %10211 = vmatmul.mubr.bf16.gmra.mrb[20].mxu0 %v16057_v60  ;;  %v16141_v60 = vld [vmem:[%s18434_s4 + $0x1484] ss:$648 sps:$4 sm:$0xff]  }
  0xe1   : > { %10260 = vmatmul.mubr.bf16.gmra.mrb[20].mxu1 %v16066_v61  ;;  %10271 = vmatpush1.bf16.xpose.msra.mxu0 %v16058_v62  ;;  %v16144_v61 = vld [vmem:[%s18434_s4 + $0x148c] ss:$648 sps:$4 sm:$0xff]   ;;  %v16139_v62 = vld [vmem:[%s18434_s4 + $0x1480] ss:$648 sps:$4 sm:$0xff]  }
  0xe2   : > { %10320 = vmatpush1.bf16.xpose.msra.mxu1 %v16061_v63  ;;  %10272 = vmatprep.subr.bf16.mxu0 %v16069_v0  ;;  %v16142_v63 = vld [vmem:[%s18434_s4 + $0x1488] ss:$648 sps:$4 sm:$0xff]  }
  0xe3   : > { %10321 = vmatprep.subr.bf16.mxu1 %v16072_v1  ;;  %10300 = vmatprep.mubr.bf16.mxu0 %v16105_v2 }
  0xe4   : > { %10349 = vmatprep.mubr.bf16.mxu1 %v16108_v3 }
  0xe9   : > { %10273 = vmatpush1.bf16.xpose.msra.mxu0 %v16067_v4 }
  0xea   : > { %10322 = vmatpush1.bf16.xpose.msra.mxu1 %v16070_v5  ;;  %10274 = vmatprep.subr.bf16.mxu0 %v16075_v6 }
  0xeb   : > { %10323 = vmatprep.subr.bf16.mxu1 %v16078_v7  ;;  %v16147_v7 = vld [vmem:[%s18434_s4 + $0x1994] ss:$648 sps:$4 sm:$0xff]  }
  0xf1   : > { %10275 = vmatpush1.bf16.xpose.msra.mxu0 %v16073_v8  ;;  %v16150_v8 = vld [vmem:[%s18434_s4 + $0x199c] ss:$648 sps:$4 sm:$0xff]  }
  0xf2   : > { %10324 = vmatpush1.bf16.xpose.msra.mxu1 %v16076_v9  ;;  %10276 = vmatprep.subr.bf16.mxu0 %v16081_v10 }
  0xf3   : > { %10325 = vmatprep.subr.bf16.mxu1 %v16084_v11 }
  0xf9   : > { %10277 = vmatpush1.bf16.xpose.msra.mxu0 %v16079_v12  ;;  %v16145_v12 = vld [vmem:[%s18434_s4 + $0x1990] ss:$648 sps:$4 sm:$0xff]  }
  0xfa   : > { %10326 = vmatpush1.bf16.xpose.msra.mxu1 %v16082_v13  ;;  %10278 = vmatprep.subr.bf16.mxu0 %v16087_v14  ;;  %v16148_v13 = vld [vmem:[%s18434_s4 + $0x1998] ss:$648 sps:$4 sm:$0xff]   ;;  %v16153_v14 = vld [vmem:[%s18434_s4 + $0x1ea4] ss:$648 sps:$4 sm:$0xff]  }
  0xfb   : > { %10327 = vmatprep.subr.bf16.mxu1 %v16090_v15  ;;  %v16156_v15 = vld [vmem:[%s18434_s4 + $0x1eac] ss:$648 sps:$4 sm:$0xff]  }
 0x101   : > { %10279 = vmatpush1.bf16.xpose.msra.mxu0 %v16085_v16  ;;  %v16151_v16 = vld [vmem:[%s18434_s4 + $0x1ea0] ss:$648 sps:$4 sm:$0xff]  }
 0x102   : > { %10328 = vmatpush1.bf16.xpose.msra.mxu1 %v16088_v17  ;;  %10280 = vmatprep.subr.bf16.mxu0 %v16093_v18  ;;  %v16154_v17 = vld [vmem:[%s18434_s4 + $0x1ea8] ss:$648 sps:$4 sm:$0xff]   ;;  %v16159_v18 = vld [vmem:[%s18434_s4 + $0x23b4] ss:$648 sps:$4 sm:$0xff]  }
 0x103   : > { %10329 = vmatprep.subr.bf16.mxu1 %v16096_v19  ;;  %v16162_v19 = vld [vmem:[%s18434_s4 + $0x23bc] ss:$648 sps:$4 sm:$0xff]  }
 0x109   : > { %10281 = vmatpush1.bf16.xpose.msra.mxu0 %v16091_v20  ;;  %v16157_v20 = vld [vmem:[%s18434_s4 + $0x23b0] ss:$648 sps:$4 sm:$0xff]  }
 0x10a   : > { %10330 = vmatpush1.bf16.xpose.msra.mxu1 %v16094_v21  ;;  %10282 = vmatprep.subr.bf16.mxu0 %v16099_v22  ;;  %v16160_v21 = vld [vmem:[%s18434_s4 + $0x23b8] ss:$648 sps:$4 sm:$0xff]   ;;  %v16171_v22 = vld [vmem:[%s18434_s4 + $0x54] ss:$648 sps:$4 sm:$0xff]  }
 0x10b   : > { %10331 = vmatprep.subr.bf16.mxu1 %v16102_v23  ;;  %v16174_v23 = vld [vmem:[%s18434_s4 + $0x5c] ss:$648 sps:$4 sm:$0xff]  }
 0x111   : > { %10283 = vmatpush1.bf16.xpose.msra.mxu0 %v16097_v24  ;;  %v16163_v24 = vld [vmem:[%s21177_s0 + $0x40] ss:$648 sps:$4 sm:$0xff]  }
 0x112   : > { %10332 = vmatpush1.bf16.xpose.msra.mxu1 %v16100_v25  ;;  %10366 = vmatprep.subr.bf16.mxu0 %v16111_v26  ;;  %v16166_v25 = vld [vmem:[%s21177_s0 + $0x48] ss:$648 sps:$4 sm:$0xff]  }
 0x113   : > { %10415 = vmatprep.subr.bf16.mxu1 %v16114_v27  ;;  %v16169_v26 = vld [vmem:[%s18434_s4 + $0x50] ss:$648 sps:$4 sm:$0xff]  }
 0x114   : > { %v16172_v27 = vld [vmem:[%s18434_s4 + $0x58] ss:$648 sps:$4 sm:$0xff]  }
 0x118   : > { %10301 = vmatmul.mubr.bf16.vlgmr.msra.gmra.mrb[24].mxu0 %v16103_v28  ;;  %v16175_v28 = vld [vmem:[%s21177_s0 + $0x554] ss:$648 sps:$4 sm:$0xff]  }
 0x119   : > { %10350 = vmatmul.mubr.bf16.vlgmr.msra.gmra.mrb[24].mxu1 %v16106_v29  ;;  %10367 = vmatpush1.bf16.xpose.msra.mxu0 %v16109_v30  ;;  %v16180_v29 = vld [vmem:[%s18434_s4 + $0x564] ss:$648 sps:$4 sm:$0xff]  }
 0x11a   : > { %10416 = vmatpush1.bf16.xpose.msra.mxu1 %v16112_v31  ;;  %10308 = vmatprep.mubr.bf16.mxu0 %v16115_v32  ;;  %v16183_v30 = vld [vmem:[%s18434_s4 + $0x56c] ss:$648 sps:$4 sm:$0xff]   ;;  %v16184_v31 = vld [vmem:[%s21177_s0 + $0x55c] ss:$648 sps:$4 sm:$0xff]   ;;  %v16177_v32 = vld [vmem:[%s21177_s0 + $0x550] ss:$648 sps:$4 sm:$0xff]  }
 0x11b   : > { %10368 = vmatprep.subr.bf16.mxu0 %v16120_v33  ;;  %10417 = vmatprep.subr.bf16.mxu1 %v16123_v34  ;;  %v16186_v33 = vld [vmem:[%s21177_s0 + $0x558] ss:$648 sps:$4 sm:$0xff]  }
 0x11c   : > { %10357 = vmatprep.mubr.bf16.mxu1 %v16124_v35  ;;  %v16178_v34 = vld [vmem:[%s18434_s4 + $0x560] ss:$648 sps:$4 sm:$0xff]  }
 0x11d   : > { %v16181_v35 = vld [vmem:[%s18434_s4 + $0x568] ss:$648 sps:$4 sm:$0xff]  }
 0x120   : > { %10309 = vmatmul.mubr.bf16.gmra.mrb[28].mxu0 %v16117_v36  ;;  %v16189_v36 = vld [vmem:[%s18434_s4 + $0xa74] ss:$648 sps:$4 sm:$0xff]  }
 0x121   : > { %10358 = vmatmul.mubr.bf16.gmra.mrb[28].mxu1 %v16126_v37  ;;  %10369 = vmatpush1.bf16.xpose.msra.mxu0 %v16118_v38  ;;  %v16192_v37 = vld [vmem:[%s18434_s4 + $0xa7c] ss:$648 sps:$4 sm:$0xff]  }
 0x122   : > { %10418 = vmatpush1.bf16.xpose.msra.mxu1 %v16121_v39  ;;  %10370 = vmatprep.subr.bf16.mxu0 %v16129_v40  ;;  %v16225_v38 = vld [vmem:[%s21177_s0 + $0x54] ss:$648 sps:$4 sm:$0xff]   ;;  %v16187_v40 = vld [vmem:[%s18434_s4 + $0xa70] ss:$648 sps:$4 sm:$0xff]  }
 0x123   : > { %10419 = vmatprep.subr.bf16.mxu1 %v16132_v41  ;;  %10398 = vmatprep.mubr.bf16.mxu0 %v16165_v42  ;;  %v16228_v39 = vld [vmem:[%s21177_s0 + $0x5c] ss:$648 sps:$4 sm:$0xff]   ;;  %v16190_v41 = vld [vmem:[%s18434_s4 + $0xa78] ss:$648 sps:$4 sm:$0xff]  }
 0x124   : > { %10447 = vmatprep.mubr.bf16.mxu1 %v16168_v43  ;;  %v16195_v42 = vld [vmem:[%s18434_s4 + $0xf84] ss:$648 sps:$4 sm:$0xff]  }
 0x125   : > { %v16198_v43 = vld [vmem:[%s18434_s4 + $0xf8c] ss:$648 sps:$4 sm:$0xff]  }
 0x129   : > { %10371 = vmatpush1.bf16.xpose.msra.mxu0 %v16127_v44 }
 0x12a   : > { %10420 = vmatpush1.bf16.xpose.msra.mxu1 %v16130_v45  ;;  %10372 = vmatprep.subr.bf16.mxu0 %v16135_v46  ;;  %v16193_v46 = vld [vmem:[%s18434_s4 + $0xf80] ss:$648 sps:$4 sm:$0xff]  }
 0x12b   : > { %10421 = vmatprep.subr.bf16.mxu1 %v16138_v47  ;;  %v10008_v48 = vpop.f32.mrb[0].mxu0  ;;  %v16196_v47 = vld [vmem:[%s18434_s4 + $0xf88] ss:$648 sps:$4 sm:$0xff]  }
 0x12c   : > { %v10057_v49 = vpop.f32.mrb[0].mxu1  ;;  %v10010_v53 = vpop.f32.mrb[1].mxu0 }
 0x12d   : > { %v18676_v52 = vadd.f32 %v10057_v49, %v10008_v48  ;;  %v10059_v54 = vpop.f32.mrb[1].mxu1  ;;  %v10011_v55 = vpop.f32.mrb[2].mxu0 }
 0x12e   : > { %v10060_v56 = vpop.f32.mrb[2].mxu1  ;;  %v10013_v58 = vpop.f32.mrb[3].mxu0 }
 0x12f   : > { %v18678_v57 = vadd.f32 %v10060_v56, %v10011_v55  ;;  %v10062_v59 = vpop.f32.mrb[3].mxu1 }
 0x130   : > { %v16201_v59 = vld [vmem:[%s18434_s4 + $0x1494] ss:$648 sps:$4 sm:$0xff]  }
 0x131   : > { %10373 = vmatpush1.bf16.xpose.msra.mxu0 %v16133_v50 }
 0x132   : > { %10422 = vmatpush1.bf16.xpose.msra.mxu1 %v16136_v51  ;;  %10374 = vmatprep.subr.bf16.mxu0 %v16141_v60  ;;  %v16204_v60 = vld [vmem:[%s18434_s4 + $0x149c] ss:$648 sps:$4 sm:$0xff]  }
 0x133   : > { %10423 = vmatprep.subr.bf16.mxu1 %v16144_v61  ;;  %v10016_v0 = vpop.f32.mrb[4].mxu0 }
 0x134   : > { %v10065_v1 = vpop.f32.mrb[4].mxu1  ;;  %v10018_v3 = vpop.f32.mrb[5].mxu0 }
 0x135   : > { %v18684_v2 = vadd.f32 %v10065_v1, %v10016_v0  ;;  %v10067_v4 = vpop.f32.mrb[5].mxu1  ;;  %v10019_v5 = vpop.f32.mrb[6].mxu0  ;;  %v16202_v0 = vld [vmem:[%s18434_s4 + $0x1498] ss:$648 sps:$4 sm:$0xff]  }
 0x136   : > { %v10068_v6 = vpop.f32.mrb[6].mxu1  ;;  %v10021_v10 = vpop.f32.mrb[7].mxu0 }
 0x137   : > { %v18688_v9 = vadd.f32 %v10068_v6, %v10019_v5  ;;  %v10070_v11 = vpop.f32.mrb[7].mxu1  ;;  %v16210_v10 = vld [vmem:[%s18434_s4 + $0x19ac] ss:$648 sps:$4 sm:$0xff]  }
 0x139   : > { %10375 = vmatpush1.bf16.xpose.msra.mxu0 %v16139_v62 }
 0x13a   : > { %10424 = vmatpush1.bf16.xpose.msra.mxu1 %v16142_v63  ;;  %10376 = vmatprep.subr.bf16.mxu0 %v16147_v7  ;;  %v16199_v63 = vld [vmem:[%s18434_s4 + $0x1490] ss:$648 sps:$4 sm:$0xff]  }
 0x13b   : > { %10425 = vmatprep.subr.bf16.mxu1 %v16150_v8  ;;  %v16207_v8 = vld [vmem:[%s18434_s4 + $0x19a4] ss:$648 sps:$4 sm:$0xff]  }
 0x141   : > { %10377 = vmatpush1.bf16.xpose.msra.mxu0 %v16145_v12 }
 0x142   : > { %10426 = vmatpush1.bf16.xpose.msra.mxu1 %v16148_v13  ;;  %10378 = vmatprep.subr.bf16.mxu0 %v16153_v14  ;;  %v16205_v13 = vld [vmem:[%s18434_s4 + $0x19a0] ss:$648 sps:$4 sm:$0xff]  }
 0x143   : > { %10427 = vmatprep.subr.bf16.mxu1 %v16156_v15  ;;  %v16208_v14 = vld [vmem:[%s18434_s4 + $0x19a8] ss:$648 sps:$4 sm:$0xff]   ;;  %v16216_v15 = vld [vmem:[%s18434_s4 + $0x1ebc] ss:$648 sps:$4 sm:$0xff]  }
 0x149   : > { %10379 = vmatpush1.bf16.xpose.msra.mxu0 %v16151_v16  ;;  %v16211_v16 = vld [vmem:[%s18434_s4 + $0x1eb0] ss:$648 sps:$4 sm:$0xff]  }
 0x14a   : > { %10428 = vmatpush1.bf16.xpose.msra.mxu1 %v16154_v17  ;;  %10380 = vmatprep.subr.bf16.mxu0 %v16159_v18  ;;  %v16214_v17 = vld [vmem:[%s18434_s4 + $0x1eb8] ss:$648 sps:$4 sm:$0xff]   ;;  %v16219_v18 = vld [vmem:[%s18434_s4 + $0x23c4] ss:$648 sps:$4 sm:$0xff]  }
 0x14b   : > { %10429 = vmatprep.subr.bf16.mxu1 %v16162_v19  ;;  %v16222_v19 = vld [vmem:[%s18434_s4 + $0x23cc] ss:$648 sps:$4 sm:$0xff]  }
 0x151   : > { %10381 = vmatpush1.bf16.xpose.msra.mxu0 %v16157_v20  ;;  %v16217_v20 = vld [vmem:[%s18434_s4 + $0x23c0] ss:$648 sps:$4 sm:$0xff]  }
 0x152   : > { %10430 = vmatpush1.bf16.xpose.msra.mxu1 %v16160_v21  ;;  %10464 = vmatprep.subr.bf16.mxu0 %v16171_v22  ;;  %v16220_v21 = vld [vmem:[%s18434_s4 + $0x23c8] ss:$648 sps:$4 sm:$0xff]   ;;  %v16231_v22 = vld [vmem:[%s18434_s4 + $0x64] ss:$648 sps:$4 sm:$0xff]  }
 0x153   : > { %10513 = vmatprep.subr.bf16.mxu1 %v16174_v23  ;;  %v16234_v23 = vld [vmem:[%s18434_s4 + $0x6c] ss:$648 sps:$4 sm:$0xff]  }
 0x158   : > { %10399 = vmatmul.mubr.bf16.vlgmr.msra.gmra.mrb[32].mxu0 %v16163_v24  ;;  %v16223_v24 = vld [vmem:[%s21177_s0 + $0x50] ss:$648 sps:$4 sm:$0xff]  }
 0x159   : > { %10448 = vmatmul.mubr.bf16.vlgmr.msra.gmra.mrb[32].mxu1 %v16166_v25  ;;  %10465 = vmatpush1.bf16.xpose.msra.mxu0 %v16169_v26  ;;  %v16226_v25 = vld [vmem:[%s21177_s0 + $0x58] ss:$648 sps:$4 sm:$0xff]  }
 0x15a   : > { %10514 = vmatpush1.bf16.xpose.msra.mxu1 %v16172_v27  ;;  %10406 = vmatprep.mubr.bf16.mxu0 %v16175_v28  ;;  %v16229_v26 = vld [vmem:[%s18434_s4 + $0x60] ss:$648 sps:$4 sm:$0xff]   ;;  %v16235_v28 = vld [vmem:[%s21177_s0 + $0x564] ss:$648 sps:$4 sm:$0xff]  }
 0x15b   : > { %10466 = vmatprep.subr.bf16.mxu0 %v16180_v29  ;;  %10515 = vmatprep.subr.bf16.mxu1 %v16183_v30  ;;  %v16232_v27 = vld [vmem:[%s18434_s4 + $0x68] ss:$648 sps:$4 sm:$0xff]   ;;  %v16240_v29 = vld [vmem:[%s18434_s4 + $0x574] ss:$648 sps:$4 sm:$0xff]  }
 0x15c   : > { %10455 = vmatprep.mubr.bf16.mxu1 %v16184_v31  ;;  %v16243_v30 = vld [vmem:[%s18434_s4 + $0x57c] ss:$648 sps:$4 sm:$0xff]   ;;  %v16244_v31 = vld [vmem:[%s21177_s0 + $0x56c] ss:$648 sps:$4 sm:$0xff]  }
 0x160   : > { %10407 = vmatmul.mubr.bf16.gmra.mrb[36].mxu0 %v16177_v32  ;;  %v16237_v32 = vld [vmem:[%s21177_s0 + $0x560] ss:$648 sps:$4 sm:$0xff]  }
 0x161   : > { %10456 = vmatmul.mubr.bf16.gmra.mrb[36].mxu1 %v16186_v33  ;;  %10467 = vmatpush1.bf16.xpose.msra.mxu0 %v16178_v34  ;;  %v16246_v33 = vld [vmem:[%s21177_s0 + $0x568] ss:$648 sps:$4 sm:$0xff]  }
 0x162   : > { %10516 = vmatpush1.bf16.xpose.msra.mxu1 %v16181_v35  ;;  %10468 = vmatprep.subr.bf16.mxu0 %v16189_v36  ;;  %v16238_v34 = vld [vmem:[%s18434_s4 + $0x570] ss:$648 sps:$4 sm:$0xff]   ;;  %v16249_v36 = vld [vmem:[%s18434_s4 + $0xa84] ss:$648 sps:$4 sm:$0xff]  }
 0x163   : > { %10517 = vmatprep.subr.bf16.mxu1 %v16192_v37  ;;  %10496 = vmatprep.mubr.bf16.mxu0 %v16225_v38  ;;  %v16241_v35 = vld [vmem:[%s18434_s4 + $0x578] ss:$648 sps:$4 sm:$0xff]   ;;  %v16252_v37 = vld [vmem:[%s18434_s4 + $0xa8c] ss:$648 sps:$4 sm:$0xff]  }
 0x164   : > { %10545 = vmatprep.mubr.bf16.mxu1 %v16228_v39  ;;  %v16285_v38 = vld [vmem:[%s21177_s0 + $0x64] ss:$648 sps:$4 sm:$0xff]  }
 0x165   : > { %v16288_v39 = vld [vmem:[%s21177_s0 + $0x6c] ss:$648 sps:$4 sm:$0xff]  }
 0x169   : > { %10469 = vmatpush1.bf16.xpose.msra.mxu0 %v16187_v40  ;;  %v16247_v40 = vld [vmem:[%s18434_s4 + $0xa80] ss:$648 sps:$4 sm:$0xff]  }
 0x16a   : > { %10518 = vmatpush1.bf16.xpose.msra.mxu1 %v16190_v41  ;;  %10470 = vmatprep.subr.bf16.mxu0 %v16195_v42  ;;  %v16250_v41 = vld [vmem:[%s18434_s4 + $0xa88] ss:$648 sps:$4 sm:$0xff]   ;;  %v16255_v42 = vld [vmem:[%s18434_s4 + $0xf94] ss:$648 sps:$4 sm:$0xff]  }
 0x16b   : > { %10519 = vmatprep.subr.bf16.mxu1 %v16198_v43  ;;  %v10106_v44 = vpop.f32.mrb[8].mxu0  ;;  %v16258_v43 = vld [vmem:[%s18434_s4 + $0xf9c] ss:$648 sps:$4 sm:$0xff]  }
 0x16c   : > { %v10155_v45 = vpop.f32.mrb[8].mxu1  ;;  %v10107_v48 = vadd.f32 %v10106_v44, %v18676_v52  ;;  %v10108_v49 = vpop.f32.mrb[9].mxu0 }
 0x16d   : > { %v10157_v50 = vpop.f32.mrb[9].mxu1  ;;  %v10109_v51 = vpop.f32.mrb[10].mxu0 }
 0x16e   : > { %v10158_v53 = vpop.f32.mrb[10].mxu1  ;;  %v18741_v54 = vadd.f32 %v10155_v45, %v10107_v48  ;;  %v10110_v55 = vadd.f32 %v10109_v51, %v18678_v57  ;;  %v10111_v56 = vpop.f32.mrb[11].mxu0 }
 0x16f   : > { %v10160_v58 = vpop.f32.mrb[11].mxu1 }
 0x170   : > { %v18746_v61 = vadd.f32 %v10158_v53, %v10110_v55 }
 0x171   : > { %10471 = vmatpush1.bf16.xpose.msra.mxu0 %v16193_v46  ;;  %v16253_v46 = vld [vmem:[%s18434_s4 + $0xf90] ss:$648 sps:$4 sm:$0xff]  }
 0x172   : > { %10520 = vmatpush1.bf16.xpose.msra.mxu1 %v16196_v47  ;;  %10472 = vmatprep.subr.bf16.mxu0 %v16201_v59  ;;  %v16256_v47 = vld [vmem:[%s18434_s4 + $0xf98] ss:$648 sps:$4 sm:$0xff]  }
 0x173   : > { %10521 = vmatprep.subr.bf16.mxu1 %v16204_v60  ;;  %v10114_v52 = vpop.f32.mrb[12].mxu0  ;;  %v16261_v60 = vld [vmem:[%s18434_s4 + $0x14a4] ss:$648 sps:$4 sm:$0xff]  }
 0x174   : > { %v10163_v62 = vpop.f32.mrb[12].mxu1  ;;  %v10115_v1 = vadd.f32 %v10114_v52, %v18684_v2  ;;  %v10116_v57 = vpop.f32.mrb[13].mxu0  ;;  %v16264_v52 = vld [vmem:[%s18434_s4 + $0x14ac] ss:$648 sps:$4 sm:$0xff]  }
 0x175   : > { %v10165_v3 = vpop.f32.mrb[13].mxu1  ;;  %v10117_v4 = vpop.f32.mrb[14].mxu0 }
 0x176   : > { %v10166_v5 = vpop.f32.mrb[14].mxu1  ;;  %v10118_v6 = vadd.f32 %v10117_v4, %v18688_v9  ;;  %v18752_v7 = vadd.f32 %v10163_v62, %v10115_v1  ;;  %v10119_v11 = vpop.f32.mrb[15].mxu0  ;;  %v16213_v9 = vld [vmem:[%s18434_s4 + $0x1eb4] ss:$648 sps:$4 sm:$0xff]   ;;  %v16262_v1 = vld [vmem:[%s18434_s4 + $0x14a8] ss:$648 sps:$4 sm:$0xff]  }
 0x177   : > { %v10168_v12 = vpop.f32.mrb[15].mxu1  ;;  %v16270_v11 = vld [vmem:[%s18434_s4 + $0x19bc] ss:$648 sps:$4 sm:$0xff]  }
 0x178   : > { %v18756_v2 = vadd.f32 %v10166_v5, %v10118_v6 }
 0x179   : > { %10473 = vmatpush1.bf16.xpose.msra.mxu0 %v16199_v63 }
 0x17a   : > { %10522 = vmatpush1.bf16.xpose.msra.mxu1 %v16202_v0  ;;  %10474 = vmatprep.subr.bf16.mxu0 %v16207_v8  ;;  %v16259_v0 = vld [vmem:[%s18434_s4 + $0x14a0] ss:$648 sps:$4 sm:$0xff]  }
 0x17b   : > { %10523 = vmatprep.subr.bf16.mxu1 %v16210_v10  ;;  %v16267_v10 = vld [vmem:[%s18434_s4 + $0x19b4] ss:$648 sps:$4 sm:$0xff]  }
 0x181   : > { %10475 = vmatpush1.bf16.xpose.msra.mxu0 %v16205_v13 }
 0x182   : > { %10524 = vmatpush1.bf16.xpose.msra.mxu1 %v16208_v14  ;;  %10476 = vmatprep.subr.bf16.mxu0 %v16213_v9  ;;  %v16265_v14 = vld [vmem:[%s18434_s4 + $0x19b0] ss:$648 sps:$4 sm:$0xff]  }
 0x183   : > { %10525 = vmatprep.subr.bf16.mxu1 %v16216_v15  ;;  %v16268_v9 = vld [vmem:[%s18434_s4 + $0x19b8] ss:$648 sps:$4 sm:$0xff]   ;;  %v16276_v15 = vld [vmem:[%s18434_s4 + $0x1ecc] ss:$648 sps:$4 sm:$0xff]  }
 0x189   : > { %10477 = vmatpush1.bf16.xpose.msra.mxu0 %v16211_v16  ;;  %v16271_v16 = vld [vmem:[%s18434_s4 + $0x1ec0] ss:$648 sps:$4 sm:$0xff]  }
 0x18a   : > { %10526 = vmatpush1.bf16.xpose.msra.mxu1 %v16214_v17  ;;  %10478 = vmatprep.subr.bf16.mxu0 %v16219_v18  ;;  %v16274_v17 = vld [vmem:[%s18434_s4 + $0x1ec8] ss:$648 sps:$4 sm:$0xff]   ;;  %v16279_v18 = vld [vmem:[%s18434_s4 + $0x23d4] ss:$648 sps:$4 sm:$0xff]  }
 0x18b   : > { %10527 = vmatprep.subr.bf16.mxu1 %v16222_v19  ;;  %v16282_v19 = vld [vmem:[%s18434_s4 + $0x23dc] ss:$648 sps:$4 sm:$0xff]  }
 0x191   : > { %10479 = vmatpush1.bf16.xpose.msra.mxu0 %v16217_v20  ;;  %v16277_v20 = vld [vmem:[%s18434_s4 + $0x23d0] ss:$648 sps:$4 sm:$0xff]  }
 0x192   : > { %10528 = vmatpush1.bf16.xpose.msra.mxu1 %v16220_v21  ;;  %10562 = vmatprep.subr.bf16.mxu0 %v16231_v22  ;;  %v16280_v21 = vld [vmem:[%s18434_s4 + $0x23d8] ss:$648 sps:$4 sm:$0xff]   ;;  %v16291_v22 = vld [vmem:[%s18434_s4 + $0x74] ss:$648 sps:$4 sm:$0xff]  }
 0x193   : > { %10611 = vmatprep.subr.bf16.mxu1 %v16234_v23  ;;  %v16294_v23 = vld [vmem:[%s18434_s4 + $0x7c] ss:$648 sps:$4 sm:$0xff]  }
 0x198   : > { %10497 = vmatmul.mubr.bf16.vlgmr.msra.gmra.mrb[40].mxu0 %v16223_v24  ;;  %v16283_v24 = vld [vmem:[%s21177_s0 + $0x60] ss:$648 sps:$4 sm:$0xff]  }
 0x199   : > { %10546 = vmatmul.mubr.bf16.vlgmr.msra.gmra.mrb[40].mxu1 %v16226_v25  ;;  %10563 = vmatpush1.bf16.xpose.msra.mxu0 %v16229_v26  ;;  %v16286_v25 = vld [vmem:[%s21177_s0 + $0x68] ss:$648 sps:$4 sm:$0xff]  }
 0x19a   : > { %10612 = vmatpush1.bf16.xpose.msra.mxu1 %v16232_v27  ;;  %10504 = vmatprep.mubr.bf16.mxu0 %v16235_v28  ;;  %v16289_v26 = vld [vmem:[%s18434_s4 + $0x70] ss:$648 sps:$4 sm:$0xff]   ;;  %v16295_v28 = vld [vmem:[%s21177_s0 + $0x574] ss:$648 sps:$4 sm:$0xff]  }
 0x19b   : > { %10564 = vmatprep.subr.bf16.mxu0 %v16240_v29  ;;  %10613 = vmatprep.subr.bf16.mxu1 %v16243_v30  ;;  %v16292_v27 = vld [vmem:[%s18434_s4 + $0x78] ss:$648 sps:$4 sm:$0xff]   ;;  %v16300_v29 = vld [vmem:[%s18434_s4 + $0x584] ss:$648 sps:$4 sm:$0xff]  }
 0x19c   : > { %10553 = vmatprep.mubr.bf16.mxu1 %v16244_v31  ;;  %v16303_v30 = vld [vmem:[%s18434_s4 + $0x58c] ss:$648 sps:$4 sm:$0xff]   ;;  %v16304_v31 = vld [vmem:[%s21177_s0 + $0x57c] ss:$648 sps:$4 sm:$0xff]  }
 0x1a0   : > { %10505 = vmatmul.mubr.bf16.gmra.mrb[44].mxu0 %v16237_v32  ;;  %v16297_v32 = vld [vmem:[%s21177_s0 + $0x570] ss:$648 sps:$4 sm:$0xff]  }
 0x1a1   : > { %10554 = vmatmul.mubr.bf16.gmra.mrb[44].mxu1 %v16246_v33  ;;  %10565 = vmatpush1.bf16.xpose.msra.mxu0 %v16238_v34  ;;  %v16306_v33 = vld [vmem:[%s21177_s0 + $0x578] ss:$648 sps:$4 sm:$0xff]  }
 0x1a2   : > { %10614 = vmatpush1.bf16.xpose.msra.mxu1 %v16241_v35  ;;  %10566 = vmatprep.subr.bf16.mxu0 %v16249_v36  ;;  %v16298_v34 = vld [vmem:[%s18434_s4 + $0x580] ss:$648 sps:$4 sm:$0xff]   ;;  %v16309_v36 = vld [vmem:[%s18434_s4 + $0xa94] ss:$648 sps:$4 sm:$0xff]  }
 0x1a3   : > { %10615 = vmatprep.subr.bf16.mxu1 %v16252_v37  ;;  %10594 = vmatprep.mubr.bf16.mxu0 %v16285_v38  ;;  %v16301_v35 = vld [vmem:[%s18434_s4 + $0x588] ss:$648 sps:$4 sm:$0xff]   ;;  %v16312_v37 = vld [vmem:[%s18434_s4 + $0xa9c] ss:$648 sps:$4 sm:$0xff]  }
 0x1a4   : > { %10643 = vmatprep.mubr.bf16.mxu1 %v16288_v39  ;;  %v16345_v38 = vld [vmem:[%s21177_s0 + $0x74] ss:$648 sps:$4 sm:$0xff]  }
 0x1a5   : > { %v16348_v39 = vld [vmem:[%s21177_s0 + $0x7c] ss:$648 sps:$4 sm:$0xff]  }
 0x1a9   : > { %10567 = vmatpush1.bf16.xpose.msra.mxu0 %v16247_v40  ;;  %v16307_v40 = vld [vmem:[%s18434_s4 + $0xa90] ss:$648 sps:$4 sm:$0xff]  }
 0x1aa   : > { %10616 = vmatpush1.bf16.xpose.msra.mxu1 %v16250_v41  ;;  %10568 = vmatprep.subr.bf16.mxu0 %v16255_v42  ;;  %v16310_v41 = vld [vmem:[%s18434_s4 + $0xa98] ss:$648 sps:$4 sm:$0xff]   ;;  %v16315_v42 = vld [vmem:[%s18434_s4 + $0xfa4] ss:$648 sps:$4 sm:$0xff]  }
 0x1ab   : > { %10617 = vmatprep.subr.bf16.mxu1 %v16258_v43  ;;  %v10204_v44 = vpop.f32.mrb[16].mxu0  ;;  %v16318_v43 = vld [vmem:[%s18434_s4 + $0xfac] ss:$648 sps:$4 sm:$0xff]  }
 0x1ac   : > { %v10253_v45 = vpop.f32.mrb[16].mxu1  ;;  %v10205_v48 = vadd.f32 %v10204_v44, %v18741_v54  ;;  %v10206_v49 = vpop.f32.mrb[17].mxu0 }
 0x1ad   : > { %v10255_v50 = vpop.f32.mrb[17].mxu1  ;;  %v10207_v51 = vpop.f32.mrb[18].mxu0 }
 0x1ae   : > { %v10256_v53 = vpop.f32.mrb[18].mxu1  ;;  %v18809_v55 = vadd.f32 %v10253_v45, %v10205_v48  ;;  %v10208_v56 = vadd.f32 %v10207_v51, %v18746_v61  ;;  %v10209_v58 = vpop.f32.mrb[19].mxu0 }
 0x1af   : > { %v10258_v59 = vpop.f32.mrb[19].mxu1 }
 0x1b0   : > { %v18814_v62 = vadd.f32 %v10256_v53, %v10208_v56 }
 0x1b1   : > { %10569 = vmatpush1.bf16.xpose.msra.mxu0 %v16253_v46  ;;  %v16313_v46 = vld [vmem:[%s18434_s4 + $0xfa0] ss:$648 sps:$4 sm:$0xff]  }
 0x1b2   : > { %10618 = vmatpush1.bf16.xpose.msra.mxu1 %v16256_v47  ;;  %10570 = vmatprep.subr.bf16.mxu0 %v16261_v60  ;;  %v16316_v47 = vld [vmem:[%s18434_s4 + $0xfa8] ss:$648 sps:$4 sm:$0xff]  }
 0x1b3   : > { %10619 = vmatprep.subr.bf16.mxu1 %v16264_v52  ;;  %v10212_v54 = vpop.f32.mrb[20].mxu0  ;;  %v16321_v52 = vld [vmem:[%s18434_s4 + $0x14b4] ss:$648 sps:$4 sm:$0xff]  }
 0x1b4   : > { %v10261_v63 = vpop.f32.mrb[20].mxu1  ;;  %v10213_v57 = vadd.f32 %v10212_v54, %v18752_v7  ;;  %v10214_v61 = vpop.f32.mrb[21].mxu0  ;;  %v16324_v54 = vld [vmem:[%s18434_s4 + $0x14bc] ss:$648 sps:$4 sm:$0xff]  }
 0x1b5   : > { %v10263_v3 = vpop.f32.mrb[21].mxu1  ;;  %v10215_v4 = vpop.f32.mrb[22].mxu0 }
 0x1b6   : > { %v10264_v5 = vpop.f32.mrb[22].mxu1  ;;  %v10216_v6 = vadd.f32 %v10215_v4, %v18756_v2  ;;  %v18820_v8 = vadd.f32 %v10261_v63, %v10213_v57  ;;  %v10217_v12 = vpop.f32.mrb[23].mxu0  ;;  %v16273_v2 = vld [vmem:[%s18434_s4 + $0x1ec4] ss:$648 sps:$4 sm:$0xff]   ;;  %v16322_v57 = vld [vmem:[%s18434_s4 + $0x14b8] ss:$648 sps:$4 sm:$0xff]  }
 0x1b7   : > { %v10266_v13 = vpop.f32.mrb[23].mxu1  ;;  %v16330_v12 = vld [vmem:[%s18434_s4 + $0x19cc] ss:$648 sps:$4 sm:$0xff]  }
 0x1b8   : > { %v18824_v7 = vadd.f32 %v10264_v5, %v10216_v6 }
 0x1b9   : > { %10571 = vmatpush1.bf16.xpose.msra.mxu0 %v16259_v0 }
 0x1ba   : > { %10620 = vmatpush1.bf16.xpose.msra.mxu1 %v16262_v1  ;;  %10572 = vmatprep.subr.bf16.mxu0 %v16267_v10  ;;  %v16319_v1 = vld [vmem:[%s18434_s4 + $0x14b0] ss:$648 sps:$4 sm:$0xff]  }
 0x1bb   : > { %10621 = vmatprep.subr.bf16.mxu1 %v16270_v11  ;;  %v16327_v11 = vld [vmem:[%s18434_s4 + $0x19c4] ss:$648 sps:$4 sm:$0xff]  }
 0x1c1   : > { %10573 = vmatpush1.bf16.xpose.msra.mxu0 %v16265_v14 }
 0x1c2   : > { %10622 = vmatpush1.bf16.xpose.msra.mxu1 %v16268_v9  ;;  %10574 = vmatprep.subr.bf16.mxu0 %v16273_v2  ;;  %v16325_v9 = vld [vmem:[%s18434_s4 + $0x19c0] ss:$648 sps:$4 sm:$0xff]  }
 0x1c3   : > { %10623 = vmatprep.subr.bf16.mxu1 %v16276_v15  ;;  %v16328_v2 = vld [vmem:[%s18434_s4 + $0x19c8] ss:$648 sps:$4 sm:$0xff]   ;;  %v16336_v15 = vld [vmem:[%s18434_s4 + $0x1edc] ss:$648 sps:$4 sm:$0xff]  }
 0x1c9   : > { %10575 = vmatpush1.bf16.xpose.msra.mxu0 %v16271_v16  ;;  %v16331_v16 = vld [vmem:[%s18434_s4 + $0x1ed0] ss:$648 sps:$4 sm:$0xff]  }
 0x1ca   : > { %10624 = vmatpush1.bf16.xpose.msra.mxu1 %v16274_v17  ;;  %10576 = vmatprep.subr.bf16.mxu0 %v16279_v18  ;;  %v16334_v17 = vld [vmem:[%s18434_s4 + $0x1ed8] ss:$648 sps:$4 sm:$0xff]   ;;  %v16339_v18 = vld [vmem:[%s18434_s4 + $0x23e4] ss:$648 sps:$4 sm:$0xff]  }
 0x1cb   : > { %10625 = vmatprep.subr.bf16.mxu1 %v16282_v19  ;;  %v16342_v19 = vld [vmem:[%s18434_s4 + $0x23ec] ss:$648 sps:$4 sm:$0xff]  }
 0x1d1   : > { %10577 = vmatpush1.bf16.xpose.msra.mxu0 %v16277_v20  ;;  %v16337_v20 = vld [vmem:[%s18434_s4 + $0x23e0] ss:$648 sps:$4 sm:$0xff]  }
 0x1d2   : > { %10626 = vmatpush1.bf16.xpose.msra.mxu1 %v16280_v21  ;;  %10660 = vmatprep.subr.bf16.mxu0 %v16291_v22  ;;  %v16340_v21 = vld [vmem:[%s18434_s4 + $0x23e8] ss:$648 sps:$4 sm:$0xff]   ;;  %v16351_v22 = vld [vmem:[%s18434_s4 + $0x84] ss:$648 sps:$4 sm:$0xff]  }
 0x1d3   : > { %10709 = vmatprep.subr.bf16.mxu1 %v16294_v23  ;;  %v16354_v23 = vld [vmem:[%s18434_s4 + $0x8c] ss:$648 sps:$4 sm:$0xff]  }
 0x1d8   : > { %10595 = vmatmul.mubr.bf16.vlgmr.msra.gmra.mrb[48].mxu0 %v16283_v24  ;;  %v16343_v24 = vld [vmem:[%s21177_s0 + $0x70] ss:$648 sps:$4 sm:$0xff]  }
 0x1d9   : > { %10644 = vmatmul.mubr.bf16.vlgmr.msra.gmra.mrb[48].mxu1 %v16286_v25  ;;  %10661 = vmatpush1.bf16.xpose.msra.mxu0 %v16289_v26  ;;  %v16346_v25 = vld [vmem:[%s21177_s0 + $0x78] ss:$648 sps:$4 sm:$0xff]  }
 0x1da   : > { %10710 = vmatpush1.bf16.xpose.msra.mxu1 %v16292_v27  ;;  %10602 = vmatprep.mubr.bf16.mxu0 %v16295_v28  ;;  %v16349_v26 = vld [vmem:[%s18434_s4 + $0x80] ss:$648 sps:$4 sm:$0xff]   ;;  %v16355_v28 = vld [vmem:[%s21177_s0 + $0x584] ss:$648 sps:$4 sm:$0xff]  }
 0x1db   : > { %10662 = vmatprep.subr.bf16.mxu0 %v16300_v29  ;;  %10711 = vmatprep.subr.bf16.mxu1 %v16303_v30  ;;  %v16352_v27 = vld [vmem:[%s18434_s4 + $0x88] ss:$648 sps:$4 sm:$0xff]   ;;  %v16360_v29 = vld [vmem:[%s18434_s4 + $0x594] ss:$648 sps:$4 sm:$0xff]  }
 0x1dc   : > { %10651 = vmatprep.mubr.bf16.mxu1 %v16304_v31  ;;  %v16363_v30 = vld [vmem:[%s18434_s4 + $0x59c] ss:$648 sps:$4 sm:$0xff]   ;;  %v16364_v31 = vld [vmem:[%s21177_s0 + $0x58c] ss:$648 sps:$4 sm:$0xff]  }
 0x1e0   : > { %10603 = vmatmul.mubr.bf16.gmra.mrb[52].mxu0 %v16297_v32  ;;  %v16357_v32 = vld [vmem:[%s21177_s0 + $0x580] ss:$648 sps:$4 sm:$0xff]  }
 0x1e1   : > { %10652 = vmatmul.mubr.bf16.gmra.mrb[52].mxu1 %v16306_v33  ;;  %10663 = vmatpush1.bf16.xpose.msra.mxu0 %v16298_v34  ;;  %v16366_v33 = vld [vmem:[%s21177_s0 + $0x588] ss:$648 sps:$4 sm:$0xff]  }
 0x1e2   : > { %10712 = vmatpush1.bf16.xpose.msra.mxu1 %v16301_v35  ;;  %10664 = vmatprep.subr.bf16.mxu0 %v16309_v36  ;;  %v16358_v34 = vld [vmem:[%s18434_s4 + $0x590] ss:$648 sps:$4 sm:$0xff]   ;;  %v16369_v36 = vld [vmem:[%s18434_s4 + $0xaa4] ss:$648 sps:$4 sm:$0xff]  }
 0x1e3   : > { %10713 = vmatprep.subr.bf16.mxu1 %v16312_v37  ;;  %10692 = vmatprep.mubr.bf16.mxu0 %v16345_v38  ;;  %v16361_v35 = vld [vmem:[%s18434_s4 + $0x598] ss:$648 sps:$4 sm:$0xff]   ;;  %v16372_v37 = vld [vmem:[%s18434_s4 + $0xaac] ss:$648 sps:$4 sm:$0xff]  }
 0x1e4   : > { %10741 = vmatprep.mubr.bf16.mxu1 %v16348_v39  ;;  %v16405_v38 = vld [vmem:[%s21177_s0 + $0x84] ss:$648 sps:$4 sm:$0xff]  }
 0x1e5   : > { %v16408_v39 = vld [vmem:[%s21177_s0 + $0x8c] ss:$648 sps:$4 sm:$0xff]  }
 0x1e9   : > { %10665 = vmatpush1.bf16.xpose.msra.mxu0 %v16307_v40  ;;  %v16367_v40 = vld [vmem:[%s18434_s4 + $0xaa0] ss:$648 sps:$4 sm:$0xff]  }
 0x1ea   : > { %10714 = vmatpush1.bf16.xpose.msra.mxu1 %v16310_v41  ;;  %10666 = vmatprep.subr.bf16.mxu0 %v16315_v42  ;;  %v16370_v41 = vld [vmem:[%s18434_s4 + $0xaa8] ss:$648 sps:$4 sm:$0xff]   ;;  %v16375_v42 = vld [vmem:[%s18434_s4 + $0xfb4] ss:$648 sps:$4 sm:$0xff]  }
 0x1eb   : > { %10715 = vmatprep.subr.bf16.mxu1 %v16318_v43  ;;  %v10302_v44 = vpop.f32.mrb[24].mxu0  ;;  %v16378_v43 = vld [vmem:[%s18434_s4 + $0xfbc] ss:$648 sps:$4 sm:$0xff]  }
 0x1ec   : > { %v10351_v45 = vpop.f32.mrb[24].mxu1  ;;  %v10303_v48 = vadd.f32 %v10302_v44, %v18809_v55  ;;  %v10304_v49 = vpop.f32.mrb[25].mxu0 }
 0x1ed   : > { %v10353_v50 = vpop.f32.mrb[25].mxu1  ;;  %v10305_v51 = vpop.f32.mrb[26].mxu0 }
 0x1ee   : > { %v10354_v53 = vpop.f32.mrb[26].mxu1  ;;  %v18877_v56 = vadd.f32 %v10351_v45, %v10303_v48  ;;  %v10306_v58 = vadd.f32 %v10305_v51, %v18814_v62  ;;  %v10307_v59 = vpop.f32.mrb[27].mxu0 }
 0x1ef   : > { %v10356_v60 = vpop.f32.mrb[27].mxu1 }
 0x1f0   : > { %v18882_v63 = vadd.f32 %v10354_v53, %v10306_v58 }
 0x1f1   : > { %10667 = vmatpush1.bf16.xpose.msra.mxu0 %v16313_v46  ;;  %v16373_v46 = vld [vmem:[%s18434_s4 + $0xfb0] ss:$648 sps:$4 sm:$0xff]  }
 0x1f2   : > { %10716 = vmatpush1.bf16.xpose.msra.mxu1 %v16316_v47  ;;  %10668 = vmatprep.subr.bf16.mxu0 %v16321_v52  ;;  %v16376_v47 = vld [vmem:[%s18434_s4 + $0xfb8] ss:$648 sps:$4 sm:$0xff]  }
 0x1f3   : > { %10717 = vmatprep.subr.bf16.mxu1 %v16324_v54  ;;  %v10310_v55 = vpop.f32.mrb[28].mxu0  ;;  %v16381_v54 = vld [vmem:[%s18434_s4 + $0x14c4] ss:$648 sps:$4 sm:$0xff]  }
 0x1f4   : > { %v10359_v0 = vpop.f32.mrb[28].mxu1  ;;  %v10311_v61 = vadd.f32 %v10310_v55, %v18820_v8  ;;  %v10312_v62 = vpop.f32.mrb[29].mxu0  ;;  %v16384_v55 = vld [vmem:[%s18434_s4 + $0x14cc] ss:$648 sps:$4 sm:$0xff]  }
 0x1f5   : > { %v10361_v3 = vpop.f32.mrb[29].mxu1  ;;  %v10313_v4 = vpop.f32.mrb[30].mxu0 }
 0x1f6   : > { %v10362_v5 = vpop.f32.mrb[30].mxu1  ;;  %v10314_v6 = vadd.f32 %v10313_v4, %v18824_v7  ;;  %v18888_v10 = vadd.f32 %v10359_v0, %v10311_v61  ;;  %v10315_v13 = vpop.f32.mrb[31].mxu0  ;;  %v16333_v7 = vld [vmem:[%s18434_s4 + $0x1ed4] ss:$648 sps:$4 sm:$0xff]   ;;  %v16382_v61 = vld [vmem:[%s18434_s4 + $0x14c8] ss:$648 sps:$4 sm:$0xff]  }
 0x1f7   : > { %v10364_v14 = vpop.f32.mrb[31].mxu1  ;;  %v16390_v13 = vld [vmem:[%s18434_s4 + $0x19dc] ss:$648 sps:$4 sm:$0xff]  }
 0x1f8   : > { %v18892_v8 = vadd.f32 %v10362_v5, %v10314_v6 }
 0x1f9   : > { %10669 = vmatpush1.bf16.xpose.msra.mxu0 %v16319_v1 }
 0x1fa   : > { %10718 = vmatpush1.bf16.xpose.msra.mxu1 %v16322_v57  ;;  %10670 = vmatprep.subr.bf16.mxu0 %v16327_v11  ;;  %v16379_v57 = vld [vmem:[%s18434_s4 + $0x14c0] ss:$648 sps:$4 sm:$0xff]  }
 0x1fb   : > { %10719 = vmatprep.subr.bf16.mxu1 %v16330_v12  ;;  %v16387_v12 = vld [vmem:[%s18434_s4 + $0x19d4] ss:$648 sps:$4 sm:$0xff]  }
 0x201   : > { %10671 = vmatpush1.bf16.xpose.msra.mxu0 %v16325_v9 }
 0x202   : > { %10720 = vmatpush1.bf16.xpose.msra.mxu1 %v16328_v2  ;;  %10672 = vmatprep.subr.bf16.mxu0 %v16333_v7  ;;  %v16385_v2 = vld [vmem:[%s18434_s4 + $0x19d0] ss:$648 sps:$4 sm:$0xff]  }
 0x203   : > { %10721 = vmatprep.subr.bf16.mxu1 %v16336_v15  ;;  %v16388_v7 = vld [vmem:[%s18434_s4 + $0x19d8] ss:$648 sps:$4 sm:$0xff]   ;;  %v16396_v15 = vld [vmem:[%s18434_s4 + $0x1eec] ss:$648 sps:$4 sm:$0xff]  }
 0x209   : > { %10673 = vmatpush1.bf16.xpose.msra.mxu0 %v16331_v16  ;;  %v16391_v16 = vld [vmem:[%s18434_s4 + $0x1ee0] ss:$648 sps:$4 sm:$0xff]  }
 0x20a   : > { %10722 = vmatpush1.bf16.xpose.msra.mxu1 %v16334_v17  ;;  %10674 = vmatprep.subr.bf16.mxu0 %v16339_v18  ;;  %v16394_v17 = vld [vmem:[%s18434_s4 + $0x1ee8] ss:$648 sps:$4 sm:$0xff]   ;;  %v16399_v18 = vld [vmem:[%s18434_s4 + $0x23f4] ss:$648 sps:$4 sm:$0xff]  }
 0x20b   : > { %10723 = vmatprep.subr.bf16.mxu1 %v16342_v19  ;;  %v16402_v19 = vld [vmem:[%s18434_s4 + $0x23fc] ss:$648 sps:$4 sm:$0xff]  }
 0x211   : > { %10675 = vmatpush1.bf16.xpose.msra.mxu0 %v16337_v20  ;;  %v16397_v20 = vld [vmem:[%s18434_s4 + $0x23f0] ss:$648 sps:$4 sm:$0xff]  }
 0x212   : > { %10724 = vmatpush1.bf16.xpose.msra.mxu1 %v16340_v21  ;;  %10758 = vmatprep.subr.bf16.mxu0 %v16351_v22  ;;  %v16400_v21 = vld [vmem:[%s18434_s4 + $0x23f8] ss:$648 sps:$4 sm:$0xff]   ;;  %v16411_v22 = vld [vmem:[%s18434_s4 + $0x94] ss:$648 sps:$4 sm:$0xff]  }
 0x213   : > { %10807 = vmatprep.subr.bf16.mxu1 %v16354_v23  ;;  %v16414_v23 = vld [vmem:[%s18434_s4 + $0x9c] ss:$648 sps:$4 sm:$0xff]  }
 0x218   : > { %10693 = vmatmul.mubr.bf16.vlgmr.msra.gmra.mrb[56].mxu0 %v16343_v24  ;;  %v16403_v24 = vld [vmem:[%s21177_s0 + $0x80] ss:$648 sps:$4 sm:$0xff]  }
 0x219   : > { %10742 = vmatmul.mubr.bf16.vlgmr.msra.gmra.mrb[56].mxu1 %v16346_v25  ;;  %10759 = vmatpush1.bf16.xpose.msra.mxu0 %v16349_v26  ;;  %v16406_v25 = vld [vmem:[%s21177_s0 + $0x88] ss:$648 sps:$4 sm:$0xff]  }
 0x21a   : > { %10808 = vmatpush1.bf16.xpose.msra.mxu1 %v16352_v27  ;;  %10700 = vmatprep.mubr.bf16.mxu0 %v16355_v28  ;;  %v16409_v26 = vld [vmem:[%s18434_s4 + $0x90] ss:$648 sps:$4 sm:$0xff]   ;;  %v16415_v28 = vld [vmem:[%s21177_s0 + $0x594] ss:$648 sps:$4 sm:$0xff]  }
 0x21b   : > { %10760 = vmatprep.subr.bf16.mxu0 %v16360_v29  ;;  %10809 = vmatprep.subr.bf16.mxu1 %v16363_v30  ;;  %v16412_v27 = vld [vmem:[%s18434_s4 + $0x98] ss:$648 sps:$4 sm:$0xff]   ;;  %v16420_v29 = vld [vmem:[%s18434_s4 + $0x5a4] ss:$648 sps:$4 sm:$0xff]  }
 0x21c   : > { %10749 = vmatprep.mubr.bf16.mxu1 %v16364_v31  ;;  %v16423_v30 = vld [vmem:[%s18434_s4 + $0x5ac] ss:$648 sps:$4 sm:$0xff]   ;;  %v16424_v31 = vld [vmem:[%s21177_s0 + $0x59c] ss:$648 sps:$4 sm:$0xff]  }
 0x220   : > { %10701 = vmatmul.mubr.bf16.gmra.mrb[60].mxu0 %v16357_v32  ;;  %v16417_v32 = vld [vmem:[%s21177_s0 + $0x590] ss:$648 sps:$4 sm:$0xff]  }
 0x221   : > { %10750 = vmatmul.mubr.bf16.gmra.mrb[60].mxu1 %v16366_v33  ;;  %10761 = vmatpush1.bf16.xpose.msra.mxu0 %v16358_v34  ;;  %v16426_v33 = vld [vmem:[%s21177_s0 + $0x598] ss:$648 sps:$4 sm:$0xff]  }
 0x222   : > { %10810 = vmatpush1.bf16.xpose.msra.mxu1 %v16361_v35  ;;  %10762 = vmatprep.subr.bf16.mxu0 %v16369_v36  ;;  %v16418_v34 = vld [vmem:[%s18434_s4 + $0x5a0] ss:$648 sps:$4 sm:$0xff]   ;;  %v16429_v36 = vld [vmem:[%s18434_s4 + $0xab4] ss:$648 sps:$4 sm:$0xff]  }
 0x223   : > { %10811 = vmatprep.subr.bf16.mxu1 %v16372_v37  ;;  %10790 = vmatprep.mubr.bf16.mxu0 %v16405_v38  ;;  %v16421_v35 = vld [vmem:[%s18434_s4 + $0x5a8] ss:$648 sps:$4 sm:$0xff]   ;;  %v16432_v37 = vld [vmem:[%s18434_s4 + $0xabc] ss:$648 sps:$4 sm:$0xff]  }
 0x224   : > { %10839 = vmatprep.mubr.bf16.mxu1 %v16408_v39  ;;  %v16465_v38 = vld [vmem:[%s21177_s0 + $0x94] ss:$648 sps:$4 sm:$0xff]  }
 0x225   : > { %v16468_v39 = vld [vmem:[%s21177_s0 + $0x9c] ss:$648 sps:$4 sm:$0xff]  }
 0x229   : > { %10763 = vmatpush1.bf16.xpose.msra.mxu0 %v16367_v40  ;;  %v16427_v40 = vld [vmem:[%s18434_s4 + $0xab0] ss:$648 sps:$4 sm:$0xff]  }
 0x22a   : > { %10812 = vmatpush1.bf16.xpose.msra.mxu1 %v16370_v41  ;;  %10764 = vmatprep.subr.bf16.mxu0 %v16375_v42  ;;  %v16430_v41 = vld [vmem:[%s18434_s4 + $0xab8] ss:$648 sps:$4 sm:$0xff]   ;;  %v16435_v42 = vld [vmem:[%s18434_s4 + $0xfc4] ss:$648 sps:$4 sm:$0xff]  }
 0x22b   : > { %10813 = vmatprep.subr.bf16.mxu1 %v16378_v43  ;;  %v10400_v44 = vpop.f32.mrb[32].mxu0  ;;  %v16438_v43 = vld [vmem:[%s18434_s4 + $0xfcc] ss:$648 sps:$4 sm:$0xff]  }
 0x22c   : > { %v10449_v45 = vpop.f32.mrb[32].mxu1  ;;  %v10401_v48 = vadd.f32 %v10400_v44, %v18877_v56  ;;  %v10402_v49 = vpop.f32.mrb[33].mxu0 }
 0x22d   : > { %v10451_v50 = vpop.f32.mrb[33].mxu1  ;;  %v10403_v51 = vpop.f32.mrb[34].mxu0 }
 0x22e   : > { %v10452_v53 = vpop.f32.mrb[34].mxu1  ;;  %v18945_v58 = vadd.f32 %v10449_v45, %v10401_v48  ;;  %v10404_v59 = vadd.f32 %v10403_v51, %v18882_v63  ;;  %v10405_v60 = vpop.f32.mrb[35].mxu0 }
 0x22f   : > { %v10454_v52 = vpop.f32.mrb[35].mxu1 }
 0x230   : > { %v18950_v0 = vadd.f32 %v10452_v53, %v10404_v59 }
 0x231   : > { %10765 = vmatpush1.bf16.xpose.msra.mxu0 %v16373_v46  ;;  %v16433_v46 = vld [vmem:[%s18434_s4 + $0xfc0] ss:$648 sps:$4 sm:$0xff]  }
 0x232   : > { %10814 = vmatpush1.bf16.xpose.msra.mxu1 %v16376_v47  ;;  %10766 = vmatprep.subr.bf16.mxu0 %v16381_v54  ;;  %v16436_v47 = vld [vmem:[%s18434_s4 + $0xfc8] ss:$648 sps:$4 sm:$0xff]  }
 0x233   : > { %10815 = vmatprep.subr.bf16.mxu1 %v16384_v55  ;;  %v10408_v56 = vpop.f32.mrb[36].mxu0  ;;  %v16441_v55 = vld [vmem:[%s18434_s4 + $0x14d4] ss:$648 sps:$4 sm:$0xff]  }
 0x234   : > { %v10457_v1 = vpop.f32.mrb[36].mxu1  ;;  %v10409_v62 = vadd.f32 %v10408_v56, %v18888_v10  ;;  %v10410_v63 = vpop.f32.mrb[37].mxu0  ;;  %v16444_v56 = vld [vmem:[%s18434_s4 + $0x14dc] ss:$648 sps:$4 sm:$0xff]  }
 0x235   : > { %v10459_v3 = vpop.f32.mrb[37].mxu1  ;;  %v10411_v4 = vpop.f32.mrb[38].mxu0 }
 0x236   : > { %v10460_v5 = vpop.f32.mrb[38].mxu1  ;;  %v10412_v6 = vadd.f32 %v10411_v4, %v18892_v8  ;;  %v18956_v11 = vadd.f32 %v10457_v1, %v10409_v62  ;;  %v10413_v14 = vpop.f32.mrb[39].mxu0  ;;  %v16393_v8 = vld [vmem:[%s18434_s4 + $0x1ee4] ss:$648 sps:$4 sm:$0xff]   ;;  %v16442_v62 = vld [vmem:[%s18434_s4 + $0x14d8] ss:$648 sps:$4 sm:$0xff]  }
 0x237   : > { %v10462_v9 = vpop.f32.mrb[39].mxu1  ;;  %v16450_v14 = vld [vmem:[%s18434_s4 + $0x19ec] ss:$648 sps:$4 sm:$0xff]  }
 0x238   : > { %v18960_v10 = vadd.f32 %v10460_v5, %v10412_v6 }
 0x239   : > { %10767 = vmatpush1.bf16.xpose.msra.mxu0 %v16379_v57 }
 0x23a   : > { %10816 = vmatpush1.bf16.xpose.msra.mxu1 %v16382_v61  ;;  %10768 = vmatprep.subr.bf16.mxu0 %v16387_v12  ;;  %v16439_v61 = vld [vmem:[%s18434_s4 + $0x14d0] ss:$648 sps:$4 sm:$0xff]  }
 0x23b   : > { %10817 = vmatprep.subr.bf16.mxu1 %v16390_v13  ;;  %v16447_v13 = vld [vmem:[%s18434_s4 + $0x19e4] ss:$648 sps:$4 sm:$0xff]  }
 0x241   : > { %10769 = vmatpush1.bf16.xpose.msra.mxu0 %v16385_v2 }
 0x242   : > { %10818 = vmatpush1.bf16.xpose.msra.mxu1 %v16388_v7  ;;  %10770 = vmatprep.subr.bf16.mxu0 %v16393_v8  ;;  %v16445_v7 = vld [vmem:[%s18434_s4 + $0x19e0] ss:$648 sps:$4 sm:$0xff]  }
 0x243   : > { %10819 = vmatprep.subr.bf16.mxu1 %v16396_v15  ;;  %v16448_v8 = vld [vmem:[%s18434_s4 + $0x19e8] ss:$648 sps:$4 sm:$0xff]   ;;  %v16456_v15 = vld [vmem:[%s18434_s4 + $0x1efc] ss:$648 sps:$4 sm:$0xff]  }
 0x249   : > { %10771 = vmatpush1.bf16.xpose.msra.mxu0 %v16391_v16  ;;  %v16451_v16 = vld [vmem:[%s18434_s4 + $0x1ef0] ss:$648 sps:$4 sm:$0xff]  }
 0x24a   : > { %10820 = vmatpush1.bf16.xpose.msra.mxu1 %v16394_v17  ;;  %10772 = vmatprep.subr.bf16.mxu0 %v16399_v18  ;;  %v16454_v17 = vld [vmem:[%s18434_s4 + $0x1ef8] ss:$648 sps:$4 sm:$0xff]   ;;  %v16459_v18 = vld [vmem:[%s18434_s4 + $0x2404] ss:$648 sps:$4 sm:$0xff]  }
 0x24b   : > { %10821 = vmatprep.subr.bf16.mxu1 %v16402_v19  ;;  %v16462_v19 = vld [vmem:[%s18434_s4 + $0x240c] ss:$648 sps:$4 sm:$0xff]  }
 0x251   : > { %10773 = vmatpush1.bf16.xpose.msra.mxu0 %v16397_v20  ;;  %v16457_v20 = vld [vmem:[%s18434_s4 + $0x2400] ss:$648 sps:$4 sm:$0xff]  }
 0x252   : > { %10822 = vmatpush1.bf16.xpose.msra.mxu1 %v16400_v21  ;;  %10856 = vmatprep.subr.bf16.mxu0 %v16411_v22  ;;  %v16460_v21 = vld [vmem:[%s18434_s4 + $0x2408] ss:$648 sps:$4 sm:$0xff]   ;;  %v16471_v22 = vld [vmem:[%s18434_s4 + $0xa4] ss:$648 sps:$4 sm:$0xff]  }
 0x253   : > { %10905 = vmatprep.subr.bf16.mxu1 %v16414_v23  ;;  %v16474_v23 = vld [vmem:[%s18434_s4 + $0xac] ss:$648 sps:$4 sm:$0xff]  }
 0x258   : > { %10791 = vmatmul.mubr.bf16.vlgmr.msra.gmra.mrb[64].mxu0 %v16403_v24  ;;  %v16463_v24 = vld [vmem:[%s21177_s0 + $0x90] ss:$648 sps:$4 sm:$0xff]  }
 0x259   : > { %10840 = vmatmul.mubr.bf16.vlgmr.msra.gmra.mrb[64].mxu1 %v16406_v25  ;;  %10857 = vmatpush1.bf16.xpose.msra.mxu0 %v16409_v26  ;;  %v16466_v25 = vld [vmem:[%s21177_s0 + $0x98] ss:$648 sps:$4 sm:$0xff]  }
 0x25a   : > { %10906 = vmatpush1.bf16.xpose.msra.mxu1 %v16412_v27  ;;  %10798 = vmatprep.mubr.bf16.mxu0 %v16415_v28  ;;  %v16469_v26 = vld [vmem:[%s18434_s4 + $0xa0] ss:$648 sps:$4 sm:$0xff]   ;;  %v16475_v28 = vld [vmem:[%s21177_s0 + $0x5a4] ss:$648 sps:$4 sm:$0xff]  }
 0x25b   : > { %10858 = vmatprep.subr.bf16.mxu0 %v16420_v29  ;;  %10907 = vmatprep.subr.bf16.mxu1 %v16423_v30  ;;  %v16472_v27 = vld [vmem:[%s18434_s4 + $0xa8] ss:$648 sps:$4 sm:$0xff]   ;;  %v16480_v29 = vld [vmem:[%s18434_s4 + $0x5b4] ss:$648 sps:$4 sm:$0xff]  }
 0x25c   : > { %10847 = vmatprep.mubr.bf16.mxu1 %v16424_v31  ;;  %v16483_v30 = vld [vmem:[%s18434_s4 + $0x5bc] ss:$648 sps:$4 sm:$0xff]   ;;  %v16484_v31 = vld [vmem:[%s21177_s0 + $0x5ac] ss:$648 sps:$4 sm:$0xff]  }
 0x260   : > { %10799 = vmatmul.mubr.bf16.gmra.mrb[68].mxu0 %v16417_v32  ;;  %v16477_v32 = vld [vmem:[%s21177_s0 + $0x5a0] ss:$648 sps:$4 sm:$0xff]  }
 0x261   : > { %10848 = vmatmul.mubr.bf16.gmra.mrb[68].mxu1 %v16426_v33  ;;  %10859 = vmatpush1.bf16.xpose.msra.mxu0 %v16418_v34  ;;  %v16486_v33 = vld [vmem:[%s21177_s0 + $0x5a8] ss:$648 sps:$4 sm:$0xff]  }
 0x262   : > { %10908 = vmatpush1.bf16.xpose.msra.mxu1 %v16421_v35  ;;  %10860 = vmatprep.subr.bf16.mxu0 %v16429_v36  ;;  %v16478_v34 = vld [vmem:[%s18434_s4 + $0x5b0] ss:$648 sps:$4 sm:$0xff]   ;;  %v16489_v36 = vld [vmem:[%s18434_s4 + $0xac4] ss:$648 sps:$4 sm:$0xff]  }
 0x263   : > { %10909 = vmatprep.subr.bf16.mxu1 %v16432_v37  ;;  %10888 = vmatprep.mubr.bf16.mxu0 %v16465_v38  ;;  %v16481_v35 = vld [vmem:[%s18434_s4 + $0x5b8] ss:$648 sps:$4 sm:$0xff]   ;;  %v16492_v37 = vld [vmem:[%s18434_s4 + $0xacc] ss:$648 sps:$4 sm:$0xff]  }
 0x264   : > { %10937 = vmatprep.mubr.bf16.mxu1 %v16468_v39  ;;  %v16525_v38 = vld [vmem:[%s21177_s0 + $0xa4] ss:$648 sps:$4 sm:$0xff]  }
 0x265   : > { %v16528_v39 = vld [vmem:[%s21177_s0 + $0xac] ss:$648 sps:$4 sm:$0xff]  }
 0x269   : > { %10861 = vmatpush1.bf16.xpose.msra.mxu0 %v16427_v40  ;;  %v16487_v40 = vld [vmem:[%s18434_s4 + $0xac0] ss:$648 sps:$4 sm:$0xff]  }
 0x26a   : > { %10910 = vmatpush1.bf16.xpose.msra.mxu1 %v16430_v41  ;;  %10862 = vmatprep.subr.bf16.mxu0 %v16435_v42  ;;  %v16490_v41 = vld [vmem:[%s18434_s4 + $0xac8] ss:$648 sps:$4 sm:$0xff]   ;;  %v16495_v42 = vld [vmem:[%s18434_s4 + $0xfd4] ss:$648 sps:$4 sm:$0xff]  }
 0x26b   : > { %10911 = vmatprep.subr.bf16.mxu1 %v16438_v43  ;;  %v10498_v44 = vpop.f32.mrb[40].mxu0  ;;  %v16498_v43 = vld [vmem:[%s18434_s4 + $0xfdc] ss:$648 sps:$4 sm:$0xff]  }
 0x26c   : > { %v10547_v45 = vpop.f32.mrb[40].mxu1  ;;  %v10499_v48 = vadd.f32 %v10498_v44, %v18945_v58  ;;  %v10500_v49 = vpop.f32.mrb[41].mxu0 }
 0x26d   : > { %v10549_v50 = vpop.f32.mrb[41].mxu1  ;;  %v10501_v51 = vpop.f32.mrb[42].mxu0 }
 0x26e   : > { %v10550_v53 = vpop.f32.mrb[42].mxu1  ;;  %v19013_v59 = vadd.f32 %v10547_v45, %v10499_v48  ;;  %v10502_v60 = vadd.f32 %v10501_v51, %v18950_v0  ;;  %v10503_v52 = vpop.f32.mrb[43].mxu0 }
 0x26f   : > { %v10552_v54 = vpop.f32.mrb[43].mxu1 }
 0x270   : > { %v19018_v1 = vadd.f32 %v10550_v53, %v10502_v60 }
 0x271   : > { %10863 = vmatpush1.bf16.xpose.msra.mxu0 %v16433_v46  ;;  %v16493_v46 = vld [vmem:[%s18434_s4 + $0xfd0] ss:$648 sps:$4 sm:$0xff]  }
 0x272   : > { %10912 = vmatpush1.bf16.xpose.msra.mxu1 %v16436_v47  ;;  %10864 = vmatprep.subr.bf16.mxu0 %v16441_v55  ;;  %v16496_v47 = vld [vmem:[%s18434_s4 + $0xfd8] ss:$648 sps:$4 sm:$0xff]  }
 0x273   : > { %10913 = vmatprep.subr.bf16.mxu1 %v16444_v56  ;;  %v10506_v58 = vpop.f32.mrb[44].mxu0  ;;  %v16501_v56 = vld [vmem:[%s18434_s4 + $0x14e4] ss:$648 sps:$4 sm:$0xff]  }
 0x274   : > { %v10555_v57 = vpop.f32.mrb[44].mxu1  ;;  %v10507_v63 = vadd.f32 %v10506_v58, %v18956_v11  ;;  %v10508_v0 = vpop.f32.mrb[45].mxu0  ;;  %v16504_v58 = vld [vmem:[%s18434_s4 + $0x14ec] ss:$648 sps:$4 sm:$0xff]  }
 0x275   : > { %v10557_v3 = vpop.f32.mrb[45].mxu1  ;;  %v10509_v4 = vpop.f32.mrb[46].mxu0 }
 0x276   : > { %v10558_v5 = vpop.f32.mrb[46].mxu1  ;;  %v10510_v6 = vadd.f32 %v10509_v4, %v18960_v10  ;;  %v19024_v12 = vadd.f32 %v10555_v57, %v10507_v63  ;;  %v10511_v9 = vpop.f32.mrb[47].mxu0  ;;  %v16453_v10 = vld [vmem:[%s18434_s4 + $0x1ef4] ss:$648 sps:$4 sm:$0xff]   ;;  %v16502_v63 = vld [vmem:[%s18434_s4 + $0x14e8] ss:$648 sps:$4 sm:$0xff]  }
 0x277   : > { %v10560_v2 = vpop.f32.mrb[47].mxu1  ;;  %v16510_v9 = vld [vmem:[%s18434_s4 + $0x19fc] ss:$648 sps:$4 sm:$0xff]  }
 0x278   : > { %v19028_v11 = vadd.f32 %v10558_v5, %v10510_v6 }
 0x279   : > { %10865 = vmatpush1.bf16.xpose.msra.mxu0 %v16439_v61 }
 0x27a   : > { %10914 = vmatpush1.bf16.xpose.msra.mxu1 %v16442_v62  ;;  %10866 = vmatprep.subr.bf16.mxu0 %v16447_v13  ;;  %v16499_v62 = vld [vmem:[%s18434_s4 + $0x14e0] ss:$648 sps:$4 sm:$0xff]  }
 0x27b   : > { %10915 = vmatprep.subr.bf16.mxu1 %v16450_v14  ;;  %v16507_v14 = vld [vmem:[%s18434_s4 + $0x19f4] ss:$648 sps:$4 sm:$0xff]  }
 0x281   : > { %10867 = vmatpush1.bf16.xpose.msra.mxu0 %v16445_v7 }
 0x282   : > { %10916 = vmatpush1.bf16.xpose.msra.mxu1 %v16448_v8  ;;  %10868 = vmatprep.subr.bf16.mxu0 %v16453_v10  ;;  %v16505_v8 = vld [vmem:[%s18434_s4 + $0x19f0] ss:$648 sps:$4 sm:$0xff]  }
 0x283   : > { %10917 = vmatprep.subr.bf16.mxu1 %v16456_v15  ;;  %v16508_v10 = vld [vmem:[%s18434_s4 + $0x19f8] ss:$648 sps:$4 sm:$0xff]   ;;  %v16516_v15 = vld [vmem:[%s18434_s4 + $0x1f0c] ss:$648 sps:$4 sm:$0xff]  }
 0x289   : > { %10869 = vmatpush1.bf16.xpose.msra.mxu0 %v16451_v16  ;;  %v16511_v16 = vld [vmem:[%s18434_s4 + $0x1f00] ss:$648 sps:$4 sm:$0xff]  }
 0x28a   : > { %10918 = vmatpush1.bf16.xpose.msra.mxu1 %v16454_v17  ;;  %10870 = vmatprep.subr.bf16.mxu0 %v16459_v18  ;;  %v16514_v17 = vld [vmem:[%s18434_s4 + $0x1f08] ss:$648 sps:$4 sm:$0xff]   ;;  %v16519_v18 = vld [vmem:[%s18434_s4 + $0x2414] ss:$648 sps:$4 sm:$0xff]  }
 0x28b   : > { %10919 = vmatprep.subr.bf16.mxu1 %v16462_v19  ;;  %v16522_v19 = vld [vmem:[%s18434_s4 + $0x241c] ss:$648 sps:$4 sm:$0xff]  }
 0x291   : > { %10871 = vmatpush1.bf16.xpose.msra.mxu0 %v16457_v20  ;;  %v16517_v20 = vld [vmem:[%s18434_s4 + $0x2410] ss:$648 sps:$4 sm:$0xff]  }
 0x292   : > { %10920 = vmatpush1.bf16.xpose.msra.mxu1 %v16460_v21  ;;  %10954 = vmatprep.subr.bf16.mxu0 %v16471_v22  ;;  %v16520_v21 = vld [vmem:[%s18434_s4 + $0x2418] ss:$648 sps:$4 sm:$0xff]   ;;  %v16531_v22 = vld [vmem:[%s18434_s4 + $0xb4] ss:$648 sps:$4 sm:$0xff]  }
 0x293   : > { %11003 = vmatprep.subr.bf16.mxu1 %v16474_v23  ;;  %v16534_v23 = vld [vmem:[%s18434_s4 + $0xbc] ss:$648 sps:$4 sm:$0xff]  }
 0x298   : > { %10889 = vmatmul.mubr.bf16.vlgmr.msra.gmra.mrb[72].mxu0 %v16463_v24  ;;  %v16523_v24 = vld [vmem:[%s21177_s0 + $0xa0] ss:$648 sps:$4 sm:$0xff]  }
 0x299   : > { %10938 = vmatmul.mubr.bf16.vlgmr.msra.gmra.mrb[72].mxu1 %v16466_v25  ;;  %10955 = vmatpush1.bf16.xpose.msra.mxu0 %v16469_v26  ;;  %v16526_v25 = vld [vmem:[%s21177_s0 + $0xa8] ss:$648 sps:$4 sm:$0xff]  }
 0x29a   : > { %11004 = vmatpush1.bf16.xpose.msra.mxu1 %v16472_v27  ;;  %10896 = vmatprep.mubr.bf16.mxu0 %v16475_v28  ;;  %v16529_v26 = vld [vmem:[%s18434_s4 + $0xb0] ss:$648 sps:$4 sm:$0xff]   ;;  %v16535_v28 = vld [vmem:[%s21177_s0 + $0x5b4] ss:$648 sps:$4 sm:$0xff]  }
 0x29b   : > { %10956 = vmatprep.subr.bf16.mxu0 %v16480_v29  ;;  %11005 = vmatprep.subr.bf16.mxu1 %v16483_v30  ;;  %v16532_v27 = vld [vmem:[%s18434_s4 + $0xb8] ss:$648 sps:$4 sm:$0xff]   ;;  %v16540_v29 = vld [vmem:[%s18434_s4 + $0x5c4] ss:$648 sps:$4 sm:$0xff]  }
 0x29c   : > { %10945 = vmatprep.mubr.bf16.mxu1 %v16484_v31  ;;  %v16543_v30 = vld [vmem:[%s18434_s4 + $0x5cc] ss:$648 sps:$4 sm:$0xff]   ;;  %v16544_v31 = vld [vmem:[%s21177_s0 + $0x5bc] ss:$648 sps:$4 sm:$0xff]  }
 0x2a0   : > { %10897 = vmatmul.mubr.bf16.gmra.mrb[76].mxu0 %v16477_v32  ;;  %v16537_v32 = vld [vmem:[%s21177_s0 + $0x5b0] ss:$648 sps:$4 sm:$0xff]  }
 0x2a1   : > { %10946 = vmatmul.mubr.bf16.gmra.mrb[76].mxu1 %v16486_v33  ;;  %10957 = vmatpush1.bf16.xpose.msra.mxu0 %v16478_v34  ;;  %v16546_v33 = vld [vmem:[%s21177_s0 + $0x5b8] ss:$648 sps:$4 sm:$0xff]  }
 0x2a2   : > { %11006 = vmatpush1.bf16.xpose.msra.mxu1 %v16481_v35  ;;  %10958 = vmatprep.subr.bf16.mxu0 %v16489_v36  ;;  %v16538_v34 = vld [vmem:[%s18434_s4 + $0x5c0] ss:$648 sps:$4 sm:$0xff]   ;;  %v16549_v36 = vld [vmem:[%s18434_s4 + $0xad4] ss:$648 sps:$4 sm:$0xff]  }
 0x2a3   : > { %11007 = vmatprep.subr.bf16.mxu1 %v16492_v37  ;;  %10986 = vmatprep.mubr.bf16.mxu0 %v16525_v38  ;;  %v16541_v35 = vld [vmem:[%s18434_s4 + $0x5c8] ss:$648 sps:$4 sm:$0xff]   ;;  %v16552_v37 = vld [vmem:[%s18434_s4 + $0xadc] ss:$648 sps:$4 sm:$0xff]  }
 0x2a4   : > { %11035 = vmatprep.mubr.bf16.mxu1 %v16528_v39  ;;  %v16585_v38 = vld [vmem:[%s21177_s0 + $0xb4] ss:$648 sps:$4 sm:$0xff]  }
 0x2a5   : > { %v16588_v39 = vld [vmem:[%s21177_s0 + $0xbc] ss:$648 sps:$4 sm:$0xff]  }
 0x2a9   : > { %10959 = vmatpush1.bf16.xpose.msra.mxu0 %v16487_v40  ;;  %v16547_v40 = vld [vmem:[%s18434_s4 + $0xad0] ss:$648 sps:$4 sm:$0xff]  }
 0x2aa   : > { %11008 = vmatpush1.bf16.xpose.msra.mxu1 %v16490_v41  ;;  %10960 = vmatprep.subr.bf16.mxu0 %v16495_v42  ;;  %v16550_v41 = vld [vmem:[%s18434_s4 + $0xad8] ss:$648 sps:$4 sm:$0xff]   ;;  %v16555_v42 = vld [vmem:[%s18434_s4 + $0xfe4] ss:$648 sps:$4 sm:$0xff]  }
 0x2ab   : > { %11009 = vmatprep.subr.bf16.mxu1 %v16498_v43  ;;  %v10596_v44 = vpop.f32.mrb[48].mxu0  ;;  %v16558_v43 = vld [vmem:[%s18434_s4 + $0xfec] ss:$648 sps:$4 sm:$0xff]  }
 0x2ac   : > { %v10645_v45 = vpop.f32.mrb[48].mxu1  ;;  %v10597_v48 = vadd.f32 %v10596_v44, %v19013_v59  ;;  %v10598_v49 = vpop.f32.mrb[49].mxu0 }
 0x2ad   : > { %v10647_v50 = vpop.f32.mrb[49].mxu1  ;;  %v10599_v51 = vpop.f32.mrb[50].mxu0 }
 0x2ae   : > { %v10648_v53 = vpop.f32.mrb[50].mxu1  ;;  %v19081_v60 = vadd.f32 %v10645_v45, %v10597_v48  ;;  %v10600_v52 = vadd.f32 %v10599_v51, %v19018_v1  ;;  %v10601_v54 = vpop.f32.mrb[51].mxu0  ;;  %v16553_v51 = vld [vmem:[%s18434_s4 + $0xfe0] ss:$648 sps:$4 sm:$0xff]  }
 0x2af   : > { %v10650_v55 = vpop.f32.mrb[51].mxu1 }
 0x2b0   : > { %v19086_v57 = vadd.f32 %v10648_v53, %v10600_v52  ;;  %v16556_v53 = vld [vmem:[%s18434_s4 + $0xfe8] ss:$648 sps:$4 sm:$0xff]  }
 0x2b1   : > { %10961 = vmatpush1.bf16.xpose.msra.mxu0 %v16493_v46 }
 0x2b2   : > { %11010 = vmatpush1.bf16.xpose.msra.mxu1 %v16496_v47  ;;  %10962 = vmatprep.subr.bf16.mxu0 %v16501_v56 }
 0x2b3   : > { %11011 = vmatprep.subr.bf16.mxu1 %v16504_v58  ;;  %v10604_v59 = vpop.f32.mrb[52].mxu0  ;;  %v16561_v58 = vld [vmem:[%s18434_s4 + $0x14f4] ss:$648 sps:$4 sm:$0xff]  }
 0x2b4   : > { %v10653_v61 = vpop.f32.mrb[52].mxu1  ;;  %v10605_v0 = vadd.f32 %v10604_v59, %v19024_v12  ;;  %v10606_v1 = vpop.f32.mrb[53].mxu0  ;;  %v16564_v59 = vld [vmem:[%s18434_s4 + $0x14fc] ss:$648 sps:$4 sm:$0xff]  }
 0x2b5   : > { %v10655_v3 = vpop.f32.mrb[53].mxu1  ;;  %v10607_v4 = vpop.f32.mrb[54].mxu0 }
 0x2b6   : > { %v10656_v5 = vpop.f32.mrb[54].mxu1  ;;  %v10608_v6 = vadd.f32 %v10607_v4, %v19028_v11  ;;  %v19092_v13 = vadd.f32 %v10653_v61, %v10605_v0  ;;  %v10609_v2 = vpop.f32.mrb[55].mxu0  ;;  %v16513_v11 = vld [vmem:[%s18434_s4 + $0x1f04] ss:$648 sps:$4 sm:$0xff]   ;;  %v16559_v4 = vld [vmem:[%s18434_s4 + $0x14f0] ss:$648 sps:$4 sm:$0xff]  }
 0x2b7   : > { %v10658_v7 = vpop.f32.mrb[55].mxu1  ;;  %v16570_v2 = vld [vmem:[%s18434_s4 + $0x1a0c] ss:$648 sps:$4 sm:$0xff]  }
 0x2b8   : > { %v19096_v12 = vadd.f32 %v10656_v5, %v10608_v6  ;;  %v16562_v5 = vld [vmem:[%s18434_s4 + $0x14f8] ss:$648 sps:$4 sm:$0xff]  }
 0x2b9   : > { %10963 = vmatpush1.bf16.xpose.msra.mxu0 %v16499_v62 }
 0x2ba   : > { %11012 = vmatpush1.bf16.xpose.msra.mxu1 %v16502_v63  ;;  %10964 = vmatprep.subr.bf16.mxu0 %v16507_v14 }
 0x2bb   : > { %11013 = vmatprep.subr.bf16.mxu1 %v16510_v9  ;;  %v16567_v9 = vld [vmem:[%s18434_s4 + $0x1a04] ss:$648 sps:$4 sm:$0xff]  }
 0x2c1   : > { %10965 = vmatpush1.bf16.xpose.msra.mxu0 %v16505_v8 }
 0x2c2   : > { %11014 = vmatpush1.bf16.xpose.msra.mxu1 %v16508_v10  ;;  %10966 = vmatprep.subr.bf16.mxu0 %v16513_v11  ;;  %v16565_v10 = vld [vmem:[%s18434_s4 + $0x1a00] ss:$648 sps:$4 sm:$0xff]  }
 0x2c3   : > { %11015 = vmatprep.subr.bf16.mxu1 %v16516_v15  ;;  %v16568_v11 = vld [vmem:[%s18434_s4 + $0x1a08] ss:$648 sps:$4 sm:$0xff]   ;;  %v16576_v15 = vld [vmem:[%s18434_s4 + $0x1f1c] ss:$648 sps:$4 sm:$0xff]  }
 0x2c9   : > { %10967 = vmatpush1.bf16.xpose.msra.mxu0 %v16511_v16  ;;  %v16571_v16 = vld [vmem:[%s18434_s4 + $0x1f10] ss:$648 sps:$4 sm:$0xff]  }
 0x2ca   : > { %11016 = vmatpush1.bf16.xpose.msra.mxu1 %v16514_v17  ;;  %10968 = vmatprep.subr.bf16.mxu0 %v16519_v18  ;;  %v16574_v17 = vld [vmem:[%s18434_s4 + $0x1f18] ss:$648 sps:$4 sm:$0xff]   ;;  %v16579_v18 = vld [vmem:[%s18434_s4 + $0x2424] ss:$648 sps:$4 sm:$0xff]  }
 0x2cb   : > { %11017 = vmatprep.subr.bf16.mxu1 %v16522_v19  ;;  %v16582_v19 = vld [vmem:[%s18434_s4 + $0x242c] ss:$648 sps:$4 sm:$0xff]  }
 0x2d1   : > { %10969 = vmatpush1.bf16.xpose.msra.mxu0 %v16517_v20  ;;  %v16577_v20 = vld [vmem:[%s18434_s4 + $0x2420] ss:$648 sps:$4 sm:$0xff]  }
 0x2d2   : > { %11018 = vmatpush1.bf16.xpose.msra.mxu1 %v16520_v21  ;;  %11052 = vmatprep.subr.bf16.mxu0 %v16531_v22  ;;  %v16580_v21 = vld [vmem:[%s18434_s4 + $0x2428] ss:$648 sps:$4 sm:$0xff]   ;;  %v16591_v22 = vld [vmem:[%s18434_s4 + $0xc4] ss:$648 sps:$4 sm:$0xff]  }
 0x2d3   : > { %11101 = vmatprep.subr.bf16.mxu1 %v16534_v23  ;;  %v16594_v23 = vld [vmem:[%s18434_s4 + $0xcc] ss:$648 sps:$4 sm:$0xff]  }
 0x2d8   : > { %10987 = vmatmul.mubr.bf16.vlgmr.msra.gmra.mrb[80].mxu0 %v16523_v24  ;;  %v16583_v24 = vld [vmem:[%s21177_s0 + $0xb0] ss:$648 sps:$4 sm:$0xff]  }
 0x2d9   : > { %11036 = vmatmul.mubr.bf16.vlgmr.msra.gmra.mrb[80].mxu1 %v16526_v25  ;;  %11053 = vmatpush1.bf16.xpose.msra.mxu0 %v16529_v26  ;;  %v16586_v25 = vld [vmem:[%s21177_s0 + $0xb8] ss:$648 sps:$4 sm:$0xff]  }
 0x2da   : > { %11102 = vmatpush1.bf16.xpose.msra.mxu1 %v16532_v27  ;;  %10994 = vmatprep.mubr.bf16.mxu0 %v16535_v28  ;;  %v16589_v26 = vld [vmem:[%s18434_s4 + $0xc0] ss:$648 sps:$4 sm:$0xff]   ;;  %v16595_v28 = vld [vmem:[%s21177_s0 + $0x5c4] ss:$648 sps:$4 sm:$0xff]  }
 0x2db   : > { %11054 = vmatprep.subr.bf16.mxu0 %v16540_v29  ;;  %11103 = vmatprep.subr.bf16.mxu1 %v16543_v30  ;;  %v16592_v27 = vld [vmem:[%s18434_s4 + $0xc8] ss:$648 sps:$4 sm:$0xff]   ;;  %v16600_v29 = vld [vmem:[%s18434_s4 + $0x5d4] ss:$648 sps:$4 sm:$0xff]  }
 0x2dc   : > { %11043 = vmatprep.mubr.bf16.mxu1 %v16544_v31  ;;  %v16603_v30 = vld [vmem:[%s18434_s4 + $0x5dc] ss:$648 sps:$4 sm:$0xff]   ;;  %v16604_v31 = vld [vmem:[%s21177_s0 + $0x5cc] ss:$648 sps:$4 sm:$0xff]  }
 0x2e0   : > { %10995 = vmatmul.mubr.bf16.gmra.mrb[84].mxu0 %v16537_v32  ;;  %v16597_v32 = vld [vmem:[%s21177_s0 + $0x5c0] ss:$648 sps:$4 sm:$0xff]  }
 0x2e1   : > { %11044 = vmatmul.mubr.bf16.gmra.mrb[84].mxu1 %v16546_v33  ;;  %11055 = vmatpush1.bf16.xpose.msra.mxu0 %v16538_v34  ;;  %v16606_v33 = vld [vmem:[%s21177_s0 + $0x5c8] ss:$648 sps:$4 sm:$0xff]  }
 0x2e2   : > { %11104 = vmatpush1.bf16.xpose.msra.mxu1 %v16541_v35  ;;  %11056 = vmatprep.subr.bf16.mxu0 %v16549_v36  ;;  %v16598_v34 = vld [vmem:[%s18434_s4 + $0x5d0] ss:$648 sps:$4 sm:$0xff]   ;;  %v16609_v36 = vld [vmem:[%s18434_s4 + $0xae4] ss:$648 sps:$4 sm:$0xff]  }
 0x2e3   : > { %11105 = vmatprep.subr.bf16.mxu1 %v16552_v37  ;;  %11084 = vmatprep.mubr.bf16.mxu0 %v16585_v38  ;;  %v16601_v35 = vld [vmem:[%s18434_s4 + $0x5d8] ss:$648 sps:$4 sm:$0xff]   ;;  %v16612_v37 = vld [vmem:[%s18434_s4 + $0xaec] ss:$648 sps:$4 sm:$0xff]  }
 0x2e4   : > { %11133 = vmatprep.mubr.bf16.mxu1 %v16588_v39  ;;  %v16645_v38 = vld [vmem:[%s21177_s0 + $0xc4] ss:$648 sps:$4 sm:$0xff]  }
 0x2e5   : > { %v16648_v39 = vld [vmem:[%s21177_s0 + $0xcc] ss:$648 sps:$4 sm:$0xff]  }
 0x2e9   : > { %11057 = vmatpush1.bf16.xpose.msra.mxu0 %v16547_v40  ;;  %v16607_v40 = vld [vmem:[%s18434_s4 + $0xae0] ss:$648 sps:$4 sm:$0xff]  }
 0x2ea   : > { %11106 = vmatpush1.bf16.xpose.msra.mxu1 %v16550_v41  ;;  %11058 = vmatprep.subr.bf16.mxu0 %v16555_v42  ;;  %v16610_v41 = vld [vmem:[%s18434_s4 + $0xae8] ss:$648 sps:$4 sm:$0xff]   ;;  %v16615_v42 = vld [vmem:[%s18434_s4 + $0xff4] ss:$648 sps:$4 sm:$0xff]  }
 0x2eb   : > { %11107 = vmatprep.subr.bf16.mxu1 %v16558_v43  ;;  %v10694_v44 = vpop.f32.mrb[56].mxu0  ;;  %v16618_v43 = vld [vmem:[%s18434_s4 + $0xffc] ss:$648 sps:$4 sm:$0xff]  }
 0x2ec   : > { %v10743_v45 = vpop.f32.mrb[56].mxu1  ;;  %v10695_v46 = vadd.f32 %v10694_v44, %v19081_v60  ;;  %v10696_v47 = vpop.f32.mrb[57].mxu0 }
 0x2ed   : > { %v10745_v48 = vpop.f32.mrb[57].mxu1  ;;  %v10697_v49 = vpop.f32.mrb[58].mxu0 }
 0x2ee   : > { %v10746_v50 = vpop.f32.mrb[58].mxu1  ;;  %v19149_v52 = vadd.f32 %v10743_v45, %v10695_v46  ;;  %v10698_v54 = vadd.f32 %v10697_v49, %v19086_v57  ;;  %v10699_v55 = vpop.f32.mrb[59].mxu0 }
 0x2ef   : > { %v10748_v56 = vpop.f32.mrb[59].mxu1 }
 0x2f0   : > { %v19154_v61 = vadd.f32 %v10746_v50, %v10698_v54 }
 0x2f1   : > { %11059 = vmatpush1.bf16.xpose.msra.mxu0 %v16553_v51  ;;  %v16613_v51 = vld [vmem:[%s18434_s4 + $0xff0] ss:$648 sps:$4 sm:$0xff]  }
 0x2f2   : > { %11108 = vmatpush1.bf16.xpose.msra.mxu1 %v16556_v53  ;;  %11060 = vmatprep.subr.bf16.mxu0 %v16561_v58  ;;  %v16616_v53 = vld [vmem:[%s18434_s4 + $0xff8] ss:$648 sps:$4 sm:$0xff]  }
 0x2f3   : > { %11109 = vmatprep.subr.bf16.mxu1 %v16564_v59  ;;  %v10702_v60 = vpop.f32.mrb[60].mxu0  ;;  %v16621_v59 = vld [vmem:[%s18434_s4 + $0x1504] ss:$648 sps:$4 sm:$0xff]  }
 0x2f4   : > { %v10751_v62 = vpop.f32.mrb[60].mxu1  ;;  %v10703_v63 = vadd.f32 %v10702_v60, %v19092_v13  ;;  %v10704_v0 = vpop.f32.mrb[61].mxu0  ;;  %v16624_v60 = vld [vmem:[%s18434_s4 + $0x150c] ss:$648 sps:$4 sm:$0xff]  }
 0x2f5   : > { %v10753_v57 = vpop.f32.mrb[61].mxu1  ;;  %v10705_v1 = vpop.f32.mrb[62].mxu0 }
 0x2f6   : > { %v10754_v3 = vpop.f32.mrb[62].mxu1  ;;  %v10706_v6 = vadd.f32 %v10705_v1, %v19096_v12  ;;  %v19160_v14 = vadd.f32 %v10751_v62, %v10703_v63  ;;  %v10707_v7 = vpop.f32.mrb[63].mxu0  ;;  %v16573_v12 = vld [vmem:[%s18434_s4 + $0x1f14] ss:$648 sps:$4 sm:$0xff]  }
 0x2f7   : > { %v10756_v13 = vpop.f32.mrb[63].mxu1  ;;  %v16630_v7 = vld [vmem:[%s18434_s4 + $0x1a1c] ss:$648 sps:$4 sm:$0xff]  }
 0x2f8   : > { %v19164_v8 = vadd.f32 %v10754_v3, %v10706_v6 }
 0x2f9   : > { %11061 = vmatpush1.bf16.xpose.msra.mxu0 %v16559_v4  ;;  %v16619_v4 = vld [vmem:[%s18434_s4 + $0x1500] ss:$648 sps:$4 sm:$0xff]  }
 0x2fa   : > { %11110 = vmatpush1.bf16.xpose.msra.mxu1 %v16562_v5  ;;  %11062 = vmatprep.subr.bf16.mxu0 %v16567_v9  ;;  %v16622_v5 = vld [vmem:[%s18434_s4 + $0x1508] ss:$648 sps:$4 sm:$0xff]  }
 0x2fb   : > { %11111 = vmatprep.subr.bf16.mxu1 %v16570_v2  ;;  %v16627_v2 = vld [vmem:[%s18434_s4 + $0x1a14] ss:$648 sps:$4 sm:$0xff]  }
 0x301   : > { %11063 = vmatpush1.bf16.xpose.msra.mxu0 %v16565_v10 }
 0x302   : > { %11112 = vmatpush1.bf16.xpose.msra.mxu1 %v16568_v11  ;;  %11064 = vmatprep.subr.bf16.mxu0 %v16573_v12  ;;  %v16625_v11 = vld [vmem:[%s18434_s4 + $0x1a10] ss:$648 sps:$4 sm:$0xff]  }
 0x303   : > { %11113 = vmatprep.subr.bf16.mxu1 %v16576_v15  ;;  %v16628_v12 = vld [vmem:[%s18434_s4 + $0x1a18] ss:$648 sps:$4 sm:$0xff]   ;;  %v16636_v15 = vld [vmem:[%s18434_s4 + $0x1f2c] ss:$648 sps:$4 sm:$0xff]  }
 0x309   : > { %11065 = vmatpush1.bf16.xpose.msra.mxu0 %v16571_v16  ;;  %v16631_v16 = vld [vmem:[%s18434_s4 + $0x1f20] ss:$648 sps:$4 sm:$0xff]  }
 0x30a   : > { %11114 = vmatpush1.bf16.xpose.msra.mxu1 %v16574_v17  ;;  %11066 = vmatprep.subr.bf16.mxu0 %v16579_v18  ;;  %v16634_v17 = vld [vmem:[%s18434_s4 + $0x1f28] ss:$648 sps:$4 sm:$0xff]   ;;  %v16639_v18 = vld [vmem:[%s18434_s4 + $0x2434] ss:$648 sps:$4 sm:$0xff]  }
 0x30b   : > { %11115 = vmatprep.subr.bf16.mxu1 %v16582_v19  ;;  %v16642_v19 = vld [vmem:[%s18434_s4 + $0x243c] ss:$648 sps:$4 sm:$0xff]  }
 0x311   : > { %11067 = vmatpush1.bf16.xpose.msra.mxu0 %v16577_v20  ;;  %v16637_v20 = vld [vmem:[%s18434_s4 + $0x2430] ss:$648 sps:$4 sm:$0xff]  }
 0x312   : > { %11116 = vmatpush1.bf16.xpose.msra.mxu1 %v16580_v21  ;;  %11150 = vmatprep.subr.bf16.mxu0 %v16591_v22  ;;  %v16640_v21 = vld [vmem:[%s18434_s4 + $0x2438] ss:$648 sps:$4 sm:$0xff]   ;;  %v16651_v22 = vld [vmem:[%s18434_s4 + $0xd4] ss:$648 sps:$4 sm:$0xff]  }
 0x313   : > { %11199 = vmatprep.subr.bf16.mxu1 %v16594_v23  ;;  %v16654_v23 = vld [vmem:[%s18434_s4 + $0xdc] ss:$648 sps:$4 sm:$0xff]  }
 0x318   : > { %11085 = vmatmul.mubr.bf16.vlgmr.msra.gmra.mrb[88].mxu0 %v16583_v24  ;;  %v16643_v24 = vld [vmem:[%s21177_s0 + $0xc0] ss:$648 sps:$4 sm:$0xff]  }
 0x319   : > { %11134 = vmatmul.mubr.bf16.vlgmr.msra.gmra.mrb[88].mxu1 %v16586_v25  ;;  %11151 = vmatpush1.bf16.xpose.msra.mxu0 %v16589_v26  ;;  %v16646_v25 = vld [vmem:[%s21177_s0 + $0xc8] ss:$648 sps:$4 sm:$0xff]  }
 0x31a   : > { %11200 = vmatpush1.bf16.xpose.msra.mxu1 %v16592_v27  ;;  %11092 = vmatprep.mubr.bf16.mxu0 %v16595_v28  ;;  %v16649_v26 = vld [vmem:[%s18434_s4 + $0xd0] ss:$648 sps:$4 sm:$0xff]   ;;  %v16655_v28 = vld [vmem:[%s21177_s0 + $0x5d4] ss:$648 sps:$4 sm:$0xff]  }
 0x31b   : > { %11152 = vmatprep.subr.bf16.mxu0 %v16600_v29  ;;  %11201 = vmatprep.subr.bf16.mxu1 %v16603_v30  ;;  %v16652_v27 = vld [vmem:[%s18434_s4 + $0xd8] ss:$648 sps:$4 sm:$0xff]   ;;  %v16660_v29 = vld [vmem:[%s18434_s4 + $0x5e4] ss:$648 sps:$4 sm:$0xff]  }
 0x31c   : > { %11141 = vmatprep.mubr.bf16.mxu1 %v16604_v31  ;;  %v16663_v30 = vld [vmem:[%s18434_s4 + $0x5ec] ss:$648 sps:$4 sm:$0xff]   ;;  %v16664_v31 = vld [vmem:[%s21177_s0 + $0x5dc] ss:$648 sps:$4 sm:$0xff]  }
 0x320   : > { %11093 = vmatmul.mubr.bf16.gmra.mrb[92].mxu0 %v16597_v32  ;;  %v16657_v32 = vld [vmem:[%s21177_s0 + $0x5d0] ss:$648 sps:$4 sm:$0xff]  }
 0x321   : > { %11142 = vmatmul.mubr.bf16.gmra.mrb[92].mxu1 %v16606_v33  ;;  %11153 = vmatpush1.bf16.xpose.msra.mxu0 %v16598_v34  ;;  %v16666_v33 = vld [vmem:[%s21177_s0 + $0x5d8] ss:$648 sps:$4 sm:$0xff]  }
 0x322   : > { %11202 = vmatpush1.bf16.xpose.msra.mxu1 %v16601_v35  ;;  %11154 = vmatprep.subr.bf16.mxu0 %v16609_v36  ;;  %v16658_v34 = vld [vmem:[%s18434_s4 + $0x5e0] ss:$648 sps:$4 sm:$0xff]   ;;  %v16669_v36 = vld [vmem:[%s18434_s4 + $0xaf4] ss:$648 sps:$4 sm:$0xff]  }
 0x323   : > { %11203 = vmatprep.subr.bf16.mxu1 %v16612_v37  ;;  %11182 = vmatprep.mubr.bf16.mxu0 %v16645_v38  ;;  %v16661_v35 = vld [vmem:[%s18434_s4 + $0x5e8] ss:$648 sps:$4 sm:$0xff]   ;;  %v16672_v37 = vld [vmem:[%s18434_s4 + $0xafc] ss:$648 sps:$4 sm:$0xff]  }
 0x324   : > { %11231 = vmatprep.mubr.bf16.mxu1 %v16648_v39  ;;  %v16705_v38 = vld [vmem:[%s21177_s0 + $0xd4] ss:$648 sps:$4 sm:$0xff]  }
 0x325   : > { %v16708_v39 = vld [vmem:[%s21177_s0 + $0xdc] ss:$648 sps:$4 sm:$0xff]  }
 0x329   : > { %11155 = vmatpush1.bf16.xpose.msra.mxu0 %v16607_v40  ;;  %v16667_v40 = vld [vmem:[%s18434_s4 + $0xaf0] ss:$648 sps:$4 sm:$0xff]  }
 0x32a   : > { %11204 = vmatpush1.bf16.xpose.msra.mxu1 %v16610_v41  ;;  %11156 = vmatprep.subr.bf16.mxu0 %v16615_v42  ;;  %v16670_v41 = vld [vmem:[%s18434_s4 + $0xaf8] ss:$648 sps:$4 sm:$0xff]   ;;  %v16675_v42 = vld [vmem:[%s18434_s4 + $0x1004] ss:$648 sps:$4 sm:$0xff]  }
 0x32b   : > { %11205 = vmatprep.subr.bf16.mxu1 %v16618_v43  ;;  %v10792_v44 = vpop.f32.mrb[64].mxu0  ;;  %v16678_v43 = vld [vmem:[%s18434_s4 + $0x100c] ss:$648 sps:$4 sm:$0xff]  }
 0x32c   : > { %v10841_v45 = vpop.f32.mrb[64].mxu1  ;;  %v10793_v46 = vadd.f32 %v10792_v44, %v19149_v52  ;;  %v10794_v47 = vpop.f32.mrb[65].mxu0 }
 0x32d   : > { %v10843_v48 = vpop.f32.mrb[65].mxu1  ;;  %v10795_v49 = vpop.f32.mrb[66].mxu0 }
 0x32e   : > { %v10844_v50 = vpop.f32.mrb[66].mxu1  ;;  %v19217_v54 = vadd.f32 %v10841_v45, %v10793_v46  ;;  %v10796_v55 = vadd.f32 %v10795_v49, %v19154_v61  ;;  %v10797_v56 = vpop.f32.mrb[67].mxu0 }
 0x32f   : > { %v10846_v58 = vpop.f32.mrb[67].mxu1 }
 0x330   : > { %v19222_v62 = vadd.f32 %v10844_v50, %v10796_v55 }
 0x331   : > { %11157 = vmatpush1.bf16.xpose.msra.mxu0 %v16613_v51  ;;  %v16673_v51 = vld [vmem:[%s18434_s4 + $0x1000] ss:$648 sps:$4 sm:$0xff]  }
 0x332   : > { %11206 = vmatpush1.bf16.xpose.msra.mxu1 %v16616_v53  ;;  %11158 = vmatprep.subr.bf16.mxu0 %v16621_v59  ;;  %v16676_v53 = vld [vmem:[%s18434_s4 + $0x1008] ss:$648 sps:$4 sm:$0xff]  }
 0x333   : > { %11207 = vmatprep.subr.bf16.mxu1 %v16624_v60  ;;  %v10800_v52 = vpop.f32.mrb[68].mxu0  ;;  %v16681_v60 = vld [vmem:[%s18434_s4 + $0x1514] ss:$648 sps:$4 sm:$0xff]  }
 0x334   : > { %v10849_v63 = vpop.f32.mrb[68].mxu1  ;;  %v10801_v0 = vadd.f32 %v10800_v52, %v19160_v14  ;;  %v10802_v57 = vpop.f32.mrb[69].mxu0  ;;  %v16684_v52 = vld [vmem:[%s18434_s4 + $0x151c] ss:$648 sps:$4 sm:$0xff]  }
 0x335   : > { %v10851_v61 = vpop.f32.mrb[69].mxu1  ;;  %v10803_v1 = vpop.f32.mrb[70].mxu0 }
 0x336   : > { %v10852_v3 = vpop.f32.mrb[70].mxu1  ;;  %v10804_v6 = vadd.f32 %v10803_v1, %v19164_v8  ;;  %v19228_v9 = vadd.f32 %v10849_v63, %v10801_v0  ;;  %v10805_v13 = vpop.f32.mrb[71].mxu0  ;;  %v16633_v8 = vld [vmem:[%s18434_s4 + $0x1f24] ss:$648 sps:$4 sm:$0xff]  }
 0x337   : > { %v10854_v14 = vpop.f32.mrb[71].mxu1  ;;  %v16690_v13 = vld [vmem:[%s18434_s4 + $0x1a2c] ss:$648 sps:$4 sm:$0xff]  }
 0x338   : > { %v19232_v10 = vadd.f32 %v10852_v3, %v10804_v6 }
 0x339   : > { %11159 = vmatpush1.bf16.xpose.msra.mxu0 %v16619_v4  ;;  %v16679_v4 = vld [vmem:[%s18434_s4 + $0x1510] ss:$648 sps:$4 sm:$0xff]  }
 0x33a   : > { %11208 = vmatpush1.bf16.xpose.msra.mxu1 %v16622_v5  ;;  %11160 = vmatprep.subr.bf16.mxu0 %v16627_v2  ;;  %v16682_v5 = vld [vmem:[%s18434_s4 + $0x1518] ss:$648 sps:$4 sm:$0xff]  }
 0x33b   : > { %11209 = vmatprep.subr.bf16.mxu1 %v16630_v7  ;;  %v16687_v7 = vld [vmem:[%s18434_s4 + $0x1a24] ss:$648 sps:$4 sm:$0xff]  }
 0x341   : > { %11161 = vmatpush1.bf16.xpose.msra.mxu0 %v16625_v11 }
 0x342   : > { %11210 = vmatpush1.bf16.xpose.msra.mxu1 %v16628_v12  ;;  %11162 = vmatprep.subr.bf16.mxu0 %v16633_v8  ;;  %v16685_v12 = vld [vmem:[%s18434_s4 + $0x1a20] ss:$648 sps:$4 sm:$0xff]  }
 0x343   : > { %11211 = vmatprep.subr.bf16.mxu1 %v16636_v15  ;;  %v16688_v8 = vld [vmem:[%s18434_s4 + $0x1a28] ss:$648 sps:$4 sm:$0xff]   ;;  %v16696_v15 = vld [vmem:[%s18434_s4 + $0x1f3c] ss:$648 sps:$4 sm:$0xff]  }
 0x349   : > { %11163 = vmatpush1.bf16.xpose.msra.mxu0 %v16631_v16  ;;  %v16691_v16 = vld [vmem:[%s18434_s4 + $0x1f30] ss:$648 sps:$4 sm:$0xff]  }
 0x34a   : > { %11212 = vmatpush1.bf16.xpose.msra.mxu1 %v16634_v17  ;;  %11164 = vmatprep.subr.bf16.mxu0 %v16639_v18  ;;  %v16694_v17 = vld [vmem:[%s18434_s4 + $0x1f38] ss:$648 sps:$4 sm:$0xff]   ;;  %v16699_v18 = vld [vmem:[%s18434_s4 + $0x2444] ss:$648 sps:$4 sm:$0xff]  }
 0x34b   : > { %11213 = vmatprep.subr.bf16.mxu1 %v16642_v19  ;;  %v16702_v19 = vld [vmem:[%s18434_s4 + $0x244c] ss:$648 sps:$4 sm:$0xff]  }
 0x351   : > { %11165 = vmatpush1.bf16.xpose.msra.mxu0 %v16637_v20  ;;  %v16697_v20 = vld [vmem:[%s18434_s4 + $0x2440] ss:$648 sps:$4 sm:$0xff]  }
 0x352   : > { %11214 = vmatpush1.bf16.xpose.msra.mxu1 %v16640_v21  ;;  %11248 = vmatprep.subr.bf16.mxu0 %v16651_v22  ;;  %v16700_v21 = vld [vmem:[%s18434_s4 + $0x2448] ss:$648 sps:$4 sm:$0xff]   ;;  %v16711_v22 = vld [vmem:[%s18434_s4 + $0xe4] ss:$648 sps:$4 sm:$0xff]  }
 0x353   : > { %11297 = vmatprep.subr.bf16.mxu1 %v16654_v23  ;;  %v16714_v23 = vld [vmem:[%s18434_s4 + $0xec] ss:$648 sps:$4 sm:$0xff]  }
 0x358   : > { %11183 = vmatmul.mubr.bf16.vlgmr.msra.gmra.mrb[96].mxu0 %v16643_v24  ;;  %v16703_v24 = vld [vmem:[%s21177_s0 + $0xd0] ss:$648 sps:$4 sm:$0xff]  }
 0x359   : > { %11232 = vmatmul.mubr.bf16.vlgmr.msra.gmra.mrb[96].mxu1 %v16646_v25  ;;  %11249 = vmatpush1.bf16.xpose.msra.mxu0 %v16649_v26  ;;  %v16706_v25 = vld [vmem:[%s21177_s0 + $0xd8] ss:$648 sps:$4 sm:$0xff]  }
 0x35a   : > { %11298 = vmatpush1.bf16.xpose.msra.mxu1 %v16652_v27  ;;  %11190 = vmatprep.mubr.bf16.mxu0 %v16655_v28  ;;  %v16709_v26 = vld [vmem:[%s18434_s4 + $0xe0] ss:$648 sps:$4 sm:$0xff]   ;;  %v16715_v28 = vld [vmem:[%s21177_s0 + $0x5e4] ss:$648 sps:$4 sm:$0xff]  }
 0x35b   : > { %11250 = vmatprep.subr.bf16.mxu0 %v16660_v29  ;;  %11299 = vmatprep.subr.bf16.mxu1 %v16663_v30  ;;  %v16712_v27 = vld [vmem:[%s18434_s4 + $0xe8] ss:$648 sps:$4 sm:$0xff]   ;;  %v16720_v29 = vld [vmem:[%s18434_s4 + $0x5f4] ss:$648 sps:$4 sm:$0xff]  }
 0x35c   : > { %11239 = vmatprep.mubr.bf16.mxu1 %v16664_v31  ;;  %v16723_v30 = vld [vmem:[%s18434_s4 + $0x5fc] ss:$648 sps:$4 sm:$0xff]   ;;  %v16724_v31 = vld [vmem:[%s21177_s0 + $0x5ec] ss:$648 sps:$4 sm:$0xff]  }
 0x360   : > { %11191 = vmatmul.mubr.bf16.gmra.mrb[100].mxu0 %v16657_v32  ;;  %v16717_v32 = vld [vmem:[%s21177_s0 + $0x5e0] ss:$648 sps:$4 sm:$0xff]  }
 0x361   : > { %11240 = vmatmul.mubr.bf16.gmra.mrb[100].mxu1 %v16666_v33  ;;  %11251 = vmatpush1.bf16.xpose.msra.mxu0 %v16658_v34  ;;  %v16726_v33 = vld [vmem:[%s21177_s0 + $0x5e8] ss:$648 sps:$4 sm:$0xff]  }
 0x362   : > { %11300 = vmatpush1.bf16.xpose.msra.mxu1 %v16661_v35  ;;  %11252 = vmatprep.subr.bf16.mxu0 %v16669_v36  ;;  %v16718_v34 = vld [vmem:[%s18434_s4 + $0x5f0] ss:$648 sps:$4 sm:$0xff]   ;;  %v16729_v36 = vld [vmem:[%s18434_s4 + $0xb04] ss:$648 sps:$4 sm:$0xff]  }
 0x363   : > { %11301 = vmatprep.subr.bf16.mxu1 %v16672_v37  ;;  %11280 = vmatprep.mubr.bf16.mxu0 %v16705_v38  ;;  %v16721_v35 = vld [vmem:[%s18434_s4 + $0x5f8] ss:$648 sps:$4 sm:$0xff]   ;;  %v16732_v37 = vld [vmem:[%s18434_s4 + $0xb0c] ss:$648 sps:$4 sm:$0xff]  }
 0x364   : > { %11329 = vmatprep.mubr.bf16.mxu1 %v16708_v39  ;;  %v16765_v38 = vld [vmem:[%s21177_s0 + $0xe4] ss:$648 sps:$4 sm:$0xff]  }
 0x365   : > { %v16768_v39 = vld [vmem:[%s21177_s0 + $0xec] ss:$648 sps:$4 sm:$0xff]  }
 0x369   : > { %11253 = vmatpush1.bf16.xpose.msra.mxu0 %v16667_v40  ;;  %v16727_v40 = vld [vmem:[%s18434_s4 + $0xb00] ss:$648 sps:$4 sm:$0xff]  }
 0x36a   : > { %11302 = vmatpush1.bf16.xpose.msra.mxu1 %v16670_v41  ;;  %11254 = vmatprep.subr.bf16.mxu0 %v16675_v42  ;;  %v16730_v41 = vld [vmem:[%s18434_s4 + $0xb08] ss:$648 sps:$4 sm:$0xff]   ;;  %v16735_v42 = vld [vmem:[%s18434_s4 + $0x1014] ss:$648 sps:$4 sm:$0xff]  }
 0x36b   : > { %11303 = vmatprep.subr.bf16.mxu1 %v16678_v43  ;;  %v10890_v44 = vpop.f32.mrb[72].mxu0  ;;  %v16738_v43 = vld [vmem:[%s18434_s4 + $0x101c] ss:$648 sps:$4 sm:$0xff]  }
 0x36c   : > { %v10939_v45 = vpop.f32.mrb[72].mxu1  ;;  %v10891_v46 = vadd.f32 %v10890_v44, %v19217_v54  ;;  %v10892_v47 = vpop.f32.mrb[73].mxu0 }
 0x36d   : > { %v10941_v48 = vpop.f32.mrb[73].mxu1  ;;  %v10893_v49 = vpop.f32.mrb[74].mxu0 }
 0x36e   : > { %v10942_v50 = vpop.f32.mrb[74].mxu1  ;;  %v19285_v55 = vadd.f32 %v10939_v45, %v10891_v46  ;;  %v10894_v56 = vadd.f32 %v10893_v49, %v19222_v62  ;;  %v10895_v58 = vpop.f32.mrb[75].mxu0 }
 0x36f   : > { %v10944_v59 = vpop.f32.mrb[75].mxu1 }
 0x370   : > { %v19290_v63 = vadd.f32 %v10942_v50, %v10894_v56 }
 0x371   : > { %11255 = vmatpush1.bf16.xpose.msra.mxu0 %v16673_v51  ;;  %v16733_v51 = vld [vmem:[%s18434_s4 + $0x1010] ss:$648 sps:$4 sm:$0xff]  }
 0x372   : > { %11304 = vmatpush1.bf16.xpose.msra.mxu1 %v16676_v53  ;;  %11256 = vmatprep.subr.bf16.mxu0 %v16681_v60  ;;  %v16736_v53 = vld [vmem:[%s18434_s4 + $0x1018] ss:$648 sps:$4 sm:$0xff]  }
 0x373   : > { %11305 = vmatprep.subr.bf16.mxu1 %v16684_v52  ;;  %v10898_v54 = vpop.f32.mrb[76].mxu0  ;;  %v16741_v52 = vld [vmem:[%s18434_s4 + $0x1524] ss:$648 sps:$4 sm:$0xff]  }
 0x374   : > { %v10947_v0 = vpop.f32.mrb[76].mxu1  ;;  %v10899_v57 = vadd.f32 %v10898_v54, %v19228_v9  ;;  %v10900_v61 = vpop.f32.mrb[77].mxu0  ;;  %v16744_v54 = vld [vmem:[%s18434_s4 + $0x152c] ss:$648 sps:$4 sm:$0xff]  }
 0x375   : > { %v10949_v62 = vpop.f32.mrb[77].mxu1  ;;  %v10901_v1 = vpop.f32.mrb[78].mxu0 }
 0x376   : > { %v10950_v3 = vpop.f32.mrb[78].mxu1  ;;  %v10902_v6 = vadd.f32 %v10901_v1, %v19232_v10  ;;  %v19296_v2 = vadd.f32 %v10947_v0, %v10899_v57  ;;  %v10903_v14 = vpop.f32.mrb[79].mxu0  ;;  %v16693_v10 = vld [vmem:[%s18434_s4 + $0x1f34] ss:$648 sps:$4 sm:$0xff]  }
 0x377   : > { %v10952_v9 = vpop.f32.mrb[79].mxu1  ;;  %v16750_v14 = vld [vmem:[%s18434_s4 + $0x1a3c] ss:$648 sps:$4 sm:$0xff]  }
 0x378   : > { %v19300_v11 = vadd.f32 %v10950_v3, %v10902_v6 }
 0x379   : > { %11257 = vmatpush1.bf16.xpose.msra.mxu0 %v16679_v4  ;;  %v16739_v4 = vld [vmem:[%s18434_s4 + $0x1520] ss:$648 sps:$4 sm:$0xff]  }
 0x37a   : > { %11306 = vmatpush1.bf16.xpose.msra.mxu1 %v16682_v5  ;;  %11258 = vmatprep.subr.bf16.mxu0 %v16687_v7  ;;  %v16742_v5 = vld [vmem:[%s18434_s4 + $0x1528] ss:$648 sps:$4 sm:$0xff]  }
 0x37b   : > { %11307 = vmatprep.subr.bf16.mxu1 %v16690_v13  ;;  %v16747_v13 = vld [vmem:[%s18434_s4 + $0x1a34] ss:$648 sps:$4 sm:$0xff]  }
 0x381   : > { %11259 = vmatpush1.bf16.xpose.msra.mxu0 %v16685_v12 }
 0x382   : > { %11308 = vmatpush1.bf16.xpose.msra.mxu1 %v16688_v8  ;;  %11260 = vmatprep.subr.bf16.mxu0 %v16693_v10  ;;  %v16745_v8 = vld [vmem:[%s18434_s4 + $0x1a30] ss:$648 sps:$4 sm:$0xff]  }
 0x383   : > { %11309 = vmatprep.subr.bf16.mxu1 %v16696_v15  ;;  %v16748_v10 = vld [vmem:[%s18434_s4 + $0x1a38] ss:$648 sps:$4 sm:$0xff]   ;;  %v16756_v15 = vld [vmem:[%s18434_s4 + $0x1f4c] ss:$648 sps:$4 sm:$0xff]  }
 0x389   : > { %11261 = vmatpush1.bf16.xpose.msra.mxu0 %v16691_v16  ;;  %v16751_v16 = vld [vmem:[%s18434_s4 + $0x1f40] ss:$648 sps:$4 sm:$0xff]  }
 0x38a   : > { %11310 = vmatpush1.bf16.xpose.msra.mxu1 %v16694_v17  ;;  %11262 = vmatprep.subr.bf16.mxu0 %v16699_v18  ;;  %v16754_v17 = vld [vmem:[%s18434_s4 + $0x1f48] ss:$648 sps:$4 sm:$0xff]   ;;  %v16759_v18 = vld [vmem:[%s18434_s4 + $0x2454] ss:$648 sps:$4 sm:$0xff]  }
 0x38b   : > { %11311 = vmatprep.subr.bf16.mxu1 %v16702_v19  ;;  %v16762_v19 = vld [vmem:[%s18434_s4 + $0x245c] ss:$648 sps:$4 sm:$0xff]  }
 0x391   : > { %11263 = vmatpush1.bf16.xpose.msra.mxu0 %v16697_v20  ;;  %v16757_v20 = vld [vmem:[%s18434_s4 + $0x2450] ss:$648 sps:$4 sm:$0xff]  }
 0x392   : > { %11312 = vmatpush1.bf16.xpose.msra.mxu1 %v16700_v21  ;;  %11346 = vmatprep.subr.bf16.mxu0 %v16711_v22  ;;  %v16760_v21 = vld [vmem:[%s18434_s4 + $0x2458] ss:$648 sps:$4 sm:$0xff]   ;;  %v16771_v22 = vld [vmem:[%s18434_s4 + $0xf4] ss:$648 sps:$4 sm:$0xff]  }
 0x393   : > { %11395 = vmatprep.subr.bf16.mxu1 %v16714_v23  ;;  %v16774_v23 = vld [vmem:[%s18434_s4 + $0xfc] ss:$648 sps:$4 sm:$0xff]  }
 0x398   : > { %11281 = vmatmul.mubr.bf16.vlgmr.msra.gmra.mrb[104].mxu0 %v16703_v24  ;;  %v16763_v24 = vld [vmem:[%s21177_s0 + $0xe0] ss:$648 sps:$4 sm:$0xff]  }
 0x399   : > { %11330 = vmatmul.mubr.bf16.vlgmr.msra.gmra.mrb[104].mxu1 %v16706_v25  ;;  %11347 = vmatpush1.bf16.xpose.msra.mxu0 %v16709_v26  ;;  %v16766_v25 = vld [vmem:[%s21177_s0 + $0xe8] ss:$648 sps:$4 sm:$0xff]  }
 0x39a   : > { %11396 = vmatpush1.bf16.xpose.msra.mxu1 %v16712_v27  ;;  %11288 = vmatprep.mubr.bf16.mxu0 %v16715_v28  ;;  %v16769_v26 = vld [vmem:[%s18434_s4 + $0xf0] ss:$648 sps:$4 sm:$0xff]   ;;  %v16775_v28 = vld [vmem:[%s21177_s0 + $0x5f4] ss:$648 sps:$4 sm:$0xff]  }
 0x39b   : > { %11348 = vmatprep.subr.bf16.mxu0 %v16720_v29  ;;  %11397 = vmatprep.subr.bf16.mxu1 %v16723_v30  ;;  %v16772_v27 = vld [vmem:[%s18434_s4 + $0xf8] ss:$648 sps:$4 sm:$0xff]   ;;  %v16780_v29 = vld [vmem:[%s18434_s4 + $0x604] ss:$648 sps:$4 sm:$0xff]  }
 0x39c   : > { %11337 = vmatprep.mubr.bf16.mxu1 %v16724_v31  ;;  %v16783_v30 = vld [vmem:[%s18434_s4 + $0x60c] ss:$648 sps:$4 sm:$0xff]   ;;  %v16784_v31 = vld [vmem:[%s21177_s0 + $0x5fc] ss:$648 sps:$4 sm:$0xff]  }
 0x3a0   : > { %11289 = vmatmul.mubr.bf16.gmra.mrb[108].mxu0 %v16717_v32  ;;  %v16777_v32 = vld [vmem:[%s21177_s0 + $0x5f0] ss:$648 sps:$4 sm:$0xff]  }
 0x3a1   : > { %11338 = vmatmul.mubr.bf16.gmra.mrb[108].mxu1 %v16726_v33  ;;  %11349 = vmatpush1.bf16.xpose.msra.mxu0 %v16718_v34  ;;  %v16786_v33 = vld [vmem:[%s21177_s0 + $0x5f8] ss:$648 sps:$4 sm:$0xff]  }
 0x3a2   : > { %11398 = vmatpush1.bf16.xpose.msra.mxu1 %v16721_v35  ;;  %11350 = vmatprep.subr.bf16.mxu0 %v16729_v36  ;;  %v16778_v34 = vld [vmem:[%s18434_s4 + $0x600] ss:$648 sps:$4 sm:$0xff]   ;;  %v16789_v36 = vld [vmem:[%s18434_s4 + $0xb14] ss:$648 sps:$4 sm:$0xff]  }
 0x3a3   : > { %11399 = vmatprep.subr.bf16.mxu1 %v16732_v37  ;;  %11378 = vmatprep.mubr.bf16.mxu0 %v16765_v38  ;;  %v16781_v35 = vld [vmem:[%s18434_s4 + $0x608] ss:$648 sps:$4 sm:$0xff]   ;;  %v16792_v37 = vld [vmem:[%s18434_s4 + $0xb1c] ss:$648 sps:$4 sm:$0xff]  }
 0x3a4   : > { %11427 = vmatprep.mubr.bf16.mxu1 %v16768_v39  ;;  %v16825_v38 = vld [vmem:[%s21177_s0 + $0xf4] ss:$648 sps:$4 sm:$0xff]  }
 0x3a5   : > { %v16828_v39 = vld [vmem:[%s21177_s0 + $0xfc] ss:$648 sps:$4 sm:$0xff]  }
 0x3a9   : > { %11351 = vmatpush1.bf16.xpose.msra.mxu0 %v16727_v40  ;;  %v16787_v40 = vld [vmem:[%s18434_s4 + $0xb10] ss:$648 sps:$4 sm:$0xff]  }
 0x3aa   : > { %11400 = vmatpush1.bf16.xpose.msra.mxu1 %v16730_v41  ;;  %11352 = vmatprep.subr.bf16.mxu0 %v16735_v42  ;;  %v16790_v41 = vld [vmem:[%s18434_s4 + $0xb18] ss:$648 sps:$4 sm:$0xff]   ;;  %v16795_v42 = vld [vmem:[%s18434_s4 + $0x1024] ss:$648 sps:$4 sm:$0xff]  }
 0x3ab   : > { %11401 = vmatprep.subr.bf16.mxu1 %v16738_v43  ;;  %v10988_v44 = vpop.f32.mrb[80].mxu0  ;;  %v16798_v43 = vld [vmem:[%s18434_s4 + $0x102c] ss:$648 sps:$4 sm:$0xff]  }
 0x3ac   : > { %v11037_v45 = vpop.f32.mrb[80].mxu1  ;;  %v10989_v46 = vadd.f32 %v10988_v44, %v19285_v55  ;;  %v10990_v47 = vpop.f32.mrb[81].mxu0 }
 0x3ad   : > { %v11039_v48 = vpop.f32.mrb[81].mxu1  ;;  %v10991_v49 = vpop.f32.mrb[82].mxu0 }
 0x3ae   : > { %v11040_v50 = vpop.f32.mrb[82].mxu1  ;;  %v19353_v56 = vadd.f32 %v11037_v45, %v10989_v46  ;;  %v10992_v58 = vadd.f32 %v10991_v49, %v19290_v63  ;;  %v10993_v59 = vpop.f32.mrb[83].mxu0 }
 0x3af   : > { %v11042_v60 = vpop.f32.mrb[83].mxu1 }
 0x3b0   : > { %v19358_v0 = vadd.f32 %v11040_v50, %v10992_v58 }
 0x3b1   : > { %11353 = vmatpush1.bf16.xpose.msra.mxu0 %v16733_v51  ;;  %v16793_v51 = vld [vmem:[%s18434_s4 + $0x1020] ss:$648 sps:$4 sm:$0xff]  }
 0x3b2   : > { %11402 = vmatpush1.bf16.xpose.msra.mxu1 %v16736_v53  ;;  %11354 = vmatprep.subr.bf16.mxu0 %v16741_v52  ;;  %v16796_v53 = vld [vmem:[%s18434_s4 + $0x1028] ss:$648 sps:$4 sm:$0xff]  }
 0x3b3   : > { %11403 = vmatprep.subr.bf16.mxu1 %v16744_v54  ;;  %v10996_v55 = vpop.f32.mrb[84].mxu0  ;;  %v16801_v54 = vld [vmem:[%s18434_s4 + $0x1534] ss:$648 sps:$4 sm:$0xff]  }
 0x3b4   : > { %v11045_v57 = vpop.f32.mrb[84].mxu1  ;;  %v10997_v61 = vadd.f32 %v10996_v55, %v19296_v2  ;;  %v10998_v62 = vpop.f32.mrb[85].mxu0  ;;  %v16804_v55 = vld [vmem:[%s18434_s4 + $0x153c] ss:$648 sps:$4 sm:$0xff]  }
 0x3b5   : > { %v11047_v63 = vpop.f32.mrb[85].mxu1  ;;  %v10999_v1 = vpop.f32.mrb[86].mxu0 }
 0x3b6   : > { %v11048_v3 = vpop.f32.mrb[86].mxu1  ;;  %v11000_v6 = vadd.f32 %v10999_v1, %v19300_v11  ;;  %v19364_v7 = vadd.f32 %v11045_v57, %v10997_v61  ;;  %v11001_v9 = vpop.f32.mrb[87].mxu0  ;;  %v16753_v11 = vld [vmem:[%s18434_s4 + $0x1f44] ss:$648 sps:$4 sm:$0xff]  }
 0x3b7   : > { %v11050_v2 = vpop.f32.mrb[87].mxu1  ;;  %v16810_v9 = vld [vmem:[%s18434_s4 + $0x1a4c] ss:$648 sps:$4 sm:$0xff]  }
 0x3b8   : > { %v19368_v12 = vadd.f32 %v11048_v3, %v11000_v6 }
 0x3b9   : > { %11355 = vmatpush1.bf16.xpose.msra.mxu0 %v16739_v4  ;;  %v16799_v4 = vld [vmem:[%s18434_s4 + $0x1530] ss:$648 sps:$4 sm:$0xff]  }
 0x3ba   : > { %11404 = vmatpush1.bf16.xpose.msra.mxu1 %v16742_v5  ;;  %11356 = vmatprep.subr.bf16.mxu0 %v16747_v13  ;;  %v16802_v5 = vld [vmem:[%s18434_s4 + $0x1538] ss:$648 sps:$4 sm:$0xff]  }
 0x3bb   : > { %11405 = vmatprep.subr.bf16.mxu1 %v16750_v14  ;;  %v16807_v14 = vld [vmem:[%s18434_s4 + $0x1a44] ss:$648 sps:$4 sm:$0xff]  }
 0x3c1   : > { %11357 = vmatpush1.bf16.xpose.msra.mxu0 %v16745_v8 }
 0x3c2   : > { %11406 = vmatpush1.bf16.xpose.msra.mxu1 %v16748_v10  ;;  %11358 = vmatprep.subr.bf16.mxu0 %v16753_v11  ;;  %v16805_v10 = vld [vmem:[%s18434_s4 + $0x1a40] ss:$648 sps:$4 sm:$0xff]  }
 0x3c3   : > { %11407 = vmatprep.subr.bf16.mxu1 %v16756_v15  ;;  %v16808_v11 = vld [vmem:[%s18434_s4 + $0x1a48] ss:$648 sps:$4 sm:$0xff]   ;;  %v16816_v15 = vld [vmem:[%s18434_s4 + $0x1f5c] ss:$648 sps:$4 sm:$0xff]  }
 0x3c9   : > { %11359 = vmatpush1.bf16.xpose.msra.mxu0 %v16751_v16  ;;  %v16811_v16 = vld [vmem:[%s18434_s4 + $0x1f50] ss:$648 sps:$4 sm:$0xff]  }
 0x3ca   : > { %11408 = vmatpush1.bf16.xpose.msra.mxu1 %v16754_v17  ;;  %11360 = vmatprep.subr.bf16.mxu0 %v16759_v18  ;;  %v16814_v17 = vld [vmem:[%s18434_s4 + $0x1f58] ss:$648 sps:$4 sm:$0xff]   ;;  %v16819_v18 = vld [vmem:[%s18434_s4 + $0x2464] ss:$648 sps:$4 sm:$0xff]  }
 0x3cb   : > { %11409 = vmatprep.subr.bf16.mxu1 %v16762_v19  ;;  %v16822_v19 = vld [vmem:[%s18434_s4 + $0x246c] ss:$648 sps:$4 sm:$0xff]  }
 0x3d1   : > { %11361 = vmatpush1.bf16.xpose.msra.mxu0 %v16757_v20  ;;  %v16817_v20 = vld [vmem:[%s18434_s4 + $0x2460] ss:$648 sps:$4 sm:$0xff]  }
 0x3d2   : > { %11410 = vmatpush1.bf16.xpose.msra.mxu1 %v16760_v21  ;;  %11444 = vmatprep.subr.bf16.mxu0 %v16771_v22  ;;  %v16820_v21 = vld [vmem:[%s18434_s4 + $0x2468] ss:$648 sps:$4 sm:$0xff]   ;;  %v16831_v22 = vld [vmem:[%s18434_s4 + $0x104] ss:$648 sps:$4 sm:$0xff]  }
 0x3d3   : > { %11493 = vmatprep.subr.bf16.mxu1 %v16774_v23  ;;  %v16834_v23 = vld [vmem:[%s18434_s4 + $0x10c] ss:$648 sps:$4 sm:$0xff]  }
 0x3d8   : > { %11379 = vmatmul.mubr.bf16.vlgmr.msra.gmra.mrb[112].mxu0 %v16763_v24  ;;  %v16823_v24 = vld [vmem:[%s21177_s0 + $0xf0] ss:$648 sps:$4 sm:$0xff]  }
 0x3d9   : > { %11428 = vmatmul.mubr.bf16.vlgmr.msra.gmra.mrb[112].mxu1 %v16766_v25  ;;  %11445 = vmatpush1.bf16.xpose.msra.mxu0 %v16769_v26  ;;  %v16826_v25 = vld [vmem:[%s21177_s0 + $0xf8] ss:$648 sps:$4 sm:$0xff]  }
 0x3da   : > { %11494 = vmatpush1.bf16.xpose.msra.mxu1 %v16772_v27  ;;  %11386 = vmatprep.mubr.bf16.mxu0 %v16775_v28  ;;  %v16829_v26 = vld [vmem:[%s18434_s4 + $0x100] ss:$648 sps:$4 sm:$0xff]   ;;  %v16835_v28 = vld [vmem:[%s21177_s0 + $0x604] ss:$648 sps:$4 sm:$0xff]  }
 0x3db   : > { %11446 = vmatprep.subr.bf16.mxu0 %v16780_v29  ;;  %11495 = vmatprep.subr.bf16.mxu1 %v16783_v30  ;;  %v16832_v27 = vld [vmem:[%s18434_s4 + $0x108] ss:$648 sps:$4 sm:$0xff]   ;;  %v16840_v29 = vld [vmem:[%s18434_s4 + $0x614] ss:$648 sps:$4 sm:$0xff]  }
 0x3dc   : > { %11435 = vmatprep.mubr.bf16.mxu1 %v16784_v31  ;;  %v16843_v30 = vld [vmem:[%s18434_s4 + $0x61c] ss:$648 sps:$4 sm:$0xff]   ;;  %v16844_v31 = vld [vmem:[%s21177_s0 + $0x60c] ss:$648 sps:$4 sm:$0xff]  }
 0x3e0   : > { %11387 = vmatmul.mubr.bf16.gmra.mrb[116].mxu0 %v16777_v32  ;;  %v16837_v32 = vld [vmem:[%s21177_s0 + $0x600] ss:$648 sps:$4 sm:$0xff]  }
 0x3e1   : > { %11436 = vmatmul.mubr.bf16.gmra.mrb[116].mxu1 %v16786_v33  ;;  %11447 = vmatpush1.bf16.xpose.msra.mxu0 %v16778_v34  ;;  %v16846_v33 = vld [vmem:[%s21177_s0 + $0x608] ss:$648 sps:$4 sm:$0xff]  }
 0x3e2   : > { %11496 = vmatpush1.bf16.xpose.msra.mxu1 %v16781_v35  ;;  %11448 = vmatprep.subr.bf16.mxu0 %v16789_v36  ;;  %v16838_v34 = vld [vmem:[%s18434_s4 + $0x610] ss:$648 sps:$4 sm:$0xff]   ;;  %v16849_v36 = vld [vmem:[%s18434_s4 + $0xb24] ss:$648 sps:$4 sm:$0xff]  }
 0x3e3   : > { %11497 = vmatprep.subr.bf16.mxu1 %v16792_v37  ;;  %11476 = vmatprep.mubr.bf16.mxu0 %v16825_v38  ;;  %v16841_v35 = vld [vmem:[%s18434_s4 + $0x618] ss:$648 sps:$4 sm:$0xff]   ;;  %v16852_v37 = vld [vmem:[%s18434_s4 + $0xb2c] ss:$648 sps:$4 sm:$0xff]  }
 0x3e4   : > { %11525 = vmatprep.mubr.bf16.mxu1 %v16828_v39  ;;  %v16885_v38 = vld [vmem:[%s21177_s0 + $0x104] ss:$648 sps:$4 sm:$0xff]  }
 0x3e5   : > { %v16888_v39 = vld [vmem:[%s21177_s0 + $0x10c] ss:$648 sps:$4 sm:$0xff]  }
 0x3e9   : > { %11449 = vmatpush1.bf16.xpose.msra.mxu0 %v16787_v40  ;;  %v16847_v40 = vld [vmem:[%s18434_s4 + $0xb20] ss:$648 sps:$4 sm:$0xff]  }
 0x3ea   : > { %11498 = vmatpush1.bf16.xpose.msra.mxu1 %v16790_v41  ;;  %11450 = vmatprep.subr.bf16.mxu0 %v16795_v42  ;;  %v16850_v41 = vld [vmem:[%s18434_s4 + $0xb28] ss:$648 sps:$4 sm:$0xff]   ;;  %v16855_v42 = vld [vmem:[%s18434_s4 + $0x1034] ss:$648 sps:$4 sm:$0xff]  }
 0x3eb   : > { %11499 = vmatprep.subr.bf16.mxu1 %v16798_v43  ;;  %v11086_v44 = vpop.f32.mrb[88].mxu0  ;;  %v16858_v43 = vld [vmem:[%s18434_s4 + $0x103c] ss:$648 sps:$4 sm:$0xff]  }
 0x3ec   : > { %v11135_v45 = vpop.f32.mrb[88].mxu1  ;;  %v11087_v46 = vadd.f32 %v11086_v44, %v19353_v56  ;;  %v11088_v47 = vpop.f32.mrb[89].mxu0 }
 0x3ed   : > { %v11137_v48 = vpop.f32.mrb[89].mxu1  ;;  %v11089_v49 = vpop.f32.mrb[90].mxu0 }
 0x3ee   : > { %v11138_v50 = vpop.f32.mrb[90].mxu1  ;;  %v19421_v58 = vadd.f32 %v11135_v45, %v11087_v46  ;;  %v11090_v59 = vadd.f32 %v11089_v49, %v19358_v0  ;;  %v11091_v60 = vpop.f32.mrb[91].mxu0 }
 0x3ef   : > { %v11140_v52 = vpop.f32.mrb[91].mxu1 }
 0x3f0   : > { %v19426_v57 = vadd.f32 %v11138_v50, %v11090_v59 }
 0x3f1   : > { %11451 = vmatpush1.bf16.xpose.msra.mxu0 %v16793_v51  ;;  %v16853_v51 = vld [vmem:[%s18434_s4 + $0x1030] ss:$648 sps:$4 sm:$0xff]  }
 0x3f2   : > { %11500 = vmatpush1.bf16.xpose.msra.mxu1 %v16796_v53  ;;  %11452 = vmatprep.subr.bf16.mxu0 %v16801_v54  ;;  %v16856_v53 = vld [vmem:[%s18434_s4 + $0x1038] ss:$648 sps:$4 sm:$0xff]  }
 0x3f3   : > { %11501 = vmatprep.subr.bf16.mxu1 %v16804_v55  ;;  %v11094_v56 = vpop.f32.mrb[92].mxu0  ;;  %v16861_v55 = vld [vmem:[%s18434_s4 + $0x1544] ss:$648 sps:$4 sm:$0xff]  }
 0x3f4   : > { %v11143_v61 = vpop.f32.mrb[92].mxu1  ;;  %v11095_v62 = vadd.f32 %v11094_v56, %v19364_v7  ;;  %v11096_v63 = vpop.f32.mrb[93].mxu0  ;;  %v16864_v56 = vld [vmem:[%s18434_s4 + $0x154c] ss:$648 sps:$4 sm:$0xff]  }
 0x3f5   : > { %v11145_v0 = vpop.f32.mrb[93].mxu1  ;;  %v11097_v1 = vpop.f32.mrb[94].mxu0 }
 0x3f6   : > { %v11146_v3 = vpop.f32.mrb[94].mxu1  ;;  %v11098_v6 = vadd.f32 %v11097_v1, %v19368_v12  ;;  %v19432_v13 = vadd.f32 %v11143_v61, %v11095_v62  ;;  %v11099_v2 = vpop.f32.mrb[95].mxu0  ;;  %v16813_v12 = vld [vmem:[%s18434_s4 + $0x1f54] ss:$648 sps:$4 sm:$0xff]  }
 0x3f7   : > { %v11148_v7 = vpop.f32.mrb[95].mxu1  ;;  %v16870_v2 = vld [vmem:[%s18434_s4 + $0x1a5c] ss:$648 sps:$4 sm:$0xff]  }
 0x3f8   : > { %v19436_v8 = vadd.f32 %v11146_v3, %v11098_v6 }
 0x3f9   : > { %11453 = vmatpush1.bf16.xpose.msra.mxu0 %v16799_v4  ;;  %v16859_v4 = vld [vmem:[%s18434_s4 + $0x1540] ss:$648 sps:$4 sm:$0xff]  }
 0x3fa   : > { %11502 = vmatpush1.bf16.xpose.msra.mxu1 %v16802_v5  ;;  %11454 = vmatprep.subr.bf16.mxu0 %v16807_v14  ;;  %v16862_v5 = vld [vmem:[%s18434_s4 + $0x1548] ss:$648 sps:$4 sm:$0xff]  }
 0x3fb   : > { %11503 = vmatprep.subr.bf16.mxu1 %v16810_v9  ;;  %v16867_v9 = vld [vmem:[%s18434_s4 + $0x1a54] ss:$648 sps:$4 sm:$0xff]  }
 0x401   : > { %11455 = vmatpush1.bf16.xpose.msra.mxu0 %v16805_v10 }
 0x402   : > { %11504 = vmatpush1.bf16.xpose.msra.mxu1 %v16808_v11  ;;  %11456 = vmatprep.subr.bf16.mxu0 %v16813_v12  ;;  %v16865_v11 = vld [vmem:[%s18434_s4 + $0x1a50] ss:$648 sps:$4 sm:$0xff]  }
 0x403   : > { %11505 = vmatprep.subr.bf16.mxu1 %v16816_v15  ;;  %v16868_v12 = vld [vmem:[%s18434_s4 + $0x1a58] ss:$648 sps:$4 sm:$0xff]   ;;  %v16876_v15 = vld [vmem:[%s18434_s4 + $0x1f6c] ss:$648 sps:$4 sm:$0xff]  }
 0x409   : > { %11457 = vmatpush1.bf16.xpose.msra.mxu0 %v16811_v16  ;;  %v16871_v16 = vld [vmem:[%s18434_s4 + $0x1f60] ss:$648 sps:$4 sm:$0xff]  }
 0x40a   : > { %11506 = vmatpush1.bf16.xpose.msra.mxu1 %v16814_v17  ;;  %11458 = vmatprep.subr.bf16.mxu0 %v16819_v18  ;;  %v16874_v17 = vld [vmem:[%s18434_s4 + $0x1f68] ss:$648 sps:$4 sm:$0xff]   ;;  %v16879_v18 = vld [vmem:[%s18434_s4 + $0x2474] ss:$648 sps:$4 sm:$0xff]  }
 0x40b   : > { %11507 = vmatprep.subr.bf16.mxu1 %v16822_v19  ;;  %v16882_v19 = vld [vmem:[%s18434_s4 + $0x247c] ss:$648 sps:$4 sm:$0xff]  }
 0x411   : > { %11459 = vmatpush1.bf16.xpose.msra.mxu0 %v16817_v20  ;;  %v16877_v20 = vld [vmem:[%s18434_s4 + $0x2470] ss:$648 sps:$4 sm:$0xff]  }
 0x412   : > { %11508 = vmatpush1.bf16.xpose.msra.mxu1 %v16820_v21  ;;  %11542 = vmatprep.subr.bf16.mxu0 %v16831_v22  ;;  %v16880_v21 = vld [vmem:[%s18434_s4 + $0x2478] ss:$648 sps:$4 sm:$0xff]   ;;  %v16891_v22 = vld [vmem:[%s18434_s4 + $0x114] ss:$648 sps:$4 sm:$0xff]  }
 0x413   : > { %11591 = vmatprep.subr.bf16.mxu1 %v16834_v23  ;;  %v16894_v23 = vld [vmem:[%s18434_s4 + $0x11c] ss:$648 sps:$4 sm:$0xff]  }
 0x418   : > { %11477 = vmatmul.mubr.bf16.vlgmr.msra.gmra.mrb[120].mxu0 %v16823_v24  ;;  %v16883_v24 = vld [vmem:[%s21177_s0 + $0x100] ss:$648 sps:$4 sm:$0xff]  }
 0x419   : > { %11526 = vmatmul.mubr.bf16.vlgmr.msra.gmra.mrb[120].mxu1 %v16826_v25  ;;  %11543 = vmatpush1.bf16.xpose.msra.mxu0 %v16829_v26  ;;  %v16886_v25 = vld [vmem:[%s21177_s0 + $0x108] ss:$648 sps:$4 sm:$0xff]  }
 0x41a   : > { %11592 = vmatpush1.bf16.xpose.msra.mxu1 %v16832_v27  ;;  %11484 = vmatprep.mubr.bf16.mxu0 %v16835_v28  ;;  %v16889_v26 = vld [vmem:[%s18434_s4 + $0x110] ss:$648 sps:$4 sm:$0xff]   ;;  %v16895_v28 = vld [vmem:[%s21177_s0 + $0x614] ss:$648 sps:$4 sm:$0xff]  }
 0x41b   : > { %11544 = vmatprep.subr.bf16.mxu0 %v16840_v29  ;;  %11593 = vmatprep.subr.bf16.mxu1 %v16843_v30  ;;  %v16892_v27 = vld [vmem:[%s18434_s4 + $0x118] ss:$648 sps:$4 sm:$0xff]   ;;  %v16900_v29 = vld [vmem:[%s18434_s4 + $0x624] ss:$648 sps:$4 sm:$0xff]  }
 0x41c   : > { %11533 = vmatprep.mubr.bf16.mxu1 %v16844_v31  ;;  %v16903_v30 = vld [vmem:[%s18434_s4 + $0x62c] ss:$648 sps:$4 sm:$0xff]   ;;  %v16904_v31 = vld [vmem:[%s21177_s0 + $0x61c] ss:$648 sps:$4 sm:$0xff]  }
 0x420   : > { %11485 = vmatmul.mubr.bf16.gmra.mrb[124].mxu0 %v16837_v32  ;;  %v16897_v32 = vld [vmem:[%s21177_s0 + $0x610] ss:$648 sps:$4 sm:$0xff]  }
 0x421   : > { %11534 = vmatmul.mubr.bf16.gmra.mrb[124].mxu1 %v16846_v33  ;;  %11545 = vmatpush1.bf16.xpose.msra.mxu0 %v16838_v34  ;;  %v16906_v33 = vld [vmem:[%s21177_s0 + $0x618] ss:$648 sps:$4 sm:$0xff]  }
 0x422   : > { %11594 = vmatpush1.bf16.xpose.msra.mxu1 %v16841_v35  ;;  %11546 = vmatprep.subr.bf16.mxu0 %v16849_v36  ;;  %v16898_v34 = vld [vmem:[%s18434_s4 + $0x620] ss:$648 sps:$4 sm:$0xff]   ;;  %v16909_v36 = vld [vmem:[%s18434_s4 + $0xb34] ss:$648 sps:$4 sm:$0xff]  }
 0x423   : > { %11595 = vmatprep.subr.bf16.mxu1 %v16852_v37  ;;  %11574 = vmatprep.mubr.bf16.mxu0 %v16885_v38  ;;  %v16901_v35 = vld [vmem:[%s18434_s4 + $0x628] ss:$648 sps:$4 sm:$0xff]   ;;  %v16912_v37 = vld [vmem:[%s18434_s4 + $0xb3c] ss:$648 sps:$4 sm:$0xff]  }
 0x424   : > { %11623 = vmatprep.mubr.bf16.mxu1 %v16888_v39  ;;  %v16945_v38 = vld [vmem:[%s21177_s0 + $0x114] ss:$648 sps:$4 sm:$0xff]  }
 0x425   : > { %v16948_v39 = vld [vmem:[%s21177_s0 + $0x11c] ss:$648 sps:$4 sm:$0xff]  }
 0x429   : > { %11547 = vmatpush1.bf16.xpose.msra.mxu0 %v16847_v40  ;;  %v16907_v40 = vld [vmem:[%s18434_s4 + $0xb30] ss:$648 sps:$4 sm:$0xff]  }
 0x42a   : > { %11596 = vmatpush1.bf16.xpose.msra.mxu1 %v16850_v41  ;;  %11548 = vmatprep.subr.bf16.mxu0 %v16855_v42  ;;  %v16910_v41 = vld [vmem:[%s18434_s4 + $0xb38] ss:$648 sps:$4 sm:$0xff]   ;;  %v16915_v42 = vld [vmem:[%s18434_s4 + $0x1044] ss:$648 sps:$4 sm:$0xff]  }
 0x42b   : > { %11597 = vmatprep.subr.bf16.mxu1 %v16858_v43  ;;  %v11184_v44 = vpop.f32.mrb[96].mxu0  ;;  %v16918_v43 = vld [vmem:[%s18434_s4 + $0x104c] ss:$648 sps:$4 sm:$0xff]  }
 0x42c   : > { %v11233_v45 = vpop.f32.mrb[96].mxu1  ;;  %v11185_v46 = vadd.f32 %v11184_v44, %v19421_v58  ;;  %v11186_v47 = vpop.f32.mrb[97].mxu0 }
 0x42d   : > { %v11235_v48 = vpop.f32.mrb[97].mxu1  ;;  %v11187_v49 = vpop.f32.mrb[98].mxu0 }
 0x42e   : > { %v11236_v50 = vpop.f32.mrb[98].mxu1  ;;  %v19489_v59 = vadd.f32 %v11233_v45, %v11185_v46  ;;  %v11188_v60 = vadd.f32 %v11187_v49, %v19426_v57  ;;  %v11189_v52 = vpop.f32.mrb[99].mxu0 }
 0x42f   : > { %v11238_v54 = vpop.f32.mrb[99].mxu1 }
 0x430   : > { %v19494_v61 = vadd.f32 %v11236_v50, %v11188_v60 }
 0x431   : > { %11549 = vmatpush1.bf16.xpose.msra.mxu0 %v16853_v51  ;;  %v16913_v51 = vld [vmem:[%s18434_s4 + $0x1040] ss:$648 sps:$4 sm:$0xff]  }
 0x432   : > { %11598 = vmatpush1.bf16.xpose.msra.mxu1 %v16856_v53  ;;  %11550 = vmatprep.subr.bf16.mxu0 %v16861_v55  ;;  %v16916_v53 = vld [vmem:[%s18434_s4 + $0x1048] ss:$648 sps:$4 sm:$0xff]  }
 0x433   : > { %11599 = vmatprep.subr.bf16.mxu1 %v16864_v56  ;;  %v11192_v58 = vpop.f32.mrb[100].mxu0  ;;  %v16921_v56 = vld [vmem:[%s18434_s4 + $0x1554] ss:$648 sps:$4 sm:$0xff]  }
 0x434   : > { %v11241_v62 = vpop.f32.mrb[100].mxu1  ;;  %v11193_v63 = vadd.f32 %v11192_v58, %v19432_v13  ;;  %v11194_v0 = vpop.f32.mrb[101].mxu0  ;;  %v16924_v58 = vld [vmem:[%s18434_s4 + $0x155c] ss:$648 sps:$4 sm:$0xff]  }
 0x435   : > { %v11243_v57 = vpop.f32.mrb[101].mxu1  ;;  %v11195_v1 = vpop.f32.mrb[102].mxu0 }
 0x436   : > { %v11244_v3 = vpop.f32.mrb[102].mxu1  ;;  %v11196_v6 = vadd.f32 %v11195_v1, %v19436_v8  ;;  %v19500_v14 = vadd.f32 %v11241_v62, %v11193_v63  ;;  %v11197_v7 = vpop.f32.mrb[103].mxu0  ;;  %v16873_v8 = vld [vmem:[%s18434_s4 + $0x1f64] ss:$648 sps:$4 sm:$0xff]  }
 0x437   : > { %v11246_v13 = vpop.f32.mrb[103].mxu1  ;;  %v16930_v7 = vld [vmem:[%s18434_s4 + $0x1a6c] ss:$648 sps:$4 sm:$0xff]  }
 0x438   : > { %v19504_v10 = vadd.f32 %v11244_v3, %v11196_v6 }
 0x439   : > { %11551 = vmatpush1.bf16.xpose.msra.mxu0 %v16859_v4  ;;  %v16919_v4 = vld [vmem:[%s18434_s4 + $0x1550] ss:$648 sps:$4 sm:$0xff]  }
 0x43a   : > { %11600 = vmatpush1.bf16.xpose.msra.mxu1 %v16862_v5  ;;  %11552 = vmatprep.subr.bf16.mxu0 %v16867_v9  ;;  %v16922_v5 = vld [vmem:[%s18434_s4 + $0x1558] ss:$648 sps:$4 sm:$0xff]  }
 0x43b   : > { %11601 = vmatprep.subr.bf16.mxu1 %v16870_v2  ;;  %v16927_v2 = vld [vmem:[%s18434_s4 + $0x1a64] ss:$648 sps:$4 sm:$0xff]  }
 0x441   : > { %11553 = vmatpush1.bf16.xpose.msra.mxu0 %v16865_v11 }
 0x442   : > { %11602 = vmatpush1.bf16.xpose.msra.mxu1 %v16868_v12  ;;  %11554 = vmatprep.subr.bf16.mxu0 %v16873_v8  ;;  %v16925_v12 = vld [vmem:[%s18434_s4 + $0x1a60] ss:$648 sps:$4 sm:$0xff]  }
 0x443   : > { %11603 = vmatprep.subr.bf16.mxu1 %v16876_v15  ;;  %v16928_v8 = vld [vmem:[%s18434_s4 + $0x1a68] ss:$648 sps:$4 sm:$0xff]   ;;  %v16936_v15 = vld [vmem:[%s18434_s4 + $0x1f7c] ss:$648 sps:$4 sm:$0xff]  }
 0x449   : > { %11555 = vmatpush1.bf16.xpose.msra.mxu0 %v16871_v16  ;;  %v16931_v16 = vld [vmem:[%s18434_s4 + $0x1f70] ss:$648 sps:$4 sm:$0xff]  }
 0x44a   : > { %11604 = vmatpush1.bf16.xpose.msra.mxu1 %v16874_v17  ;;  %11556 = vmatprep.subr.bf16.mxu0 %v16879_v18  ;;  %v16934_v17 = vld [vmem:[%s18434_s4 + $0x1f78] ss:$648 sps:$4 sm:$0xff]   ;;  %v16939_v18 = vld [vmem:[%s18434_s4 + $0x2484] ss:$648 sps:$4 sm:$0xff]  }
 0x44b   : > { %11605 = vmatprep.subr.bf16.mxu1 %v16882_v19  ;;  %v16942_v19 = vld [vmem:[%s18434_s4 + $0x248c] ss:$648 sps:$4 sm:$0xff]  }
 0x451   : > { %11557 = vmatpush1.bf16.xpose.msra.mxu0 %v16877_v20  ;;  %v16937_v20 = vld [vmem:[%s18434_s4 + $0x2480] ss:$648 sps:$4 sm:$0xff]  }
 0x452   : > { %11606 = vmatpush1.bf16.xpose.msra.mxu1 %v16880_v21  ;;  %11640 = vmatprep.subr.bf16.mxu0 %v16891_v22  ;;  %v16940_v21 = vld [vmem:[%s18434_s4 + $0x2488] ss:$648 sps:$4 sm:$0xff]   ;;  %v16951_v22 = vld [vmem:[%s18434_s4 + $0x124] ss:$648 sps:$4 sm:$0xff]  }
 0x453   : > { %11689 = vmatprep.subr.bf16.mxu1 %v16894_v23  ;;  %v16954_v23 = vld [vmem:[%s18434_s4 + $0x12c] ss:$648 sps:$4 sm:$0xff]  }
 0x458   : > { %11575 = vmatmul.mubr.bf16.vlgmr.msra.gmra.mrb[128].mxu0 %v16883_v24  ;;  %v16943_v24 = vld [vmem:[%s21177_s0 + $0x110] ss:$648 sps:$4 sm:$0xff]  }
 0x459   : > { %11624 = vmatmul.mubr.bf16.vlgmr.msra.gmra.mrb[128].mxu1 %v16886_v25  ;;  %11641 = vmatpush1.bf16.xpose.msra.mxu0 %v16889_v26  ;;  %v16946_v25 = vld [vmem:[%s21177_s0 + $0x118] ss:$648 sps:$4 sm:$0xff]  }
 0x45a   : > { %11690 = vmatpush1.bf16.xpose.msra.mxu1 %v16892_v27  ;;  %11582 = vmatprep.mubr.bf16.mxu0 %v16895_v28  ;;  %v16949_v26 = vld [vmem:[%s18434_s4 + $0x120] ss:$648 sps:$4 sm:$0xff]   ;;  %v16955_v28 = vld [vmem:[%s21177_s0 + $0x624] ss:$648 sps:$4 sm:$0xff]  }
 0x45b   : > { %11642 = vmatprep.subr.bf16.mxu0 %v16900_v29  ;;  %11691 = vmatprep.subr.bf16.mxu1 %v16903_v30  ;;  %v16952_v27 = vld [vmem:[%s18434_s4 + $0x128] ss:$648 sps:$4 sm:$0xff]   ;;  %v16960_v29 = vld [vmem:[%s18434_s4 + $0x634] ss:$648 sps:$4 sm:$0xff]  }
 0x45c   : > { %11631 = vmatprep.mubr.bf16.mxu1 %v16904_v31  ;;  %v16963_v30 = vld [vmem:[%s18434_s4 + $0x63c] ss:$648 sps:$4 sm:$0xff]   ;;  %v16964_v31 = vld [vmem:[%s21177_s0 + $0x62c] ss:$648 sps:$4 sm:$0xff]  }
 0x460   : > { %11583 = vmatmul.mubr.bf16.gmra.mrb[132].mxu0 %v16897_v32  ;;  %v16957_v32 = vld [vmem:[%s21177_s0 + $0x620] ss:$648 sps:$4 sm:$0xff]  }
 0x461   : > { %11632 = vmatmul.mubr.bf16.gmra.mrb[132].mxu1 %v16906_v33  ;;  %11643 = vmatpush1.bf16.xpose.msra.mxu0 %v16898_v34  ;;  %v16966_v33 = vld [vmem:[%s21177_s0 + $0x628] ss:$648 sps:$4 sm:$0xff]  }
 0x462   : > { %11692 = vmatpush1.bf16.xpose.msra.mxu1 %v16901_v35  ;;  %11644 = vmatprep.subr.bf16.mxu0 %v16909_v36  ;;  %v16958_v34 = vld [vmem:[%s18434_s4 + $0x630] ss:$648 sps:$4 sm:$0xff]   ;;  %v16969_v36 = vld [vmem:[%s18434_s4 + $0xb44] ss:$648 sps:$4 sm:$0xff]  }
 0x463   : > { %11693 = vmatprep.subr.bf16.mxu1 %v16912_v37  ;;  %11672 = vmatprep.mubr.bf16.mxu0 %v16945_v38  ;;  %v16961_v35 = vld [vmem:[%s18434_s4 + $0x638] ss:$648 sps:$4 sm:$0xff]   ;;  %v16972_v37 = vld [vmem:[%s18434_s4 + $0xb4c] ss:$648 sps:$4 sm:$0xff]  }
 0x464   : > { %11721 = vmatprep.mubr.bf16.mxu1 %v16948_v39  ;;  %v17005_v38 = vld [vmem:[%s21177_s0 + $0x124] ss:$648 sps:$4 sm:$0xff]  }
 0x465   : > { %v17008_v39 = vld [vmem:[%s21177_s0 + $0x12c] ss:$648 sps:$4 sm:$0xff]  }
 0x469   : > { %11645 = vmatpush1.bf16.xpose.msra.mxu0 %v16907_v40  ;;  %v16967_v40 = vld [vmem:[%s18434_s4 + $0xb40] ss:$648 sps:$4 sm:$0xff]  }
 0x46a   : > { %11694 = vmatpush1.bf16.xpose.msra.mxu1 %v16910_v41  ;;  %11646 = vmatprep.subr.bf16.mxu0 %v16915_v42  ;;  %v16970_v41 = vld [vmem:[%s18434_s4 + $0xb48] ss:$648 sps:$4 sm:$0xff]   ;;  %v16975_v42 = vld [vmem:[%s18434_s4 + $0x1054] ss:$648 sps:$4 sm:$0xff]  }
 0x46b   : > { %11695 = vmatprep.subr.bf16.mxu1 %v16918_v43  ;;  %v11282_v44 = vpop.f32.mrb[104].mxu0  ;;  %v16978_v43 = vld [vmem:[%s18434_s4 + $0x105c] ss:$648 sps:$4 sm:$0xff]  }
 0x46c   : > { %v11331_v45 = vpop.f32.mrb[104].mxu1  ;;  %v11283_v46 = vadd.f32 %v11282_v44, %v19489_v59  ;;  %v11284_v47 = vpop.f32.mrb[105].mxu0 }
 0x46d   : > { %v11333_v48 = vpop.f32.mrb[105].mxu1  ;;  %v11285_v49 = vpop.f32.mrb[106].mxu0 }
 0x46e   : > { %v11334_v50 = vpop.f32.mrb[106].mxu1  ;;  %v19557_v60 = vadd.f32 %v11331_v45, %v11283_v46  ;;  %v11286_v52 = vadd.f32 %v11285_v49, %v19494_v61  ;;  %v11287_v54 = vpop.f32.mrb[107].mxu0 }
 0x46f   : > { %v11336_v55 = vpop.f32.mrb[107].mxu1 }
 0x470   : > { %v19562_v62 = vadd.f32 %v11334_v50, %v11286_v52 }
 0x471   : > { %11647 = vmatpush1.bf16.xpose.msra.mxu0 %v16913_v51  ;;  %v16973_v51 = vld [vmem:[%s18434_s4 + $0x1050] ss:$648 sps:$4 sm:$0xff]  }
 0x472   : > { %11696 = vmatpush1.bf16.xpose.msra.mxu1 %v16916_v53  ;;  %11648 = vmatprep.subr.bf16.mxu0 %v16921_v56  ;;  %v16976_v53 = vld [vmem:[%s18434_s4 + $0x1058] ss:$648 sps:$4 sm:$0xff]  }
 0x473   : > { %11697 = vmatprep.subr.bf16.mxu1 %v16924_v58  ;;  %v11290_v59 = vpop.f32.mrb[108].mxu0  ;;  %v16981_v58 = vld [vmem:[%s18434_s4 + $0x1564] ss:$648 sps:$4 sm:$0xff]  }
 0x474   : > { %v11339_v63 = vpop.f32.mrb[108].mxu1  ;;  %v11291_v0 = vadd.f32 %v11290_v59, %v19500_v14  ;;  %v11292_v57 = vpop.f32.mrb[109].mxu0  ;;  %v16984_v59 = vld [vmem:[%s18434_s4 + $0x156c] ss:$648 sps:$4 sm:$0xff]  }
 0x475   : > { %v11341_v61 = vpop.f32.mrb[109].mxu1  ;;  %v11293_v1 = vpop.f32.mrb[110].mxu0 }
 0x476   : > { %v11342_v3 = vpop.f32.mrb[110].mxu1  ;;  %v11294_v6 = vadd.f32 %v11293_v1, %v19504_v10  ;;  %v19568_v9 = vadd.f32 %v11339_v63, %v11291_v0  ;;  %v11295_v13 = vpop.f32.mrb[111].mxu0  ;;  %v16933_v10 = vld [vmem:[%s18434_s4 + $0x1f74] ss:$648 sps:$4 sm:$0xff]  }
 0x477   : > { %v11344_v14 = vpop.f32.mrb[111].mxu1  ;;  %v16990_v13 = vld [vmem:[%s18434_s4 + $0x1a7c] ss:$648 sps:$4 sm:$0xff]  }
 0x478   : > { %v19572_v11 = vadd.f32 %v11342_v3, %v11294_v6 }
 0x479   : > { %11649 = vmatpush1.bf16.xpose.msra.mxu0 %v16919_v4  ;;  %v16979_v4 = vld [vmem:[%s18434_s4 + $0x1560] ss:$648 sps:$4 sm:$0xff]  }
 0x47a   : > { %11698 = vmatpush1.bf16.xpose.msra.mxu1 %v16922_v5  ;;  %11650 = vmatprep.subr.bf16.mxu0 %v16927_v2  ;;  %v16982_v5 = vld [vmem:[%s18434_s4 + $0x1568] ss:$648 sps:$4 sm:$0xff]  }
 0x47b   : > { %11699 = vmatprep.subr.bf16.mxu1 %v16930_v7  ;;  %v16987_v7 = vld [vmem:[%s18434_s4 + $0x1a74] ss:$648 sps:$4 sm:$0xff]  }
 0x481   : > { %11651 = vmatpush1.bf16.xpose.msra.mxu0 %v16925_v12 }
 0x482   : > { %11700 = vmatpush1.bf16.xpose.msra.mxu1 %v16928_v8  ;;  %11652 = vmatprep.subr.bf16.mxu0 %v16933_v10  ;;  %v16985_v8 = vld [vmem:[%s18434_s4 + $0x1a70] ss:$648 sps:$4 sm:$0xff]  }
 0x483   : > { %11701 = vmatprep.subr.bf16.mxu1 %v16936_v15  ;;  %v16988_v10 = vld [vmem:[%s18434_s4 + $0x1a78] ss:$648 sps:$4 sm:$0xff]   ;;  %v16996_v15 = vld [vmem:[%s18434_s4 + $0x1f8c] ss:$648 sps:$4 sm:$0xff]  }
 0x489   : > { %11653 = vmatpush1.bf16.xpose.msra.mxu0 %v16931_v16  ;;  %v16991_v16 = vld [vmem:[%s18434_s4 + $0x1f80] ss:$648 sps:$4 sm:$0xff]  }
 0x48a   : > { %11702 = vmatpush1.bf16.xpose.msra.mxu1 %v16934_v17  ;;  %11654 = vmatprep.subr.bf16.mxu0 %v16939_v18  ;;  %v16994_v17 = vld [vmem:[%s18434_s4 + $0x1f88] ss:$648 sps:$4 sm:$0xff]   ;;  %v16999_v18 = vld [vmem:[%s18434_s4 + $0x2494] ss:$648 sps:$4 sm:$0xff]  }
 0x48b   : > { %11703 = vmatprep.subr.bf16.mxu1 %v16942_v19  ;;  %v17002_v19 = vld [vmem:[%s18434_s4 + $0x249c] ss:$648 sps:$4 sm:$0xff]  }
 0x491   : > { %11655 = vmatpush1.bf16.xpose.msra.mxu0 %v16937_v20  ;;  %v16997_v20 = vld [vmem:[%s18434_s4 + $0x2490] ss:$648 sps:$4 sm:$0xff]  }
 0x492   : > { %11704 = vmatpush1.bf16.xpose.msra.mxu1 %v16940_v21  ;;  %11738 = vmatprep.subr.bf16.mxu0 %v16951_v22  ;;  %v17000_v21 = vld [vmem:[%s18434_s4 + $0x2498] ss:$648 sps:$4 sm:$0xff]   ;;  %v17011_v22 = vld [vmem:[%s18434_s4 + $0x134] ss:$648 sps:$4 sm:$0xff]  }
 0x493   : > { %11787 = vmatprep.subr.bf16.mxu1 %v16954_v23  ;;  %v17014_v23 = vld [vmem:[%s18434_s4 + $0x13c] ss:$648 sps:$4 sm:$0xff]  }
 0x498   : > { %11673 = vmatmul.mubr.bf16.vlgmr.msra.gmra.mrb[136].mxu0 %v16943_v24  ;;  %v17003_v24 = vld [vmem:[%s21177_s0 + $0x120] ss:$648 sps:$4 sm:$0xff]  }
 0x499   : > { %11722 = vmatmul.mubr.bf16.vlgmr.msra.gmra.mrb[136].mxu1 %v16946_v25  ;;  %11739 = vmatpush1.bf16.xpose.msra.mxu0 %v16949_v26  ;;  %v17006_v25 = vld [vmem:[%s21177_s0 + $0x128] ss:$648 sps:$4 sm:$0xff]  }
 0x49a   : > { %11788 = vmatpush1.bf16.xpose.msra.mxu1 %v16952_v27  ;;  %11680 = vmatprep.mubr.bf16.mxu0 %v16955_v28  ;;  %v17009_v26 = vld [vmem:[%s18434_s4 + $0x130] ss:$648 sps:$4 sm:$0xff]   ;;  %v17015_v28 = vld [vmem:[%s21177_s0 + $0x634] ss:$648 sps:$4 sm:$0xff]  }
 0x49b   : > { %11740 = vmatprep.subr.bf16.mxu0 %v16960_v29  ;;  %11789 = vmatprep.subr.bf16.mxu1 %v16963_v30  ;;  %v17012_v27 = vld [vmem:[%s18434_s4 + $0x138] ss:$648 sps:$4 sm:$0xff]   ;;  %v17020_v29 = vld [vmem:[%s18434_s4 + $0x644] ss:$648 sps:$4 sm:$0xff]  }
 0x49c   : > { %11729 = vmatprep.mubr.bf16.mxu1 %v16964_v31  ;;  %v17023_v30 = vld [vmem:[%s18434_s4 + $0x64c] ss:$648 sps:$4 sm:$0xff]   ;;  %v17024_v31 = vld [vmem:[%s21177_s0 + $0x63c] ss:$648 sps:$4 sm:$0xff]  }
 0x4a0   : > { %11681 = vmatmul.mubr.bf16.gmra.mrb[140].mxu0 %v16957_v32  ;;  %v17017_v32 = vld [vmem:[%s21177_s0 + $0x630] ss:$648 sps:$4 sm:$0xff]  }
 0x4a1   : > { %11730 = vmatmul.mubr.bf16.gmra.mrb[140].mxu1 %v16966_v33  ;;  %11741 = vmatpush1.bf16.xpose.msra.mxu0 %v16958_v34  ;;  %v17026_v33 = vld [vmem:[%s21177_s0 + $0x638] ss:$648 sps:$4 sm:$0xff]  }
 0x4a2   : > { %11790 = vmatpush1.bf16.xpose.msra.mxu1 %v16961_v35  ;;  %11742 = vmatprep.subr.bf16.mxu0 %v16969_v36  ;;  %v17018_v34 = vld [vmem:[%s18434_s4 + $0x640] ss:$648 sps:$4 sm:$0xff]   ;;  %v17029_v36 = vld [vmem:[%s18434_s4 + $0xb54] ss:$648 sps:$4 sm:$0xff]  }
 0x4a3   : > { %11791 = vmatprep.subr.bf16.mxu1 %v16972_v37  ;;  %11770 = vmatprep.mubr.bf16.mxu0 %v17005_v38  ;;  %v17021_v35 = vld [vmem:[%s18434_s4 + $0x648] ss:$648 sps:$4 sm:$0xff]   ;;  %v17032_v37 = vld [vmem:[%s18434_s4 + $0xb5c] ss:$648 sps:$4 sm:$0xff]  }
 0x4a4   : > { %11819 = vmatprep.mubr.bf16.mxu1 %v17008_v39  ;;  %v17065_v38 = vld [vmem:[%s21177_s0 + $0x134] ss:$648 sps:$4 sm:$0xff]  }
 0x4a5   : > { %v17068_v39 = vld [vmem:[%s21177_s0 + $0x13c] ss:$648 sps:$4 sm:$0xff]  }
 0x4a9   : > { %11743 = vmatpush1.bf16.xpose.msra.mxu0 %v16967_v40  ;;  %v17027_v40 = vld [vmem:[%s18434_s4 + $0xb50] ss:$648 sps:$4 sm:$0xff]  }
 0x4aa   : > { %11792 = vmatpush1.bf16.xpose.msra.mxu1 %v16970_v41  ;;  %11744 = vmatprep.subr.bf16.mxu0 %v16975_v42  ;;  %v17030_v41 = vld [vmem:[%s18434_s4 + $0xb58] ss:$648 sps:$4 sm:$0xff]   ;;  %v17035_v42 = vld [vmem:[%s18434_s4 + $0x1064] ss:$648 sps:$4 sm:$0xff]  }
 0x4ab   : > { %11793 = vmatprep.subr.bf16.mxu1 %v16978_v43  ;;  %v11380_v44 = vpop.f32.mrb[112].mxu0  ;;  %v17038_v43 = vld [vmem:[%s18434_s4 + $0x106c] ss:$648 sps:$4 sm:$0xff]  }
 0x4ac   : > { %v11429_v45 = vpop.f32.mrb[112].mxu1  ;;  %v11381_v46 = vadd.f32 %v11380_v44, %v19557_v60  ;;  %v11382_v47 = vpop.f32.mrb[113].mxu0 }
 0x4ad   : > { %v11431_v48 = vpop.f32.mrb[113].mxu1  ;;  %v11383_v49 = vpop.f32.mrb[114].mxu0 }
 0x4ae   : > { %v11432_v50 = vpop.f32.mrb[114].mxu1  ;;  %v19625_v52 = vadd.f32 %v11429_v45, %v11381_v46  ;;  %v11384_v54 = vadd.f32 %v11383_v49, %v19562_v62  ;;  %v11385_v55 = vpop.f32.mrb[115].mxu0 }
 0x4af   : > { %v11434_v56 = vpop.f32.mrb[115].mxu1 }
 0x4b0   : > { %v19630_v63 = vadd.f32 %v11432_v50, %v11384_v54 }
 0x4b1   : > { %11745 = vmatpush1.bf16.xpose.msra.mxu0 %v16973_v51  ;;  %v17033_v51 = vld [vmem:[%s18434_s4 + $0x1060] ss:$648 sps:$4 sm:$0xff]  }
 0x4b2   : > { %11794 = vmatpush1.bf16.xpose.msra.mxu1 %v16976_v53  ;;  %11746 = vmatprep.subr.bf16.mxu0 %v16981_v58  ;;  %v17036_v53 = vld [vmem:[%s18434_s4 + $0x1068] ss:$648 sps:$4 sm:$0xff]  }
 0x4b3   : > { %11795 = vmatprep.subr.bf16.mxu1 %v16984_v59  ;;  %v11388_v60 = vpop.f32.mrb[116].mxu0  ;;  %v17041_v59 = vld [vmem:[%s18434_s4 + $0x1574] ss:$648 sps:$4 sm:$0xff]  }
 0x4b4   : > { %v11437_v0 = vpop.f32.mrb[116].mxu1  ;;  %v11389_v57 = vadd.f32 %v11388_v60, %v19568_v9  ;;  %v11390_v61 = vpop.f32.mrb[117].mxu0  ;;  %v17044_v60 = vld [vmem:[%s18434_s4 + $0x157c] ss:$648 sps:$4 sm:$0xff]  }
 0x4b5   : > { %v11439_v62 = vpop.f32.mrb[117].mxu1  ;;  %v11391_v1 = vpop.f32.mrb[118].mxu0 }
 0x4b6   : > { %v11440_v3 = vpop.f32.mrb[118].mxu1  ;;  %v11392_v6 = vadd.f32 %v11391_v1, %v19572_v11  ;;  %v19636_v2 = vadd.f32 %v11437_v0, %v11389_v57  ;;  %v11393_v14 = vpop.f32.mrb[119].mxu0  ;;  %v16993_v11 = vld [vmem:[%s18434_s4 + $0x1f84] ss:$648 sps:$4 sm:$0xff]  }
 0x4b7   : > { %v11442_v9 = vpop.f32.mrb[119].mxu1  ;;  %v17050_v14 = vld [vmem:[%s18434_s4 + $0x1a8c] ss:$648 sps:$4 sm:$0xff]  }
 0x4b8   : > { %v19640_v12 = vadd.f32 %v11440_v3, %v11392_v6 }
 0x4b9   : > { %11747 = vmatpush1.bf16.xpose.msra.mxu0 %v16979_v4  ;;  %v17039_v4 = vld [vmem:[%s18434_s4 + $0x1570] ss:$648 sps:$4 sm:$0xff]  }
 0x4ba   : > { %11796 = vmatpush1.bf16.xpose.msra.mxu1 %v16982_v5  ;;  %11748 = vmatprep.subr.bf16.mxu0 %v16987_v7  ;;  %v17042_v5 = vld [vmem:[%s18434_s4 + $0x1578] ss:$648 sps:$4 sm:$0xff]  }
 0x4bb   : > { %11797 = vmatprep.subr.bf16.mxu1 %v16990_v13  ;;  %v17047_v13 = vld [vmem:[%s18434_s4 + $0x1a84] ss:$648 sps:$4 sm:$0xff]  }
 0x4c1   : > { %11749 = vmatpush1.bf16.xpose.msra.mxu0 %v16985_v8 }
 0x4c2   : > { %11798 = vmatpush1.bf16.xpose.msra.mxu1 %v16988_v10  ;;  %11750 = vmatprep.subr.bf16.mxu0 %v16993_v11  ;;  %v17045_v10 = vld [vmem:[%s18434_s4 + $0x1a80] ss:$648 sps:$4 sm:$0xff]  }
 0x4c3   : > { %11799 = vmatprep.subr.bf16.mxu1 %v16996_v15  ;;  %v17048_v11 = vld [vmem:[%s18434_s4 + $0x1a88] ss:$648 sps:$4 sm:$0xff]   ;;  %v17056_v15 = vld [vmem:[%s18434_s4 + $0x1f9c] ss:$648 sps:$4 sm:$0xff]  }
 0x4c9   : > { %11751 = vmatpush1.bf16.xpose.msra.mxu0 %v16991_v16  ;;  %v17051_v16 = vld [vmem:[%s18434_s4 + $0x1f90] ss:$648 sps:$4 sm:$0xff]  }
 0x4ca   : > { %11800 = vmatpush1.bf16.xpose.msra.mxu1 %v16994_v17  ;;  %11752 = vmatprep.subr.bf16.mxu0 %v16999_v18  ;;  %v17054_v17 = vld [vmem:[%s18434_s4 + $0x1f98] ss:$648 sps:$4 sm:$0xff]   ;;  %v17059_v18 = vld [vmem:[%s18434_s4 + $0x24a4] ss:$648 sps:$4 sm:$0xff]  }
 0x4cb   : > { %11801 = vmatprep.subr.bf16.mxu1 %v17002_v19  ;;  %v17062_v19 = vld [vmem:[%s18434_s4 + $0x24ac] ss:$648 sps:$4 sm:$0xff]  }
 0x4d1   : > { %11753 = vmatpush1.bf16.xpose.msra.mxu0 %v16997_v20  ;;  %v17057_v20 = vld [vmem:[%s18434_s4 + $0x24a0] ss:$648 sps:$4 sm:$0xff]  }
 0x4d2   : > { %11802 = vmatpush1.bf16.xpose.msra.mxu1 %v17000_v21  ;;  %11836 = vmatprep.subr.bf16.mxu0 %v17011_v22  ;;  %v17060_v21 = vld [vmem:[%s18434_s4 + $0x24a8] ss:$648 sps:$4 sm:$0xff]   ;;  %v17071_v22 = vld [vmem:[%s18434_s4 + $0x144] ss:$648 sps:$4 sm:$0xff]  }
 0x4d3   : > { %11885 = vmatprep.subr.bf16.mxu1 %v17014_v23  ;;  %v17074_v23 = vld [vmem:[%s18434_s4 + $0x14c] ss:$648 sps:$4 sm:$0xff]  }
 0x4d8   : > { %11771 = vmatmul.mubr.bf16.vlgmr.msra.gmra.mrb[144].mxu0 %v17003_v24  ;;  %v17063_v24 = vld [vmem:[%s21177_s0 + $0x130] ss:$648 sps:$4 sm:$0xff]  }
 0x4d9   : > { %11820 = vmatmul.mubr.bf16.vlgmr.msra.gmra.mrb[144].mxu1 %v17006_v25  ;;  %11837 = vmatpush1.bf16.xpose.msra.mxu0 %v17009_v26  ;;  %v17066_v25 = vld [vmem:[%s21177_s0 + $0x138] ss:$648 sps:$4 sm:$0xff]  }
 0x4da   : > { %11886 = vmatpush1.bf16.xpose.msra.mxu1 %v17012_v27  ;;  %11778 = vmatprep.mubr.bf16.mxu0 %v17015_v28  ;;  %v17069_v26 = vld [vmem:[%s18434_s4 + $0x140] ss:$648 sps:$4 sm:$0xff]   ;;  %v17075_v28 = vld [vmem:[%s21177_s0 + $0x644] ss:$648 sps:$4 sm:$0xff]  }
 0x4db   : > { %11838 = vmatprep.subr.bf16.mxu0 %v17020_v29  ;;  %11887 = vmatprep.subr.bf16.mxu1 %v17023_v30  ;;  %v17072_v27 = vld [vmem:[%s18434_s4 + $0x148] ss:$648 sps:$4 sm:$0xff]   ;;  %v17080_v29 = vld [vmem:[%s18434_s4 + $0x654] ss:$648 sps:$4 sm:$0xff]  }
 0x4dc   : > { %11827 = vmatprep.mubr.bf16.mxu1 %v17024_v31  ;;  %v17083_v30 = vld [vmem:[%s18434_s4 + $0x65c] ss:$648 sps:$4 sm:$0xff]   ;;  %v17084_v31 = vld [vmem:[%s21177_s0 + $0x64c] ss:$648 sps:$4 sm:$0xff]  }
 0x4e0   : > { %11779 = vmatmul.mubr.bf16.gmra.mrb[148].mxu0 %v17017_v32  ;;  %v17077_v32 = vld [vmem:[%s21177_s0 + $0x640] ss:$648 sps:$4 sm:$0xff]  }
 0x4e1   : > { %11828 = vmatmul.mubr.bf16.gmra.mrb[148].mxu1 %v17026_v33  ;;  %11839 = vmatpush1.bf16.xpose.msra.mxu0 %v17018_v34  ;;  %v17086_v33 = vld [vmem:[%s21177_s0 + $0x648] ss:$648 sps:$4 sm:$0xff]  }
 0x4e2   : > { %11888 = vmatpush1.bf16.xpose.msra.mxu1 %v17021_v35  ;;  %11840 = vmatprep.subr.bf16.mxu0 %v17029_v36  ;;  %v17078_v34 = vld [vmem:[%s18434_s4 + $0x650] ss:$648 sps:$4 sm:$0xff]   ;;  %v17089_v36 = vld [vmem:[%s18434_s4 + $0xb64] ss:$648 sps:$4 sm:$0xff]  }
 0x4e3   : > { %11889 = vmatprep.subr.bf16.mxu1 %v17032_v37  ;;  %11868 = vmatprep.mubr.bf16.mxu0 %v17065_v38  ;;  %v17081_v35 = vld [vmem:[%s18434_s4 + $0x658] ss:$648 sps:$4 sm:$0xff]   ;;  %v17092_v37 = vld [vmem:[%s18434_s4 + $0xb6c] ss:$648 sps:$4 sm:$0xff]  }
 0x4e4   : > { %11917 = vmatprep.mubr.bf16.mxu1 %v17068_v39  ;;  %v17125_v38 = vld [vmem:[%s21177_s0 + $0x144] ss:$648 sps:$4 sm:$0xff]  }
 0x4e5   : > { %v17128_v39 = vld [vmem:[%s21177_s0 + $0x14c] ss:$648 sps:$4 sm:$0xff]  }
 0x4e9   : > { %11841 = vmatpush1.bf16.xpose.msra.mxu0 %v17027_v40  ;;  %v17087_v40 = vld [vmem:[%s18434_s4 + $0xb60] ss:$648 sps:$4 sm:$0xff]  }
 0x4ea   : > { %11890 = vmatpush1.bf16.xpose.msra.mxu1 %v17030_v41  ;;  %11842 = vmatprep.subr.bf16.mxu0 %v17035_v42  ;;  %v17090_v41 = vld [vmem:[%s18434_s4 + $0xb68] ss:$648 sps:$4 sm:$0xff]   ;;  %v17095_v42 = vld [vmem:[%s18434_s4 + $0x1074] ss:$648 sps:$4 sm:$0xff]  }
 0x4eb   : > { %11891 = vmatprep.subr.bf16.mxu1 %v17038_v43  ;;  %v11478_v44 = vpop.f32.mrb[120].mxu0  ;;  %v17098_v43 = vld [vmem:[%s18434_s4 + $0x107c] ss:$648 sps:$4 sm:$0xff]  }
 0x4ec   : > { %v11527_v45 = vpop.f32.mrb[120].mxu1  ;;  %v11479_v46 = vadd.f32 %v11478_v44, %v19625_v52  ;;  %v11480_v47 = vpop.f32.mrb[121].mxu0 }
 0x4ed   : > { %v11529_v48 = vpop.f32.mrb[121].mxu1  ;;  %v11481_v49 = vpop.f32.mrb[122].mxu0 }
 0x4ee   : > { %v11530_v50 = vpop.f32.mrb[122].mxu1  ;;  %v19693_v54 = vadd.f32 %v11527_v45, %v11479_v46  ;;  %v11482_v55 = vadd.f32 %v11481_v49, %v19630_v63  ;;  %v11483_v56 = vpop.f32.mrb[123].mxu0 }
 0x4ef   : > { %v11532_v58 = vpop.f32.mrb[123].mxu1 }
 0x4f0   : > { %v19698_v0 = vadd.f32 %v11530_v50, %v11482_v55 }
 0x4f1   : > { %11843 = vmatpush1.bf16.xpose.msra.mxu0 %v17033_v51  ;;  %v17093_v51 = vld [vmem:[%s18434_s4 + $0x1070] ss:$648 sps:$4 sm:$0xff]  }
 0x4f2   : > { %11892 = vmatpush1.bf16.xpose.msra.mxu1 %v17036_v53  ;;  %11844 = vmatprep.subr.bf16.mxu0 %v17041_v59  ;;  %v17096_v53 = vld [vmem:[%s18434_s4 + $0x1078] ss:$648 sps:$4 sm:$0xff]  }
 0x4f3   : > { %11893 = vmatprep.subr.bf16.mxu1 %v17044_v60  ;;  %v11486_v52 = vpop.f32.mrb[124].mxu0  ;;  %v17101_v60 = vld [vmem:[%s18434_s4 + $0x1584] ss:$648 sps:$4 sm:$0xff]  }
 0x4f4   : > { %v11535_v57 = vpop.f32.mrb[124].mxu1  ;;  %v11487_v61 = vadd.f32 %v11486_v52, %v19636_v2  ;;  %v11488_v62 = vpop.f32.mrb[125].mxu0  ;;  %v17104_v52 = vld [vmem:[%s18434_s4 + $0x158c] ss:$648 sps:$4 sm:$0xff]  }
 0x4f5   : > { %v11537_v63 = vpop.f32.mrb[125].mxu1  ;;  %v11489_v1 = vpop.f32.mrb[126].mxu0 }
 0x4f6   : > { %v11538_v3 = vpop.f32.mrb[126].mxu1  ;;  %v11490_v6 = vadd.f32 %v11489_v1, %v19640_v12  ;;  %v19704_v7 = vadd.f32 %v11535_v57, %v11487_v61  ;;  %v11491_v9 = vpop.f32.mrb[127].mxu0  ;;  %v17053_v12 = vld [vmem:[%s18434_s4 + $0x1f94] ss:$648 sps:$4 sm:$0xff]  }
 0x4f7   : > { %v11540_v2 = vpop.f32.mrb[127].mxu1  ;;  %v17110_v9 = vld [vmem:[%s18434_s4 + $0x1a9c] ss:$648 sps:$4 sm:$0xff]  }
 0x4f8   : > { %v19708_v8 = vadd.f32 %v11538_v3, %v11490_v6 }
 0x4f9   : > { %11845 = vmatpush1.bf16.xpose.msra.mxu0 %v17039_v4  ;;  %v17099_v4 = vld [vmem:[%s18434_s4 + $0x1580] ss:$648 sps:$4 sm:$0xff]  }
 0x4fa   : > { %11894 = vmatpush1.bf16.xpose.msra.mxu1 %v17042_v5  ;;  %11846 = vmatprep.subr.bf16.mxu0 %v17047_v13  ;;  %v17102_v5 = vld [vmem:[%s18434_s4 + $0x1588] ss:$648 sps:$4 sm:$0xff]  }
 0x4fb   : > { %11895 = vmatprep.subr.bf16.mxu1 %v17050_v14  ;;  %v17107_v14 = vld [vmem:[%s18434_s4 + $0x1a94] ss:$648 sps:$4 sm:$0xff]  }
 0x501   : > { %11847 = vmatpush1.bf16.xpose.msra.mxu0 %v17045_v10 }
 0x502   : > { %11896 = vmatpush1.bf16.xpose.msra.mxu1 %v17048_v11  ;;  %11848 = vmatprep.subr.bf16.mxu0 %v17053_v12  ;;  %v17105_v11 = vld [vmem:[%s18434_s4 + $0x1a90] ss:$648 sps:$4 sm:$0xff]  }
 0x503   : > { %11897 = vmatprep.subr.bf16.mxu1 %v17056_v15  ;;  %v17108_v12 = vld [vmem:[%s18434_s4 + $0x1a98] ss:$648 sps:$4 sm:$0xff]   ;;  %v17116_v15 = vld [vmem:[%s18434_s4 + $0x1fac] ss:$648 sps:$4 sm:$0xff]  }
 0x509   : > { %11849 = vmatpush1.bf16.xpose.msra.mxu0 %v17051_v16  ;;  %v17111_v16 = vld [vmem:[%s18434_s4 + $0x1fa0] ss:$648 sps:$4 sm:$0xff]  }
 0x50a   : > { %11898 = vmatpush1.bf16.xpose.msra.mxu1 %v17054_v17  ;;  %11850 = vmatprep.subr.bf16.mxu0 %v17059_v18  ;;  %v17114_v17 = vld [vmem:[%s18434_s4 + $0x1fa8] ss:$648 sps:$4 sm:$0xff]   ;;  %v17119_v18 = vld [vmem:[%s18434_s4 + $0x24b4] ss:$648 sps:$4 sm:$0xff]  }
 0x50b   : > { %11899 = vmatprep.subr.bf16.mxu1 %v17062_v19  ;;  %v17122_v19 = vld [vmem:[%s18434_s4 + $0x24bc] ss:$648 sps:$4 sm:$0xff]  }
 0x511   : > { %11851 = vmatpush1.bf16.xpose.msra.mxu0 %v17057_v20  ;;  %v17117_v20 = vld [vmem:[%s18434_s4 + $0x24b0] ss:$648 sps:$4 sm:$0xff]  }
 0x512   : > { %11900 = vmatpush1.bf16.xpose.msra.mxu1 %v17060_v21  ;;  %11934 = vmatprep.subr.bf16.mxu0 %v17071_v22  ;;  %v17120_v21 = vld [vmem:[%s18434_s4 + $0x24b8] ss:$648 sps:$4 sm:$0xff]   ;;  %v17131_v22 = vld [vmem:[%s18434_s4 + $0x154] ss:$648 sps:$4 sm:$0xff]  }
 0x513   : > { %11983 = vmatprep.subr.bf16.mxu1 %v17074_v23  ;;  %v17134_v23 = vld [vmem:[%s18434_s4 + $0x15c] ss:$648 sps:$4 sm:$0xff]  }
 0x518   : > { %11869 = vmatmul.mubr.bf16.vlgmr.msra.gmra.mrb[152].mxu0 %v17063_v24  ;;  %v17123_v24 = vld [vmem:[%s21177_s0 + $0x140] ss:$648 sps:$4 sm:$0xff]  }
 0x519   : > { %11918 = vmatmul.mubr.bf16.vlgmr.msra.gmra.mrb[152].mxu1 %v17066_v25  ;;  %11935 = vmatpush1.bf16.xpose.msra.mxu0 %v17069_v26  ;;  %v17126_v25 = vld [vmem:[%s21177_s0 + $0x148] ss:$648 sps:$4 sm:$0xff]  }
 0x51a   : > { %11984 = vmatpush1.bf16.xpose.msra.mxu1 %v17072_v27  ;;  %11876 = vmatprep.mubr.bf16.mxu0 %v17075_v28  ;;  %v17129_v26 = vld [vmem:[%s18434_s4 + $0x150] ss:$648 sps:$4 sm:$0xff]   ;;  %v17135_v28 = vld [vmem:[%s21177_s0 + $0x654] ss:$648 sps:$4 sm:$0xff]  }
 0x51b   : > { %11936 = vmatprep.subr.bf16.mxu0 %v17080_v29  ;;  %11985 = vmatprep.subr.bf16.mxu1 %v17083_v30  ;;  %v17132_v27 = vld [vmem:[%s18434_s4 + $0x158] ss:$648 sps:$4 sm:$0xff]   ;;  %v17140_v29 = vld [vmem:[%s18434_s4 + $0x664] ss:$648 sps:$4 sm:$0xff]  }
 0x51c   : > { %11925 = vmatprep.mubr.bf16.mxu1 %v17084_v31  ;;  %v17143_v30 = vld [vmem:[%s18434_s4 + $0x66c] ss:$648 sps:$4 sm:$0xff]   ;;  %v17144_v31 = vld [vmem:[%s21177_s0 + $0x65c] ss:$648 sps:$4 sm:$0xff]  }
 0x520   : > { %11877 = vmatmul.mubr.bf16.gmra.mrb[156].mxu0 %v17077_v32  ;;  %v17137_v32 = vld [vmem:[%s21177_s0 + $0x650] ss:$648 sps:$4 sm:$0xff]  }
 0x521   : > { %11926 = vmatmul.mubr.bf16.gmra.mrb[156].mxu1 %v17086_v33  ;;  %11937 = vmatpush1.bf16.xpose.msra.mxu0 %v17078_v34  ;;  %v17146_v33 = vld [vmem:[%s21177_s0 + $0x658] ss:$648 sps:$4 sm:$0xff]  }
 0x522   : > { %11986 = vmatpush1.bf16.xpose.msra.mxu1 %v17081_v35  ;;  %11938 = vmatprep.subr.bf16.mxu0 %v17089_v36  ;;  %v17138_v34 = vld [vmem:[%s18434_s4 + $0x660] ss:$648 sps:$4 sm:$0xff]   ;;  %v17149_v36 = vld [vmem:[%s18434_s4 + $0xb74] ss:$648 sps:$4 sm:$0xff]  }
 0x523   : > { %11987 = vmatprep.subr.bf16.mxu1 %v17092_v37  ;;  %11966 = vmatprep.mubr.bf16.mxu0 %v17125_v38  ;;  %v17141_v35 = vld [vmem:[%s18434_s4 + $0x668] ss:$648 sps:$4 sm:$0xff]   ;;  %v17152_v37 = vld [vmem:[%s18434_s4 + $0xb7c] ss:$648 sps:$4 sm:$0xff]  }
 0x524   : > { %12015 = vmatprep.mubr.bf16.mxu1 %v17128_v39  ;;  %v17185_v38 = vld [vmem:[%s21177_s0 + $0x154] ss:$648 sps:$4 sm:$0xff]  }
 0x525   : > { %v17188_v39 = vld [vmem:[%s21177_s0 + $0x15c] ss:$648 sps:$4 sm:$0xff]  }
 0x529   : > { %11939 = vmatpush1.bf16.xpose.msra.mxu0 %v17087_v40  ;;  %v17147_v40 = vld [vmem:[%s18434_s4 + $0xb70] ss:$648 sps:$4 sm:$0xff]  }
 0x52a   : > { %11988 = vmatpush1.bf16.xpose.msra.mxu1 %v17090_v41  ;;  %11940 = vmatprep.subr.bf16.mxu0 %v17095_v42  ;;  %v17150_v41 = vld [vmem:[%s18434_s4 + $0xb78] ss:$648 sps:$4 sm:$0xff]   ;;  %v17155_v42 = vld [vmem:[%s18434_s4 + $0x1084] ss:$648 sps:$4 sm:$0xff]  }
 0x52b   : > { %11989 = vmatprep.subr.bf16.mxu1 %v17098_v43  ;;  %v11576_v44 = vpop.f32.mrb[128].mxu0  ;;  %v17158_v43 = vld [vmem:[%s18434_s4 + $0x108c] ss:$648 sps:$4 sm:$0xff]  }
 0x52c   : > { %v11625_v45 = vpop.f32.mrb[128].mxu1  ;;  %v11577_v46 = vadd.f32 %v11576_v44, %v19693_v54  ;;  %v11578_v47 = vpop.f32.mrb[129].mxu0 }
 0x52d   : > { %v11627_v48 = vpop.f32.mrb[129].mxu1  ;;  %v11579_v49 = vpop.f32.mrb[130].mxu0 }
 0x52e   : > { %v11628_v50 = vpop.f32.mrb[130].mxu1  ;;  %v19761_v55 = vadd.f32 %v11625_v45, %v11577_v46  ;;  %v11580_v56 = vadd.f32 %v11579_v49, %v19698_v0  ;;  %v11581_v58 = vpop.f32.mrb[131].mxu0 }
 0x52f   : > { %v11630_v59 = vpop.f32.mrb[131].mxu1 }
 0x530   : > { %v19766_v57 = vadd.f32 %v11628_v50, %v11580_v56 }
 0x531   : > { %11941 = vmatpush1.bf16.xpose.msra.mxu0 %v17093_v51  ;;  %v17153_v51 = vld [vmem:[%s18434_s4 + $0x1080] ss:$648 sps:$4 sm:$0xff]  }
 0x532   : > { %11990 = vmatpush1.bf16.xpose.msra.mxu1 %v17096_v53  ;;  %11942 = vmatprep.subr.bf16.mxu0 %v17101_v60  ;;  %v17156_v53 = vld [vmem:[%s18434_s4 + $0x1088] ss:$648 sps:$4 sm:$0xff]  }
 0x533   : > { %11991 = vmatprep.subr.bf16.mxu1 %v17104_v52  ;;  %v11584_v54 = vpop.f32.mrb[132].mxu0  ;;  %v17161_v52 = vld [vmem:[%s18434_s4 + $0x1594] ss:$648 sps:$4 sm:$0xff]  }
 0x534   : > { %v11633_v61 = vpop.f32.mrb[132].mxu1  ;;  %v11585_v62 = vadd.f32 %v11584_v54, %v19704_v7  ;;  %v11586_v63 = vpop.f32.mrb[133].mxu0  ;;  %v17164_v54 = vld [vmem:[%s18434_s4 + $0x159c] ss:$648 sps:$4 sm:$0xff]  }
 0x535   : > { %v11635_v0 = vpop.f32.mrb[133].mxu1  ;;  %v11587_v1 = vpop.f32.mrb[134].mxu0 }
 0x536   : > { %v11636_v3 = vpop.f32.mrb[134].mxu1  ;;  %v11588_v6 = vadd.f32 %v11587_v1, %v19708_v8  ;;  %v19772_v13 = vadd.f32 %v11633_v61, %v11585_v62  ;;  %v11589_v2 = vpop.f32.mrb[135].mxu0  ;;  %v17113_v8 = vld [vmem:[%s18434_s4 + $0x1fa4] ss:$648 sps:$4 sm:$0xff]  }
 0x537   : > { %v11638_v7 = vpop.f32.mrb[135].mxu1  ;;  %v17170_v2 = vld [vmem:[%s18434_s4 + $0x1aac] ss:$648 sps:$4 sm:$0xff]  }
 0x538   : > { %v19776_v10 = vadd.f32 %v11636_v3, %v11588_v6 }
 0x539   : > { %11943 = vmatpush1.bf16.xpose.msra.mxu0 %v17099_v4  ;;  %v17159_v4 = vld [vmem:[%s18434_s4 + $0x1590] ss:$648 sps:$4 sm:$0xff]  }
 0x53a   : > { %11992 = vmatpush1.bf16.xpose.msra.mxu1 %v17102_v5  ;;  %11944 = vmatprep.subr.bf16.mxu0 %v17107_v14  ;;  %v17162_v5 = vld [vmem:[%s18434_s4 + $0x1598] ss:$648 sps:$4 sm:$0xff]  }
 0x53b   : > { %11993 = vmatprep.subr.bf16.mxu1 %v17110_v9  ;;  %v17167_v9 = vld [vmem:[%s18434_s4 + $0x1aa4] ss:$648 sps:$4 sm:$0xff]  }
 0x541   : > { %11945 = vmatpush1.bf16.xpose.msra.mxu0 %v17105_v11 }
 0x542   : > { %11994 = vmatpush1.bf16.xpose.msra.mxu1 %v17108_v12  ;;  %11946 = vmatprep.subr.bf16.mxu0 %v17113_v8  ;;  %v17165_v12 = vld [vmem:[%s18434_s4 + $0x1aa0] ss:$648 sps:$4 sm:$0xff]  }
 0x543   : > { %11995 = vmatprep.subr.bf16.mxu1 %v17116_v15  ;;  %v17168_v8 = vld [vmem:[%s18434_s4 + $0x1aa8] ss:$648 sps:$4 sm:$0xff]   ;;  %v17176_v15 = vld [vmem:[%s18434_s4 + $0x1fbc] ss:$648 sps:$4 sm:$0xff]  }
 0x549   : > { %11947 = vmatpush1.bf16.xpose.msra.mxu0 %v17111_v16  ;;  %v17171_v16 = vld [vmem:[%s18434_s4 + $0x1fb0] ss:$648 sps:$4 sm:$0xff]  }
 0x54a   : > { %11996 = vmatpush1.bf16.xpose.msra.mxu1 %v17114_v17  ;;  %11948 = vmatprep.subr.bf16.mxu0 %v17119_v18  ;;  %v17174_v17 = vld [vmem:[%s18434_s4 + $0x1fb8] ss:$648 sps:$4 sm:$0xff]   ;;  %v17179_v18 = vld [vmem:[%s18434_s4 + $0x24c4] ss:$648 sps:$4 sm:$0xff]  }
 0x54b   : > { %11997 = vmatprep.subr.bf16.mxu1 %v17122_v19  ;;  %v17182_v19 = vld [vmem:[%s18434_s4 + $0x24cc] ss:$648 sps:$4 sm:$0xff]  }
 0x551   : > { %11949 = vmatpush1.bf16.xpose.msra.mxu0 %v17117_v20  ;;  %v17177_v20 = vld [vmem:[%s18434_s4 + $0x24c0] ss:$648 sps:$4 sm:$0xff]  }
 0x552   : > { %11998 = vmatpush1.bf16.xpose.msra.mxu1 %v17120_v21  ;;  %12032 = vmatprep.subr.bf16.mxu0 %v17131_v22  ;;  %v17180_v21 = vld [vmem:[%s18434_s4 + $0x24c8] ss:$648 sps:$4 sm:$0xff]   ;;  %v17191_v22 = vld [vmem:[%s18434_s4 + $0x164] ss:$648 sps:$4 sm:$0xff]  }
 0x553   : > { %12081 = vmatprep.subr.bf16.mxu1 %v17134_v23  ;;  %v17194_v23 = vld [vmem:[%s18434_s4 + $0x16c] ss:$648 sps:$4 sm:$0xff]  }
 0x558   : > { %11967 = vmatmul.mubr.bf16.vlgmr.msra.gmra.mrb[160].mxu0 %v17123_v24  ;;  %v17183_v24 = vld [vmem:[%s21177_s0 + $0x150] ss:$648 sps:$4 sm:$0xff]  }
 0x559   : > { %12016 = vmatmul.mubr.bf16.vlgmr.msra.gmra.mrb[160].mxu1 %v17126_v25  ;;  %12033 = vmatpush1.bf16.xpose.msra.mxu0 %v17129_v26  ;;  %v17186_v25 = vld [vmem:[%s21177_s0 + $0x158] ss:$648 sps:$4 sm:$0xff]  }
 0x55a   : > { %12082 = vmatpush1.bf16.xpose.msra.mxu1 %v17132_v27  ;;  %11974 = vmatprep.mubr.bf16.mxu0 %v17135_v28  ;;  %v17189_v26 = vld [vmem:[%s18434_s4 + $0x160] ss:$648 sps:$4 sm:$0xff]   ;;  %v17195_v28 = vld [vmem:[%s21177_s0 + $0x664] ss:$648 sps:$4 sm:$0xff]  }
 0x55b   : > { %12034 = vmatprep.subr.bf16.mxu0 %v17140_v29  ;;  %12083 = vmatprep.subr.bf16.mxu1 %v17143_v30  ;;  %v17192_v27 = vld [vmem:[%s18434_s4 + $0x168] ss:$648 sps:$4 sm:$0xff]   ;;  %v17200_v29 = vld [vmem:[%s18434_s4 + $0x674] ss:$648 sps:$4 sm:$0xff]  }
 0x55c   : > { %12023 = vmatprep.mubr.bf16.mxu1 %v17144_v31  ;;  %v17203_v30 = vld [vmem:[%s18434_s4 + $0x67c] ss:$648 sps:$4 sm:$0xff]   ;;  %v17204_v31 = vld [vmem:[%s21177_s0 + $0x66c] ss:$648 sps:$4 sm:$0xff]  }
 0x560   : > { %11975 = vmatmul.mubr.bf16.gmra.mrb[164].mxu0 %v17137_v32  ;;  %v17197_v32 = vld [vmem:[%s21177_s0 + $0x660] ss:$648 sps:$4 sm:$0xff]  }
 0x561   : > { %12024 = vmatmul.mubr.bf16.gmra.mrb[164].mxu1 %v17146_v33  ;;  %12035 = vmatpush1.bf16.xpose.msra.mxu0 %v17138_v34  ;;  %v17206_v33 = vld [vmem:[%s21177_s0 + $0x668] ss:$648 sps:$4 sm:$0xff]  }
 0x562   : > { %12084 = vmatpush1.bf16.xpose.msra.mxu1 %v17141_v35  ;;  %12036 = vmatprep.subr.bf16.mxu0 %v17149_v36  ;;  %v17198_v34 = vld [vmem:[%s18434_s4 + $0x670] ss:$648 sps:$4 sm:$0xff]   ;;  %v17209_v36 = vld [vmem:[%s18434_s4 + $0xb84] ss:$648 sps:$4 sm:$0xff]  }
 0x563   : > { %12085 = vmatprep.subr.bf16.mxu1 %v17152_v37  ;;  %12064 = vmatprep.mubr.bf16.mxu0 %v17185_v38  ;;  %v17201_v35 = vld [vmem:[%s18434_s4 + $0x678] ss:$648 sps:$4 sm:$0xff]   ;;  %v17212_v37 = vld [vmem:[%s18434_s4 + $0xb8c] ss:$648 sps:$4 sm:$0xff]  }
 0x564   : > { %12113 = vmatprep.mubr.bf16.mxu1 %v17188_v39  ;;  %v17245_v38 = vld [vmem:[%s21177_s0 + $0x164] ss:$648 sps:$4 sm:$0xff]  }
 0x565   : > { %v17248_v39 = vld [vmem:[%s21177_s0 + $0x16c] ss:$648 sps:$4 sm:$0xff]  }
 0x569   : > { %12037 = vmatpush1.bf16.xpose.msra.mxu0 %v17147_v40  ;;  %v17207_v40 = vld [vmem:[%s18434_s4 + $0xb80] ss:$648 sps:$4 sm:$0xff]  }
 0x56a   : > { %12086 = vmatpush1.bf16.xpose.msra.mxu1 %v17150_v41  ;;  %12038 = vmatprep.subr.bf16.mxu0 %v17155_v42  ;;  %v17210_v41 = vld [vmem:[%s18434_s4 + $0xb88] ss:$648 sps:$4 sm:$0xff]   ;;  %v17215_v42 = vld [vmem:[%s18434_s4 + $0x1094] ss:$648 sps:$4 sm:$0xff]  }
 0x56b   : > { %12087 = vmatprep.subr.bf16.mxu1 %v17158_v43  ;;  %v11674_v44 = vpop.f32.mrb[136].mxu0  ;;  %v17218_v43 = vld [vmem:[%s18434_s4 + $0x109c] ss:$648 sps:$4 sm:$0xff]  }
 0x56c   : > { %v11723_v45 = vpop.f32.mrb[136].mxu1  ;;  %v11675_v46 = vadd.f32 %v11674_v44, %v19761_v55  ;;  %v11676_v47 = vpop.f32.mrb[137].mxu0 }
 0x56d   : > { %v11725_v48 = vpop.f32.mrb[137].mxu1  ;;  %v11677_v49 = vpop.f32.mrb[138].mxu0 }
 0x56e   : > { %v11726_v50 = vpop.f32.mrb[138].mxu1  ;;  %v19829_v56 = vadd.f32 %v11723_v45, %v11675_v46  ;;  %v11678_v58 = vadd.f32 %v11677_v49, %v19766_v57  ;;  %v11679_v59 = vpop.f32.mrb[139].mxu0 }
 0x56f   : > { %v11728_v60 = vpop.f32.mrb[139].mxu1 }
 0x570   : > { %v19834_v61 = vadd.f32 %v11726_v50, %v11678_v58 }
 0x571   : > { %12039 = vmatpush1.bf16.xpose.msra.mxu0 %v17153_v51  ;;  %v17213_v51 = vld [vmem:[%s18434_s4 + $0x1090] ss:$648 sps:$4 sm:$0xff]  }
 0x572   : > { %12088 = vmatpush1.bf16.xpose.msra.mxu1 %v17156_v53  ;;  %12040 = vmatprep.subr.bf16.mxu0 %v17161_v52  ;;  %v17216_v53 = vld [vmem:[%s18434_s4 + $0x1098] ss:$648 sps:$4 sm:$0xff]  }
 0x573   : > { %12089 = vmatprep.subr.bf16.mxu1 %v17164_v54  ;;  %v11682_v55 = vpop.f32.mrb[140].mxu0  ;;  %v17221_v54 = vld [vmem:[%s18434_s4 + $0x15a4] ss:$648 sps:$4 sm:$0xff]  }
 0x574   : > { %v11731_v62 = vpop.f32.mrb[140].mxu1  ;;  %v11683_v63 = vadd.f32 %v11682_v55, %v19772_v13  ;;  %v11684_v0 = vpop.f32.mrb[141].mxu0  ;;  %v17224_v55 = vld [vmem:[%s18434_s4 + $0x15ac] ss:$648 sps:$4 sm:$0xff]  }
 0x575   : > { %v11733_v57 = vpop.f32.mrb[141].mxu1  ;;  %v11685_v1 = vpop.f32.mrb[142].mxu0 }
 0x576   : > { %v11734_v3 = vpop.f32.mrb[142].mxu1  ;;  %v11686_v6 = vadd.f32 %v11685_v1, %v19776_v10  ;;  %v19840_v14 = vadd.f32 %v11731_v62, %v11683_v63  ;;  %v11687_v7 = vpop.f32.mrb[143].mxu0  ;;  %v17173_v10 = vld [vmem:[%s18434_s4 + $0x1fb4] ss:$648 sps:$4 sm:$0xff]  }
 0x577   : > { %v11736_v13 = vpop.f32.mrb[143].mxu1  ;;  %v17230_v7 = vld [vmem:[%s18434_s4 + $0x1abc] ss:$648 sps:$4 sm:$0xff]  }
 0x578   : > { %v19844_v11 = vadd.f32 %v11734_v3, %v11686_v6 }
 0x579   : > { %12041 = vmatpush1.bf16.xpose.msra.mxu0 %v17159_v4  ;;  %v17219_v4 = vld [vmem:[%s18434_s4 + $0x15a0] ss:$648 sps:$4 sm:$0xff]  }
 0x57a   : > { %12090 = vmatpush1.bf16.xpose.msra.mxu1 %v17162_v5  ;;  %12042 = vmatprep.subr.bf16.mxu0 %v17167_v9  ;;  %v17222_v5 = vld [vmem:[%s18434_s4 + $0x15a8] ss:$648 sps:$4 sm:$0xff]  }
 0x57b   : > { %12091 = vmatprep.subr.bf16.mxu1 %v17170_v2  ;;  %v17227_v2 = vld [vmem:[%s18434_s4 + $0x1ab4] ss:$648 sps:$4 sm:$0xff]  }
 0x581   : > { %12043 = vmatpush1.bf16.xpose.msra.mxu0 %v17165_v12 }
 0x582   : > { %12092 = vmatpush1.bf16.xpose.msra.mxu1 %v17168_v8  ;;  %12044 = vmatprep.subr.bf16.mxu0 %v17173_v10  ;;  %v17225_v8 = vld [vmem:[%s18434_s4 + $0x1ab0] ss:$648 sps:$4 sm:$0xff]  }
 0x583   : > { %12093 = vmatprep.subr.bf16.mxu1 %v17176_v15  ;;  %v17228_v10 = vld [vmem:[%s18434_s4 + $0x1ab8] ss:$648 sps:$4 sm:$0xff]   ;;  %v17236_v15 = vld [vmem:[%s18434_s4 + $0x1fcc] ss:$648 sps:$4 sm:$0xff]  }
 0x589   : > { %12045 = vmatpush1.bf16.xpose.msra.mxu0 %v17171_v16  ;;  %v17231_v16 = vld [vmem:[%s18434_s4 + $0x1fc0] ss:$648 sps:$4 sm:$0xff]  }
 0x58a   : > { %12094 = vmatpush1.bf16.xpose.msra.mxu1 %v17174_v17  ;;  %12046 = vmatprep.subr.bf16.mxu0 %v17179_v18  ;;  %v17234_v17 = vld [vmem:[%s18434_s4 + $0x1fc8] ss:$648 sps:$4 sm:$0xff]   ;;  %v17239_v18 = vld [vmem:[%s18434_s4 + $0x24d4] ss:$648 sps:$4 sm:$0xff]  }
 0x58b   : > { %12095 = vmatprep.subr.bf16.mxu1 %v17182_v19  ;;  %v17242_v19 = vld [vmem:[%s18434_s4 + $0x24dc] ss:$648 sps:$4 sm:$0xff]  }
 0x591   : > { %12047 = vmatpush1.bf16.xpose.msra.mxu0 %v17177_v20  ;;  %v17237_v20 = vld [vmem:[%s18434_s4 + $0x24d0] ss:$648 sps:$4 sm:$0xff]  }
 0x592   : > { %12096 = vmatpush1.bf16.xpose.msra.mxu1 %v17180_v21  ;;  %12130 = vmatprep.subr.bf16.mxu0 %v17191_v22  ;;  %v17240_v21 = vld [vmem:[%s18434_s4 + $0x24d8] ss:$648 sps:$4 sm:$0xff]   ;;  %v17251_v22 = vld [vmem:[%s18434_s4 + $0x174] ss:$648 sps:$4 sm:$0xff]  }
 0x593   : > { %12179 = vmatprep.subr.bf16.mxu1 %v17194_v23  ;;  %v17254_v23 = vld [vmem:[%s18434_s4 + $0x17c] ss:$648 sps:$4 sm:$0xff]  }
 0x598   : > { %12065 = vmatmul.mubr.bf16.vlgmr.msra.gmra.mrb[168].mxu0 %v17183_v24  ;;  %v17243_v24 = vld [vmem:[%s21177_s0 + $0x160] ss:$648 sps:$4 sm:$0xff]  }
 0x599   : > { %12114 = vmatmul.mubr.bf16.vlgmr.msra.gmra.mrb[168].mxu1 %v17186_v25  ;;  %12131 = vmatpush1.bf16.xpose.msra.mxu0 %v17189_v26  ;;  %v17246_v25 = vld [vmem:[%s21177_s0 + $0x168] ss:$648 sps:$4 sm:$0xff]  }
 0x59a   : > { %12180 = vmatpush1.bf16.xpose.msra.mxu1 %v17192_v27  ;;  %12072 = vmatprep.mubr.bf16.mxu0 %v17195_v28  ;;  %v17249_v26 = vld [vmem:[%s18434_s4 + $0x170] ss:$648 sps:$4 sm:$0xff]   ;;  %v17255_v28 = vld [vmem:[%s21177_s0 + $0x674] ss:$648 sps:$4 sm:$0xff]  }
 0x59b   : > { %12132 = vmatprep.subr.bf16.mxu0 %v17200_v29  ;;  %12181 = vmatprep.subr.bf16.mxu1 %v17203_v30  ;;  %v17252_v27 = vld [vmem:[%s18434_s4 + $0x178] ss:$648 sps:$4 sm:$0xff]   ;;  %v17260_v29 = vld [vmem:[%s18434_s4 + $0x684] ss:$648 sps:$4 sm:$0xff]  }
 0x59c   : > { %12121 = vmatprep.mubr.bf16.mxu1 %v17204_v31  ;;  %v17263_v30 = vld [vmem:[%s18434_s4 + $0x68c] ss:$648 sps:$4 sm:$0xff]   ;;  %v17264_v31 = vld [vmem:[%s21177_s0 + $0x67c] ss:$648 sps:$4 sm:$0xff]  }
 0x5a0   : > { %12073 = vmatmul.mubr.bf16.gmra.mrb[172].mxu0 %v17197_v32  ;;  %v17257_v32 = vld [vmem:[%s21177_s0 + $0x670] ss:$648 sps:$4 sm:$0xff]  }
 0x5a1   : > { %12122 = vmatmul.mubr.bf16.gmra.mrb[172].mxu1 %v17206_v33  ;;  %12133 = vmatpush1.bf16.xpose.msra.mxu0 %v17198_v34  ;;  %v17266_v33 = vld [vmem:[%s21177_s0 + $0x678] ss:$648 sps:$4 sm:$0xff]  }
 0x5a2   : > { %12182 = vmatpush1.bf16.xpose.msra.mxu1 %v17201_v35  ;;  %12134 = vmatprep.subr.bf16.mxu0 %v17209_v36  ;;  %v17258_v34 = vld [vmem:[%s18434_s4 + $0x680] ss:$648 sps:$4 sm:$0xff]   ;;  %v17269_v36 = vld [vmem:[%s18434_s4 + $0xb94] ss:$648 sps:$4 sm:$0xff]  }
 0x5a3   : > { %12183 = vmatprep.subr.bf16.mxu1 %v17212_v37  ;;  %12162 = vmatprep.mubr.bf16.mxu0 %v17245_v38  ;;  %v17261_v35 = vld [vmem:[%s18434_s4 + $0x688] ss:$648 sps:$4 sm:$0xff]   ;;  %v17272_v37 = vld [vmem:[%s18434_s4 + $0xb9c] ss:$648 sps:$4 sm:$0xff]  }
 0x5a4   : > { %12211 = vmatprep.mubr.bf16.mxu1 %v17248_v39  ;;  %v17305_v38 = vld [vmem:[%s21177_s0 + $0x174] ss:$648 sps:$4 sm:$0xff]  }
 0x5a5   : > { %v17308_v39 = vld [vmem:[%s21177_s0 + $0x17c] ss:$648 sps:$4 sm:$0xff]  }
 0x5a9   : > { %12135 = vmatpush1.bf16.xpose.msra.mxu0 %v17207_v40  ;;  %v17267_v40 = vld [vmem:[%s18434_s4 + $0xb90] ss:$648 sps:$4 sm:$0xff]  }
 0x5aa   : > { %12184 = vmatpush1.bf16.xpose.msra.mxu1 %v17210_v41  ;;  %12136 = vmatprep.subr.bf16.mxu0 %v17215_v42  ;;  %v17270_v41 = vld [vmem:[%s18434_s4 + $0xb98] ss:$648 sps:$4 sm:$0xff]   ;;  %v17275_v42 = vld [vmem:[%s18434_s4 + $0x10a4] ss:$648 sps:$4 sm:$0xff]  }
 0x5ab   : > { %12185 = vmatprep.subr.bf16.mxu1 %v17218_v43  ;;  %v11772_v44 = vpop.f32.mrb[144].mxu0  ;;  %v17278_v43 = vld [vmem:[%s18434_s4 + $0x10ac] ss:$648 sps:$4 sm:$0xff]  }
 0x5ac   : > { %v11821_v45 = vpop.f32.mrb[144].mxu1  ;;  %v11773_v46 = vadd.f32 %v11772_v44, %v19829_v56  ;;  %v11774_v47 = vpop.f32.mrb[145].mxu0 }
 0x5ad   : > { %v11823_v48 = vpop.f32.mrb[145].mxu1  ;;  %v11775_v49 = vpop.f32.mrb[146].mxu0 }
 0x5ae   : > { %v11824_v50 = vpop.f32.mrb[146].mxu1  ;;  %v19897_v58 = vadd.f32 %v11821_v45, %v11773_v46  ;;  %v11776_v59 = vadd.f32 %v11775_v49, %v19834_v61  ;;  %v11777_v60 = vpop.f32.mrb[147].mxu0 }
 0x5af   : > { %v11826_v52 = vpop.f32.mrb[147].mxu1 }
 0x5b0   : > { %v19902_v62 = vadd.f32 %v11824_v50, %v11776_v59 }
 0x5b1   : > { %12137 = vmatpush1.bf16.xpose.msra.mxu0 %v17213_v51  ;;  %v17273_v51 = vld [vmem:[%s18434_s4 + $0x10a0] ss:$648 sps:$4 sm:$0xff]  }
 0x5b2   : > { %12186 = vmatpush1.bf16.xpose.msra.mxu1 %v17216_v53  ;;  %12138 = vmatprep.subr.bf16.mxu0 %v17221_v54  ;;  %v17276_v53 = vld [vmem:[%s18434_s4 + $0x10a8] ss:$648 sps:$4 sm:$0xff]  }
 0x5b3   : > { %12187 = vmatprep.subr.bf16.mxu1 %v17224_v55  ;;  %v11780_v56 = vpop.f32.mrb[148].mxu0  ;;  %v17281_v55 = vld [vmem:[%s18434_s4 + $0x15b4] ss:$648 sps:$4 sm:$0xff]  }
 0x5b4   : > { %v11829_v63 = vpop.f32.mrb[148].mxu1  ;;  %v11781_v0 = vadd.f32 %v11780_v56, %v19840_v14  ;;  %v11782_v57 = vpop.f32.mrb[149].mxu0  ;;  %v17284_v56 = vld [vmem:[%s18434_s4 + $0x15bc] ss:$648 sps:$4 sm:$0xff]  }
 0x5b5   : > { %v11831_v61 = vpop.f32.mrb[149].mxu1  ;;  %v11783_v1 = vpop.f32.mrb[150].mxu0 }
 0x5b6   : > { %v11832_v3 = vpop.f32.mrb[150].mxu1  ;;  %v11784_v6 = vadd.f32 %v11783_v1, %v19844_v11  ;;  %v19908_v9 = vadd.f32 %v11829_v63, %v11781_v0  ;;  %v11785_v13 = vpop.f32.mrb[151].mxu0  ;;  %v17233_v11 = vld [vmem:[%s18434_s4 + $0x1fc4] ss:$648 sps:$4 sm:$0xff]  }
 0x5b7   : > { %v11834_v14 = vpop.f32.mrb[151].mxu1  ;;  %v17290_v13 = vld [vmem:[%s18434_s4 + $0x1acc] ss:$648 sps:$4 sm:$0xff]  }
 0x5b8   : > { %v19912_v12 = vadd.f32 %v11832_v3, %v11784_v6 }
 0x5b9   : > { %12139 = vmatpush1.bf16.xpose.msra.mxu0 %v17219_v4  ;;  %v17279_v4 = vld [vmem:[%s18434_s4 + $0x15b0] ss:$648 sps:$4 sm:$0xff]  }
 0x5ba   : > { %12188 = vmatpush1.bf16.xpose.msra.mxu1 %v17222_v5  ;;  %12140 = vmatprep.subr.bf16.mxu0 %v17227_v2  ;;  %v17282_v5 = vld [vmem:[%s18434_s4 + $0x15b8] ss:$648 sps:$4 sm:$0xff]  }
 0x5bb   : > { %12189 = vmatprep.subr.bf16.mxu1 %v17230_v7  ;;  %v17287_v7 = vld [vmem:[%s18434_s4 + $0x1ac4] ss:$648 sps:$4 sm:$0xff]  }
 0x5c1   : > { %12141 = vmatpush1.bf16.xpose.msra.mxu0 %v17225_v8 }
 0x5c2   : > { %12190 = vmatpush1.bf16.xpose.msra.mxu1 %v17228_v10  ;;  %12142 = vmatprep.subr.bf16.mxu0 %v17233_v11  ;;  %v17285_v10 = vld [vmem:[%s18434_s4 + $0x1ac0] ss:$648 sps:$4 sm:$0xff]  }
 0x5c3   : > { %12191 = vmatprep.subr.bf16.mxu1 %v17236_v15  ;;  %v17288_v11 = vld [vmem:[%s18434_s4 + $0x1ac8] ss:$648 sps:$4 sm:$0xff]   ;;  %v17296_v15 = vld [vmem:[%s18434_s4 + $0x1fdc] ss:$648 sps:$4 sm:$0xff]  }
 0x5c9   : > { %12143 = vmatpush1.bf16.xpose.msra.mxu0 %v17231_v16  ;;  %v17291_v16 = vld [vmem:[%s18434_s4 + $0x1fd0] ss:$648 sps:$4 sm:$0xff]  }
 0x5ca   : > { %12192 = vmatpush1.bf16.xpose.msra.mxu1 %v17234_v17  ;;  %12144 = vmatprep.subr.bf16.mxu0 %v17239_v18  ;;  %v17294_v17 = vld [vmem:[%s18434_s4 + $0x1fd8] ss:$648 sps:$4 sm:$0xff]   ;;  %v17299_v18 = vld [vmem:[%s18434_s4 + $0x24e4] ss:$648 sps:$4 sm:$0xff]  }
 0x5cb   : > { %12193 = vmatprep.subr.bf16.mxu1 %v17242_v19  ;;  %v17302_v19 = vld [vmem:[%s18434_s4 + $0x24ec] ss:$648 sps:$4 sm:$0xff]  }
 0x5d1   : > { %12145 = vmatpush1.bf16.xpose.msra.mxu0 %v17237_v20  ;;  %v17297_v20 = vld [vmem:[%s18434_s4 + $0x24e0] ss:$648 sps:$4 sm:$0xff]  }
 0x5d2   : > { %12194 = vmatpush1.bf16.xpose.msra.mxu1 %v17240_v21  ;;  %12228 = vmatprep.subr.bf16.mxu0 %v17251_v22  ;;  %v17300_v21 = vld [vmem:[%s18434_s4 + $0x24e8] ss:$648 sps:$4 sm:$0xff]   ;;  %v17311_v22 = vld [vmem:[%s18434_s4 + $0x184] ss:$648 sps:$4 sm:$0xff]  }
 0x5d3   : > { %12277 = vmatprep.subr.bf16.mxu1 %v17254_v23  ;;  %v17314_v23 = vld [vmem:[%s18434_s4 + $0x18c] ss:$648 sps:$4 sm:$0xff]  }
 0x5d8   : > { %12163 = vmatmul.mubr.bf16.vlgmr.msra.gmra.mrb[176].mxu0 %v17243_v24  ;;  %v17303_v24 = vld [vmem:[%s21177_s0 + $0x170] ss:$648 sps:$4 sm:$0xff]  }
 0x5d9   : > { %12212 = vmatmul.mubr.bf16.vlgmr.msra.gmra.mrb[176].mxu1 %v17246_v25  ;;  %12229 = vmatpush1.bf16.xpose.msra.mxu0 %v17249_v26  ;;  %v17306_v25 = vld [vmem:[%s21177_s0 + $0x178] ss:$648 sps:$4 sm:$0xff]  }
 0x5da   : > { %12278 = vmatpush1.bf16.xpose.msra.mxu1 %v17252_v27  ;;  %12170 = vmatprep.mubr.bf16.mxu0 %v17255_v28  ;;  %v17309_v26 = vld [vmem:[%s18434_s4 + $0x180] ss:$648 sps:$4 sm:$0xff]   ;;  %v17315_v28 = vld [vmem:[%s21177_s0 + $0x684] ss:$648 sps:$4 sm:$0xff]  }
 0x5db   : > { %12230 = vmatprep.subr.bf16.mxu0 %v17260_v29  ;;  %12279 = vmatprep.subr.bf16.mxu1 %v17263_v30  ;;  %v17312_v27 = vld [vmem:[%s18434_s4 + $0x188] ss:$648 sps:$4 sm:$0xff]   ;;  %v17320_v29 = vld [vmem:[%s18434_s4 + $0x694] ss:$648 sps:$4 sm:$0xff]  }
 0x5dc   : > { %12219 = vmatprep.mubr.bf16.mxu1 %v17264_v31  ;;  %v17323_v30 = vld [vmem:[%s18434_s4 + $0x69c] ss:$648 sps:$4 sm:$0xff]   ;;  %v17324_v31 = vld [vmem:[%s21177_s0 + $0x68c] ss:$648 sps:$4 sm:$0xff]  }
 0x5e0   : > { %12171 = vmatmul.mubr.bf16.gmra.mrb[180].mxu0 %v17257_v32  ;;  %v17317_v32 = vld [vmem:[%s21177_s0 + $0x680] ss:$648 sps:$4 sm:$0xff]  }
 0x5e1   : > { %12220 = vmatmul.mubr.bf16.gmra.mrb[180].mxu1 %v17266_v33  ;;  %12231 = vmatpush1.bf16.xpose.msra.mxu0 %v17258_v34  ;;  %v17326_v33 = vld [vmem:[%s21177_s0 + $0x688] ss:$648 sps:$4 sm:$0xff]  }
 0x5e2   : > { %12280 = vmatpush1.bf16.xpose.msra.mxu1 %v17261_v35  ;;  %12232 = vmatprep.subr.bf16.mxu0 %v17269_v36  ;;  %v17318_v34 = vld [vmem:[%s18434_s4 + $0x690] ss:$648 sps:$4 sm:$0xff]   ;;  %v17329_v36 = vld [vmem:[%s18434_s4 + $0xba4] ss:$648 sps:$4 sm:$0xff]  }
 0x5e3   : > { %12281 = vmatprep.subr.bf16.mxu1 %v17272_v37  ;;  %12260 = vmatprep.mubr.bf16.mxu0 %v17305_v38  ;;  %v17321_v35 = vld [vmem:[%s18434_s4 + $0x698] ss:$648 sps:$4 sm:$0xff]   ;;  %v17332_v37 = vld [vmem:[%s18434_s4 + $0xbac] ss:$648 sps:$4 sm:$0xff]  }
 0x5e4   : > { %12309 = vmatprep.mubr.bf16.mxu1 %v17308_v39  ;;  %v17365_v38 = vld [vmem:[%s21177_s0 + $0x184] ss:$648 sps:$4 sm:$0xff]  }
 0x5e5   : > { %v17368_v39 = vld [vmem:[%s21177_s0 + $0x18c] ss:$648 sps:$4 sm:$0xff]  }
 0x5e9   : > { %12233 = vmatpush1.bf16.xpose.msra.mxu0 %v17267_v40  ;;  %v17327_v40 = vld [vmem:[%s18434_s4 + $0xba0] ss:$648 sps:$4 sm:$0xff]  }
 0x5ea   : > { %12282 = vmatpush1.bf16.xpose.msra.mxu1 %v17270_v41  ;;  %12234 = vmatprep.subr.bf16.mxu0 %v17275_v42  ;;  %v17330_v41 = vld [vmem:[%s18434_s4 + $0xba8] ss:$648 sps:$4 sm:$0xff]   ;;  %v17335_v42 = vld [vmem:[%s18434_s4 + $0x10b4] ss:$648 sps:$4 sm:$0xff]  }
 0x5eb   : > { %12283 = vmatprep.subr.bf16.mxu1 %v17278_v43  ;;  %v11870_v44 = vpop.f32.mrb[152].mxu0  ;;  %v17338_v43 = vld [vmem:[%s18434_s4 + $0x10bc] ss:$648 sps:$4 sm:$0xff]  }
 0x5ec   : > { %v11919_v45 = vpop.f32.mrb[152].mxu1  ;;  %v11871_v46 = vadd.f32 %v11870_v44, %v19897_v58  ;;  %v11872_v47 = vpop.f32.mrb[153].mxu0 }
 0x5ed   : > { %v11921_v48 = vpop.f32.mrb[153].mxu1  ;;  %v11873_v49 = vpop.f32.mrb[154].mxu0 }
 0x5ee   : > { %v11922_v50 = vpop.f32.mrb[154].mxu1  ;;  %v19965_v59 = vadd.f32 %v11919_v45, %v11871_v46  ;;  %v11874_v60 = vadd.f32 %v11873_v49, %v19902_v62  ;;  %v11875_v52 = vpop.f32.mrb[155].mxu0 }
 0x5ef   : > { %v11924_v54 = vpop.f32.mrb[155].mxu1 }
 0x5f0   : > { %v19970_v63 = vadd.f32 %v11922_v50, %v11874_v60 }
 0x5f1   : > { %12235 = vmatpush1.bf16.xpose.msra.mxu0 %v17273_v51  ;;  %v17333_v51 = vld [vmem:[%s18434_s4 + $0x10b0] ss:$648 sps:$4 sm:$0xff]  }
 0x5f2   : > { %12284 = vmatpush1.bf16.xpose.msra.mxu1 %v17276_v53  ;;  %12236 = vmatprep.subr.bf16.mxu0 %v17281_v55  ;;  %v17336_v53 = vld [vmem:[%s18434_s4 + $0x10b8] ss:$648 sps:$4 sm:$0xff]  }
 0x5f3   : > { %12285 = vmatprep.subr.bf16.mxu1 %v17284_v56  ;;  %v11878_v58 = vpop.f32.mrb[156].mxu0  ;;  %v17341_v56 = vld [vmem:[%s18434_s4 + $0x15c4] ss:$648 sps:$4 sm:$0xff]  }
 0x5f4   : > { %v11927_v0 = vpop.f32.mrb[156].mxu1  ;;  %v11879_v57 = vadd.f32 %v11878_v58, %v19908_v9  ;;  %v11880_v61 = vpop.f32.mrb[157].mxu0  ;;  %v17344_v58 = vld [vmem:[%s18434_s4 + $0x15cc] ss:$648 sps:$4 sm:$0xff]  }
 0x5f5   : > { %v11929_v62 = vpop.f32.mrb[157].mxu1  ;;  %v11881_v1 = vpop.f32.mrb[158].mxu0 }
 0x5f6   : > { %v11930_v3 = vpop.f32.mrb[158].mxu1  ;;  %v11882_v6 = vadd.f32 %v11881_v1, %v19912_v12  ;;  %v19976_v2 = vadd.f32 %v11927_v0, %v11879_v57  ;;  %v11883_v14 = vpop.f32.mrb[159].mxu0  ;;  %v17293_v12 = vld [vmem:[%s18434_s4 + $0x1fd4] ss:$648 sps:$4 sm:$0xff]  }
 0x5f7   : > { %v11932_v9 = vpop.f32.mrb[159].mxu1  ;;  %v17350_v14 = vld [vmem:[%s18434_s4 + $0x1adc] ss:$648 sps:$4 sm:$0xff]  }
 0x5f8   : > { %v19980_v8 = vadd.f32 %v11930_v3, %v11882_v6 }
 0x5f9   : > { %12237 = vmatpush1.bf16.xpose.msra.mxu0 %v17279_v4  ;;  %v17339_v4 = vld [vmem:[%s18434_s4 + $0x15c0] ss:$648 sps:$4 sm:$0xff]  }
 0x5fa   : > { %12286 = vmatpush1.bf16.xpose.msra.mxu1 %v17282_v5  ;;  %12238 = vmatprep.subr.bf16.mxu0 %v17287_v7  ;;  %v17342_v5 = vld [vmem:[%s18434_s4 + $0x15c8] ss:$648 sps:$4 sm:$0xff]  }
 0x5fb   : > { %12287 = vmatprep.subr.bf16.mxu1 %v17290_v13  ;;  %v17347_v13 = vld [vmem:[%s18434_s4 + $0x1ad4] ss:$648 sps:$4 sm:$0xff]  }
 0x601   : > { %12239 = vmatpush1.bf16.xpose.msra.mxu0 %v17285_v10 }
 0x602   : > { %12288 = vmatpush1.bf16.xpose.msra.mxu1 %v17288_v11  ;;  %12240 = vmatprep.subr.bf16.mxu0 %v17293_v12  ;;  %v17345_v11 = vld [vmem:[%s18434_s4 + $0x1ad0] ss:$648 sps:$4 sm:$0xff]  }
 0x603   : > { %12289 = vmatprep.subr.bf16.mxu1 %v17296_v15  ;;  %v17348_v12 = vld [vmem:[%s18434_s4 + $0x1ad8] ss:$648 sps:$4 sm:$0xff]   ;;  %v17356_v15 = vld [vmem:[%s18434_s4 + $0x1fec] ss:$648 sps:$4 sm:$0xff]  }
 0x609   : > { %12241 = vmatpush1.bf16.xpose.msra.mxu0 %v17291_v16  ;;  %v17351_v16 = vld [vmem:[%s18434_s4 + $0x1fe0] ss:$648 sps:$4 sm:$0xff]  }
 0x60a   : > { %12290 = vmatpush1.bf16.xpose.msra.mxu1 %v17294_v17  ;;  %12242 = vmatprep.subr.bf16.mxu0 %v17299_v18  ;;  %v17354_v17 = vld [vmem:[%s18434_s4 + $0x1fe8] ss:$648 sps:$4 sm:$0xff]   ;;  %v17359_v18 = vld [vmem:[%s18434_s4 + $0x24f4] ss:$648 sps:$4 sm:$0xff]  }
 0x60b   : > { %12291 = vmatprep.subr.bf16.mxu1 %v17302_v19  ;;  %v17362_v19 = vld [vmem:[%s18434_s4 + $0x24fc] ss:$648 sps:$4 sm:$0xff]  }
 0x611   : > { %12243 = vmatpush1.bf16.xpose.msra.mxu0 %v17297_v20  ;;  %v17357_v20 = vld [vmem:[%s18434_s4 + $0x24f0] ss:$648 sps:$4 sm:$0xff]  }
 0x612   : > { %12292 = vmatpush1.bf16.xpose.msra.mxu1 %v17300_v21  ;;  %12326 = vmatprep.subr.bf16.mxu0 %v17311_v22  ;;  %v17360_v21 = vld [vmem:[%s18434_s4 + $0x24f8] ss:$648 sps:$4 sm:$0xff]   ;;  %v17371_v22 = vld [vmem:[%s18434_s4 + $0x194] ss:$648 sps:$4 sm:$0xff]  }
 0x613   : > { %12375 = vmatprep.subr.bf16.mxu1 %v17314_v23  ;;  %v17374_v23 = vld [vmem:[%s18434_s4 + $0x19c] ss:$648 sps:$4 sm:$0xff]  }
 0x618   : > { %12261 = vmatmul.mubr.bf16.vlgmr.msra.gmra.mrb[184].mxu0 %v17303_v24  ;;  %v17363_v24 = vld [vmem:[%s21177_s0 + $0x180] ss:$648 sps:$4 sm:$0xff]  }
 0x619   : > { %12310 = vmatmul.mubr.bf16.vlgmr.msra.gmra.mrb[184].mxu1 %v17306_v25  ;;  %12327 = vmatpush1.bf16.xpose.msra.mxu0 %v17309_v26  ;;  %v17366_v25 = vld [vmem:[%s21177_s0 + $0x188] ss:$648 sps:$4 sm:$0xff]  }
 0x61a   : > { %12376 = vmatpush1.bf16.xpose.msra.mxu1 %v17312_v27  ;;  %12268 = vmatprep.mubr.bf16.mxu0 %v17315_v28  ;;  %v17369_v26 = vld [vmem:[%s18434_s4 + $0x190] ss:$648 sps:$4 sm:$0xff]   ;;  %v17375_v28 = vld [vmem:[%s21177_s0 + $0x694] ss:$648 sps:$4 sm:$0xff]  }
 0x61b   : > { %12328 = vmatprep.subr.bf16.mxu0 %v17320_v29  ;;  %12377 = vmatprep.subr.bf16.mxu1 %v17323_v30  ;;  %v17372_v27 = vld [vmem:[%s18434_s4 + $0x198] ss:$648 sps:$4 sm:$0xff]   ;;  %v17380_v29 = vld [vmem:[%s18434_s4 + $0x6a4] ss:$648 sps:$4 sm:$0xff]  }
 0x61c   : > { %12317 = vmatprep.mubr.bf16.mxu1 %v17324_v31  ;;  %v17383_v30 = vld [vmem:[%s18434_s4 + $0x6ac] ss:$648 sps:$4 sm:$0xff]   ;;  %v17384_v31 = vld [vmem:[%s21177_s0 + $0x69c] ss:$648 sps:$4 sm:$0xff]  }
 0x620   : > { %12269 = vmatmul.mubr.bf16.gmra.mrb[188].mxu0 %v17317_v32  ;;  %v17377_v32 = vld [vmem:[%s21177_s0 + $0x690] ss:$648 sps:$4 sm:$0xff]  }
 0x621   : > { %12318 = vmatmul.mubr.bf16.gmra.mrb[188].mxu1 %v17326_v33  ;;  %12329 = vmatpush1.bf16.xpose.msra.mxu0 %v17318_v34  ;;  %v17386_v33 = vld [vmem:[%s21177_s0 + $0x698] ss:$648 sps:$4 sm:$0xff]  }
 0x622   : > { %12378 = vmatpush1.bf16.xpose.msra.mxu1 %v17321_v35  ;;  %12330 = vmatprep.subr.bf16.mxu0 %v17329_v36  ;;  %v17378_v34 = vld [vmem:[%s18434_s4 + $0x6a0] ss:$648 sps:$4 sm:$0xff]   ;;  %v17389_v36 = vld [vmem:[%s18434_s4 + $0xbb4] ss:$648 sps:$4 sm:$0xff]  }
 0x623   : > { %12379 = vmatprep.subr.bf16.mxu1 %v17332_v37  ;;  %12358 = vmatprep.mubr.bf16.mxu0 %v17365_v38  ;;  %v17381_v35 = vld [vmem:[%s18434_s4 + $0x6a8] ss:$648 sps:$4 sm:$0xff]   ;;  %v17392_v37 = vld [vmem:[%s18434_s4 + $0xbbc] ss:$648 sps:$4 sm:$0xff]  }
 0x624   : > { %12407 = vmatprep.mubr.bf16.mxu1 %v17368_v39  ;;  %v17425_v38 = vld [vmem:[%s21177_s0 + $0x194] ss:$648 sps:$4 sm:$0xff]  }
 0x625   : > { %v17428_v39 = vld [vmem:[%s21177_s0 + $0x19c] ss:$648 sps:$4 sm:$0xff]  }
 0x629   : > { %12331 = vmatpush1.bf16.xpose.msra.mxu0 %v17327_v40  ;;  %v17387_v40 = vld [vmem:[%s18434_s4 + $0xbb0] ss:$648 sps:$4 sm:$0xff]  }
 0x62a   : > { %12380 = vmatpush1.bf16.xpose.msra.mxu1 %v17330_v41  ;;  %12332 = vmatprep.subr.bf16.mxu0 %v17335_v42  ;;  %v17390_v41 = vld [vmem:[%s18434_s4 + $0xbb8] ss:$648 sps:$4 sm:$0xff]   ;;  %v17395_v42 = vld [vmem:[%s18434_s4 + $0x10c4] ss:$648 sps:$4 sm:$0xff]  }
 0x62b   : > { %12381 = vmatprep.subr.bf16.mxu1 %v17338_v43  ;;  %v11968_v44 = vpop.f32.mrb[160].mxu0  ;;  %v17398_v43 = vld [vmem:[%s18434_s4 + $0x10cc] ss:$648 sps:$4 sm:$0xff]  }
 0x62c   : > { %v12017_v45 = vpop.f32.mrb[160].mxu1  ;;  %v11969_v46 = vadd.f32 %v11968_v44, %v19965_v59  ;;  %v11970_v47 = vpop.f32.mrb[161].mxu0 }
 0x62d   : > { %v12019_v48 = vpop.f32.mrb[161].mxu1  ;;  %v11971_v49 = vpop.f32.mrb[162].mxu0 }
 0x62e   : > { %v12020_v50 = vpop.f32.mrb[162].mxu1  ;;  %v20033_v60 = vadd.f32 %v12017_v45, %v11969_v46  ;;  %v11972_v52 = vadd.f32 %v11971_v49, %v19970_v63  ;;  %v11973_v54 = vpop.f32.mrb[163].mxu0 }
 0x62f   : > { %v12022_v55 = vpop.f32.mrb[163].mxu1 }
 0x630   : > { %v20038_v0 = vadd.f32 %v12020_v50, %v11972_v52 }
 0x631   : > { %12333 = vmatpush1.bf16.xpose.msra.mxu0 %v17333_v51  ;;  %v17393_v51 = vld [vmem:[%s18434_s4 + $0x10c0] ss:$648 sps:$4 sm:$0xff]  }
 0x632   : > { %12382 = vmatpush1.bf16.xpose.msra.mxu1 %v17336_v53  ;;  %12334 = vmatprep.subr.bf16.mxu0 %v17341_v56  ;;  %v17396_v53 = vld [vmem:[%s18434_s4 + $0x10c8] ss:$648 sps:$4 sm:$0xff]  }
 0x633   : > { %12383 = vmatprep.subr.bf16.mxu1 %v17344_v58  ;;  %v11976_v59 = vpop.f32.mrb[164].mxu0  ;;  %v17401_v58 = vld [vmem:[%s18434_s4 + $0x15d4] ss:$648 sps:$4 sm:$0xff]  }
 0x634   : > { %v12025_v57 = vpop.f32.mrb[164].mxu1  ;;  %v11977_v61 = vadd.f32 %v11976_v59, %v19976_v2  ;;  %v11978_v62 = vpop.f32.mrb[165].mxu0  ;;  %v17404_v59 = vld [vmem:[%s18434_s4 + $0x15dc] ss:$648 sps:$4 sm:$0xff]  }
 0x635   : > { %v12027_v63 = vpop.f32.mrb[165].mxu1  ;;  %v11979_v1 = vpop.f32.mrb[166].mxu0 }
 0x636   : > { %v12028_v3 = vpop.f32.mrb[166].mxu1  ;;  %v11980_v6 = vadd.f32 %v11979_v1, %v19980_v8  ;;  %v20044_v7 = vadd.f32 %v12025_v57, %v11977_v61  ;;  %v11981_v9 = vpop.f32.mrb[167].mxu0  ;;  %v17353_v8 = vld [vmem:[%s18434_s4 + $0x1fe4] ss:$648 sps:$4 sm:$0xff]  }
 0x637   : > { %v12030_v2 = vpop.f32.mrb[167].mxu1  ;;  %v17410_v9 = vld [vmem:[%s18434_s4 + $0x1aec] ss:$648 sps:$4 sm:$0xff]  }
 0x638   : > { %v20048_v10 = vadd.f32 %v12028_v3, %v11980_v6 }
 0x639   : > { %12335 = vmatpush1.bf16.xpose.msra.mxu0 %v17339_v4  ;;  %v17399_v4 = vld [vmem:[%s18434_s4 + $0x15d0] ss:$648 sps:$4 sm:$0xff]  }
 0x63a   : > { %12384 = vmatpush1.bf16.xpose.msra.mxu1 %v17342_v5  ;;  %12336 = vmatprep.subr.bf16.mxu0 %v17347_v13  ;;  %v17402_v5 = vld [vmem:[%s18434_s4 + $0x15d8] ss:$648 sps:$4 sm:$0xff]  }
 0x63b   : > { %12385 = vmatprep.subr.bf16.mxu1 %v17350_v14  ;;  %v17407_v14 = vld [vmem:[%s18434_s4 + $0x1ae4] ss:$648 sps:$4 sm:$0xff]  }
 0x641   : > { %12337 = vmatpush1.bf16.xpose.msra.mxu0 %v17345_v11 }
 0x642   : > { %12386 = vmatpush1.bf16.xpose.msra.mxu1 %v17348_v12  ;;  %12338 = vmatprep.subr.bf16.mxu0 %v17353_v8  ;;  %v17405_v12 = vld [vmem:[%s18434_s4 + $0x1ae0] ss:$648 sps:$4 sm:$0xff]  }
 0x643   : > { %12387 = vmatprep.subr.bf16.mxu1 %v17356_v15  ;;  %v17408_v8 = vld [vmem:[%s18434_s4 + $0x1ae8] ss:$648 sps:$4 sm:$0xff]   ;;  %v17416_v15 = vld [vmem:[%s18434_s4 + $0x1ffc] ss:$648 sps:$4 sm:$0xff]  }
 0x649   : > { %12339 = vmatpush1.bf16.xpose.msra.mxu0 %v17351_v16  ;;  %v17411_v16 = vld [vmem:[%s18434_s4 + $0x1ff0] ss:$648 sps:$4 sm:$0xff]  }
 0x64a   : > { %12388 = vmatpush1.bf16.xpose.msra.mxu1 %v17354_v17  ;;  %12340 = vmatprep.subr.bf16.mxu0 %v17359_v18  ;;  %v17414_v17 = vld [vmem:[%s18434_s4 + $0x1ff8] ss:$648 sps:$4 sm:$0xff]   ;;  %v17419_v18 = vld [vmem:[%s18434_s4 + $0x2504] ss:$648 sps:$4 sm:$0xff]  }
 0x64b   : > { %12389 = vmatprep.subr.bf16.mxu1 %v17362_v19  ;;  %v17422_v19 = vld [vmem:[%s18434_s4 + $0x250c] ss:$648 sps:$4 sm:$0xff]  }
 0x651   : > { %12341 = vmatpush1.bf16.xpose.msra.mxu0 %v17357_v20  ;;  %v17417_v20 = vld [vmem:[%s18434_s4 + $0x2500] ss:$648 sps:$4 sm:$0xff]  }
 0x652   : > { %12390 = vmatpush1.bf16.xpose.msra.mxu1 %v17360_v21  ;;  %12424 = vmatprep.subr.bf16.mxu0 %v17371_v22  ;;  %v17420_v21 = vld [vmem:[%s18434_s4 + $0x2508] ss:$648 sps:$4 sm:$0xff]   ;;  %v17431_v22 = vld [vmem:[%s18434_s4 + $0x1a4] ss:$648 sps:$4 sm:$0xff]  }
 0x653   : > { %12473 = vmatprep.subr.bf16.mxu1 %v17374_v23  ;;  %v17434_v23 = vld [vmem:[%s18434_s4 + $0x1ac] ss:$648 sps:$4 sm:$0xff]  }
 0x658   : > { %12359 = vmatmul.mubr.bf16.vlgmr.msra.gmra.mrb[192].mxu0 %v17363_v24  ;;  %v17423_v24 = vld [vmem:[%s21177_s0 + $0x190] ss:$648 sps:$4 sm:$0xff]  }
 0x659   : > { %12408 = vmatmul.mubr.bf16.vlgmr.msra.gmra.mrb[192].mxu1 %v17366_v25  ;;  %12425 = vmatpush1.bf16.xpose.msra.mxu0 %v17369_v26  ;;  %v17426_v25 = vld [vmem:[%s21177_s0 + $0x198] ss:$648 sps:$4 sm:$0xff]  }
 0x65a   : > { %12474 = vmatpush1.bf16.xpose.msra.mxu1 %v17372_v27  ;;  %12366 = vmatprep.mubr.bf16.mxu0 %v17375_v28  ;;  %v17429_v26 = vld [vmem:[%s18434_s4 + $0x1a0] ss:$648 sps:$4 sm:$0xff]   ;;  %v17435_v28 = vld [vmem:[%s21177_s0 + $0x6a4] ss:$648 sps:$4 sm:$0xff]  }
 0x65b   : > { %12426 = vmatprep.subr.bf16.mxu0 %v17380_v29  ;;  %12475 = vmatprep.subr.bf16.mxu1 %v17383_v30  ;;  %v17432_v27 = vld [vmem:[%s18434_s4 + $0x1a8] ss:$648 sps:$4 sm:$0xff]   ;;  %v17440_v29 = vld [vmem:[%s18434_s4 + $0x6b4] ss:$648 sps:$4 sm:$0xff]  }
 0x65c   : > { %12415 = vmatprep.mubr.bf16.mxu1 %v17384_v31  ;;  %v17443_v30 = vld [vmem:[%s18434_s4 + $0x6bc] ss:$648 sps:$4 sm:$0xff]   ;;  %v17444_v31 = vld [vmem:[%s21177_s0 + $0x6ac] ss:$648 sps:$4 sm:$0xff]  }
 0x660   : > { %12367 = vmatmul.mubr.bf16.gmra.mrb[196].mxu0 %v17377_v32  ;;  %v17437_v32 = vld [vmem:[%s21177_s0 + $0x6a0] ss:$648 sps:$4 sm:$0xff]  }
 0x661   : > { %12416 = vmatmul.mubr.bf16.gmra.mrb[196].mxu1 %v17386_v33  ;;  %12427 = vmatpush1.bf16.xpose.msra.mxu0 %v17378_v34  ;;  %v17446_v33 = vld [vmem:[%s21177_s0 + $0x6a8] ss:$648 sps:$4 sm:$0xff]  }
 0x662   : > { %12476 = vmatpush1.bf16.xpose.msra.mxu1 %v17381_v35  ;;  %12428 = vmatprep.subr.bf16.mxu0 %v17389_v36  ;;  %v17438_v34 = vld [vmem:[%s18434_s4 + $0x6b0] ss:$648 sps:$4 sm:$0xff]   ;;  %v17449_v36 = vld [vmem:[%s18434_s4 + $0xbc4] ss:$648 sps:$4 sm:$0xff]  }
 0x663   : > { %12477 = vmatprep.subr.bf16.mxu1 %v17392_v37  ;;  %12456 = vmatprep.mubr.bf16.mxu0 %v17425_v38  ;;  %v17441_v35 = vld [vmem:[%s18434_s4 + $0x6b8] ss:$648 sps:$4 sm:$0xff]   ;;  %v17452_v37 = vld [vmem:[%s18434_s4 + $0xbcc] ss:$648 sps:$4 sm:$0xff]  }
 0x664   : > { %12505 = vmatprep.mubr.bf16.mxu1 %v17428_v39  ;;  %v17485_v38 = vld [vmem:[%s21177_s0 + $0x1a4] ss:$648 sps:$4 sm:$0xff]  }
 0x665   : > { %v17488_v39 = vld [vmem:[%s21177_s0 + $0x1ac] ss:$648 sps:$4 sm:$0xff]  }
 0x669   : > { %12429 = vmatpush1.bf16.xpose.msra.mxu0 %v17387_v40  ;;  %v17447_v40 = vld [vmem:[%s18434_s4 + $0xbc0] ss:$648 sps:$4 sm:$0xff]  }
 0x66a   : > { %12478 = vmatpush1.bf16.xpose.msra.mxu1 %v17390_v41  ;;  %12430 = vmatprep.subr.bf16.mxu0 %v17395_v42  ;;  %v17450_v41 = vld [vmem:[%s18434_s4 + $0xbc8] ss:$648 sps:$4 sm:$0xff]   ;;  %v17455_v42 = vld [vmem:[%s18434_s4 + $0x10d4] ss:$648 sps:$4 sm:$0xff]  }
 0x66b   : > { %12479 = vmatprep.subr.bf16.mxu1 %v17398_v43  ;;  %v12066_v44 = vpop.f32.mrb[168].mxu0  ;;  %v17458_v43 = vld [vmem:[%s18434_s4 + $0x10dc] ss:$648 sps:$4 sm:$0xff]  }
 0x66c   : > { %v12115_v45 = vpop.f32.mrb[168].mxu1  ;;  %v12067_v46 = vadd.f32 %v12066_v44, %v20033_v60  ;;  %v12068_v47 = vpop.f32.mrb[169].mxu0 }
 0x66d   : > { %v12117_v48 = vpop.f32.mrb[169].mxu1  ;;  %v12069_v49 = vpop.f32.mrb[170].mxu0 }
 0x66e   : > { %v12118_v50 = vpop.f32.mrb[170].mxu1  ;;  %v20101_v52 = vadd.f32 %v12115_v45, %v12067_v46  ;;  %v12070_v54 = vadd.f32 %v12069_v49, %v20038_v0  ;;  %v12071_v55 = vpop.f32.mrb[171].mxu0 }
 0x66f   : > { %v12120_v56 = vpop.f32.mrb[171].mxu1 }
 0x670   : > { %v20106_v57 = vadd.f32 %v12118_v50, %v12070_v54 }
 0x671   : > { %12431 = vmatpush1.bf16.xpose.msra.mxu0 %v17393_v51  ;;  %v17453_v51 = vld [vmem:[%s18434_s4 + $0x10d0] ss:$648 sps:$4 sm:$0xff]  }
 0x672   : > { %12480 = vmatpush1.bf16.xpose.msra.mxu1 %v17396_v53  ;;  %12432 = vmatprep.subr.bf16.mxu0 %v17401_v58  ;;  %v17456_v53 = vld [vmem:[%s18434_s4 + $0x10d8] ss:$648 sps:$4 sm:$0xff]  }
 0x673   : > { %12481 = vmatprep.subr.bf16.mxu1 %v17404_v59  ;;  %v12074_v60 = vpop.f32.mrb[172].mxu0  ;;  %v17461_v59 = vld [vmem:[%s18434_s4 + $0x15e4] ss:$648 sps:$4 sm:$0xff]  }
 0x674   : > { %v12123_v61 = vpop.f32.mrb[172].mxu1  ;;  %v12075_v62 = vadd.f32 %v12074_v60, %v20044_v7  ;;  %v12076_v63 = vpop.f32.mrb[173].mxu0  ;;  %v17464_v60 = vld [vmem:[%s18434_s4 + $0x15ec] ss:$648 sps:$4 sm:$0xff]  }
 0x675   : > { %v12125_v0 = vpop.f32.mrb[173].mxu1  ;;  %v12077_v1 = vpop.f32.mrb[174].mxu0 }
 0x676   : > { %v12126_v3 = vpop.f32.mrb[174].mxu1  ;;  %v12078_v6 = vadd.f32 %v12077_v1, %v20048_v10  ;;  %v20112_v13 = vadd.f32 %v12123_v61, %v12075_v62  ;;  %v12079_v2 = vpop.f32.mrb[175].mxu0  ;;  %v17413_v10 = vld [vmem:[%s18434_s4 + $0x1ff4] ss:$648 sps:$4 sm:$0xff]  }
 0x677   : > { %v12128_v7 = vpop.f32.mrb[175].mxu1  ;;  %v17470_v2 = vld [vmem:[%s18434_s4 + $0x1afc] ss:$648 sps:$4 sm:$0xff]  }
 0x678   : > { %v20116_v11 = vadd.f32 %v12126_v3, %v12078_v6 }
 0x679   : > { %12433 = vmatpush1.bf16.xpose.msra.mxu0 %v17399_v4  ;;  %v17459_v4 = vld [vmem:[%s18434_s4 + $0x15e0] ss:$648 sps:$4 sm:$0xff]  }
 0x67a   : > { %12482 = vmatpush1.bf16.xpose.msra.mxu1 %v17402_v5  ;;  %12434 = vmatprep.subr.bf16.mxu0 %v17407_v14  ;;  %v17462_v5 = vld [vmem:[%s18434_s4 + $0x15e8] ss:$648 sps:$4 sm:$0xff]  }
 0x67b   : > { %12483 = vmatprep.subr.bf16.mxu1 %v17410_v9  ;;  %v17467_v9 = vld [vmem:[%s18434_s4 + $0x1af4] ss:$648 sps:$4 sm:$0xff]  }
 0x681   : > { %12435 = vmatpush1.bf16.xpose.msra.mxu0 %v17405_v12 }
 0x682   : > { %12484 = vmatpush1.bf16.xpose.msra.mxu1 %v17408_v8  ;;  %12436 = vmatprep.subr.bf16.mxu0 %v17413_v10  ;;  %v17465_v8 = vld [vmem:[%s18434_s4 + $0x1af0] ss:$648 sps:$4 sm:$0xff]  }
 0x683   : > { %12485 = vmatprep.subr.bf16.mxu1 %v17416_v15  ;;  %v17468_v10 = vld [vmem:[%s18434_s4 + $0x1af8] ss:$648 sps:$4 sm:$0xff]   ;;  %v17476_v15 = vld [vmem:[%s18434_s4 + $0x200c] ss:$648 sps:$4 sm:$0xff]  }
 0x689   : > { %12437 = vmatpush1.bf16.xpose.msra.mxu0 %v17411_v16  ;;  %v17471_v16 = vld [vmem:[%s18434_s4 + $0x2000] ss:$648 sps:$4 sm:$0xff]  }
 0x68a   : > { %12486 = vmatpush1.bf16.xpose.msra.mxu1 %v17414_v17  ;;  %12438 = vmatprep.subr.bf16.mxu0 %v17419_v18  ;;  %v17474_v17 = vld [vmem:[%s18434_s4 + $0x2008] ss:$648 sps:$4 sm:$0xff]   ;;  %v17479_v18 = vld [vmem:[%s18434_s4 + $0x2514] ss:$648 sps:$4 sm:$0xff]  }
 0x68b   : > { %12487 = vmatprep.subr.bf16.mxu1 %v17422_v19  ;;  %v17482_v19 = vld [vmem:[%s18434_s4 + $0x251c] ss:$648 sps:$4 sm:$0xff]  }
 0x691   : > { %12439 = vmatpush1.bf16.xpose.msra.mxu0 %v17417_v20  ;;  %v17477_v20 = vld [vmem:[%s18434_s4 + $0x2510] ss:$648 sps:$4 sm:$0xff]  }
 0x692   : > { %12488 = vmatpush1.bf16.xpose.msra.mxu1 %v17420_v21  ;;  %12522 = vmatprep.subr.bf16.mxu0 %v17431_v22  ;;  %v17480_v21 = vld [vmem:[%s18434_s4 + $0x2518] ss:$648 sps:$4 sm:$0xff]   ;;  %v17491_v22 = vld [vmem:[%s18434_s4 + $0x1b4] ss:$648 sps:$4 sm:$0xff]  }
 0x693   : > { %12571 = vmatprep.subr.bf16.mxu1 %v17434_v23  ;;  %v17494_v23 = vld [vmem:[%s18434_s4 + $0x1bc] ss:$648 sps:$4 sm:$0xff]  }
 0x698   : > { %12457 = vmatmul.mubr.bf16.vlgmr.msra.gmra.mrb[200].mxu0 %v17423_v24  ;;  %v17483_v24 = vld [vmem:[%s21177_s0 + $0x1a0] ss:$648 sps:$4 sm:$0xff]  }
 0x699   : > { %12506 = vmatmul.mubr.bf16.vlgmr.msra.gmra.mrb[200].mxu1 %v17426_v25  ;;  %12523 = vmatpush1.bf16.xpose.msra.mxu0 %v17429_v26  ;;  %v17486_v25 = vld [vmem:[%s21177_s0 + $0x1a8] ss:$648 sps:$4 sm:$0xff]  }
 0x69a   : > { %12572 = vmatpush1.bf16.xpose.msra.mxu1 %v17432_v27  ;;  %12464 = vmatprep.mubr.bf16.mxu0 %v17435_v28  ;;  %v17489_v26 = vld [vmem:[%s18434_s4 + $0x1b0] ss:$648 sps:$4 sm:$0xff]   ;;  %v17495_v28 = vld [vmem:[%s21177_s0 + $0x6b4] ss:$648 sps:$4 sm:$0xff]  }
 0x69b   : > { %12524 = vmatprep.subr.bf16.mxu0 %v17440_v29  ;;  %12573 = vmatprep.subr.bf16.mxu1 %v17443_v30  ;;  %v17492_v27 = vld [vmem:[%s18434_s4 + $0x1b8] ss:$648 sps:$4 sm:$0xff]   ;;  %v17500_v29 = vld [vmem:[%s18434_s4 + $0x6c4] ss:$648 sps:$4 sm:$0xff]  }
 0x69c   : > { %12513 = vmatprep.mubr.bf16.mxu1 %v17444_v31  ;;  %v17503_v30 = vld [vmem:[%s18434_s4 + $0x6cc] ss:$648 sps:$4 sm:$0xff]   ;;  %v17504_v31 = vld [vmem:[%s21177_s0 + $0x6bc] ss:$648 sps:$4 sm:$0xff]  }
 0x6a0   : > { %12465 = vmatmul.mubr.bf16.gmra.mrb[204].mxu0 %v17437_v32  ;;  %v17497_v32 = vld [vmem:[%s21177_s0 + $0x6b0] ss:$648 sps:$4 sm:$0xff]  }
 0x6a1   : > { %12514 = vmatmul.mubr.bf16.gmra.mrb[204].mxu1 %v17446_v33  ;;  %12525 = vmatpush1.bf16.xpose.msra.mxu0 %v17438_v34  ;;  %v17506_v33 = vld [vmem:[%s21177_s0 + $0x6b8] ss:$648 sps:$4 sm:$0xff]  }
 0x6a2   : > { %12574 = vmatpush1.bf16.xpose.msra.mxu1 %v17441_v35  ;;  %12526 = vmatprep.subr.bf16.mxu0 %v17449_v36  ;;  %v17498_v34 = vld [vmem:[%s18434_s4 + $0x6c0] ss:$648 sps:$4 sm:$0xff]   ;;  %v17509_v36 = vld [vmem:[%s18434_s4 + $0xbd4] ss:$648 sps:$4 sm:$0xff]  }
 0x6a3   : > { %12575 = vmatprep.subr.bf16.mxu1 %v17452_v37  ;;  %12554 = vmatprep.mubr.bf16.mxu0 %v17485_v38  ;;  %v17501_v35 = vld [vmem:[%s18434_s4 + $0x6c8] ss:$648 sps:$4 sm:$0xff]   ;;  %v17512_v37 = vld [vmem:[%s18434_s4 + $0xbdc] ss:$648 sps:$4 sm:$0xff]  }
 0x6a4   : > { %12603 = vmatprep.mubr.bf16.mxu1 %v17488_v39  ;;  %v17545_v38 = vld [vmem:[%s21177_s0 + $0x1b4] ss:$648 sps:$4 sm:$0xff]  }
 0x6a5   : > { %v17548_v39 = vld [vmem:[%s21177_s0 + $0x1bc] ss:$648 sps:$4 sm:$0xff]  }
 0x6a9   : > { %12527 = vmatpush1.bf16.xpose.msra.mxu0 %v17447_v40  ;;  %v17507_v40 = vld [vmem:[%s18434_s4 + $0xbd0] ss:$648 sps:$4 sm:$0xff]  }
 0x6aa   : > { %12576 = vmatpush1.bf16.xpose.msra.mxu1 %v17450_v41  ;;  %12528 = vmatprep.subr.bf16.mxu0 %v17455_v42  ;;  %v17510_v41 = vld [vmem:[%s18434_s4 + $0xbd8] ss:$648 sps:$4 sm:$0xff]   ;;  %v17515_v42 = vld [vmem:[%s18434_s4 + $0x10e4] ss:$648 sps:$4 sm:$0xff]  }
 0x6ab   : > { %12577 = vmatprep.subr.bf16.mxu1 %v17458_v43  ;;  %v12164_v44 = vpop.f32.mrb[176].mxu0  ;;  %v17518_v43 = vld [vmem:[%s18434_s4 + $0x10ec] ss:$648 sps:$4 sm:$0xff]  }
 0x6ac   : > { %v12213_v45 = vpop.f32.mrb[176].mxu1  ;;  %v12165_v46 = vadd.f32 %v12164_v44, %v20101_v52  ;;  %v12166_v47 = vpop.f32.mrb[177].mxu0 }
 0x6ad   : > { %v12215_v48 = vpop.f32.mrb[177].mxu1  ;;  %v12167_v49 = vpop.f32.mrb[178].mxu0 }
 0x6ae   : > { %v12216_v50 = vpop.f32.mrb[178].mxu1  ;;  %v20169_v54 = vadd.f32 %v12213_v45, %v12165_v46  ;;  %v12168_v55 = vadd.f32 %v12167_v49, %v20106_v57  ;;  %v12169_v56 = vpop.f32.mrb[179].mxu0 }
 0x6af   : > { %v12218_v58 = vpop.f32.mrb[179].mxu1 }
 0x6b0   : > { %v20174_v61 = vadd.f32 %v12216_v50, %v12168_v55 }
 0x6b1   : > { %12529 = vmatpush1.bf16.xpose.msra.mxu0 %v17453_v51  ;;  %v17513_v51 = vld [vmem:[%s18434_s4 + $0x10e0] ss:$648 sps:$4 sm:$0xff]  }
 0x6b2   : > { %12578 = vmatpush1.bf16.xpose.msra.mxu1 %v17456_v53  ;;  %12530 = vmatprep.subr.bf16.mxu0 %v17461_v59  ;;  %v17516_v53 = vld [vmem:[%s18434_s4 + $0x10e8] ss:$648 sps:$4 sm:$0xff]  }
 0x6b3   : > { %12579 = vmatprep.subr.bf16.mxu1 %v17464_v60  ;;  %v12172_v52 = vpop.f32.mrb[180].mxu0  ;;  %v17521_v60 = vld [vmem:[%s18434_s4 + $0x15f4] ss:$648 sps:$4 sm:$0xff]  }
 0x6b4   : > { %v12221_v62 = vpop.f32.mrb[180].mxu1  ;;  %v12173_v63 = vadd.f32 %v12172_v52, %v20112_v13  ;;  %v12174_v0 = vpop.f32.mrb[181].mxu0  ;;  %v17524_v52 = vld [vmem:[%s18434_s4 + $0x15fc] ss:$648 sps:$4 sm:$0xff]  }
 0x6b5   : > { %v12223_v57 = vpop.f32.mrb[181].mxu1  ;;  %v12175_v1 = vpop.f32.mrb[182].mxu0 }
 0x6b6   : > { %v12224_v3 = vpop.f32.mrb[182].mxu1  ;;  %v12176_v6 = vadd.f32 %v12175_v1, %v20116_v11  ;;  %v20180_v14 = vadd.f32 %v12221_v62, %v12173_v63  ;;  %v12177_v7 = vpop.f32.mrb[183].mxu0  ;;  %v17473_v11 = vld [vmem:[%s18434_s4 + $0x2004] ss:$648 sps:$4 sm:$0xff]  }
 0x6b7   : > { %v12226_v13 = vpop.f32.mrb[183].mxu1  ;;  %v17530_v7 = vld [vmem:[%s18434_s4 + $0x1b0c] ss:$648 sps:$4 sm:$0xff]  }
 0x6b8   : > { %v20184_v12 = vadd.f32 %v12224_v3, %v12176_v6 }
 0x6b9   : > { %12531 = vmatpush1.bf16.xpose.msra.mxu0 %v17459_v4  ;;  %v17519_v4 = vld [vmem:[%s18434_s4 + $0x15f0] ss:$648 sps:$4 sm:$0xff]  }
 0x6ba   : > { %12580 = vmatpush1.bf16.xpose.msra.mxu1 %v17462_v5  ;;  %12532 = vmatprep.subr.bf16.mxu0 %v17467_v9  ;;  %v17522_v5 = vld [vmem:[%s18434_s4 + $0x15f8] ss:$648 sps:$4 sm:$0xff]  }
 0x6bb   : > { %12581 = vmatprep.subr.bf16.mxu1 %v17470_v2  ;;  %v17527_v2 = vld [vmem:[%s18434_s4 + $0x1b04] ss:$648 sps:$4 sm:$0xff]  }
 0x6c1   : > { %12533 = vmatpush1.bf16.xpose.msra.mxu0 %v17465_v8 }
 0x6c2   : > { %12582 = vmatpush1.bf16.xpose.msra.mxu1 %v17468_v10  ;;  %12534 = vmatprep.subr.bf16.mxu0 %v17473_v11  ;;  %v17525_v10 = vld [vmem:[%s18434_s4 + $0x1b00] ss:$648 sps:$4 sm:$0xff]  }
 0x6c3   : > { %12583 = vmatprep.subr.bf16.mxu1 %v17476_v15  ;;  %v17528_v11 = vld [vmem:[%s18434_s4 + $0x1b08] ss:$648 sps:$4 sm:$0xff]   ;;  %v17536_v15 = vld [vmem:[%s18434_s4 + $0x201c] ss:$648 sps:$4 sm:$0xff]  }
 0x6c9   : > { %12535 = vmatpush1.bf16.xpose.msra.mxu0 %v17471_v16  ;;  %v17531_v16 = vld [vmem:[%s18434_s4 + $0x2010] ss:$648 sps:$4 sm:$0xff]  }
 0x6ca   : > { %12584 = vmatpush1.bf16.xpose.msra.mxu1 %v17474_v17  ;;  %12536 = vmatprep.subr.bf16.mxu0 %v17479_v18  ;;  %v17534_v17 = vld [vmem:[%s18434_s4 + $0x2018] ss:$648 sps:$4 sm:$0xff]   ;;  %v17539_v18 = vld [vmem:[%s18434_s4 + $0x2524] ss:$648 sps:$4 sm:$0xff]  }
 0x6cb   : > { %12585 = vmatprep.subr.bf16.mxu1 %v17482_v19  ;;  %v17542_v19 = vld [vmem:[%s18434_s4 + $0x252c] ss:$648 sps:$4 sm:$0xff]  }
 0x6d1   : > { %12537 = vmatpush1.bf16.xpose.msra.mxu0 %v17477_v20  ;;  %v17537_v20 = vld [vmem:[%s18434_s4 + $0x2520] ss:$648 sps:$4 sm:$0xff]  }
 0x6d2   : > { %12586 = vmatpush1.bf16.xpose.msra.mxu1 %v17480_v21  ;;  %12620 = vmatprep.subr.bf16.mxu0 %v17491_v22  ;;  %v17540_v21 = vld [vmem:[%s18434_s4 + $0x2528] ss:$648 sps:$4 sm:$0xff]   ;;  %v17551_v22 = vld [vmem:[%s18434_s4 + $0x1c4] ss:$648 sps:$4 sm:$0xff]  }
 0x6d3   : > { %12669 = vmatprep.subr.bf16.mxu1 %v17494_v23  ;;  %v17554_v23 = vld [vmem:[%s18434_s4 + $0x1cc] ss:$648 sps:$4 sm:$0xff]  }
 0x6d8   : > { %12555 = vmatmul.mubr.bf16.vlgmr.msra.gmra.mrb[208].mxu0 %v17483_v24  ;;  %v17543_v24 = vld [vmem:[%s21177_s0 + $0x1b0] ss:$648 sps:$4 sm:$0xff]  }
 0x6d9   : > { %12604 = vmatmul.mubr.bf16.vlgmr.msra.gmra.mrb[208].mxu1 %v17486_v25  ;;  %12621 = vmatpush1.bf16.xpose.msra.mxu0 %v17489_v26  ;;  %v17546_v25 = vld [vmem:[%s21177_s0 + $0x1b8] ss:$648 sps:$4 sm:$0xff]  }
 0x6da   : > { %12670 = vmatpush1.bf16.xpose.msra.mxu1 %v17492_v27  ;;  %12562 = vmatprep.mubr.bf16.mxu0 %v17495_v28  ;;  %v17549_v26 = vld [vmem:[%s18434_s4 + $0x1c0] ss:$648 sps:$4 sm:$0xff]   ;;  %v17555_v28 = vld [vmem:[%s21177_s0 + $0x6c4] ss:$648 sps:$4 sm:$0xff]  }
 0x6db   : > { %12622 = vmatprep.subr.bf16.mxu0 %v17500_v29  ;;  %12671 = vmatprep.subr.bf16.mxu1 %v17503_v30  ;;  %v17552_v27 = vld [vmem:[%s18434_s4 + $0x1c8] ss:$648 sps:$4 sm:$0xff]   ;;  %v17560_v29 = vld [vmem:[%s18434_s4 + $0x6d4] ss:$648 sps:$4 sm:$0xff]  }
 0x6dc   : > { %12611 = vmatprep.mubr.bf16.mxu1 %v17504_v31  ;;  %v17563_v30 = vld [vmem:[%s18434_s4 + $0x6dc] ss:$648 sps:$4 sm:$0xff]   ;;  %v17564_v31 = vld [vmem:[%s21177_s0 + $0x6cc] ss:$648 sps:$4 sm:$0xff]  }
 0x6e0   : > { %12563 = vmatmul.mubr.bf16.gmra.mrb[212].mxu0 %v17497_v32  ;;  %v17557_v32 = vld [vmem:[%s21177_s0 + $0x6c0] ss:$648 sps:$4 sm:$0xff]  }
 0x6e1   : > { %12612 = vmatmul.mubr.bf16.gmra.mrb[212].mxu1 %v17506_v33  ;;  %12623 = vmatpush1.bf16.xpose.msra.mxu0 %v17498_v34  ;;  %v17566_v33 = vld [vmem:[%s21177_s0 + $0x6c8] ss:$648 sps:$4 sm:$0xff]  }
 0x6e2   : > { %12672 = vmatpush1.bf16.xpose.msra.mxu1 %v17501_v35  ;;  %12624 = vmatprep.subr.bf16.mxu0 %v17509_v36  ;;  %v17558_v34 = vld [vmem:[%s18434_s4 + $0x6d0] ss:$648 sps:$4 sm:$0xff]   ;;  %v17569_v36 = vld [vmem:[%s18434_s4 + $0xbe4] ss:$648 sps:$4 sm:$0xff]  }
 0x6e3   : > { %12673 = vmatprep.subr.bf16.mxu1 %v17512_v37  ;;  %12652 = vmatprep.mubr.bf16.mxu0 %v17545_v38  ;;  %v17561_v35 = vld [vmem:[%s18434_s4 + $0x6d8] ss:$648 sps:$4 sm:$0xff]   ;;  %v17572_v37 = vld [vmem:[%s18434_s4 + $0xbec] ss:$648 sps:$4 sm:$0xff]  }
 0x6e4   : > { %12701 = vmatprep.mubr.bf16.mxu1 %v17548_v39  ;;  %v17605_v38 = vld [vmem:[%s21177_s0 + $0x1c4] ss:$648 sps:$4 sm:$0xff]  }
 0x6e5   : > { %v17608_v39 = vld [vmem:[%s21177_s0 + $0x1cc] ss:$648 sps:$4 sm:$0xff]  }
 0x6e9   : > { %12625 = vmatpush1.bf16.xpose.msra.mxu0 %v17507_v40  ;;  %v17567_v40 = vld [vmem:[%s18434_s4 + $0xbe0] ss:$648 sps:$4 sm:$0xff]  }
 0x6ea   : > { %12674 = vmatpush1.bf16.xpose.msra.mxu1 %v17510_v41  ;;  %12626 = vmatprep.subr.bf16.mxu0 %v17515_v42  ;;  %v17570_v41 = vld [vmem:[%s18434_s4 + $0xbe8] ss:$648 sps:$4 sm:$0xff]   ;;  %v17575_v42 = vld [vmem:[%s18434_s4 + $0x10f4] ss:$648 sps:$4 sm:$0xff]  }
 0x6eb   : > { %12675 = vmatprep.subr.bf16.mxu1 %v17518_v43  ;;  %v12262_v44 = vpop.f32.mrb[184].mxu0  ;;  %v17578_v43 = vld [vmem:[%s18434_s4 + $0x10fc] ss:$648 sps:$4 sm:$0xff]  }
 0x6ec   : > { %v12311_v45 = vpop.f32.mrb[184].mxu1  ;;  %v12263_v46 = vadd.f32 %v12262_v44, %v20169_v54  ;;  %v12264_v47 = vpop.f32.mrb[185].mxu0 }
 0x6ed   : > { %v12313_v48 = vpop.f32.mrb[185].mxu1  ;;  %v12265_v49 = vpop.f32.mrb[186].mxu0 }
 0x6ee   : > { %v12314_v50 = vpop.f32.mrb[186].mxu1  ;;  %v20237_v55 = vadd.f32 %v12311_v45, %v12263_v46  ;;  %v12266_v56 = vadd.f32 %v12265_v49, %v20174_v61  ;;  %v12267_v58 = vpop.f32.mrb[187].mxu0 }
 0x6ef   : > { %v12316_v59 = vpop.f32.mrb[187].mxu1 }
 0x6f0   : > { %v20242_v62 = vadd.f32 %v12314_v50, %v12266_v56 }
 0x6f1   : > { %12627 = vmatpush1.bf16.xpose.msra.mxu0 %v17513_v51  ;;  %v17573_v51 = vld [vmem:[%s18434_s4 + $0x10f0] ss:$648 sps:$4 sm:$0xff]  }
 0x6f2   : > { %12676 = vmatpush1.bf16.xpose.msra.mxu1 %v17516_v53  ;;  %12628 = vmatprep.subr.bf16.mxu0 %v17521_v60  ;;  %v17576_v53 = vld [vmem:[%s18434_s4 + $0x10f8] ss:$648 sps:$4 sm:$0xff]  }
 0x6f3   : > { %12677 = vmatprep.subr.bf16.mxu1 %v17524_v52  ;;  %v12270_v54 = vpop.f32.mrb[188].mxu0  ;;  %v17581_v52 = vld [vmem:[%s18434_s4 + $0x1604] ss:$648 sps:$4 sm:$0xff]  }
 0x6f4   : > { %v12319_v63 = vpop.f32.mrb[188].mxu1  ;;  %v12271_v0 = vadd.f32 %v12270_v54, %v20180_v14  ;;  %v12272_v57 = vpop.f32.mrb[189].mxu0  ;;  %v17584_v54 = vld [vmem:[%s18434_s4 + $0x160c] ss:$648 sps:$4 sm:$0xff]  }
 0x6f5   : > { %v12321_v61 = vpop.f32.mrb[189].mxu1  ;;  %v12273_v1 = vpop.f32.mrb[190].mxu0 }
 0x6f6   : > { %v12322_v3 = vpop.f32.mrb[190].mxu1  ;;  %v12274_v6 = vadd.f32 %v12273_v1, %v20184_v12  ;;  %v20248_v9 = vadd.f32 %v12319_v63, %v12271_v0  ;;  %v12275_v13 = vpop.f32.mrb[191].mxu0  ;;  %v17533_v12 = vld [vmem:[%s18434_s4 + $0x2014] ss:$648 sps:$4 sm:$0xff]  }
 0x6f7   : > { %v12324_v14 = vpop.f32.mrb[191].mxu1  ;;  %v17590_v13 = vld [vmem:[%s18434_s4 + $0x1b1c] ss:$648 sps:$4 sm:$0xff]  }
 0x6f8   : > { %v20252_v8 = vadd.f32 %v12322_v3, %v12274_v6 }
 0x6f9   : > { %12629 = vmatpush1.bf16.xpose.msra.mxu0 %v17519_v4  ;;  %v17579_v4 = vld [vmem:[%s18434_s4 + $0x1600] ss:$648 sps:$4 sm:$0xff]  }
 0x6fa   : > { %12678 = vmatpush1.bf16.xpose.msra.mxu1 %v17522_v5  ;;  %12630 = vmatprep.subr.bf16.mxu0 %v17527_v2  ;;  %v17582_v5 = vld [vmem:[%s18434_s4 + $0x1608] ss:$648 sps:$4 sm:$0xff]  }
 0x6fb   : > { %12679 = vmatprep.subr.bf16.mxu1 %v17530_v7  ;;  %v17587_v7 = vld [vmem:[%s18434_s4 + $0x1b14] ss:$648 sps:$4 sm:$0xff]  }
 0x701   : > { %12631 = vmatpush1.bf16.xpose.msra.mxu0 %v17525_v10 }
 0x702   : > { %12680 = vmatpush1.bf16.xpose.msra.mxu1 %v17528_v11  ;;  %12632 = vmatprep.subr.bf16.mxu0 %v17533_v12  ;;  %v17585_v11 = vld [vmem:[%s18434_s4 + $0x1b10] ss:$648 sps:$4 sm:$0xff]  }
 0x703   : > { %12681 = vmatprep.subr.bf16.mxu1 %v17536_v15  ;;  %v17588_v12 = vld [vmem:[%s18434_s4 + $0x1b18] ss:$648 sps:$4 sm:$0xff]   ;;  %v17596_v15 = vld [vmem:[%s18434_s4 + $0x202c] ss:$648 sps:$4 sm:$0xff]  }
 0x709   : > { %12633 = vmatpush1.bf16.xpose.msra.mxu0 %v17531_v16  ;;  %v17591_v16 = vld [vmem:[%s18434_s4 + $0x2020] ss:$648 sps:$4 sm:$0xff]  }
 0x70a   : > { %12682 = vmatpush1.bf16.xpose.msra.mxu1 %v17534_v17  ;;  %12634 = vmatprep.subr.bf16.mxu0 %v17539_v18  ;;  %v17594_v17 = vld [vmem:[%s18434_s4 + $0x2028] ss:$648 sps:$4 sm:$0xff]   ;;  %v17599_v18 = vld [vmem:[%s18434_s4 + $0x2534] ss:$648 sps:$4 sm:$0xff]  }
 0x70b   : > { %12683 = vmatprep.subr.bf16.mxu1 %v17542_v19  ;;  %v17602_v19 = vld [vmem:[%s18434_s4 + $0x253c] ss:$648 sps:$4 sm:$0xff]  }
 0x711   : > { %12635 = vmatpush1.bf16.xpose.msra.mxu0 %v17537_v20  ;;  %v17597_v20 = vld [vmem:[%s18434_s4 + $0x2530] ss:$648 sps:$4 sm:$0xff]  }
 0x712   : > { %12684 = vmatpush1.bf16.xpose.msra.mxu1 %v17540_v21  ;;  %12718 = vmatprep.subr.bf16.mxu0 %v17551_v22  ;;  %v17600_v21 = vld [vmem:[%s18434_s4 + $0x2538] ss:$648 sps:$4 sm:$0xff]   ;;  %v17611_v22 = vld [vmem:[%s18434_s4 + $0x1d4] ss:$648 sps:$4 sm:$0xff]  }
 0x713   : > { %12767 = vmatprep.subr.bf16.mxu1 %v17554_v23  ;;  %v17614_v23 = vld [vmem:[%s18434_s4 + $0x1dc] ss:$648 sps:$4 sm:$0xff]  }
 0x718   : > { %12653 = vmatmul.mubr.bf16.vlgmr.msra.gmra.mrb[216].mxu0 %v17543_v24  ;;  %v17603_v24 = vld [vmem:[%s21177_s0 + $0x1c0] ss:$648 sps:$4 sm:$0xff]  }
 0x719   : > { %12702 = vmatmul.mubr.bf16.vlgmr.msra.gmra.mrb[216].mxu1 %v17546_v25  ;;  %12719 = vmatpush1.bf16.xpose.msra.mxu0 %v17549_v26  ;;  %v17606_v25 = vld [vmem:[%s21177_s0 + $0x1c8] ss:$648 sps:$4 sm:$0xff]  }
 0x71a   : > { %12768 = vmatpush1.bf16.xpose.msra.mxu1 %v17552_v27  ;;  %12660 = vmatprep.mubr.bf16.mxu0 %v17555_v28  ;;  %v17609_v26 = vld [vmem:[%s18434_s4 + $0x1d0] ss:$648 sps:$4 sm:$0xff]   ;;  %v17615_v28 = vld [vmem:[%s21177_s0 + $0x6d4] ss:$648 sps:$4 sm:$0xff]  }
 0x71b   : > { %12720 = vmatprep.subr.bf16.mxu0 %v17560_v29  ;;  %12769 = vmatprep.subr.bf16.mxu1 %v17563_v30  ;;  %v17612_v27 = vld [vmem:[%s18434_s4 + $0x1d8] ss:$648 sps:$4 sm:$0xff]   ;;  %v17620_v29 = vld [vmem:[%s18434_s4 + $0x6e4] ss:$648 sps:$4 sm:$0xff]  }
 0x71c   : > { %12709 = vmatprep.mubr.bf16.mxu1 %v17564_v31  ;;  %v17623_v30 = vld [vmem:[%s18434_s4 + $0x6ec] ss:$648 sps:$4 sm:$0xff]   ;;  %v17624_v31 = vld [vmem:[%s21177_s0 + $0x6dc] ss:$648 sps:$4 sm:$0xff]  }
 0x720   : > { %12661 = vmatmul.mubr.bf16.gmra.mrb[220].mxu0 %v17557_v32  ;;  %v17617_v32 = vld [vmem:[%s21177_s0 + $0x6d0] ss:$648 sps:$4 sm:$0xff]  }
 0x721   : > { %12710 = vmatmul.mubr.bf16.gmra.mrb[220].mxu1 %v17566_v33  ;;  %12721 = vmatpush1.bf16.xpose.msra.mxu0 %v17558_v34  ;;  %v17626_v33 = vld [vmem:[%s21177_s0 + $0x6d8] ss:$648 sps:$4 sm:$0xff]  }
 0x722   : > { %12770 = vmatpush1.bf16.xpose.msra.mxu1 %v17561_v35  ;;  %12722 = vmatprep.subr.bf16.mxu0 %v17569_v36  ;;  %v17618_v34 = vld [vmem:[%s18434_s4 + $0x6e0] ss:$648 sps:$4 sm:$0xff]   ;;  %v17629_v36 = vld [vmem:[%s18434_s4 + $0xbf4] ss:$648 sps:$4 sm:$0xff]  }
 0x723   : > { %12771 = vmatprep.subr.bf16.mxu1 %v17572_v37  ;;  %12750 = vmatprep.mubr.bf16.mxu0 %v17605_v38  ;;  %v17621_v35 = vld [vmem:[%s18434_s4 + $0x6e8] ss:$648 sps:$4 sm:$0xff]   ;;  %v17632_v37 = vld [vmem:[%s18434_s4 + $0xbfc] ss:$648 sps:$4 sm:$0xff]  }
 0x724   : > { %12799 = vmatprep.mubr.bf16.mxu1 %v17608_v39  ;;  %v17665_v38 = vld [vmem:[%s21177_s0 + $0x1d4] ss:$648 sps:$4 sm:$0xff]  }
 0x725   : > { %v17668_v39 = vld [vmem:[%s21177_s0 + $0x1dc] ss:$648 sps:$4 sm:$0xff]  }
 0x729   : > { %12723 = vmatpush1.bf16.xpose.msra.mxu0 %v17567_v40  ;;  %v17627_v40 = vld [vmem:[%s18434_s4 + $0xbf0] ss:$648 sps:$4 sm:$0xff]  }
 0x72a   : > { %12772 = vmatpush1.bf16.xpose.msra.mxu1 %v17570_v41  ;;  %12724 = vmatprep.subr.bf16.mxu0 %v17575_v42  ;;  %v17630_v41 = vld [vmem:[%s18434_s4 + $0xbf8] ss:$648 sps:$4 sm:$0xff]   ;;  %v17635_v42 = vld [vmem:[%s18434_s4 + $0x1104] ss:$648 sps:$4 sm:$0xff]  }
 0x72b   : > { %12773 = vmatprep.subr.bf16.mxu1 %v17578_v43  ;;  %v12360_v44 = vpop.f32.mrb[192].mxu0  ;;  %v17638_v43 = vld [vmem:[%s18434_s4 + $0x110c] ss:$648 sps:$4 sm:$0xff]  }
 0x72c   : > { %v12409_v45 = vpop.f32.mrb[192].mxu1  ;;  %v12361_v46 = vadd.f32 %v12360_v44, %v20237_v55  ;;  %v12362_v47 = vpop.f32.mrb[193].mxu0 }
 0x72d   : > { %v12411_v48 = vpop.f32.mrb[193].mxu1  ;;  %v12363_v49 = vpop.f32.mrb[194].mxu0 }
 0x72e   : > { %v12412_v50 = vpop.f32.mrb[194].mxu1  ;;  %v20305_v56 = vadd.f32 %v12409_v45, %v12361_v46  ;;  %v12364_v58 = vadd.f32 %v12363_v49, %v20242_v62  ;;  %v12365_v59 = vpop.f32.mrb[195].mxu0 }
 0x72f   : > { %v12414_v60 = vpop.f32.mrb[195].mxu1 }
 0x730   : > { %v20310_v63 = vadd.f32 %v12412_v50, %v12364_v58 }
 0x731   : > { %12725 = vmatpush1.bf16.xpose.msra.mxu0 %v17573_v51  ;;  %v17633_v51 = vld [vmem:[%s18434_s4 + $0x1100] ss:$648 sps:$4 sm:$0xff]  }
 0x732   : > { %12774 = vmatpush1.bf16.xpose.msra.mxu1 %v17576_v53  ;;  %12726 = vmatprep.subr.bf16.mxu0 %v17581_v52  ;;  %v17636_v53 = vld [vmem:[%s18434_s4 + $0x1108] ss:$648 sps:$4 sm:$0xff]  }
 0x733   : > { %12775 = vmatprep.subr.bf16.mxu1 %v17584_v54  ;;  %v12368_v55 = vpop.f32.mrb[196].mxu0  ;;  %v17641_v54 = vld [vmem:[%s18434_s4 + $0x1614] ss:$648 sps:$4 sm:$0xff]  }
 0x734   : > { %v12417_v0 = vpop.f32.mrb[196].mxu1  ;;  %v12369_v57 = vadd.f32 %v12368_v55, %v20248_v9  ;;  %v12370_v61 = vpop.f32.mrb[197].mxu0  ;;  %v17644_v55 = vld [vmem:[%s18434_s4 + $0x161c] ss:$648 sps:$4 sm:$0xff]  }
 0x735   : > { %v12419_v62 = vpop.f32.mrb[197].mxu1  ;;  %v12371_v1 = vpop.f32.mrb[198].mxu0 }
 0x736   : > { %v12420_v3 = vpop.f32.mrb[198].mxu1  ;;  %v12372_v6 = vadd.f32 %v12371_v1, %v20252_v8  ;;  %v20316_v2 = vadd.f32 %v12417_v0, %v12369_v57  ;;  %v12373_v14 = vpop.f32.mrb[199].mxu0  ;;  %v17593_v8 = vld [vmem:[%s18434_s4 + $0x2024] ss:$648 sps:$4 sm:$0xff]  }
 0x737   : > { %v12422_v9 = vpop.f32.mrb[199].mxu1  ;;  %v17650_v14 = vld [vmem:[%s18434_s4 + $0x1b2c] ss:$648 sps:$4 sm:$0xff]  }
 0x738   : > { %v20320_v10 = vadd.f32 %v12420_v3, %v12372_v6 }
 0x739   : > { %12727 = vmatpush1.bf16.xpose.msra.mxu0 %v17579_v4  ;;  %v17639_v4 = vld [vmem:[%s18434_s4 + $0x1610] ss:$648 sps:$4 sm:$0xff]  }
 0x73a   : > { %12776 = vmatpush1.bf16.xpose.msra.mxu1 %v17582_v5  ;;  %12728 = vmatprep.subr.bf16.mxu0 %v17587_v7  ;;  %v17642_v5 = vld [vmem:[%s18434_s4 + $0x1618] ss:$648 sps:$4 sm:$0xff]  }
 0x73b   : > { %12777 = vmatprep.subr.bf16.mxu1 %v17590_v13  ;;  %v17647_v13 = vld [vmem:[%s18434_s4 + $0x1b24] ss:$648 sps:$4 sm:$0xff]  }
 0x741   : > { %12729 = vmatpush1.bf16.xpose.msra.mxu0 %v17585_v11 }
 0x742   : > { %12778 = vmatpush1.bf16.xpose.msra.mxu1 %v17588_v12  ;;  %12730 = vmatprep.subr.bf16.mxu0 %v17593_v8  ;;  %v17645_v12 = vld [vmem:[%s18434_s4 + $0x1b20] ss:$648 sps:$4 sm:$0xff]  }
 0x743   : > { %12779 = vmatprep.subr.bf16.mxu1 %v17596_v15  ;;  %v17648_v8 = vld [vmem:[%s18434_s4 + $0x1b28] ss:$648 sps:$4 sm:$0xff]   ;;  %v17656_v15 = vld [vmem:[%s18434_s4 + $0x203c] ss:$648 sps:$4 sm:$0xff]  }
 0x749   : > { %12731 = vmatpush1.bf16.xpose.msra.mxu0 %v17591_v16  ;;  %v17651_v16 = vld [vmem:[%s18434_s4 + $0x2030] ss:$648 sps:$4 sm:$0xff]  }
 0x74a   : > { %12780 = vmatpush1.bf16.xpose.msra.mxu1 %v17594_v17  ;;  %12732 = vmatprep.subr.bf16.mxu0 %v17599_v18  ;;  %v17654_v17 = vld [vmem:[%s18434_s4 + $0x2038] ss:$648 sps:$4 sm:$0xff]   ;;  %v17659_v18 = vld [vmem:[%s18434_s4 + $0x2544] ss:$648 sps:$4 sm:$0xff]  }
 0x74b   : > { %12781 = vmatprep.subr.bf16.mxu1 %v17602_v19  ;;  %v17662_v19 = vld [vmem:[%s18434_s4 + $0x254c] ss:$648 sps:$4 sm:$0xff]  }
 0x751   : > { %12733 = vmatpush1.bf16.xpose.msra.mxu0 %v17597_v20  ;;  %v17657_v20 = vld [vmem:[%s18434_s4 + $0x2540] ss:$648 sps:$4 sm:$0xff]  }
 0x752   : > { %12782 = vmatpush1.bf16.xpose.msra.mxu1 %v17600_v21  ;;  %12816 = vmatprep.subr.bf16.mxu0 %v17611_v22  ;;  %v17660_v21 = vld [vmem:[%s18434_s4 + $0x2548] ss:$648 sps:$4 sm:$0xff]   ;;  %v17671_v22 = vld [vmem:[%s18434_s4 + $0x1e4] ss:$648 sps:$4 sm:$0xff]  }
 0x753   : > { %12865 = vmatprep.subr.bf16.mxu1 %v17614_v23  ;;  %v17674_v23 = vld [vmem:[%s18434_s4 + $0x1ec] ss:$648 sps:$4 sm:$0xff]  }
 0x758   : > { %12751 = vmatmul.mubr.bf16.vlgmr.msra.gmra.mrb[224].mxu0 %v17603_v24  ;;  %v17663_v24 = vld [vmem:[%s21177_s0 + $0x1d0] ss:$648 sps:$4 sm:$0xff]  }
 0x759   : > { %12800 = vmatmul.mubr.bf16.vlgmr.msra.gmra.mrb[224].mxu1 %v17606_v25  ;;  %12817 = vmatpush1.bf16.xpose.msra.mxu0 %v17609_v26  ;;  %v17666_v25 = vld [vmem:[%s21177_s0 + $0x1d8] ss:$648 sps:$4 sm:$0xff]  }
 0x75a   : > { %12866 = vmatpush1.bf16.xpose.msra.mxu1 %v17612_v27  ;;  %12758 = vmatprep.mubr.bf16.mxu0 %v17615_v28  ;;  %v17669_v26 = vld [vmem:[%s18434_s4 + $0x1e0] ss:$648 sps:$4 sm:$0xff]   ;;  %v17675_v28 = vld [vmem:[%s21177_s0 + $0x6e4] ss:$648 sps:$4 sm:$0xff]  }
 0x75b   : > { %12818 = vmatprep.subr.bf16.mxu0 %v17620_v29  ;;  %12867 = vmatprep.subr.bf16.mxu1 %v17623_v30  ;;  %v17672_v27 = vld [vmem:[%s18434_s4 + $0x1e8] ss:$648 sps:$4 sm:$0xff]   ;;  %v17680_v29 = vld [vmem:[%s18434_s4 + $0x6f4] ss:$648 sps:$4 sm:$0xff]  }
 0x75c   : > { %12807 = vmatprep.mubr.bf16.mxu1 %v17624_v31  ;;  %v17683_v30 = vld [vmem:[%s18434_s4 + $0x6fc] ss:$648 sps:$4 sm:$0xff]   ;;  %v17684_v31 = vld [vmem:[%s21177_s0 + $0x6ec] ss:$648 sps:$4 sm:$0xff]  }
 0x760   : > { %12759 = vmatmul.mubr.bf16.gmra.mrb[228].mxu0 %v17617_v32  ;;  %v17677_v32 = vld [vmem:[%s21177_s0 + $0x6e0] ss:$648 sps:$4 sm:$0xff]  }
 0x761   : > { %12808 = vmatmul.mubr.bf16.gmra.mrb[228].mxu1 %v17626_v33  ;;  %12819 = vmatpush1.bf16.xpose.msra.mxu0 %v17618_v34  ;;  %v17686_v33 = vld [vmem:[%s21177_s0 + $0x6e8] ss:$648 sps:$4 sm:$0xff]  }
 0x762   : > { %12868 = vmatpush1.bf16.xpose.msra.mxu1 %v17621_v35  ;;  %12820 = vmatprep.subr.bf16.mxu0 %v17629_v36  ;;  %v17678_v34 = vld [vmem:[%s18434_s4 + $0x6f0] ss:$648 sps:$4 sm:$0xff]   ;;  %v17689_v36 = vld [vmem:[%s18434_s4 + $0xc04] ss:$648 sps:$4 sm:$0xff]  }
 0x763   : > { %12869 = vmatprep.subr.bf16.mxu1 %v17632_v37  ;;  %12848 = vmatprep.mubr.bf16.mxu0 %v17665_v38  ;;  %v17681_v35 = vld [vmem:[%s18434_s4 + $0x6f8] ss:$648 sps:$4 sm:$0xff]   ;;  %v17692_v37 = vld [vmem:[%s18434_s4 + $0xc0c] ss:$648 sps:$4 sm:$0xff]  }
 0x764   : > { %12897 = vmatprep.mubr.bf16.mxu1 %v17668_v39  ;;  %v17725_v38 = vld [vmem:[%s21177_s0 + $0x1e4] ss:$648 sps:$4 sm:$0xff]  }
 0x765   : > { %v17728_v39 = vld [vmem:[%s21177_s0 + $0x1ec] ss:$648 sps:$4 sm:$0xff]  }
 0x769   : > { %12821 = vmatpush1.bf16.xpose.msra.mxu0 %v17627_v40  ;;  %v17687_v40 = vld [vmem:[%s18434_s4 + $0xc00] ss:$648 sps:$4 sm:$0xff]  }
 0x76a   : > { %12870 = vmatpush1.bf16.xpose.msra.mxu1 %v17630_v41  ;;  %12822 = vmatprep.subr.bf16.mxu0 %v17635_v42  ;;  %v17690_v41 = vld [vmem:[%s18434_s4 + $0xc08] ss:$648 sps:$4 sm:$0xff]   ;;  %v17695_v42 = vld [vmem:[%s18434_s4 + $0x1114] ss:$648 sps:$4 sm:$0xff]  }
 0x76b   : > { %12871 = vmatprep.subr.bf16.mxu1 %v17638_v43  ;;  %v12458_v44 = vpop.f32.mrb[200].mxu0  ;;  %v17698_v43 = vld [vmem:[%s18434_s4 + $0x111c] ss:$648 sps:$4 sm:$0xff]  }
 0x76c   : > { %v12507_v45 = vpop.f32.mrb[200].mxu1  ;;  %v12459_v46 = vadd.f32 %v12458_v44, %v20305_v56  ;;  %v12460_v47 = vpop.f32.mrb[201].mxu0 }
 0x76d   : > { %v12509_v48 = vpop.f32.mrb[201].mxu1  ;;  %v12461_v49 = vpop.f32.mrb[202].mxu0 }
 0x76e   : > { %v12510_v50 = vpop.f32.mrb[202].mxu1  ;;  %v20373_v58 = vadd.f32 %v12507_v45, %v12459_v46  ;;  %v12462_v59 = vadd.f32 %v12461_v49, %v20310_v63  ;;  %v12463_v60 = vpop.f32.mrb[203].mxu0 }
 0x76f   : > { %v12512_v52 = vpop.f32.mrb[203].mxu1 }
 0x770   : > { %v20378_v0 = vadd.f32 %v12510_v50, %v12462_v59 }
 0x771   : > { %12823 = vmatpush1.bf16.xpose.msra.mxu0 %v17633_v51  ;;  %v17693_v51 = vld [vmem:[%s18434_s4 + $0x1110] ss:$648 sps:$4 sm:$0xff]  }
 0x772   : > { %12872 = vmatpush1.bf16.xpose.msra.mxu1 %v17636_v53  ;;  %12824 = vmatprep.subr.bf16.mxu0 %v17641_v54  ;;  %v17696_v53 = vld [vmem:[%s18434_s4 + $0x1118] ss:$648 sps:$4 sm:$0xff]  }
 0x773   : > { %12873 = vmatprep.subr.bf16.mxu1 %v17644_v55  ;;  %v12466_v56 = vpop.f32.mrb[204].mxu0  ;;  %v17701_v55 = vld [vmem:[%s18434_s4 + $0x1624] ss:$648 sps:$4 sm:$0xff]  }
 0x774   : > { %v12515_v57 = vpop.f32.mrb[204].mxu1  ;;  %v12467_v61 = vadd.f32 %v12466_v56, %v20316_v2  ;;  %v12468_v62 = vpop.f32.mrb[205].mxu0  ;;  %v17704_v56 = vld [vmem:[%s18434_s4 + $0x162c] ss:$648 sps:$4 sm:$0xff]  }
 0x775   : > { %v12517_v63 = vpop.f32.mrb[205].mxu1  ;;  %v12469_v1 = vpop.f32.mrb[206].mxu0 }
 0x776   : > { %v12518_v3 = vpop.f32.mrb[206].mxu1  ;;  %v12470_v6 = vadd.f32 %v12469_v1, %v20320_v10  ;;  %v20384_v7 = vadd.f32 %v12515_v57, %v12467_v61  ;;  %v12471_v9 = vpop.f32.mrb[207].mxu0  ;;  %v17653_v10 = vld [vmem:[%s18434_s4 + $0x2034] ss:$648 sps:$4 sm:$0xff]  }
 0x777   : > { %v12520_v2 = vpop.f32.mrb[207].mxu1  ;;  %v17710_v9 = vld [vmem:[%s18434_s4 + $0x1b3c] ss:$648 sps:$4 sm:$0xff]  }
 0x778   : > { %v20388_v11 = vadd.f32 %v12518_v3, %v12470_v6 }
 0x779   : > { %12825 = vmatpush1.bf16.xpose.msra.mxu0 %v17639_v4  ;;  %v17699_v4 = vld [vmem:[%s18434_s4 + $0x1620] ss:$648 sps:$4 sm:$0xff]  }
 0x77a   : > { %12874 = vmatpush1.bf16.xpose.msra.mxu1 %v17642_v5  ;;  %12826 = vmatprep.subr.bf16.mxu0 %v17647_v13  ;;  %v17702_v5 = vld [vmem:[%s18434_s4 + $0x1628] ss:$648 sps:$4 sm:$0xff]  }
 0x77b   : > { %12875 = vmatprep.subr.bf16.mxu1 %v17650_v14  ;;  %v17707_v14 = vld [vmem:[%s18434_s4 + $0x1b34] ss:$648 sps:$4 sm:$0xff]  }
 0x781   : > { %12827 = vmatpush1.bf16.xpose.msra.mxu0 %v17645_v12 }
 0x782   : > { %12876 = vmatpush1.bf16.xpose.msra.mxu1 %v17648_v8  ;;  %12828 = vmatprep.subr.bf16.mxu0 %v17653_v10  ;;  %v17705_v8 = vld [vmem:[%s18434_s4 + $0x1b30] ss:$648 sps:$4 sm:$0xff]  }
 0x783   : > { %12877 = vmatprep.subr.bf16.mxu1 %v17656_v15  ;;  %v17708_v10 = vld [vmem:[%s18434_s4 + $0x1b38] ss:$648 sps:$4 sm:$0xff]   ;;  %v17716_v15 = vld [vmem:[%s18434_s4 + $0x204c] ss:$648 sps:$4 sm:$0xff]  }
 0x789   : > { %12829 = vmatpush1.bf16.xpose.msra.mxu0 %v17651_v16  ;;  %v17711_v16 = vld [vmem:[%s18434_s4 + $0x2040] ss:$648 sps:$4 sm:$0xff]  }
 0x78a   : > { %12878 = vmatpush1.bf16.xpose.msra.mxu1 %v17654_v17  ;;  %12830 = vmatprep.subr.bf16.mxu0 %v17659_v18  ;;  %v17714_v17 = vld [vmem:[%s18434_s4 + $0x2048] ss:$648 sps:$4 sm:$0xff]   ;;  %v17719_v18 = vld [vmem:[%s18434_s4 + $0x2554] ss:$648 sps:$4 sm:$0xff]  }
 0x78b   : > { %12879 = vmatprep.subr.bf16.mxu1 %v17662_v19  ;;  %v17722_v19 = vld [vmem:[%s18434_s4 + $0x255c] ss:$648 sps:$4 sm:$0xff]  }
 0x791   : > { %12831 = vmatpush1.bf16.xpose.msra.mxu0 %v17657_v20  ;;  %v17717_v20 = vld [vmem:[%s18434_s4 + $0x2550] ss:$648 sps:$4 sm:$0xff]  }
 0x792   : > { %12880 = vmatpush1.bf16.xpose.msra.mxu1 %v17660_v21  ;;  %12914 = vmatprep.subr.bf16.mxu0 %v17671_v22  ;;  %v17720_v21 = vld [vmem:[%s18434_s4 + $0x2558] ss:$648 sps:$4 sm:$0xff]   ;;  %v17731_v22 = vld [vmem:[%s18434_s4 + $0x1f4] ss:$648 sps:$4 sm:$0xff]  }
 0x793   : > { %12963 = vmatprep.subr.bf16.mxu1 %v17674_v23  ;;  %v17734_v23 = vld [vmem:[%s18434_s4 + $0x1fc] ss:$648 sps:$4 sm:$0xff]  }
 0x798   : > { %12849 = vmatmul.mubr.bf16.vlgmr.msra.gmra.mrb[232].mxu0 %v17663_v24  ;;  %v17723_v24 = vld [vmem:[%s21177_s0 + $0x1e0] ss:$648 sps:$4 sm:$0xff]  }
 0x799   : > { %12898 = vmatmul.mubr.bf16.vlgmr.msra.gmra.mrb[232].mxu1 %v17666_v25  ;;  %12915 = vmatpush1.bf16.xpose.msra.mxu0 %v17669_v26  ;;  %v17726_v25 = vld [vmem:[%s21177_s0 + $0x1e8] ss:$648 sps:$4 sm:$0xff]  }
 0x79a   : > { %12964 = vmatpush1.bf16.xpose.msra.mxu1 %v17672_v27  ;;  %12856 = vmatprep.mubr.bf16.mxu0 %v17675_v28  ;;  %v17729_v26 = vld [vmem:[%s18434_s4 + $0x1f0] ss:$648 sps:$4 sm:$0xff]   ;;  %v17735_v28 = vld [vmem:[%s21177_s0 + $0x6f4] ss:$648 sps:$4 sm:$0xff]  }
 0x79b   : > { %12916 = vmatprep.subr.bf16.mxu0 %v17680_v29  ;;  %12965 = vmatprep.subr.bf16.mxu1 %v17683_v30  ;;  %v17732_v27 = vld [vmem:[%s18434_s4 + $0x1f8] ss:$648 sps:$4 sm:$0xff]   ;;  %v17740_v29 = vld [vmem:[%s18434_s4 + $0x704] ss:$648 sps:$4 sm:$0xff]  }
 0x79c   : > { %12905 = vmatprep.mubr.bf16.mxu1 %v17684_v31  ;;  %v17743_v30 = vld [vmem:[%s18434_s4 + $0x70c] ss:$648 sps:$4 sm:$0xff]   ;;  %v17744_v31 = vld [vmem:[%s21177_s0 + $0x6fc] ss:$648 sps:$4 sm:$0xff]  }
 0x7a0   : > { %12857 = vmatmul.mubr.bf16.gmra.mrb[236].mxu0 %v17677_v32  ;;  %v17737_v32 = vld [vmem:[%s21177_s0 + $0x6f0] ss:$648 sps:$4 sm:$0xff]  }
 0x7a1   : > { %12906 = vmatmul.mubr.bf16.gmra.mrb[236].mxu1 %v17686_v33  ;;  %12917 = vmatpush1.bf16.xpose.msra.mxu0 %v17678_v34  ;;  %v17746_v33 = vld [vmem:[%s21177_s0 + $0x6f8] ss:$648 sps:$4 sm:$0xff]  }
 0x7a2   : > { %12966 = vmatpush1.bf16.xpose.msra.mxu1 %v17681_v35  ;;  %12918 = vmatprep.subr.bf16.mxu0 %v17689_v36  ;;  %v17738_v34 = vld [vmem:[%s18434_s4 + $0x700] ss:$648 sps:$4 sm:$0xff]   ;;  %v17749_v36 = vld [vmem:[%s18434_s4 + $0xc14] ss:$648 sps:$4 sm:$0xff]  }
 0x7a3   : > { %12967 = vmatprep.subr.bf16.mxu1 %v17692_v37  ;;  %12946 = vmatprep.mubr.bf16.mxu0 %v17725_v38  ;;  %v17741_v35 = vld [vmem:[%s18434_s4 + $0x708] ss:$648 sps:$4 sm:$0xff]   ;;  %v17752_v37 = vld [vmem:[%s18434_s4 + $0xc1c] ss:$648 sps:$4 sm:$0xff]  }
 0x7a4   : > { %12995 = vmatprep.mubr.bf16.mxu1 %v17728_v39  ;;  %v17785_v38 = vld [vmem:[%s21177_s0 + $0x1f4] ss:$648 sps:$4 sm:$0xff]  }
 0x7a5   : > { %v17788_v39 = vld [vmem:[%s21177_s0 + $0x1fc] ss:$648 sps:$4 sm:$0xff]  }
 0x7a9   : > { %12919 = vmatpush1.bf16.xpose.msra.mxu0 %v17687_v40  ;;  %v17747_v40 = vld [vmem:[%s18434_s4 + $0xc10] ss:$648 sps:$4 sm:$0xff]  }
 0x7aa   : > { %12968 = vmatpush1.bf16.xpose.msra.mxu1 %v17690_v41  ;;  %12920 = vmatprep.subr.bf16.mxu0 %v17695_v42  ;;  %v17750_v41 = vld [vmem:[%s18434_s4 + $0xc18] ss:$648 sps:$4 sm:$0xff]   ;;  %v17755_v42 = vld [vmem:[%s18434_s4 + $0x1124] ss:$648 sps:$4 sm:$0xff]  }
 0x7ab   : > { %12969 = vmatprep.subr.bf16.mxu1 %v17698_v43  ;;  %v12556_v44 = vpop.f32.mrb[208].mxu0  ;;  %v17758_v43 = vld [vmem:[%s18434_s4 + $0x112c] ss:$648 sps:$4 sm:$0xff]  }
 0x7ac   : > { %v12605_v45 = vpop.f32.mrb[208].mxu1  ;;  %v12557_v46 = vadd.f32 %v12556_v44, %v20373_v58  ;;  %v12558_v47 = vpop.f32.mrb[209].mxu0 }
 0x7ad   : > { %v12607_v48 = vpop.f32.mrb[209].mxu1  ;;  %v12559_v49 = vpop.f32.mrb[210].mxu0 }
 0x7ae   : > { %v12608_v50 = vpop.f32.mrb[210].mxu1  ;;  %v20441_v59 = vadd.f32 %v12605_v45, %v12557_v46  ;;  %v12560_v60 = vadd.f32 %v12559_v49, %v20378_v0  ;;  %v12561_v52 = vpop.f32.mrb[211].mxu0 }
 0x7af   : > { %v12610_v54 = vpop.f32.mrb[211].mxu1 }
 0x7b0   : > { %v20446_v57 = vadd.f32 %v12608_v50, %v12560_v60 }
 0x7b1   : > { %12921 = vmatpush1.bf16.xpose.msra.mxu0 %v17693_v51  ;;  %v17753_v51 = vld [vmem:[%s18434_s4 + $0x1120] ss:$648 sps:$4 sm:$0xff]  }
 0x7b2   : > { %12970 = vmatpush1.bf16.xpose.msra.mxu1 %v17696_v53  ;;  %12922 = vmatprep.subr.bf16.mxu0 %v17701_v55  ;;  %v17756_v53 = vld [vmem:[%s18434_s4 + $0x1128] ss:$648 sps:$4 sm:$0xff]  }
 0x7b3   : > { %12971 = vmatprep.subr.bf16.mxu1 %v17704_v56  ;;  %v12564_v58 = vpop.f32.mrb[212].mxu0  ;;  %v17761_v56 = vld [vmem:[%s18434_s4 + $0x1634] ss:$648 sps:$4 sm:$0xff]  }
 0x7b4   : > { %v12613_v61 = vpop.f32.mrb[212].mxu1  ;;  %v12565_v62 = vadd.f32 %v12564_v58, %v20384_v7  ;;  %v12566_v63 = vpop.f32.mrb[213].mxu0  ;;  %v17764_v58 = vld [vmem:[%s18434_s4 + $0x163c] ss:$648 sps:$4 sm:$0xff]  }
 0x7b5   : > { %v12615_v0 = vpop.f32.mrb[213].mxu1  ;;  %v12567_v1 = vpop.f32.mrb[214].mxu0 }
 0x7b6   : > { %v12616_v3 = vpop.f32.mrb[214].mxu1  ;;  %v12568_v6 = vadd.f32 %v12567_v1, %v20388_v11  ;;  %v20452_v13 = vadd.f32 %v12613_v61, %v12565_v62  ;;  %v12569_v2 = vpop.f32.mrb[215].mxu0  ;;  %v17713_v11 = vld [vmem:[%s18434_s4 + $0x2044] ss:$648 sps:$4 sm:$0xff]  }
 0x7b7   : > { %v12618_v7 = vpop.f32.mrb[215].mxu1  ;;  %v17770_v2 = vld [vmem:[%s18434_s4 + $0x1b4c] ss:$648 sps:$4 sm:$0xff]  }
 0x7b8   : > { %v20456_v12 = vadd.f32 %v12616_v3, %v12568_v6 }
 0x7b9   : > { %12923 = vmatpush1.bf16.xpose.msra.mxu0 %v17699_v4  ;;  %v17759_v4 = vld [vmem:[%s18434_s4 + $0x1630] ss:$648 sps:$4 sm:$0xff]  }
 0x7ba   : > { %12972 = vmatpush1.bf16.xpose.msra.mxu1 %v17702_v5  ;;  %12924 = vmatprep.subr.bf16.mxu0 %v17707_v14  ;;  %v17762_v5 = vld [vmem:[%s18434_s4 + $0x1638] ss:$648 sps:$4 sm:$0xff]  }
 0x7bb   : > { %12973 = vmatprep.subr.bf16.mxu1 %v17710_v9  ;;  %v17767_v9 = vld [vmem:[%s18434_s4 + $0x1b44] ss:$648 sps:$4 sm:$0xff]  }
 0x7c1   : > { %12925 = vmatpush1.bf16.xpose.msra.mxu0 %v17705_v8 }
 0x7c2   : > { %12974 = vmatpush1.bf16.xpose.msra.mxu1 %v17708_v10  ;;  %12926 = vmatprep.subr.bf16.mxu0 %v17713_v11  ;;  %v17765_v10 = vld [vmem:[%s18434_s4 + $0x1b40] ss:$648 sps:$4 sm:$0xff]  }
 0x7c3   : > { %12975 = vmatprep.subr.bf16.mxu1 %v17716_v15  ;;  %v17768_v11 = vld [vmem:[%s18434_s4 + $0x1b48] ss:$648 sps:$4 sm:$0xff]   ;;  %v17776_v15 = vld [vmem:[%s18434_s4 + $0x205c] ss:$648 sps:$4 sm:$0xff]  }
 0x7c9   : > { %12927 = vmatpush1.bf16.xpose.msra.mxu0 %v17711_v16  ;;  %v17771_v16 = vld [vmem:[%s18434_s4 + $0x2050] ss:$648 sps:$4 sm:$0xff]  }
 0x7ca   : > { %12976 = vmatpush1.bf16.xpose.msra.mxu1 %v17714_v17  ;;  %12928 = vmatprep.subr.bf16.mxu0 %v17719_v18  ;;  %v17774_v17 = vld [vmem:[%s18434_s4 + $0x2058] ss:$648 sps:$4 sm:$0xff]   ;;  %v17779_v18 = vld [vmem:[%s18434_s4 + $0x2564] ss:$648 sps:$4 sm:$0xff]  }
 0x7cb   : > { %12977 = vmatprep.subr.bf16.mxu1 %v17722_v19  ;;  %v17782_v19 = vld [vmem:[%s18434_s4 + $0x256c] ss:$648 sps:$4 sm:$0xff]  }
 0x7d1   : > { %12929 = vmatpush1.bf16.xpose.msra.mxu0 %v17717_v20  ;;  %v17777_v20 = vld [vmem:[%s18434_s4 + $0x2560] ss:$648 sps:$4 sm:$0xff]  }
 0x7d2   : > { %12978 = vmatpush1.bf16.xpose.msra.mxu1 %v17720_v21  ;;  %13012 = vmatprep.subr.bf16.mxu0 %v17731_v22  ;;  %v17780_v21 = vld [vmem:[%s18434_s4 + $0x2568] ss:$648 sps:$4 sm:$0xff]   ;;  %v17791_v22 = vld [vmem:[%s18434_s4 + $0x204] ss:$648 sps:$4 sm:$0xff]  }
 0x7d3   : > { %13061 = vmatprep.subr.bf16.mxu1 %v17734_v23  ;;  %v17794_v23 = vld [vmem:[%s18434_s4 + $0x20c] ss:$648 sps:$4 sm:$0xff]  }
 0x7d8   : > { %12947 = vmatmul.mubr.bf16.vlgmr.msra.gmra.mrb[240].mxu0 %v17723_v24  ;;  %v17783_v24 = vld [vmem:[%s21177_s0 + $0x1f0] ss:$648 sps:$4 sm:$0xff]  }
 0x7d9   : > { %12996 = vmatmul.mubr.bf16.vlgmr.msra.gmra.mrb[240].mxu1 %v17726_v25  ;;  %13013 = vmatpush1.bf16.xpose.msra.mxu0 %v17729_v26  ;;  %v17786_v25 = vld [vmem:[%s21177_s0 + $0x1f8] ss:$648 sps:$4 sm:$0xff]  }
 0x7da   : > { %13062 = vmatpush1.bf16.xpose.msra.mxu1 %v17732_v27  ;;  %12954 = vmatprep.mubr.bf16.mxu0 %v17735_v28  ;;  %v17789_v26 = vld [vmem:[%s18434_s4 + $0x200] ss:$648 sps:$4 sm:$0xff]   ;;  %v17795_v28 = vld [vmem:[%s21177_s0 + $0x704] ss:$648 sps:$4 sm:$0xff]  }
 0x7db   : > { %13014 = vmatprep.subr.bf16.mxu0 %v17740_v29  ;;  %13063 = vmatprep.subr.bf16.mxu1 %v17743_v30  ;;  %v17792_v27 = vld [vmem:[%s18434_s4 + $0x208] ss:$648 sps:$4 sm:$0xff]   ;;  %v17800_v29 = vld [vmem:[%s18434_s4 + $0x714] ss:$648 sps:$4 sm:$0xff]  }
 0x7dc   : > { %13003 = vmatprep.mubr.bf16.mxu1 %v17744_v31  ;;  %v17803_v30 = vld [vmem:[%s18434_s4 + $0x71c] ss:$648 sps:$4 sm:$0xff]   ;;  %v17804_v31 = vld [vmem:[%s21177_s0 + $0x70c] ss:$648 sps:$4 sm:$0xff]  }
 0x7e0   : > { %12955 = vmatmul.mubr.bf16.gmra.mrb[244].mxu0 %v17737_v32  ;;  %v17797_v32 = vld [vmem:[%s21177_s0 + $0x700] ss:$648 sps:$4 sm:$0xff]  }
 0x7e1   : > { %13004 = vmatmul.mubr.bf16.gmra.mrb[244].mxu1 %v17746_v33  ;;  %13015 = vmatpush1.bf16.xpose.msra.mxu0 %v17738_v34  ;;  %v17806_v33 = vld [vmem:[%s21177_s0 + $0x708] ss:$648 sps:$4 sm:$0xff]  }
 0x7e2   : > { %13064 = vmatpush1.bf16.xpose.msra.mxu1 %v17741_v35  ;;  %13016 = vmatprep.subr.bf16.mxu0 %v17749_v36  ;;  %v17798_v34 = vld [vmem:[%s18434_s4 + $0x710] ss:$648 sps:$4 sm:$0xff]   ;;  %v17809_v36 = vld [vmem:[%s18434_s4 + $0xc24] ss:$648 sps:$4 sm:$0xff]  }
 0x7e3   : > { %13065 = vmatprep.subr.bf16.mxu1 %v17752_v37  ;;  %13044 = vmatprep.mubr.bf16.mxu0 %v17785_v38  ;;  %v17801_v35 = vld [vmem:[%s18434_s4 + $0x718] ss:$648 sps:$4 sm:$0xff]   ;;  %v17812_v37 = vld [vmem:[%s18434_s4 + $0xc2c] ss:$648 sps:$4 sm:$0xff]  }
 0x7e4   : > { %13093 = vmatprep.mubr.bf16.mxu1 %v17788_v39  ;;  %v17845_v38 = vld [vmem:[%s21177_s0 + $0x204] ss:$648 sps:$4 sm:$0xff]  }
 0x7e5   : > { %v17848_v39 = vld [vmem:[%s21177_s0 + $0x20c] ss:$648 sps:$4 sm:$0xff]  }
 0x7e9   : > { %13017 = vmatpush1.bf16.xpose.msra.mxu0 %v17747_v40  ;;  %v17807_v40 = vld [vmem:[%s18434_s4 + $0xc20] ss:$648 sps:$4 sm:$0xff]  }
 0x7ea   : > { %13066 = vmatpush1.bf16.xpose.msra.mxu1 %v17750_v41  ;;  %13018 = vmatprep.subr.bf16.mxu0 %v17755_v42  ;;  %v17810_v41 = vld [vmem:[%s18434_s4 + $0xc28] ss:$648 sps:$4 sm:$0xff]   ;;  %v17815_v42 = vld [vmem:[%s18434_s4 + $0x1134] ss:$648 sps:$4 sm:$0xff]  }
 0x7eb   : > { %13067 = vmatprep.subr.bf16.mxu1 %v17758_v43  ;;  %v12654_v44 = vpop.f32.mrb[216].mxu0  ;;  %v17818_v43 = vld [vmem:[%s18434_s4 + $0x113c] ss:$648 sps:$4 sm:$0xff]  }
 0x7ec   : > { %v12703_v45 = vpop.f32.mrb[216].mxu1  ;;  %v12655_v46 = vadd.f32 %v12654_v44, %v20441_v59  ;;  %v12656_v47 = vpop.f32.mrb[217].mxu0 }
 0x7ed   : > { %v12705_v48 = vpop.f32.mrb[217].mxu1  ;;  %v12657_v49 = vpop.f32.mrb[218].mxu0 }
 0x7ee   : > { %v12706_v50 = vpop.f32.mrb[218].mxu1  ;;  %v20509_v60 = vadd.f32 %v12703_v45, %v12655_v46  ;;  %v12658_v52 = vadd.f32 %v12657_v49, %v20446_v57  ;;  %v12659_v54 = vpop.f32.mrb[219].mxu0 }
 0x7ef   : > { %v12708_v55 = vpop.f32.mrb[219].mxu1 }
 0x7f0   : > { %v20514_v61 = vadd.f32 %v12706_v50, %v12658_v52 }
 0x7f1   : > { %13019 = vmatpush1.bf16.xpose.msra.mxu0 %v17753_v51  ;;  %v17813_v51 = vld [vmem:[%s18434_s4 + $0x1130] ss:$648 sps:$4 sm:$0xff]  }
 0x7f2   : > { %13068 = vmatpush1.bf16.xpose.msra.mxu1 %v17756_v53  ;;  %13020 = vmatprep.subr.bf16.mxu0 %v17761_v56  ;;  %v17816_v53 = vld [vmem:[%s18434_s4 + $0x1138] ss:$648 sps:$4 sm:$0xff]  }
 0x7f3   : > { %13069 = vmatprep.subr.bf16.mxu1 %v17764_v58  ;;  %v12662_v59 = vpop.f32.mrb[220].mxu0  ;;  %v17821_v58 = vld [vmem:[%s18434_s4 + $0x1644] ss:$648 sps:$4 sm:$0xff]  }
 0x7f4   : > { %v12711_v62 = vpop.f32.mrb[220].mxu1  ;;  %v12663_v63 = vadd.f32 %v12662_v59, %v20452_v13  ;;  %v12664_v0 = vpop.f32.mrb[221].mxu0  ;;  %v17824_v59 = vld [vmem:[%s18434_s4 + $0x164c] ss:$648 sps:$4 sm:$0xff]  }
 0x7f5   : > { %v12713_v57 = vpop.f32.mrb[221].mxu1  ;;  %v12665_v1 = vpop.f32.mrb[222].mxu0 }
 0x7f6   : > { %v12714_v3 = vpop.f32.mrb[222].mxu1  ;;  %v12666_v6 = vadd.f32 %v12665_v1, %v20456_v12  ;;  %v20520_v14 = vadd.f32 %v12711_v62, %v12663_v63  ;;  %v12667_v7 = vpop.f32.mrb[223].mxu0  ;;  %v17773_v12 = vld [vmem:[%s18434_s4 + $0x2054] ss:$648 sps:$4 sm:$0xff]  }
 0x7f7   : > { %v12716_v13 = vpop.f32.mrb[223].mxu1  ;;  %v17830_v7 = vld [vmem:[%s18434_s4 + $0x1b5c] ss:$648 sps:$4 sm:$0xff]  }
 0x7f8   : > { %v20524_v8 = vadd.f32 %v12714_v3, %v12666_v6 }
 0x7f9   : > { %13021 = vmatpush1.bf16.xpose.msra.mxu0 %v17759_v4  ;;  %v17819_v4 = vld [vmem:[%s18434_s4 + $0x1640] ss:$648 sps:$4 sm:$0xff]  }
 0x7fa   : > { %13070 = vmatpush1.bf16.xpose.msra.mxu1 %v17762_v5  ;;  %13022 = vmatprep.subr.bf16.mxu0 %v17767_v9  ;;  %v17822_v5 = vld [vmem:[%s18434_s4 + $0x1648] ss:$648 sps:$4 sm:$0xff]  }
 0x7fb   : > { %13071 = vmatprep.subr.bf16.mxu1 %v17770_v2  ;;  %v17827_v2 = vld [vmem:[%s18434_s4 + $0x1b54] ss:$648 sps:$4 sm:$0xff]  }
 0x801   : > { %13023 = vmatpush1.bf16.xpose.msra.mxu0 %v17765_v10 }
 0x802   : > { %13072 = vmatpush1.bf16.xpose.msra.mxu1 %v17768_v11  ;;  %13024 = vmatprep.subr.bf16.mxu0 %v17773_v12  ;;  %v17825_v11 = vld [vmem:[%s18434_s4 + $0x1b50] ss:$648 sps:$4 sm:$0xff]  }
 0x803   : > { %13073 = vmatprep.subr.bf16.mxu1 %v17776_v15  ;;  %v17828_v12 = vld [vmem:[%s18434_s4 + $0x1b58] ss:$648 sps:$4 sm:$0xff]   ;;  %v17836_v15 = vld [vmem:[%s18434_s4 + $0x206c] ss:$648 sps:$4 sm:$0xff]  }
 0x809   : > { %13025 = vmatpush1.bf16.xpose.msra.mxu0 %v17771_v16  ;;  %v17831_v16 = vld [vmem:[%s18434_s4 + $0x2060] ss:$648 sps:$4 sm:$0xff]  }
 0x80a   : > { %13074 = vmatpush1.bf16.xpose.msra.mxu1 %v17774_v17  ;;  %13026 = vmatprep.subr.bf16.mxu0 %v17779_v18  ;;  %v17834_v17 = vld [vmem:[%s18434_s4 + $0x2068] ss:$648 sps:$4 sm:$0xff]   ;;  %v17839_v18 = vld [vmem:[%s18434_s4 + $0x2574] ss:$648 sps:$4 sm:$0xff]  }
 0x80b   : > { %13075 = vmatprep.subr.bf16.mxu1 %v17782_v19  ;;  %v17842_v19 = vld [vmem:[%s18434_s4 + $0x257c] ss:$648 sps:$4 sm:$0xff]  }
 0x811   : > { %13027 = vmatpush1.bf16.xpose.msra.mxu0 %v17777_v20  ;;  %v17837_v20 = vld [vmem:[%s18434_s4 + $0x2570] ss:$648 sps:$4 sm:$0xff]  }
 0x812   : > { %13076 = vmatpush1.bf16.xpose.msra.mxu1 %v17780_v21  ;;  %13110 = vmatprep.subr.bf16.mxu0 %v17791_v22  ;;  %v17840_v21 = vld [vmem:[%s18434_s4 + $0x2578] ss:$648 sps:$4 sm:$0xff]   ;;  %v17851_v22 = vld [vmem:[%s18434_s4 + $0x214] ss:$648 sps:$4 sm:$0xff]  }
 0x813   : > { %13159 = vmatprep.subr.bf16.mxu1 %v17794_v23  ;;  %v17854_v23 = vld [vmem:[%s18434_s4 + $0x21c] ss:$648 sps:$4 sm:$0xff]  }
 0x818   : > { %13045 = vmatmul.mubr.bf16.vlgmr.msra.gmra.mrb[248].mxu0 %v17783_v24  ;;  %v17843_v24 = vld [vmem:[%s21177_s0 + $0x200] ss:$648 sps:$4 sm:$0xff]  }
 0x819   : > { %13094 = vmatmul.mubr.bf16.vlgmr.msra.gmra.mrb[248].mxu1 %v17786_v25  ;;  %13111 = vmatpush1.bf16.xpose.msra.mxu0 %v17789_v26  ;;  %v17846_v25 = vld [vmem:[%s21177_s0 + $0x208] ss:$648 sps:$4 sm:$0xff]  }
 0x81a   : > { %13160 = vmatpush1.bf16.xpose.msra.mxu1 %v17792_v27  ;;  %13052 = vmatprep.mubr.bf16.mxu0 %v17795_v28  ;;  %v17849_v26 = vld [vmem:[%s18434_s4 + $0x210] ss:$648 sps:$4 sm:$0xff]   ;;  %v17857_v28 = vld [vmem:[%s21177_s0 + $0x714] ss:$648 sps:$4 sm:$0xff]  }
 0x81b   : > { %13112 = vmatprep.subr.bf16.mxu0 %v17800_v29  ;;  %13161 = vmatprep.subr.bf16.mxu1 %v17803_v30  ;;  %v17852_v27 = vld [vmem:[%s18434_s4 + $0x218] ss:$648 sps:$4 sm:$0xff]   ;;  %v17860_v29 = vld [vmem:[%s18434_s4 + $0x724] ss:$648 sps:$4 sm:$0xff]  }
 0x81c   : > { %13101 = vmatprep.mubr.bf16.mxu1 %v17804_v31  ;;  %v17863_v30 = vld [vmem:[%s18434_s4 + $0x72c] ss:$648 sps:$4 sm:$0xff]   ;;  %v17866_v31 = vld [vmem:[%s21177_s0 + $0x71c] ss:$648 sps:$4 sm:$0xff]  }
 0x820   : > { %13053 = vmatmul.mubr.bf16.gmra.mrb[252].mxu0 %v17797_v32  ;;  %v17855_v32 = vld [vmem:[%s21177_s0 + $0x710] ss:$648 sps:$4 sm:$0xff]  }
 0x821   : > { %13102 = vmatmul.mubr.bf16.gmra.mrb[252].mxu1 %v17806_v33  ;;  %13113 = vmatpush1.bf16.xpose.msra.mxu0 %v17798_v34  ;;  %v17864_v33 = vld [vmem:[%s21177_s0 + $0x718] ss:$648 sps:$4 sm:$0xff]  }
 0x822   : > { %13162 = vmatpush1.bf16.xpose.msra.mxu1 %v17801_v35  ;;  %13114 = vmatprep.subr.bf16.mxu0 %v17809_v36  ;;  %v17858_v34 = vld [vmem:[%s18434_s4 + $0x720] ss:$648 sps:$4 sm:$0xff]   ;;  %v17869_v36 = vld [vmem:[%s18434_s4 + $0xc34] ss:$648 sps:$4 sm:$0xff]  }
 0x823   : > { %13163 = vmatprep.subr.bf16.mxu1 %v17812_v37  ;;  %13142 = vmatprep.mubr.bf16.mxu0 %v17845_v38  ;;  %v17861_v35 = vld [vmem:[%s18434_s4 + $0x728] ss:$648 sps:$4 sm:$0xff]   ;;  %v17872_v37 = vld [vmem:[%s18434_s4 + $0xc3c] ss:$648 sps:$4 sm:$0xff]  }
 0x824   : > { %13191 = vmatprep.mubr.bf16.mxu1 %v17848_v39  ;;  %v17905_v38 = vld [vmem:[%s21177_s0 + $0x214] ss:$648 sps:$4 sm:$0xff]  }
 0x825   : > { %v17908_v39 = vld [vmem:[%s21177_s0 + $0x21c] ss:$648 sps:$4 sm:$0xff]  }
 0x829   : > { %13115 = vmatpush1.bf16.xpose.msra.mxu0 %v17807_v40  ;;  %v17867_v40 = vld [vmem:[%s18434_s4 + $0xc30] ss:$648 sps:$4 sm:$0xff]  }
 0x82a   : > { %13164 = vmatpush1.bf16.xpose.msra.mxu1 %v17810_v41  ;;  %13116 = vmatprep.subr.bf16.mxu0 %v17815_v42  ;;  %v17870_v41 = vld [vmem:[%s18434_s4 + $0xc38] ss:$648 sps:$4 sm:$0xff]   ;;  %v17875_v42 = vld [vmem:[%s18434_s4 + $0x1144] ss:$648 sps:$4 sm:$0xff]  }
 0x82b   : > { %13165 = vmatprep.subr.bf16.mxu1 %v17818_v43  ;;  %v12752_v44 = vpop.f32.mrb[224].mxu0  ;;  %v17878_v43 = vld [vmem:[%s18434_s4 + $0x114c] ss:$648 sps:$4 sm:$0xff]  }
 0x82c   : > { %v12801_v45 = vpop.f32.mrb[224].mxu1  ;;  %v12753_v46 = vadd.f32 %v12752_v44, %v20509_v60  ;;  %v12754_v47 = vpop.f32.mrb[225].mxu0 }
 0x82d   : > { %v12803_v48 = vpop.f32.mrb[225].mxu1  ;;  %v12755_v49 = vpop.f32.mrb[226].mxu0 }
 0x82e   : > { %v12804_v50 = vpop.f32.mrb[226].mxu1  ;;  %v20577_v52 = vadd.f32 %v12801_v45, %v12753_v46  ;;  %v12756_v54 = vadd.f32 %v12755_v49, %v20514_v61  ;;  %v12757_v55 = vpop.f32.mrb[227].mxu0 }
 0x82f   : > { %v12806_v56 = vpop.f32.mrb[227].mxu1 }
 0x830   : > { %v20582_v62 = vadd.f32 %v12804_v50, %v12756_v54 }
 0x831   : > { %13117 = vmatpush1.bf16.xpose.msra.mxu0 %v17813_v51  ;;  %v17873_v51 = vld [vmem:[%s18434_s4 + $0x1140] ss:$648 sps:$4 sm:$0xff]  }
 0x832   : > { %13166 = vmatpush1.bf16.xpose.msra.mxu1 %v17816_v53  ;;  %13118 = vmatprep.subr.bf16.mxu0 %v17821_v58  ;;  %v17876_v53 = vld [vmem:[%s18434_s4 + $0x1148] ss:$648 sps:$4 sm:$0xff]  }
 0x833   : > { %13167 = vmatprep.subr.bf16.mxu1 %v17824_v59  ;;  %v12760_v60 = vpop.f32.mrb[228].mxu0  ;;  %v17881_v59 = vld [vmem:[%s18434_s4 + $0x1654] ss:$648 sps:$4 sm:$0xff]  }
 0x834   : > { %v12809_v63 = vpop.f32.mrb[228].mxu1  ;;  %v12761_v0 = vadd.f32 %v12760_v60, %v20520_v14  ;;  %v12762_v57 = vpop.f32.mrb[229].mxu0  ;;  %v17884_v60 = vld [vmem:[%s18434_s4 + $0x165c] ss:$648 sps:$4 sm:$0xff]  }
 0x835   : > { %v12811_v61 = vpop.f32.mrb[229].mxu1  ;;  %v12763_v1 = vpop.f32.mrb[230].mxu0 }
 0x836   : > { %v12812_v3 = vpop.f32.mrb[230].mxu1  ;;  %v12764_v6 = vadd.f32 %v12763_v1, %v20524_v8  ;;  %v20588_v9 = vadd.f32 %v12809_v63, %v12761_v0  ;;  %v12765_v13 = vpop.f32.mrb[231].mxu0  ;;  %v17833_v8 = vld [vmem:[%s18434_s4 + $0x2064] ss:$648 sps:$4 sm:$0xff]  }
 0x837   : > { %v12814_v14 = vpop.f32.mrb[231].mxu1  ;;  %v17890_v13 = vld [vmem:[%s18434_s4 + $0x1b6c] ss:$648 sps:$4 sm:$0xff]  }
 0x838   : > { %v20592_v10 = vadd.f32 %v12812_v3, %v12764_v6 }
 0x839   : > { %13119 = vmatpush1.bf16.xpose.msra.mxu0 %v17819_v4  ;;  %v17879_v4 = vld [vmem:[%s18434_s4 + $0x1650] ss:$648 sps:$4 sm:$0xff]  }
 0x83a   : > { %13168 = vmatpush1.bf16.xpose.msra.mxu1 %v17822_v5  ;;  %13120 = vmatprep.subr.bf16.mxu0 %v17827_v2  ;;  %v17882_v5 = vld [vmem:[%s18434_s4 + $0x1658] ss:$648 sps:$4 sm:$0xff]  }
 0x83b   : > { %13169 = vmatprep.subr.bf16.mxu1 %v17830_v7  ;;  %v17887_v7 = vld [vmem:[%s18434_s4 + $0x1b64] ss:$648 sps:$4 sm:$0xff]  }
 0x841   : > { %13121 = vmatpush1.bf16.xpose.msra.mxu0 %v17825_v11 }
 0x842   : > { %13170 = vmatpush1.bf16.xpose.msra.mxu1 %v17828_v12  ;;  %13122 = vmatprep.subr.bf16.mxu0 %v17833_v8  ;;  %v17885_v12 = vld [vmem:[%s18434_s4 + $0x1b60] ss:$648 sps:$4 sm:$0xff]  }
 0x843   : > { %13171 = vmatprep.subr.bf16.mxu1 %v17836_v15  ;;  %v17888_v8 = vld [vmem:[%s18434_s4 + $0x1b68] ss:$648 sps:$4 sm:$0xff]   ;;  %v17896_v15 = vld [vmem:[%s18434_s4 + $0x207c] ss:$648 sps:$4 sm:$0xff]  }
 0x849   : > { %13123 = vmatpush1.bf16.xpose.msra.mxu0 %v17831_v16  ;;  %v17891_v16 = vld [vmem:[%s18434_s4 + $0x2070] ss:$648 sps:$4 sm:$0xff]  }
 0x84a   : > { %13172 = vmatpush1.bf16.xpose.msra.mxu1 %v17834_v17  ;;  %13124 = vmatprep.subr.bf16.mxu0 %v17839_v18  ;;  %v17894_v17 = vld [vmem:[%s18434_s4 + $0x2078] ss:$648 sps:$4 sm:$0xff]   ;;  %v17899_v18 = vld [vmem:[%s18434_s4 + $0x2584] ss:$648 sps:$4 sm:$0xff]  }
 0x84b   : > { %13173 = vmatprep.subr.bf16.mxu1 %v17842_v19  ;;  %v17902_v19 = vld [vmem:[%s18434_s4 + $0x258c] ss:$648 sps:$4 sm:$0xff]  }
 0x851   : > { %13125 = vmatpush1.bf16.xpose.msra.mxu0 %v17837_v20  ;;  %v17897_v20 = vld [vmem:[%s18434_s4 + $0x2580] ss:$648 sps:$4 sm:$0xff]  }
 0x852   : > { %13174 = vmatpush1.bf16.xpose.msra.mxu1 %v17840_v21  ;;  %13208 = vmatprep.subr.bf16.mxu0 %v17851_v22  ;;  %v17900_v21 = vld [vmem:[%s18434_s4 + $0x2588] ss:$648 sps:$4 sm:$0xff]   ;;  %v17911_v22 = vld [vmem:[%s18434_s4 + $0x224] ss:$648 sps:$4 sm:$0xff]  }
 0x853   : > { %13257 = vmatprep.subr.bf16.mxu1 %v17854_v23  ;;  %v17914_v23 = vld [vmem:[%s18434_s4 + $0x22c] ss:$648 sps:$4 sm:$0xff]  }
 0x858   : > { %13143 = vmatmul.mubr.bf16.vlgmr.msra.gmra.mrb[0].mxu0 %v17843_v24  ;;  %v17903_v24 = vld [vmem:[%s21177_s0 + $0x210] ss:$648 sps:$4 sm:$0xff]  }
 0x859   : > { %13192 = vmatmul.mubr.bf16.vlgmr.msra.gmra.mrb[0].mxu1 %v17846_v25  ;;  %13209 = vmatpush1.bf16.xpose.msra.mxu0 %v17849_v26  ;;  %v17906_v25 = vld [vmem:[%s21177_s0 + $0x218] ss:$648 sps:$4 sm:$0xff]  }
 0x85a   : > { %13258 = vmatpush1.bf16.xpose.msra.mxu1 %v17852_v27  ;;  %13150 = vmatprep.mubr.bf16.mxu0 %v17857_v28  ;;  %v17909_v26 = vld [vmem:[%s18434_s4 + $0x220] ss:$648 sps:$4 sm:$0xff]   ;;  %v17917_v28 = vld [vmem:[%s21177_s0 + $0x724] ss:$648 sps:$4 sm:$0xff]  }
 0x85b   : > { %13210 = vmatprep.subr.bf16.mxu0 %v17860_v29  ;;  %13259 = vmatprep.subr.bf16.mxu1 %v17863_v30  ;;  %v17912_v27 = vld [vmem:[%s18434_s4 + $0x228] ss:$648 sps:$4 sm:$0xff]   ;;  %v17920_v29 = vld [vmem:[%s18434_s4 + $0x734] ss:$648 sps:$4 sm:$0xff]  }
 0x85c   : > { %13199 = vmatprep.mubr.bf16.mxu1 %v17866_v31  ;;  %v17923_v30 = vld [vmem:[%s18434_s4 + $0x73c] ss:$648 sps:$4 sm:$0xff]   ;;  %v17926_v31 = vld [vmem:[%s21177_s0 + $0x72c] ss:$648 sps:$4 sm:$0xff]  }
 0x860   : > { %13151 = vmatmul.mubr.bf16.gmra.mrb[4].mxu0 %v17855_v32  ;;  %v17915_v32 = vld [vmem:[%s21177_s0 + $0x720] ss:$648 sps:$4 sm:$0xff]  }
 0x861   : > { %13200 = vmatmul.mubr.bf16.gmra.mrb[4].mxu1 %v17864_v33  ;;  %13211 = vmatpush1.bf16.xpose.msra.mxu0 %v17858_v34  ;;  %v17924_v33 = vld [vmem:[%s21177_s0 + $0x728] ss:$648 sps:$4 sm:$0xff]  }
 0x862   : > { %13260 = vmatpush1.bf16.xpose.msra.mxu1 %v17861_v35  ;;  %13212 = vmatprep.subr.bf16.mxu0 %v17869_v36  ;;  %v17918_v34 = vld [vmem:[%s18434_s4 + $0x730] ss:$648 sps:$4 sm:$0xff]   ;;  %v17929_v36 = vld [vmem:[%s18434_s4 + $0xc44] ss:$648 sps:$4 sm:$0xff]  }
 0x863   : > { %13261 = vmatprep.subr.bf16.mxu1 %v17872_v37  ;;  %13240 = vmatprep.mubr.bf16.mxu0 %v17905_v38  ;;  %v17921_v35 = vld [vmem:[%s18434_s4 + $0x738] ss:$648 sps:$4 sm:$0xff]   ;;  %v17932_v37 = vld [vmem:[%s18434_s4 + $0xc4c] ss:$648 sps:$4 sm:$0xff]  }
 0x864   : > { %13289 = vmatprep.mubr.bf16.mxu1 %v17908_v39  ;;  %v17965_v38 = vld [vmem:[%s21177_s0 + $0x224] ss:$648 sps:$4 sm:$0xff]  }
 0x865   : > { %v17968_v39 = vld [vmem:[%s21177_s0 + $0x22c] ss:$648 sps:$4 sm:$0xff]  }
 0x869   : > { %13213 = vmatpush1.bf16.xpose.msra.mxu0 %v17867_v40  ;;  %v17927_v40 = vld [vmem:[%s18434_s4 + $0xc40] ss:$648 sps:$4 sm:$0xff]  }
 0x86a   : > { %13262 = vmatpush1.bf16.xpose.msra.mxu1 %v17870_v41  ;;  %13214 = vmatprep.subr.bf16.mxu0 %v17875_v42  ;;  %v17930_v41 = vld [vmem:[%s18434_s4 + $0xc48] ss:$648 sps:$4 sm:$0xff]   ;;  %v17935_v42 = vld [vmem:[%s18434_s4 + $0x1154] ss:$648 sps:$4 sm:$0xff]  }
 0x86b   : > { %13263 = vmatprep.subr.bf16.mxu1 %v17878_v43  ;;  %v12850_v44 = vpop.f32.mrb[232].mxu0  ;;  %v17938_v43 = vld [vmem:[%s18434_s4 + $0x115c] ss:$648 sps:$4 sm:$0xff]  }
 0x86c   : > { %v12899_v45 = vpop.f32.mrb[232].mxu1  ;;  %v12851_v46 = vadd.f32 %v12850_v44, %v20577_v52  ;;  %v12852_v47 = vpop.f32.mrb[233].mxu0 }
 0x86d   : > { %v12901_v48 = vpop.f32.mrb[233].mxu1  ;;  %v12853_v49 = vpop.f32.mrb[234].mxu0 }
 0x86e   : > { %v12902_v50 = vpop.f32.mrb[234].mxu1  ;;  %v20645_v54 = vadd.f32 %v12899_v45, %v12851_v46  ;;  %v12854_v55 = vadd.f32 %v12853_v49, %v20582_v62  ;;  %v12855_v56 = vpop.f32.mrb[235].mxu0 }
 0x86f   : > { %v12904_v58 = vpop.f32.mrb[235].mxu1 }
 0x870   : > { %v20650_v63 = vadd.f32 %v12902_v50, %v12854_v55 }
 0x871   : > { %13215 = vmatpush1.bf16.xpose.msra.mxu0 %v17873_v51  ;;  %v17933_v51 = vld [vmem:[%s18434_s4 + $0x1150] ss:$648 sps:$4 sm:$0xff]  }
 0x872   : > { %13264 = vmatpush1.bf16.xpose.msra.mxu1 %v17876_v53  ;;  %13216 = vmatprep.subr.bf16.mxu0 %v17881_v59  ;;  %v17936_v53 = vld [vmem:[%s18434_s4 + $0x1158] ss:$648 sps:$4 sm:$0xff]  }
 0x873   : > { %13265 = vmatprep.subr.bf16.mxu1 %v17884_v60  ;;  %v12858_v52 = vpop.f32.mrb[236].mxu0  ;;  %v17941_v60 = vld [vmem:[%s18434_s4 + $0x1664] ss:$648 sps:$4 sm:$0xff]  }
 0x874   : > { %v12907_v0 = vpop.f32.mrb[236].mxu1  ;;  %v12859_v57 = vadd.f32 %v12858_v52, %v20588_v9  ;;  %v12860_v61 = vpop.f32.mrb[237].mxu0  ;;  %v17944_v52 = vld [vmem:[%s18434_s4 + $0x166c] ss:$648 sps:$4 sm:$0xff]  }
 0x875   : > { %v12909_v62 = vpop.f32.mrb[237].mxu1  ;;  %v12861_v1 = vpop.f32.mrb[238].mxu0 }
 0x876   : > { %v12910_v3 = vpop.f32.mrb[238].mxu1  ;;  %v12862_v6 = vadd.f32 %v12861_v1, %v20592_v10  ;;  %v20656_v2 = vadd.f32 %v12907_v0, %v12859_v57  ;;  %v12863_v14 = vpop.f32.mrb[239].mxu0  ;;  %v17893_v10 = vld [vmem:[%s18434_s4 + $0x2074] ss:$648 sps:$4 sm:$0xff]  }
 0x877   : > { %v12912_v9 = vpop.f32.mrb[239].mxu1  ;;  %v17950_v14 = vld [vmem:[%s18434_s4 + $0x1b7c] ss:$648 sps:$4 sm:$0xff]  }
 0x878   : > { %v20660_v11 = vadd.f32 %v12910_v3, %v12862_v6 }
 0x879   : > { %13217 = vmatpush1.bf16.xpose.msra.mxu0 %v17879_v4  ;;  %v17939_v4 = vld [vmem:[%s18434_s4 + $0x1660] ss:$648 sps:$4 sm:$0xff]  }
 0x87a   : > { %13266 = vmatpush1.bf16.xpose.msra.mxu1 %v17882_v5  ;;  %13218 = vmatprep.subr.bf16.mxu0 %v17887_v7  ;;  %v17942_v5 = vld [vmem:[%s18434_s4 + $0x1668] ss:$648 sps:$4 sm:$0xff]  }
 0x87b   : > { %13267 = vmatprep.subr.bf16.mxu1 %v17890_v13  ;;  %v17947_v13 = vld [vmem:[%s18434_s4 + $0x1b74] ss:$648 sps:$4 sm:$0xff]  }
 0x881   : > { %13219 = vmatpush1.bf16.xpose.msra.mxu0 %v17885_v12 }
 0x882   : > { %13268 = vmatpush1.bf16.xpose.msra.mxu1 %v17888_v8  ;;  %13220 = vmatprep.subr.bf16.mxu0 %v17893_v10  ;;  %v17945_v8 = vld [vmem:[%s18434_s4 + $0x1b70] ss:$648 sps:$4 sm:$0xff]  }
 0x883   : > { %13269 = vmatprep.subr.bf16.mxu1 %v17896_v15  ;;  %v17948_v10 = vld [vmem:[%s18434_s4 + $0x1b78] ss:$648 sps:$4 sm:$0xff]   ;;  %v17956_v15 = vld [vmem:[%s18434_s4 + $0x208c] ss:$648 sps:$4 sm:$0xff]  }
 0x889   : > { %13221 = vmatpush1.bf16.xpose.msra.mxu0 %v17891_v16  ;;  %v17951_v16 = vld [vmem:[%s18434_s4 + $0x2080] ss:$648 sps:$4 sm:$0xff]  }
 0x88a   : > { %13270 = vmatpush1.bf16.xpose.msra.mxu1 %v17894_v17  ;;  %13222 = vmatprep.subr.bf16.mxu0 %v17899_v18  ;;  %v17954_v17 = vld [vmem:[%s18434_s4 + $0x2088] ss:$648 sps:$4 sm:$0xff]   ;;  %v17959_v18 = vld [vmem:[%s18434_s4 + $0x2594] ss:$648 sps:$4 sm:$0xff]  }
 0x88b   : > { %13271 = vmatprep.subr.bf16.mxu1 %v17902_v19  ;;  %v17962_v19 = vld [vmem:[%s18434_s4 + $0x259c] ss:$648 sps:$4 sm:$0xff]  }
 0x891   : > { %13223 = vmatpush1.bf16.xpose.msra.mxu0 %v17897_v20  ;;  %v17957_v20 = vld [vmem:[%s18434_s4 + $0x2590] ss:$648 sps:$4 sm:$0xff]  }
 0x892   : > { %13272 = vmatpush1.bf16.xpose.msra.mxu1 %v17900_v21  ;;  %13306 = vmatprep.subr.bf16.mxu0 %v17911_v22  ;;  %v17960_v21 = vld [vmem:[%s18434_s4 + $0x2598] ss:$648 sps:$4 sm:$0xff]   ;;  %v17971_v22 = vld [vmem:[%s18434_s4 + $0x234] ss:$648 sps:$4 sm:$0xff]  }
 0x893   : > { %13355 = vmatprep.subr.bf16.mxu1 %v17914_v23  ;;  %v17974_v23 = vld [vmem:[%s18434_s4 + $0x23c] ss:$648 sps:$4 sm:$0xff]  }
 0x898   : > { %13241 = vmatmul.mubr.bf16.vlgmr.msra.gmra.mrb[8].mxu0 %v17903_v24  ;;  %v17963_v24 = vld [vmem:[%s21177_s0 + $0x220] ss:$648 sps:$4 sm:$0xff]  }
 0x899   : > { %13290 = vmatmul.mubr.bf16.vlgmr.msra.gmra.mrb[8].mxu1 %v17906_v25  ;;  %13307 = vmatpush1.bf16.xpose.msra.mxu0 %v17909_v26  ;;  %v17966_v25 = vld [vmem:[%s21177_s0 + $0x228] ss:$648 sps:$4 sm:$0xff]  }
 0x89a   : > { %13356 = vmatpush1.bf16.xpose.msra.mxu1 %v17912_v27  ;;  %13248 = vmatprep.mubr.bf16.mxu0 %v17917_v28  ;;  %v17969_v26 = vld [vmem:[%s18434_s4 + $0x230] ss:$648 sps:$4 sm:$0xff]   ;;  %v17977_v28 = vld [vmem:[%s21177_s0 + $0x734] ss:$648 sps:$4 sm:$0xff]  }
 0x89b   : > { %13308 = vmatprep.subr.bf16.mxu0 %v17920_v29  ;;  %13357 = vmatprep.subr.bf16.mxu1 %v17923_v30  ;;  %v17972_v27 = vld [vmem:[%s18434_s4 + $0x238] ss:$648 sps:$4 sm:$0xff]   ;;  %v17980_v29 = vld [vmem:[%s18434_s4 + $0x744] ss:$648 sps:$4 sm:$0xff]  }
 0x89c   : > { %13297 = vmatprep.mubr.bf16.mxu1 %v17926_v31  ;;  %v17983_v30 = vld [vmem:[%s18434_s4 + $0x74c] ss:$648 sps:$4 sm:$0xff]   ;;  %v17986_v31 = vld [vmem:[%s21177_s0 + $0x73c] ss:$648 sps:$4 sm:$0xff]  }
 0x8a0   : > { %13249 = vmatmul.mubr.bf16.gmra.mrb[12].mxu0 %v17915_v32  ;;  %v17975_v32 = vld [vmem:[%s21177_s0 + $0x730] ss:$648 sps:$4 sm:$0xff]  }
 0x8a1   : > { %13298 = vmatmul.mubr.bf16.gmra.mrb[12].mxu1 %v17924_v33  ;;  %13309 = vmatpush1.bf16.xpose.msra.mxu0 %v17918_v34  ;;  %v17984_v33 = vld [vmem:[%s21177_s0 + $0x738] ss:$648 sps:$4 sm:$0xff]  }
 0x8a2   : > { %13358 = vmatpush1.bf16.xpose.msra.mxu1 %v17921_v35  ;;  %13310 = vmatprep.subr.bf16.mxu0 %v17929_v36  ;;  %v17978_v34 = vld [vmem:[%s18434_s4 + $0x740] ss:$648 sps:$4 sm:$0xff]   ;;  %v17989_v36 = vld [vmem:[%s18434_s4 + $0xc54] ss:$648 sps:$4 sm:$0xff]  }
 0x8a3   : > { %13359 = vmatprep.subr.bf16.mxu1 %v17932_v37  ;;  %13338 = vmatprep.mubr.bf16.mxu0 %v17965_v38  ;;  %v17981_v35 = vld [vmem:[%s18434_s4 + $0x748] ss:$648 sps:$4 sm:$0xff]   ;;  %v17992_v37 = vld [vmem:[%s18434_s4 + $0xc5c] ss:$648 sps:$4 sm:$0xff]  }
 0x8a4   : > { %13387 = vmatprep.mubr.bf16.mxu1 %v17968_v39  ;;  %v18025_v38 = vld [vmem:[%s21177_s0 + $0x234] ss:$648 sps:$4 sm:$0xff]  }
 0x8a5   : > { %v18028_v39 = vld [vmem:[%s21177_s0 + $0x23c] ss:$648 sps:$4 sm:$0xff]  }
 0x8a9   : > { %13311 = vmatpush1.bf16.xpose.msra.mxu0 %v17927_v40  ;;  %v17987_v40 = vld [vmem:[%s18434_s4 + $0xc50] ss:$648 sps:$4 sm:$0xff]  }
 0x8aa   : > { %13360 = vmatpush1.bf16.xpose.msra.mxu1 %v17930_v41  ;;  %13312 = vmatprep.subr.bf16.mxu0 %v17935_v42  ;;  %v17990_v41 = vld [vmem:[%s18434_s4 + $0xc58] ss:$648 sps:$4 sm:$0xff]   ;;  %v17995_v42 = vld [vmem:[%s18434_s4 + $0x1164] ss:$648 sps:$4 sm:$0xff]  }
 0x8ab   : > { %13361 = vmatprep.subr.bf16.mxu1 %v17938_v43  ;;  %v12948_v44 = vpop.f32.mrb[240].mxu0  ;;  %v17998_v43 = vld [vmem:[%s18434_s4 + $0x116c] ss:$648 sps:$4 sm:$0xff]  }
 0x8ac   : > { %v12997_v45 = vpop.f32.mrb[240].mxu1  ;;  %v12949_v46 = vadd.f32 %v12948_v44, %v20645_v54  ;;  %v12950_v47 = vpop.f32.mrb[241].mxu0 }
 0x8ad   : > { %v12999_v48 = vpop.f32.mrb[241].mxu1  ;;  %v12951_v49 = vpop.f32.mrb[242].mxu0 }
 0x8ae   : > { %v13000_v50 = vpop.f32.mrb[242].mxu1  ;;  %v20713_v55 = vadd.f32 %v12997_v45, %v12949_v46  ;;  %v12952_v56 = vadd.f32 %v12951_v49, %v20650_v63  ;;  %v12953_v58 = vpop.f32.mrb[243].mxu0 }
 0x8af   : > { %v13002_v59 = vpop.f32.mrb[243].mxu1 }
 0x8b0   : > { %v20718_v0 = vadd.f32 %v13000_v50, %v12952_v56 }
 0x8b1   : > { %13313 = vmatpush1.bf16.xpose.msra.mxu0 %v17933_v51  ;;  %v17993_v51 = vld [vmem:[%s18434_s4 + $0x1160] ss:$648 sps:$4 sm:$0xff]  }
 0x8b2   : > { %13362 = vmatpush1.bf16.xpose.msra.mxu1 %v17936_v53  ;;  %13314 = vmatprep.subr.bf16.mxu0 %v17941_v60  ;;  %v17996_v53 = vld [vmem:[%s18434_s4 + $0x1168] ss:$648 sps:$4 sm:$0xff]  }
 0x8b3   : > { %13363 = vmatprep.subr.bf16.mxu1 %v17944_v52  ;;  %v12956_v54 = vpop.f32.mrb[244].mxu0  ;;  %v18001_v52 = vld [vmem:[%s18434_s4 + $0x1674] ss:$648 sps:$4 sm:$0xff]  }
 0x8b4   : > { %v13005_v57 = vpop.f32.mrb[244].mxu1  ;;  %v12957_v61 = vadd.f32 %v12956_v54, %v20656_v2  ;;  %v12958_v62 = vpop.f32.mrb[245].mxu0  ;;  %v18004_v54 = vld [vmem:[%s18434_s4 + $0x167c] ss:$648 sps:$4 sm:$0xff]  }
 0x8b5   : > { %v13007_v63 = vpop.f32.mrb[245].mxu1  ;;  %v12959_v1 = vpop.f32.mrb[246].mxu0 }
 0x8b6   : > { %v13008_v3 = vpop.f32.mrb[246].mxu1  ;;  %v12960_v6 = vadd.f32 %v12959_v1, %v20660_v11  ;;  %v20724_v7 = vadd.f32 %v13005_v57, %v12957_v61  ;;  %v12961_v9 = vpop.f32.mrb[247].mxu0  ;;  %v17953_v11 = vld [vmem:[%s18434_s4 + $0x2084] ss:$648 sps:$4 sm:$0xff]  }
 0x8b7   : > { %v13010_v2 = vpop.f32.mrb[247].mxu1  ;;  %v18010_v9 = vld [vmem:[%s18434_s4 + $0x1b8c] ss:$648 sps:$4 sm:$0xff]  }
 0x8b8   : > { %v20728_v12 = vadd.f32 %v13008_v3, %v12960_v6 }
 0x8b9   : > { %13315 = vmatpush1.bf16.xpose.msra.mxu0 %v17939_v4  ;;  %v17999_v4 = vld [vmem:[%s18434_s4 + $0x1670] ss:$648 sps:$4 sm:$0xff]  }
 0x8ba   : > { %13364 = vmatpush1.bf16.xpose.msra.mxu1 %v17942_v5  ;;  %13316 = vmatprep.subr.bf16.mxu0 %v17947_v13  ;;  %v18002_v5 = vld [vmem:[%s18434_s4 + $0x1678] ss:$648 sps:$4 sm:$0xff]  }
 0x8bb   : > { %13365 = vmatprep.subr.bf16.mxu1 %v17950_v14  ;;  %v18007_v14 = vld [vmem:[%s18434_s4 + $0x1b84] ss:$648 sps:$4 sm:$0xff]  }
 0x8c1   : > { %13317 = vmatpush1.bf16.xpose.msra.mxu0 %v17945_v8 }
 0x8c2   : > { %13366 = vmatpush1.bf16.xpose.msra.mxu1 %v17948_v10  ;;  %13318 = vmatprep.subr.bf16.mxu0 %v17953_v11  ;;  %v18005_v10 = vld [vmem:[%s18434_s4 + $0x1b80] ss:$648 sps:$4 sm:$0xff]  }
 0x8c3   : > { %13367 = vmatprep.subr.bf16.mxu1 %v17956_v15  ;;  %v18008_v11 = vld [vmem:[%s18434_s4 + $0x1b88] ss:$648 sps:$4 sm:$0xff]   ;;  %v18016_v15 = vld [vmem:[%s18434_s4 + $0x209c] ss:$648 sps:$4 sm:$0xff]  }
 0x8c9   : > { %13319 = vmatpush1.bf16.xpose.msra.mxu0 %v17951_v16  ;;  %v18011_v16 = vld [vmem:[%s18434_s4 + $0x2090] ss:$648 sps:$4 sm:$0xff]  }
 0x8ca   : > { %13368 = vmatpush1.bf16.xpose.msra.mxu1 %v17954_v17  ;;  %13320 = vmatprep.subr.bf16.mxu0 %v17959_v18  ;;  %v18014_v17 = vld [vmem:[%s18434_s4 + $0x2098] ss:$648 sps:$4 sm:$0xff]   ;;  %v18019_v18 = vld [vmem:[%s18434_s4 + $0x25a4] ss:$648 sps:$4 sm:$0xff]  }
 0x8cb   : > { %13369 = vmatprep.subr.bf16.mxu1 %v17962_v19  ;;  %v18022_v19 = vld [vmem:[%s18434_s4 + $0x25ac] ss:$648 sps:$4 sm:$0xff]  }
 0x8d1   : > { %13321 = vmatpush1.bf16.xpose.msra.mxu0 %v17957_v20  ;;  %v18017_v20 = vld [vmem:[%s18434_s4 + $0x25a0] ss:$648 sps:$4 sm:$0xff]  }
 0x8d2   : > { %13370 = vmatpush1.bf16.xpose.msra.mxu1 %v17960_v21  ;;  %13404 = vmatprep.subr.bf16.mxu0 %v17971_v22  ;;  %v18020_v21 = vld [vmem:[%s18434_s4 + $0x25a8] ss:$648 sps:$4 sm:$0xff]   ;;  %v18031_v22 = vld [vmem:[%s18434_s4 + $0x244] ss:$648 sps:$4 sm:$0xff]  }
 0x8d3   : > { %13453 = vmatprep.subr.bf16.mxu1 %v17974_v23  ;;  %v18034_v23 = vld [vmem:[%s18434_s4 + $0x24c] ss:$648 sps:$4 sm:$0xff]  }
 0x8d8   : > { %13339 = vmatmul.mubr.bf16.vlgmr.msra.gmra.mrb[16].mxu0 %v17963_v24  ;;  %v18023_v24 = vld [vmem:[%s21177_s0 + $0x230] ss:$648 sps:$4 sm:$0xff]  }
 0x8d9   : > { %13388 = vmatmul.mubr.bf16.vlgmr.msra.gmra.mrb[16].mxu1 %v17966_v25  ;;  %13405 = vmatpush1.bf16.xpose.msra.mxu0 %v17969_v26  ;;  %v18026_v25 = vld [vmem:[%s21177_s0 + $0x238] ss:$648 sps:$4 sm:$0xff]  }
 0x8da   : > { %13454 = vmatpush1.bf16.xpose.msra.mxu1 %v17972_v27  ;;  %13346 = vmatprep.mubr.bf16.mxu0 %v17977_v28  ;;  %v18029_v26 = vld [vmem:[%s18434_s4 + $0x240] ss:$648 sps:$4 sm:$0xff]   ;;  %v18037_v28 = vld [vmem:[%s21177_s0 + $0x744] ss:$648 sps:$4 sm:$0xff]  }
 0x8db   : > { %13406 = vmatprep.subr.bf16.mxu0 %v17980_v29  ;;  %13455 = vmatprep.subr.bf16.mxu1 %v17983_v30  ;;  %v18032_v27 = vld [vmem:[%s18434_s4 + $0x248] ss:$648 sps:$4 sm:$0xff]   ;;  %v18040_v29 = vld [vmem:[%s18434_s4 + $0x754] ss:$648 sps:$4 sm:$0xff]  }
 0x8dc   : > { %13395 = vmatprep.mubr.bf16.mxu1 %v17986_v31  ;;  %v18043_v30 = vld [vmem:[%s18434_s4 + $0x75c] ss:$648 sps:$4 sm:$0xff]   ;;  %v18046_v31 = vld [vmem:[%s21177_s0 + $0x74c] ss:$648 sps:$4 sm:$0xff]  }
 0x8e0   : > { %13347 = vmatmul.mubr.bf16.gmra.mrb[20].mxu0 %v17975_v32  ;;  %v18035_v32 = vld [vmem:[%s21177_s0 + $0x740] ss:$648 sps:$4 sm:$0xff]  }
 0x8e1   : > { %13396 = vmatmul.mubr.bf16.gmra.mrb[20].mxu1 %v17984_v33  ;;  %13407 = vmatpush1.bf16.xpose.msra.mxu0 %v17978_v34  ;;  %v18044_v33 = vld [vmem:[%s21177_s0 + $0x748] ss:$648 sps:$4 sm:$0xff]  }
 0x8e2   : > { %13456 = vmatpush1.bf16.xpose.msra.mxu1 %v17981_v35  ;;  %13408 = vmatprep.subr.bf16.mxu0 %v17989_v36  ;;  %v18038_v34 = vld [vmem:[%s18434_s4 + $0x750] ss:$648 sps:$4 sm:$0xff]   ;;  %v18049_v36 = vld [vmem:[%s18434_s4 + $0xc64] ss:$648 sps:$4 sm:$0xff]  }
 0x8e3   : > { %13457 = vmatprep.subr.bf16.mxu1 %v17992_v37  ;;  %13436 = vmatprep.mubr.bf16.mxu0 %v18025_v38  ;;  %v18041_v35 = vld [vmem:[%s18434_s4 + $0x758] ss:$648 sps:$4 sm:$0xff]   ;;  %v18052_v37 = vld [vmem:[%s18434_s4 + $0xc6c] ss:$648 sps:$4 sm:$0xff]  }
 0x8e4   : > { %13485 = vmatprep.mubr.bf16.mxu1 %v18028_v39  ;;  %v18085_v38 = vld [vmem:[%s21177_s0 + $0x244] ss:$648 sps:$4 sm:$0xff]  }
 0x8e5   : > { %v18088_v39 = vld [vmem:[%s21177_s0 + $0x24c] ss:$648 sps:$4 sm:$0xff]  }
 0x8e9   : > { %13409 = vmatpush1.bf16.xpose.msra.mxu0 %v17987_v40  ;;  %v18047_v40 = vld [vmem:[%s18434_s4 + $0xc60] ss:$648 sps:$4 sm:$0xff]  }
 0x8ea   : > { %13458 = vmatpush1.bf16.xpose.msra.mxu1 %v17990_v41  ;;  %13410 = vmatprep.subr.bf16.mxu0 %v17995_v42  ;;  %v18050_v41 = vld [vmem:[%s18434_s4 + $0xc68] ss:$648 sps:$4 sm:$0xff]   ;;  %v18055_v42 = vld [vmem:[%s18434_s4 + $0x1174] ss:$648 sps:$4 sm:$0xff]  }
 0x8eb   : > { %13459 = vmatprep.subr.bf16.mxu1 %v17998_v43  ;;  %v13046_v44 = vpop.f32.mrb[248].mxu0  ;;  %v18058_v43 = vld [vmem:[%s18434_s4 + $0x117c] ss:$648 sps:$4 sm:$0xff]  }
 0x8ec   : > { %v13095_v45 = vpop.f32.mrb[248].mxu1  ;;  %v13047_v46 = vadd.f32 %v13046_v44, %v20713_v55  ;;  %v13048_v47 = vpop.f32.mrb[249].mxu0 }
 0x8ed   : > { %v13097_v48 = vpop.f32.mrb[249].mxu1  ;;  %v13049_v49 = vpop.f32.mrb[250].mxu0 }
 0x8ee   : > { %v13098_v50 = vpop.f32.mrb[250].mxu1  ;;  %v20781_v56 = vadd.f32 %v13095_v45, %v13047_v46  ;;  %v13050_v58 = vadd.f32 %v13049_v49, %v20718_v0  ;;  %v13051_v59 = vpop.f32.mrb[251].mxu0 }
 0x8ef   : > { %v13100_v60 = vpop.f32.mrb[251].mxu1 }
 0x8f0   : > { %v20786_v57 = vadd.f32 %v13098_v50, %v13050_v58 }
 0x8f1   : > { %13411 = vmatpush1.bf16.xpose.msra.mxu0 %v17993_v51  ;;  %v18053_v51 = vld [vmem:[%s18434_s4 + $0x1170] ss:$648 sps:$4 sm:$0xff]  }
 0x8f2   : > { %13460 = vmatpush1.bf16.xpose.msra.mxu1 %v17996_v53  ;;  %13412 = vmatprep.subr.bf16.mxu0 %v18001_v52  ;;  %v18056_v53 = vld [vmem:[%s18434_s4 + $0x1178] ss:$648 sps:$4 sm:$0xff]  }
 0x8f3   : > { %13461 = vmatprep.subr.bf16.mxu1 %v18004_v54  ;;  %v13054_v55 = vpop.f32.mrb[252].mxu0  ;;  %v18061_v54 = vld [vmem:[%s18434_s4 + $0x1684] ss:$648 sps:$4 sm:$0xff]  }
 0x8f4   : > { %v13103_v61 = vpop.f32.mrb[252].mxu1  ;;  %v13055_v62 = vadd.f32 %v13054_v55, %v20724_v7  ;;  %v13056_v63 = vpop.f32.mrb[253].mxu0  ;;  %v18064_v55 = vld [vmem:[%s18434_s4 + $0x168c] ss:$648 sps:$4 sm:$0xff]  }
 0x8f5   : > { %v13105_v0 = vpop.f32.mrb[253].mxu1  ;;  %v13057_v1 = vpop.f32.mrb[254].mxu0 }
 0x8f6   : > { %v13106_v3 = vpop.f32.mrb[254].mxu1  ;;  %v13058_v6 = vadd.f32 %v13057_v1, %v20728_v12  ;;  %v20792_v13 = vadd.f32 %v13103_v61, %v13055_v62  ;;  %v13059_v2 = vpop.f32.mrb[255].mxu0  ;;  %v18013_v12 = vld [vmem:[%s18434_s4 + $0x2094] ss:$648 sps:$4 sm:$0xff]  }
 0x8f7   : > { %v13108_v7 = vpop.f32.mrb[255].mxu1  ;;  %v18070_v2 = vld [vmem:[%s18434_s4 + $0x1b9c] ss:$648 sps:$4 sm:$0xff]  }
 0x8f8   : > { %v20796_v8 = vadd.f32 %v13106_v3, %v13058_v6 }
 0x8f9   : > { %13413 = vmatpush1.bf16.xpose.msra.mxu0 %v17999_v4  ;;  %v18059_v4 = vld [vmem:[%s18434_s4 + $0x1680] ss:$648 sps:$4 sm:$0xff]  }
 0x8fa   : > { %13462 = vmatpush1.bf16.xpose.msra.mxu1 %v18002_v5  ;;  %13414 = vmatprep.subr.bf16.mxu0 %v18007_v14  ;;  %v18062_v5 = vld [vmem:[%s18434_s4 + $0x1688] ss:$648 sps:$4 sm:$0xff]  }
 0x8fb   : > { %13463 = vmatprep.subr.bf16.mxu1 %v18010_v9  ;;  %v18067_v9 = vld [vmem:[%s18434_s4 + $0x1b94] ss:$648 sps:$4 sm:$0xff]  }
 0x901   : > { %13415 = vmatpush1.bf16.xpose.msra.mxu0 %v18005_v10 }
 0x902   : > { %13464 = vmatpush1.bf16.xpose.msra.mxu1 %v18008_v11  ;;  %13416 = vmatprep.subr.bf16.mxu0 %v18013_v12  ;;  %v18065_v11 = vld [vmem:[%s18434_s4 + $0x1b90] ss:$648 sps:$4 sm:$0xff]  }
 0x903   : > { %13465 = vmatprep.subr.bf16.mxu1 %v18016_v15  ;;  %v18068_v12 = vld [vmem:[%s18434_s4 + $0x1b98] ss:$648 sps:$4 sm:$0xff]   ;;  %v18076_v15 = vld [vmem:[%s18434_s4 + $0x20ac] ss:$648 sps:$4 sm:$0xff]  }
 0x909   : > { %13417 = vmatpush1.bf16.xpose.msra.mxu0 %v18011_v16  ;;  %v18071_v16 = vld [vmem:[%s18434_s4 + $0x20a0] ss:$648 sps:$4 sm:$0xff]  }
 0x90a   : > { %13466 = vmatpush1.bf16.xpose.msra.mxu1 %v18014_v17  ;;  %13418 = vmatprep.subr.bf16.mxu0 %v18019_v18  ;;  %v18074_v17 = vld [vmem:[%s18434_s4 + $0x20a8] ss:$648 sps:$4 sm:$0xff]   ;;  %v18079_v18 = vld [vmem:[%s18434_s4 + $0x25b4] ss:$648 sps:$4 sm:$0xff]  }
 0x90b   : > { %13467 = vmatprep.subr.bf16.mxu1 %v18022_v19  ;;  %v18082_v19 = vld [vmem:[%s18434_s4 + $0x25bc] ss:$648 sps:$4 sm:$0xff]  }
 0x911   : > { %13419 = vmatpush1.bf16.xpose.msra.mxu0 %v18017_v20  ;;  %v18077_v20 = vld [vmem:[%s18434_s4 + $0x25b0] ss:$648 sps:$4 sm:$0xff]  }
 0x912   : > { %13468 = vmatpush1.bf16.xpose.msra.mxu1 %v18020_v21  ;;  %13502 = vmatprep.subr.bf16.mxu0 %v18031_v22  ;;  %v18080_v21 = vld [vmem:[%s18434_s4 + $0x25b8] ss:$648 sps:$4 sm:$0xff]   ;;  %v18091_v22 = vld [vmem:[%s18434_s4 + $0x254] ss:$648 sps:$4 sm:$0xff]  }
 0x913   : > { %13551 = vmatprep.subr.bf16.mxu1 %v18034_v23  ;;  %v18094_v23 = vld [vmem:[%s18434_s4 + $0x25c] ss:$648 sps:$4 sm:$0xff]  }
 0x918   : > { %13437 = vmatmul.mubr.bf16.vlgmr.msra.gmra.mrb[24].mxu0 %v18023_v24  ;;  %v18083_v24 = vld [vmem:[%s21177_s0 + $0x240] ss:$648 sps:$4 sm:$0xff]  }
 0x919   : > { %13486 = vmatmul.mubr.bf16.vlgmr.msra.gmra.mrb[24].mxu1 %v18026_v25  ;;  %13503 = vmatpush1.bf16.xpose.msra.mxu0 %v18029_v26  ;;  %v18086_v25 = vld [vmem:[%s21177_s0 + $0x248] ss:$648 sps:$4 sm:$0xff]  }
 0x91a   : > { %13552 = vmatpush1.bf16.xpose.msra.mxu1 %v18032_v27  ;;  %13444 = vmatprep.mubr.bf16.mxu0 %v18037_v28  ;;  %v18089_v26 = vld [vmem:[%s18434_s4 + $0x250] ss:$648 sps:$4 sm:$0xff]   ;;  %v18097_v28 = vld [vmem:[%s21177_s0 + $0x754] ss:$648 sps:$4 sm:$0xff]  }
 0x91b   : > { %13504 = vmatprep.subr.bf16.mxu0 %v18040_v29  ;;  %13553 = vmatprep.subr.bf16.mxu1 %v18043_v30  ;;  %v18092_v27 = vld [vmem:[%s18434_s4 + $0x258] ss:$648 sps:$4 sm:$0xff]   ;;  %v18100_v29 = vld [vmem:[%s18434_s4 + $0x764] ss:$648 sps:$4 sm:$0xff]  }
 0x91c   : > { %13493 = vmatprep.mubr.bf16.mxu1 %v18046_v31  ;;  %v18103_v30 = vld [vmem:[%s18434_s4 + $0x76c] ss:$648 sps:$4 sm:$0xff]   ;;  %v18106_v31 = vld [vmem:[%s21177_s0 + $0x75c] ss:$648 sps:$4 sm:$0xff]  }
 0x920   : > { %13445 = vmatmul.mubr.bf16.gmra.mrb[28].mxu0 %v18035_v32  ;;  %v18095_v32 = vld [vmem:[%s21177_s0 + $0x750] ss:$648 sps:$4 sm:$0xff]  }
 0x921   : > { %13494 = vmatmul.mubr.bf16.gmra.mrb[28].mxu1 %v18044_v33  ;;  %13505 = vmatpush1.bf16.xpose.msra.mxu0 %v18038_v34  ;;  %v18104_v33 = vld [vmem:[%s21177_s0 + $0x758] ss:$648 sps:$4 sm:$0xff]  }
 0x922   : > { %13554 = vmatpush1.bf16.xpose.msra.mxu1 %v18041_v35  ;;  %13506 = vmatprep.subr.bf16.mxu0 %v18049_v36  ;;  %v18098_v34 = vld [vmem:[%s18434_s4 + $0x760] ss:$648 sps:$4 sm:$0xff]   ;;  %v18109_v36 = vld [vmem:[%s18434_s4 + $0xc74] ss:$648 sps:$4 sm:$0xff]  }
 0x923   : > { %13555 = vmatprep.subr.bf16.mxu1 %v18052_v37  ;;  %13534 = vmatprep.mubr.bf16.mxu0 %v18085_v38  ;;  %v18101_v35 = vld [vmem:[%s18434_s4 + $0x768] ss:$648 sps:$4 sm:$0xff]   ;;  %v18112_v37 = vld [vmem:[%s18434_s4 + $0xc7c] ss:$648 sps:$4 sm:$0xff]  }
 0x924   : > { %13583 = vmatprep.mubr.bf16.mxu1 %v18088_v39  ;;  %v18145_v38 = vld [vmem:[%s21177_s0 + $0x254] ss:$648 sps:$4 sm:$0xff]  }
 0x925   : > { %v18148_v39 = vld [vmem:[%s21177_s0 + $0x25c] ss:$648 sps:$4 sm:$0xff]  }
 0x929   : > { %13507 = vmatpush1.bf16.xpose.msra.mxu0 %v18047_v40  ;;  %v18107_v40 = vld [vmem:[%s18434_s4 + $0xc70] ss:$648 sps:$4 sm:$0xff]  }
 0x92a   : > { %13556 = vmatpush1.bf16.xpose.msra.mxu1 %v18050_v41  ;;  %13508 = vmatprep.subr.bf16.mxu0 %v18055_v42  ;;  %v18110_v41 = vld [vmem:[%s18434_s4 + $0xc78] ss:$648 sps:$4 sm:$0xff]   ;;  %v18115_v42 = vld [vmem:[%s18434_s4 + $0x1184] ss:$648 sps:$4 sm:$0xff]  }
 0x92b   : > { %13557 = vmatprep.subr.bf16.mxu1 %v18058_v43  ;;  %v13144_v44 = vpop.f32.mrb[0].mxu0  ;;  %v18118_v43 = vld [vmem:[%s18434_s4 + $0x118c] ss:$648 sps:$4 sm:$0xff]  }
 0x92c   : > { %v13193_v45 = vpop.f32.mrb[0].mxu1  ;;  %v13145_v46 = vadd.f32 %v13144_v44, %v20781_v56  ;;  %v13146_v47 = vpop.f32.mrb[1].mxu0 }
 0x92d   : > { %v13195_v48 = vpop.f32.mrb[1].mxu1  ;;  %v13147_v49 = vpop.f32.mrb[2].mxu0 }
 0x92e   : > { %v13196_v50 = vpop.f32.mrb[2].mxu1  ;;  %v20849_v58 = vadd.f32 %v13193_v45, %v13145_v46  ;;  %v13148_v59 = vadd.f32 %v13147_v49, %v20786_v57  ;;  %v13149_v60 = vpop.f32.mrb[3].mxu0 }
 0x92f   : > { %v13198_v52 = vpop.f32.mrb[3].mxu1 }
 0x930   : > { %v20854_v61 = vadd.f32 %v13196_v50, %v13148_v59 }
 0x931   : > { %13509 = vmatpush1.bf16.xpose.msra.mxu0 %v18053_v51  ;;  %v18113_v51 = vld [vmem:[%s18434_s4 + $0x1180] ss:$648 sps:$4 sm:$0xff]  }
 0x932   : > { %13558 = vmatpush1.bf16.xpose.msra.mxu1 %v18056_v53  ;;  %13510 = vmatprep.subr.bf16.mxu0 %v18061_v54  ;;  %v18116_v53 = vld [vmem:[%s18434_s4 + $0x1188] ss:$648 sps:$4 sm:$0xff]  }
 0x933   : > { %13559 = vmatprep.subr.bf16.mxu1 %v18064_v55  ;;  %v13152_v56 = vpop.f32.mrb[4].mxu0  ;;  %v18121_v55 = vld [vmem:[%s18434_s4 + $0x1694] ss:$648 sps:$4 sm:$0xff]  }
 0x934   : > { %v13201_v62 = vpop.f32.mrb[4].mxu1  ;;  %v13153_v63 = vadd.f32 %v13152_v56, %v20792_v13  ;;  %v13154_v0 = vpop.f32.mrb[5].mxu0  ;;  %v18124_v56 = vld [vmem:[%s18434_s4 + $0x169c] ss:$648 sps:$4 sm:$0xff]  }
 0x935   : > { %v13203_v57 = vpop.f32.mrb[5].mxu1  ;;  %v13155_v1 = vpop.f32.mrb[6].mxu0 }
 0x936   : > { %v13204_v3 = vpop.f32.mrb[6].mxu1  ;;  %v13156_v6 = vadd.f32 %v13155_v1, %v20796_v8  ;;  %v20860_v14 = vadd.f32 %v13201_v62, %v13153_v63  ;;  %v13157_v7 = vpop.f32.mrb[7].mxu0  ;;  %v18073_v8 = vld [vmem:[%s18434_s4 + $0x20a4] ss:$648 sps:$4 sm:$0xff]  }
 0x937   : > { %v13206_v13 = vpop.f32.mrb[7].mxu1  ;;  %v18130_v7 = vld [vmem:[%s18434_s4 + $0x1bac] ss:$648 sps:$4 sm:$0xff]  }
 0x938   : > { %v20864_v10 = vadd.f32 %v13204_v3, %v13156_v6 }
 0x939   : > { %13511 = vmatpush1.bf16.xpose.msra.mxu0 %v18059_v4  ;;  %v18119_v4 = vld [vmem:[%s18434_s4 + $0x1690] ss:$648 sps:$4 sm:$0xff]  }
 0x93a   : > { %13560 = vmatpush1.bf16.xpose.msra.mxu1 %v18062_v5  ;;  %13512 = vmatprep.subr.bf16.mxu0 %v18067_v9  ;;  %v18122_v5 = vld [vmem:[%s18434_s4 + $0x1698] ss:$648 sps:$4 sm:$0xff]  }
 0x93b   : > { %13561 = vmatprep.subr.bf16.mxu1 %v18070_v2  ;;  %v18127_v2 = vld [vmem:[%s18434_s4 + $0x1ba4] ss:$648 sps:$4 sm:$0xff]  }
 0x941   : > { %13513 = vmatpush1.bf16.xpose.msra.mxu0 %v18065_v11 }
 0x942   : > { %13562 = vmatpush1.bf16.xpose.msra.mxu1 %v18068_v12  ;;  %13514 = vmatprep.subr.bf16.mxu0 %v18073_v8  ;;  %v18125_v12 = vld [vmem:[%s18434_s4 + $0x1ba0] ss:$648 sps:$4 sm:$0xff]  }
 0x943   : > { %13563 = vmatprep.subr.bf16.mxu1 %v18076_v15  ;;  %v18128_v8 = vld [vmem:[%s18434_s4 + $0x1ba8] ss:$648 sps:$4 sm:$0xff]   ;;  %v18136_v15 = vld [vmem:[%s18434_s4 + $0x20bc] ss:$648 sps:$4 sm:$0xff]  }
 0x949   : > { %13515 = vmatpush1.bf16.xpose.msra.mxu0 %v18071_v16  ;;  %v18131_v16 = vld [vmem:[%s18434_s4 + $0x20b0] ss:$648 sps:$4 sm:$0xff]  }
 0x94a   : > { %13564 = vmatpush1.bf16.xpose.msra.mxu1 %v18074_v17  ;;  %13516 = vmatprep.subr.bf16.mxu0 %v18079_v18  ;;  %v18134_v17 = vld [vmem:[%s18434_s4 + $0x20b8] ss:$648 sps:$4 sm:$0xff]   ;;  %v18139_v18 = vld [vmem:[%s18434_s4 + $0x25c4] ss:$648 sps:$4 sm:$0xff]  }
 0x94b   : > { %13565 = vmatprep.subr.bf16.mxu1 %v18082_v19  ;;  %v18142_v19 = vld [vmem:[%s18434_s4 + $0x25cc] ss:$648 sps:$4 sm:$0xff]  }
 0x951   : > { %13517 = vmatpush1.bf16.xpose.msra.mxu0 %v18077_v20  ;;  %v18137_v20 = vld [vmem:[%s18434_s4 + $0x25c0] ss:$648 sps:$4 sm:$0xff]  }
 0x952   : > { %13566 = vmatpush1.bf16.xpose.msra.mxu1 %v18080_v21  ;;  %13600 = vmatprep.subr.bf16.mxu0 %v18091_v22  ;;  %v18140_v21 = vld [vmem:[%s18434_s4 + $0x25c8] ss:$648 sps:$4 sm:$0xff]   ;;  %v18151_v22 = vld [vmem:[%s18434_s4 + $0x264] ss:$648 sps:$4 sm:$0xff]  }
 0x953   : > { %13649 = vmatprep.subr.bf16.mxu1 %v18094_v23  ;;  %v18154_v23 = vld [vmem:[%s18434_s4 + $0x26c] ss:$648 sps:$4 sm:$0xff]  }
 0x958   : > { %13535 = vmatmul.mubr.bf16.vlgmr.msra.gmra.mrb[32].mxu0 %v18083_v24  ;;  %v18143_v24 = vld [vmem:[%s21177_s0 + $0x250] ss:$648 sps:$4 sm:$0xff]  }
 0x959   : > { %13584 = vmatmul.mubr.bf16.vlgmr.msra.gmra.mrb[32].mxu1 %v18086_v25  ;;  %13601 = vmatpush1.bf16.xpose.msra.mxu0 %v18089_v26  ;;  %v18146_v25 = vld [vmem:[%s21177_s0 + $0x258] ss:$648 sps:$4 sm:$0xff]  }
 0x95a   : > { %13650 = vmatpush1.bf16.xpose.msra.mxu1 %v18092_v27  ;;  %13542 = vmatprep.mubr.bf16.mxu0 %v18097_v28  ;;  %v18149_v26 = vld [vmem:[%s18434_s4 + $0x260] ss:$648 sps:$4 sm:$0xff]   ;;  %v18157_v28 = vld [vmem:[%s21177_s0 + $0x764] ss:$648 sps:$4 sm:$0xff]  }
 0x95b   : > { %13602 = vmatprep.subr.bf16.mxu0 %v18100_v29  ;;  %13651 = vmatprep.subr.bf16.mxu1 %v18103_v30  ;;  %v18152_v27 = vld [vmem:[%s18434_s4 + $0x268] ss:$648 sps:$4 sm:$0xff]   ;;  %v18160_v29 = vld [vmem:[%s18434_s4 + $0x774] ss:$648 sps:$4 sm:$0xff]  }
 0x95c   : > { %13591 = vmatprep.mubr.bf16.mxu1 %v18106_v31  ;;  %v18163_v30 = vld [vmem:[%s18434_s4 + $0x77c] ss:$648 sps:$4 sm:$0xff]   ;;  %v18166_v31 = vld [vmem:[%s21177_s0 + $0x76c] ss:$648 sps:$4 sm:$0xff]  }
 0x960   : > { %13543 = vmatmul.mubr.bf16.gmra.mrb[36].mxu0 %v18095_v32  ;;  %v18155_v32 = vld [vmem:[%s21177_s0 + $0x760] ss:$648 sps:$4 sm:$0xff]  }
 0x961   : > { %13592 = vmatmul.mubr.bf16.gmra.mrb[36].mxu1 %v18104_v33  ;;  %13603 = vmatpush1.bf16.xpose.msra.mxu0 %v18098_v34  ;;  %v18164_v33 = vld [vmem:[%s21177_s0 + $0x768] ss:$648 sps:$4 sm:$0xff]  }
 0x962   : > { %13652 = vmatpush1.bf16.xpose.msra.mxu1 %v18101_v35  ;;  %13604 = vmatprep.subr.bf16.mxu0 %v18109_v36  ;;  %v18158_v34 = vld [vmem:[%s18434_s4 + $0x770] ss:$648 sps:$4 sm:$0xff]   ;;  %v18169_v36 = vld [vmem:[%s18434_s4 + $0xc84] ss:$648 sps:$4 sm:$0xff]  }
 0x963   : > { %13653 = vmatprep.subr.bf16.mxu1 %v18112_v37  ;;  %13632 = vmatprep.mubr.bf16.mxu0 %v18145_v38  ;;  %v18161_v35 = vld [vmem:[%s18434_s4 + $0x778] ss:$648 sps:$4 sm:$0xff]   ;;  %v18172_v37 = vld [vmem:[%s18434_s4 + $0xc8c] ss:$648 sps:$4 sm:$0xff]  }
 0x964   : > { %13681 = vmatprep.mubr.bf16.mxu1 %v18148_v39  ;;  %v18205_v38 = vld [vmem:[%s21177_s0 + $0x264] ss:$648 sps:$4 sm:$0xff]  }
 0x965   : > { %v18208_v39 = vld [vmem:[%s21177_s0 + $0x26c] ss:$648 sps:$4 sm:$0xff]  }
 0x969   : > { %13605 = vmatpush1.bf16.xpose.msra.mxu0 %v18107_v40  ;;  %v18167_v40 = vld [vmem:[%s18434_s4 + $0xc80] ss:$648 sps:$4 sm:$0xff]  }
 0x96a   : > { %13654 = vmatpush1.bf16.xpose.msra.mxu1 %v18110_v41  ;;  %13606 = vmatprep.subr.bf16.mxu0 %v18115_v42  ;;  %v18170_v41 = vld [vmem:[%s18434_s4 + $0xc88] ss:$648 sps:$4 sm:$0xff]   ;;  %v18175_v42 = vld [vmem:[%s18434_s4 + $0x1194] ss:$648 sps:$4 sm:$0xff]  }
 0x96b   : > { %13655 = vmatprep.subr.bf16.mxu1 %v18118_v43  ;;  %v13242_v44 = vpop.f32.mrb[8].mxu0  ;;  %v18178_v43 = vld [vmem:[%s18434_s4 + $0x119c] ss:$648 sps:$4 sm:$0xff]  }
 0x96c   : > { %v13291_v45 = vpop.f32.mrb[8].mxu1  ;;  %v13243_v46 = vadd.f32 %v13242_v44, %v20849_v58  ;;  %v13244_v47 = vpop.f32.mrb[9].mxu0 }
 0x96d   : > { %v13293_v48 = vpop.f32.mrb[9].mxu1  ;;  %v13245_v49 = vpop.f32.mrb[10].mxu0 }
 0x96e   : > { %v13294_v50 = vpop.f32.mrb[10].mxu1  ;;  %v20917_v59 = vadd.f32 %v13291_v45, %v13243_v46  ;;  %v13246_v60 = vadd.f32 %v13245_v49, %v20854_v61  ;;  %v13247_v52 = vpop.f32.mrb[11].mxu0 }
 0x96f   : > { %v13296_v54 = vpop.f32.mrb[11].mxu1 }
 0x970   : > { %v20922_v62 = vadd.f32 %v13294_v50, %v13246_v60 }
 0x971   : > { %13607 = vmatpush1.bf16.xpose.msra.mxu0 %v18113_v51  ;;  %v18173_v51 = vld [vmem:[%s18434_s4 + $0x1190] ss:$648 sps:$4 sm:$0xff]  }
 0x972   : > { %13656 = vmatpush1.bf16.xpose.msra.mxu1 %v18116_v53  ;;  %13608 = vmatprep.subr.bf16.mxu0 %v18121_v55  ;;  %v18176_v53 = vld [vmem:[%s18434_s4 + $0x1198] ss:$648 sps:$4 sm:$0xff]  }
 0x973   : > { %13657 = vmatprep.subr.bf16.mxu1 %v18124_v56  ;;  %v13250_v58 = vpop.f32.mrb[12].mxu0  ;;  %v18181_v56 = vld [vmem:[%s18434_s4 + $0x16a4] ss:$648 sps:$4 sm:$0xff]  }
 0x974   : > { %v13299_v63 = vpop.f32.mrb[12].mxu1  ;;  %v13251_v0 = vadd.f32 %v13250_v58, %v20860_v14  ;;  %v13252_v57 = vpop.f32.mrb[13].mxu0  ;;  %v18184_v58 = vld [vmem:[%s18434_s4 + $0x16ac] ss:$648 sps:$4 sm:$0xff]  }
 0x975   : > { %v13301_v61 = vpop.f32.mrb[13].mxu1  ;;  %v13253_v1 = vpop.f32.mrb[14].mxu0 }
 0x976   : > { %v13302_v3 = vpop.f32.mrb[14].mxu1  ;;  %v13254_v6 = vadd.f32 %v13253_v1, %v20864_v10  ;;  %v20928_v9 = vadd.f32 %v13299_v63, %v13251_v0  ;;  %v13255_v13 = vpop.f32.mrb[15].mxu0  ;;  %v18133_v10 = vld [vmem:[%s18434_s4 + $0x20b4] ss:$648 sps:$4 sm:$0xff]  }
 0x977   : > { %v13304_v14 = vpop.f32.mrb[15].mxu1  ;;  %v18190_v13 = vld [vmem:[%s18434_s4 + $0x1bbc] ss:$648 sps:$4 sm:$0xff]  }
 0x978   : > { %v20932_v11 = vadd.f32 %v13302_v3, %v13254_v6 }
 0x979   : > { %13609 = vmatpush1.bf16.xpose.msra.mxu0 %v18119_v4  ;;  %v18179_v4 = vld [vmem:[%s18434_s4 + $0x16a0] ss:$648 sps:$4 sm:$0xff]  }
 0x97a   : > { %13658 = vmatpush1.bf16.xpose.msra.mxu1 %v18122_v5  ;;  %13610 = vmatprep.subr.bf16.mxu0 %v18127_v2  ;;  %v18182_v5 = vld [vmem:[%s18434_s4 + $0x16a8] ss:$648 sps:$4 sm:$0xff]  }
 0x97b   : > { %13659 = vmatprep.subr.bf16.mxu1 %v18130_v7  ;;  %v18187_v7 = vld [vmem:[%s18434_s4 + $0x1bb4] ss:$648 sps:$4 sm:$0xff]  }
 0x981   : > { %13611 = vmatpush1.bf16.xpose.msra.mxu0 %v18125_v12 }
 0x982   : > { %13660 = vmatpush1.bf16.xpose.msra.mxu1 %v18128_v8  ;;  %13612 = vmatprep.subr.bf16.mxu0 %v18133_v10  ;;  %v18185_v8 = vld [vmem:[%s18434_s4 + $0x1bb0] ss:$648 sps:$4 sm:$0xff]  }
 0x983   : > { %13661 = vmatprep.subr.bf16.mxu1 %v18136_v15  ;;  %v18188_v10 = vld [vmem:[%s18434_s4 + $0x1bb8] ss:$648 sps:$4 sm:$0xff]   ;;  %v18196_v15 = vld [vmem:[%s18434_s4 + $0x20cc] ss:$648 sps:$4 sm:$0xff]  }
 0x989   : > { %13613 = vmatpush1.bf16.xpose.msra.mxu0 %v18131_v16  ;;  %v18191_v16 = vld [vmem:[%s18434_s4 + $0x20c0] ss:$648 sps:$4 sm:$0xff]  }
 0x98a   : > { %13662 = vmatpush1.bf16.xpose.msra.mxu1 %v18134_v17  ;;  %13614 = vmatprep.subr.bf16.mxu0 %v18139_v18  ;;  %v18194_v17 = vld [vmem:[%s18434_s4 + $0x20c8] ss:$648 sps:$4 sm:$0xff]   ;;  %v18199_v18 = vld [vmem:[%s18434_s4 + $0x25d4] ss:$648 sps:$4 sm:$0xff]  }
 0x98b   : > { %13663 = vmatprep.subr.bf16.mxu1 %v18142_v19  ;;  %v18202_v19 = vld [vmem:[%s18434_s4 + $0x25dc] ss:$648 sps:$4 sm:$0xff]  }
 0x991   : > { %13615 = vmatpush1.bf16.xpose.msra.mxu0 %v18137_v20  ;;  %v18197_v20 = vld [vmem:[%s18434_s4 + $0x25d0] ss:$648 sps:$4 sm:$0xff]  }
 0x992   : > { %13664 = vmatpush1.bf16.xpose.msra.mxu1 %v18140_v21  ;;  %13698 = vmatprep.subr.bf16.mxu0 %v18151_v22  ;;  %v18200_v21 = vld [vmem:[%s18434_s4 + $0x25d8] ss:$648 sps:$4 sm:$0xff]   ;;  %v18211_v22 = vld [vmem:[%s18434_s4 + $0x274] ss:$648 sps:$4 sm:$0xff]  }
 0x993   : > { %13747 = vmatprep.subr.bf16.mxu1 %v18154_v23  ;;  %v18214_v23 = vld [vmem:[%s18434_s4 + $0x27c] ss:$648 sps:$4 sm:$0xff]  }
 0x998   : > { %13633 = vmatmul.mubr.bf16.vlgmr.msra.gmra.mrb[40].mxu0 %v18143_v24  ;;  %v18203_v24 = vld [vmem:[%s21177_s0 + $0x260] ss:$648 sps:$4 sm:$0xff]  }
 0x999   : > { %13682 = vmatmul.mubr.bf16.vlgmr.msra.gmra.mrb[40].mxu1 %v18146_v25  ;;  %13699 = vmatpush1.bf16.xpose.msra.mxu0 %v18149_v26  ;;  %v18206_v25 = vld [vmem:[%s21177_s0 + $0x268] ss:$648 sps:$4 sm:$0xff]  }
 0x99a   : > { %13748 = vmatpush1.bf16.xpose.msra.mxu1 %v18152_v27  ;;  %13640 = vmatprep.mubr.bf16.mxu0 %v18157_v28  ;;  %v18209_v26 = vld [vmem:[%s18434_s4 + $0x270] ss:$648 sps:$4 sm:$0xff]   ;;  %v18217_v28 = vld [vmem:[%s21177_s0 + $0x774] ss:$648 sps:$4 sm:$0xff]  }
 0x99b   : > { %13700 = vmatprep.subr.bf16.mxu0 %v18160_v29  ;;  %13749 = vmatprep.subr.bf16.mxu1 %v18163_v30  ;;  %v18212_v27 = vld [vmem:[%s18434_s4 + $0x278] ss:$648 sps:$4 sm:$0xff]   ;;  %v18220_v29 = vld [vmem:[%s18434_s4 + $0x784] ss:$648 sps:$4 sm:$0xff]  }
 0x99c   : > { %13689 = vmatprep.mubr.bf16.mxu1 %v18166_v31  ;;  %v18223_v30 = vld [vmem:[%s18434_s4 + $0x78c] ss:$648 sps:$4 sm:$0xff]   ;;  %v18226_v31 = vld [vmem:[%s21177_s0 + $0x77c] ss:$648 sps:$4 sm:$0xff]  }
 0x9a0   : > { %13641 = vmatmul.mubr.bf16.gmra.mrb[44].mxu0 %v18155_v32  ;;  %v18215_v32 = vld [vmem:[%s21177_s0 + $0x770] ss:$648 sps:$4 sm:$0xff]  }
 0x9a1   : > { %13690 = vmatmul.mubr.bf16.gmra.mrb[44].mxu1 %v18164_v33  ;;  %13701 = vmatpush1.bf16.xpose.msra.mxu0 %v18158_v34  ;;  %v18224_v33 = vld [vmem:[%s21177_s0 + $0x778] ss:$648 sps:$4 sm:$0xff]  }
 0x9a2   : > { %13750 = vmatpush1.bf16.xpose.msra.mxu1 %v18161_v35  ;;  %13702 = vmatprep.subr.bf16.mxu0 %v18169_v36  ;;  %v18218_v34 = vld [vmem:[%s18434_s4 + $0x780] ss:$648 sps:$4 sm:$0xff]   ;;  %v18229_v36 = vld [vmem:[%s18434_s4 + $0xc94] ss:$648 sps:$4 sm:$0xff]  }
 0x9a3   : > { %13751 = vmatprep.subr.bf16.mxu1 %v18172_v37  ;;  %13730 = vmatprep.mubr.bf16.mxu0 %v18205_v38  ;;  %v18221_v35 = vld [vmem:[%s18434_s4 + $0x788] ss:$648 sps:$4 sm:$0xff]   ;;  %v18232_v37 = vld [vmem:[%s18434_s4 + $0xc9c] ss:$648 sps:$4 sm:$0xff]  }
 0x9a4   : > { %13779 = vmatprep.mubr.bf16.mxu1 %v18208_v39  ;;  %v18265_v38 = vld [vmem:[%s21177_s0 + $0x274] ss:$648 sps:$4 sm:$0xff]  }
 0x9a5   : > { %v18268_v39 = vld [vmem:[%s21177_s0 + $0x27c] ss:$648 sps:$4 sm:$0xff]  }
 0x9a9   : > { %13703 = vmatpush1.bf16.xpose.msra.mxu0 %v18167_v40  ;;  %v18227_v40 = vld [vmem:[%s18434_s4 + $0xc90] ss:$648 sps:$4 sm:$0xff]  }
 0x9aa   : > { %13752 = vmatpush1.bf16.xpose.msra.mxu1 %v18170_v41  ;;  %13704 = vmatprep.subr.bf16.mxu0 %v18175_v42  ;;  %v18230_v41 = vld [vmem:[%s18434_s4 + $0xc98] ss:$648 sps:$4 sm:$0xff]   ;;  %v18235_v42 = vld [vmem:[%s18434_s4 + $0x11a4] ss:$648 sps:$4 sm:$0xff]  }
 0x9ab   : > { %13753 = vmatprep.subr.bf16.mxu1 %v18178_v43  ;;  %v13340_v44 = vpop.f32.mrb[16].mxu0  ;;  %v18238_v43 = vld [vmem:[%s18434_s4 + $0x11ac] ss:$648 sps:$4 sm:$0xff]  }
 0x9ac   : > { %v13389_v45 = vpop.f32.mrb[16].mxu1  ;;  %v13341_v46 = vadd.f32 %v13340_v44, %v20917_v59  ;;  %v13342_v47 = vpop.f32.mrb[17].mxu0 }
 0x9ad   : > { %v13391_v48 = vpop.f32.mrb[17].mxu1  ;;  %v13343_v49 = vpop.f32.mrb[18].mxu0 }
 0x9ae   : > { %v13392_v50 = vpop.f32.mrb[18].mxu1  ;;  %v20985_v60 = vadd.f32 %v13389_v45, %v13341_v46  ;;  %v13344_v52 = vadd.f32 %v13343_v49, %v20922_v62  ;;  %v13345_v54 = vpop.f32.mrb[19].mxu0 }
 0x9af   : > { %v13394_v55 = vpop.f32.mrb[19].mxu1 }
 0x9b0   : > { %v20990_v63 = vadd.f32 %v13392_v50, %v13344_v52 }
 0x9b1   : > { %13705 = vmatpush1.bf16.xpose.msra.mxu0 %v18173_v51  ;;  %v18233_v51 = vld [vmem:[%s18434_s4 + $0x11a0] ss:$648 sps:$4 sm:$0xff]  }
 0x9b2   : > { %13754 = vmatpush1.bf16.xpose.msra.mxu1 %v18176_v53  ;;  %13706 = vmatprep.subr.bf16.mxu0 %v18181_v56  ;;  %v18236_v53 = vld [vmem:[%s18434_s4 + $0x11a8] ss:$648 sps:$4 sm:$0xff]  }
 0x9b3   : > { %13755 = vmatprep.subr.bf16.mxu1 %v18184_v58  ;;  %v13348_v59 = vpop.f32.mrb[20].mxu0  ;;  %v18241_v58 = vld [vmem:[%s18434_s4 + $0x16b4] ss:$648 sps:$4 sm:$0xff]  }
 0x9b4   : > { %v13397_v0 = vpop.f32.mrb[20].mxu1  ;;  %v13349_v57 = vadd.f32 %v13348_v59, %v20928_v9  ;;  %v13350_v61 = vpop.f32.mrb[21].mxu0  ;;  %v18244_v59 = vld [vmem:[%s18434_s4 + $0x16bc] ss:$648 sps:$4 sm:$0xff]  }
 0x9b5   : > { %v13399_v62 = vpop.f32.mrb[21].mxu1  ;;  %v13351_v1 = vpop.f32.mrb[22].mxu0 }
 0x9b6   : > { %v13400_v3 = vpop.f32.mrb[22].mxu1  ;;  %v13352_v6 = vadd.f32 %v13351_v1, %v20932_v11  ;;  %v20996_v2 = vadd.f32 %v13397_v0, %v13349_v57  ;;  %v13353_v14 = vpop.f32.mrb[23].mxu0  ;;  %v18193_v11 = vld [vmem:[%s18434_s4 + $0x20c4] ss:$648 sps:$4 sm:$0xff]  }
 0x9b7   : > { %v13402_v9 = vpop.f32.mrb[23].mxu1  ;;  %v18250_v14 = vld [vmem:[%s18434_s4 + $0x1bcc] ss:$648 sps:$4 sm:$0xff]  }
 0x9b8   : > { %v21000_v12 = vadd.f32 %v13400_v3, %v13352_v6 }
 0x9b9   : > { %13707 = vmatpush1.bf16.xpose.msra.mxu0 %v18179_v4  ;;  %v18239_v4 = vld [vmem:[%s18434_s4 + $0x16b0] ss:$648 sps:$4 sm:$0xff]  }
 0x9ba   : > { %13756 = vmatpush1.bf16.xpose.msra.mxu1 %v18182_v5  ;;  %13708 = vmatprep.subr.bf16.mxu0 %v18187_v7  ;;  %v18242_v5 = vld [vmem:[%s18434_s4 + $0x16b8] ss:$648 sps:$4 sm:$0xff]  }
 0x9bb   : > { %13757 = vmatprep.subr.bf16.mxu1 %v18190_v13  ;;  %v18247_v13 = vld [vmem:[%s18434_s4 + $0x1bc4] ss:$648 sps:$4 sm:$0xff]  }
 0x9c1   : > { %13709 = vmatpush1.bf16.xpose.msra.mxu0 %v18185_v8 }
 0x9c2   : > { %13758 = vmatpush1.bf16.xpose.msra.mxu1 %v18188_v10  ;;  %13710 = vmatprep.subr.bf16.mxu0 %v18193_v11  ;;  %v18245_v10 = vld [vmem:[%s18434_s4 + $0x1bc0] ss:$648 sps:$4 sm:$0xff]  }
 0x9c3   : > { %13759 = vmatprep.subr.bf16.mxu1 %v18196_v15  ;;  %v18248_v11 = vld [vmem:[%s18434_s4 + $0x1bc8] ss:$648 sps:$4 sm:$0xff]   ;;  %v18256_v15 = vld [vmem:[%s18434_s4 + $0x20dc] ss:$648 sps:$4 sm:$0xff]  }
 0x9c9   : > { %13711 = vmatpush1.bf16.xpose.msra.mxu0 %v18191_v16  ;;  %v18251_v16 = vld [vmem:[%s18434_s4 + $0x20d0] ss:$648 sps:$4 sm:$0xff]  }
 0x9ca   : > { %13760 = vmatpush1.bf16.xpose.msra.mxu1 %v18194_v17  ;;  %13712 = vmatprep.subr.bf16.mxu0 %v18199_v18  ;;  %v18254_v17 = vld [vmem:[%s18434_s4 + $0x20d8] ss:$648 sps:$4 sm:$0xff]   ;;  %v18259_v18 = vld [vmem:[%s18434_s4 + $0x25e4] ss:$648 sps:$4 sm:$0xff]  }
 0x9cb   : > { %13761 = vmatprep.subr.bf16.mxu1 %v18202_v19  ;;  %v18262_v19 = vld [vmem:[%s18434_s4 + $0x25ec] ss:$648 sps:$4 sm:$0xff]  }
 0x9d1   : > { %13713 = vmatpush1.bf16.xpose.msra.mxu0 %v18197_v20  ;;  %v18257_v20 = vld [vmem:[%s18434_s4 + $0x25e0] ss:$648 sps:$4 sm:$0xff]  }
 0x9d2   : > { %13762 = vmatpush1.bf16.xpose.msra.mxu1 %v18200_v21  ;;  %13796 = vmatprep.subr.bf16.mxu0 %v18211_v22  ;;  %v18260_v21 = vld [vmem:[%s18434_s4 + $0x25e8] ss:$648 sps:$4 sm:$0xff]   ;;  %v18271_v22 = vld [vmem:[%s18434_s4 + $0x284] ss:$648 sps:$4 sm:$0xff]  }
 0x9d3   : > { %13845 = vmatprep.subr.bf16.mxu1 %v18214_v23  ;;  %v18263_v23 = vld [vmem:[%s21177_s0 + $0x270] ss:$648 sps:$4 sm:$0xff]  }
 0x9d8   : > { %13731 = vmatmul.mubr.bf16.vlgmr.msra.gmra.mrb[48].mxu0 %v18203_v24  ;;  %v18266_v24 = vld [vmem:[%s21177_s0 + $0x278] ss:$648 sps:$4 sm:$0xff]  }
 0x9d9   : > { %13780 = vmatmul.mubr.bf16.vlgmr.msra.gmra.mrb[48].mxu1 %v18206_v25  ;;  %13797 = vmatpush1.bf16.xpose.msra.mxu0 %v18209_v26  ;;  %v18269_v25 = vld [vmem:[%s18434_s4 + $0x280] ss:$648 sps:$4 sm:$0xff]   ;;  %v18274_v26 = vld [vmem:[%s21177_s0 + $0x784] ss:$648 sps:$4 sm:$0xff]  }
 0x9da   : > { %13846 = vmatpush1.bf16.xpose.msra.mxu1 %v18212_v27  ;;  %13738 = vmatprep.mubr.bf16.mxu0 %v18217_v28  ;;  %v18277_v27 = vld [vmem:[%s18434_s4 + $0x794] ss:$648 sps:$4 sm:$0xff]  }
 0x9db   : > { %13798 = vmatprep.subr.bf16.mxu0 %v18220_v29  ;;  %13847 = vmatprep.subr.bf16.mxu1 %v18223_v30  ;;  %v18280_v28 = vld [vmem:[%s21177_s0 + $0x78c] ss:$648 sps:$4 sm:$0xff]   ;;  %v18272_v29 = vld [vmem:[%s21177_s0 + $0x780] ss:$648 sps:$4 sm:$0xff]  }
 0x9dc   : > { %13787 = vmatprep.mubr.bf16.mxu1 %v18226_v31  ;;  %v18278_v30 = vld [vmem:[%s21177_s0 + $0x788] ss:$648 sps:$4 sm:$0xff]  }
 0x9dd   : > { %v18275_v31 = vld [vmem:[%s18434_s4 + $0x790] ss:$648 sps:$4 sm:$0xff]  }
 0x9e0   : > { %13739 = vmatmul.mubr.bf16.gmra.mrb[52].mxu0 %v18215_v32  ;;  %v18283_v32 = vld [vmem:[%s18434_s4 + $0xca4] ss:$648 sps:$4 sm:$0xff]  }
 0x9e1   : > { %13788 = vmatmul.mubr.bf16.gmra.mrb[52].mxu1 %v18224_v33  ;;  %13799 = vmatpush1.bf16.xpose.msra.mxu0 %v18218_v34  ;;  %v18301_v33 = vld [vmem:[%s21177_s0 + $0x284] ss:$648 sps:$4 sm:$0xff]   ;;  %v18304_v34 = vld [vmem:[%s21177_s0 + $0x794] ss:$648 sps:$4 sm:$0xff]  }
 0x9e2   : > { %13848 = vmatpush1.bf16.xpose.msra.mxu1 %v18221_v35  ;;  %13800 = vmatprep.subr.bf16.mxu0 %v18229_v36  ;;  %v18281_v35 = vld [vmem:[%s18434_s4 + $0xca0] ss:$648 sps:$4 sm:$0xff]   ;;  %v18286_v36 = vld [vmem:[%s18434_s4 + $0x11b4] ss:$648 sps:$4 sm:$0xff]  }
 0x9e3   : > { %13849 = vmatprep.subr.bf16.mxu1 %v18232_v37  ;;  %13828 = vmatprep.mubr.bf16.mxu0 %v18265_v38 }
 0x9e4   : > { %13877 = vmatprep.mubr.bf16.mxu1 %v18268_v39 }
 0x9e9   : > { %13801 = vmatpush1.bf16.xpose.msra.mxu0 %v18227_v40 }
 0x9ea   : > { %13850 = vmatpush1.bf16.xpose.msra.mxu1 %v18230_v41  ;;  %13802 = vmatprep.subr.bf16.mxu0 %v18235_v42 }
 0x9eb   : > { %13851 = vmatprep.subr.bf16.mxu1 %v18238_v43  ;;  %v13438_v44 = vpop.f32.mrb[24].mxu0 }
 0x9ec   : > { %v13487_v45 = vpop.f32.mrb[24].mxu1  ;;  %v13439_v46 = vadd.f32 %v13438_v44, %v20985_v60  ;;  %v13440_v47 = vpop.f32.mrb[25].mxu0  ;;  %v18284_v44 = vld [vmem:[%s18434_s4 + $0x11b0] ss:$648 sps:$4 sm:$0xff]  }
 0x9ed   : > { %v13489_v48 = vpop.f32.mrb[25].mxu1  ;;  %v13441_v49 = vpop.f32.mrb[26].mxu0 }
 0x9ee   : > { %v13490_v50 = vpop.f32.mrb[26].mxu1  ;;  %v21053_v52 = vadd.f32 %v13487_v45, %v13439_v46  ;;  %v13442_v54 = vadd.f32 %v13441_v49, %v20990_v63  ;;  %v13443_v55 = vpop.f32.mrb[27].mxu0  ;;  %v18289_v49 = vld [vmem:[%s18434_s4 + $0x16c4] ss:$648 sps:$4 sm:$0xff]  }
 0x9ef   : > { %v13492_v56 = vpop.f32.mrb[27].mxu1 }
 0x9f0   : > { %v21058_v0 = vadd.f32 %v13490_v50, %v13442_v54 }
 0x9f1   : > { %13803 = vmatpush1.bf16.xpose.msra.mxu0 %v18233_v51 }
 0x9f2   : > { %13852 = vmatpush1.bf16.xpose.msra.mxu1 %v18236_v53  ;;  %13804 = vmatprep.subr.bf16.mxu0 %v18241_v58 }
 0x9f3   : > { %13853 = vmatprep.subr.bf16.mxu1 %v18244_v59  ;;  %v13446_v60 = vpop.f32.mrb[28].mxu0  ;;  %v18287_v59 = vld [vmem:[%s18434_s4 + $0x16c0] ss:$648 sps:$4 sm:$0xff]  }
 0x9f4   : > { %v13495_v57 = vpop.f32.mrb[28].mxu1  ;;  %v13447_v61 = vadd.f32 %v13446_v60, %v20996_v2  ;;  %v13448_v62 = vpop.f32.mrb[29].mxu0 }
 0x9f5   : > { %v13497_v63 = vpop.f32.mrb[29].mxu1  ;;  %v13449_v1 = vpop.f32.mrb[30].mxu0 }
 0x9f6   : > { %v13498_v3 = vpop.f32.mrb[30].mxu1  ;;  %v13450_v6 = vadd.f32 %v13449_v1, %v21000_v12  ;;  %v21064_v7 = vadd.f32 %v13495_v57, %v13447_v61  ;;  %v13451_v9 = vpop.f32.mrb[31].mxu0  ;;  %v18253_v12 = vld [vmem:[%s18434_s4 + $0x20d4] ss:$648 sps:$4 sm:$0xff]   ;;  %v18290_v1 = vld [vmem:[%s18434_s4 + $0x1bd0] ss:$648 sps:$4 sm:$0xff]  }
 0x9f7   : > { %v13500_v2 = vpop.f32.mrb[31].mxu1  ;;  %v18292_v57 = vld [vmem:[%s18434_s4 + $0x1bd4] ss:$648 sps:$4 sm:$0xff]  }
 0x9f8   : > { %v21068_v8 = vadd.f32 %v13498_v3, %v13450_v6  ;;  %v18295_v3 = vld [vmem:[%s18434_s4 + $0x20e4] ss:$648 sps:$4 sm:$0xff]   ;;  %v18296_v6 = vld [vmem:[%s18434_s4 + $0x25f0] ss:$648 sps:$4 sm:$0xff]  }
 0x9f9   : > { %13805 = vmatpush1.bf16.xpose.msra.mxu0 %v18239_v4  ;;  %v18293_v4 = vld [vmem:[%s18434_s4 + $0x20e0] ss:$648 sps:$4 sm:$0xff]  }
 0x9fa   : > { %13854 = vmatpush1.bf16.xpose.msra.mxu1 %v18242_v5  ;;  %13806 = vmatprep.subr.bf16.mxu0 %v18247_v13  ;;  %v18298_v5 = vld [vmem:[%s18434_s4 + $0x25f4] ss:$648 sps:$4 sm:$0xff]   ;;  %v18302_v13 = vld [vmem:[%s21177_s0 + $0x790] ss:$648 sps:$4 sm:$0xff]   ;;  %s232_s4 = scalar_select %p231_p9, %s18351_s14, 1 }
 0x9fb   : > { %13855 = vmatprep.subr.bf16.mxu1 %v18250_v14 }
 0x9fc   : > { %s233_s29 = scalar_lea.vmem %s21179_s2, %s232_s4 }
 0xa01   : > { %13807 = vmatpush1.bf16.xpose.msra.mxu0 %v18245_v10 }
 0xa02   : > { %13856 = vmatpush1.bf16.xpose.msra.mxu1 %v18248_v11  ;;  %13808 = vmatprep.subr.bf16.mxu0 %v18253_v12 }
 0xa03   : > { %13857 = vmatprep.subr.bf16.mxu1 %v18256_v15 }
 0xa09   : > { %13809 = vmatpush1.bf16.xpose.msra.mxu0 %v18251_v16 }
 0xa0a   : > { %13858 = vmatpush1.bf16.xpose.msra.mxu1 %v18254_v17  ;;  %13810 = vmatprep.subr.bf16.mxu0 %v18259_v18 }
 0xa0b   : > { %13859 = vmatprep.subr.bf16.mxu1 %v18262_v19 }
 0xa11   : > { %13811 = vmatpush1.bf16.xpose.msra.mxu0 %v18257_v20 }
 0xa12   : > { %13860 = vmatpush1.bf16.xpose.msra.mxu1 %v18260_v21  ;;  %13894 = vmatprep.subr.bf16.mxu0 %v18271_v22 }
 0xa13   : > { %15818 = vmatprep.subr.bf16.mxu1 %v18271_v22 }
 0xa18   : > { %13829 = vmatmul.mubr.bf16.vlgmr.msra.gmra.mrb[56].mxu0 %v18263_v23 }
 0xa19   : > { %13878 = vmatmul.mubr.bf16.vlgmr.msra.gmra.mrb[56].mxu1 %v18266_v24  ;;  %13895 = vmatpush1.bf16.xpose.msra.mxu0 %v18269_v25 }
 0xa1a   : > { %15826 = vmatpush1.bf16.xpose.msra.mxu1 %v18269_v25  ;;  %13836 = vmatprep.mubr.bf16.mxu0 %v18274_v26 }
 0xa1b   : > { %13896 = vmatprep.subr.bf16.mxu0 %v18277_v27  ;;  %15819 = vmatprep.subr.bf16.mxu1 %v18277_v27 }
 0xa1c   : > { %13885 = vmatprep.mubr.bf16.mxu1 %v18280_v28 }
 0xa20   : > { %13837 = vmatmul.mubr.bf16.gmra.mrb[60].mxu0 %v18272_v29 }
 0xa21   : > { %13886 = vmatmul.mubr.bf16.gmra.mrb[60].mxu1 %v18278_v30  ;;  %13897 = vmatpush1.bf16.xpose.msra.mxu0 %v18275_v31 }
 0xa22   : > { %15827 = vmatpush1.bf16.xpose.msra.mxu1 %v18275_v31  ;;  %13898 = vmatprep.subr.bf16.mxu0 %v18283_v32 }
 0xa23   : > { %15820 = vmatprep.subr.bf16.mxu1 %v18283_v32  ;;  %13926 = vmatprep.mubr.bf16.mxu0 %v18301_v33 }
 0xa24   : > { %13934 = vmatprep.mubr.bf16.mxu1 %v18304_v34 }
 0xa29   : > { %13899 = vmatpush1.bf16.xpose.msra.mxu0 %v18281_v35 }
 0xa2a   : > { %15828 = vmatpush1.bf16.xpose.msra.mxu1 %v18281_v35  ;;  %13900 = vmatprep.subr.bf16.mxu0 %v18286_v36 }
 0xa2b   : > { %15821 = vmatprep.subr.bf16.mxu1 %v18286_v36  ;;  %v13536_v37 = vpop.f32.mrb[32].mxu0 }
 0xa2c   : > { %v13585_v38 = vpop.f32.mrb[32].mxu1  ;;  %v13537_v39 = vadd.f32 %v13536_v37, %v21053_v52  ;;  %v13538_v40 = vpop.f32.mrb[33].mxu0 }
 0xa2d   : > { %v13587_v41 = vpop.f32.mrb[33].mxu1  ;;  %v13539_v42 = vpop.f32.mrb[34].mxu0 }
 0xa2e   : > { %v13588_v43 = vpop.f32.mrb[34].mxu1  ;;  %v13586_v45 = vadd.f32 %v13585_v38, %v13537_v39  ;;  %v13540_v46 = vadd.f32 %v13539_v42, %v21058_v0  ;;  %v13541_v47 = vpop.f32.mrb[35].mxu0 }
 0xa2f   : > { %v13590_v48 = vpop.f32.mrb[35].mxu1 }
 0xa30   : > { %v13589_v50 = vadd.f32 %v13588_v43, %v13540_v46 }
 0xa31   : > { %13901 = vmatpush1.bf16.xpose.msra.mxu0 %v18284_v44 }
 0xa32   : > { %15829 = vmatpush1.bf16.xpose.msra.mxu1 %v18284_v44  ;;  %13902 = vmatprep.subr.bf16.mxu0 %v18289_v49 }
 0xa33   : > { %15822 = vmatprep.subr.bf16.mxu1 %v18289_v49  ;;  %v13544_v51 = vpop.f32.mrb[36].mxu0 }
 0xa34   : > { %v13593_v53 = vpop.f32.mrb[36].mxu1  ;;  %v13545_v52 = vadd.f32 %v13544_v51, %v21064_v7  ;;  %v13546_v54 = vpop.f32.mrb[37].mxu0  ;;  %v18299_v7 = vld [vmem:[%s21177_s0 + $0x280] ss:$648 sps:$4 sm:$0xff]  }
 0xa35   : > { %v13595_v55 = vpop.f32.mrb[37].mxu1  ;;  %v13547_v56 = vpop.f32.mrb[38].mxu0 }
 0xa36   : > { %v13596_v58 = vpop.f32.mrb[38].mxu1  ;;  %v13548_v0 = vadd.f32 %v13547_v56, %v21068_v8  ;;  %v13594_v60 = vadd.f32 %v13593_v53, %v13545_v52  ;;  %v13549_v61 = vpop.f32.mrb[39].mxu0 }
 0xa37   : > { %v13598_v62 = vpop.f32.mrb[39].mxu1 }
 0xa38   : > { %v13597_v63 = vadd.f32 %v13596_v58, %v13548_v0 }
 0xa39   : > { %13903 = vmatpush1.bf16.xpose.msra.mxu0 %v18287_v59 }
 0xa3a   : > { %15830 = vmatpush1.bf16.xpose.msra.mxu1 %v18287_v59  ;;  %13904 = vmatprep.subr.bf16.mxu0 %v18292_v57 }
 0xa3b   : > { %15823 = vmatprep.subr.bf16.mxu1 %v18292_v57 }
 0xa41   : > { %13905 = vmatpush1.bf16.xpose.msra.mxu0 %v18290_v1 }
 0xa42   : > { %15831 = vmatpush1.bf16.xpose.msra.mxu1 %v18290_v1  ;;  %13906 = vmatprep.subr.bf16.mxu0 %v18295_v3 }
 0xa43   : > { %15824 = vmatprep.subr.bf16.mxu1 %v18295_v3 }
 0xa49   : > { %13907 = vmatpush1.bf16.xpose.msra.mxu0 %v18293_v4 }
 0xa4a   : > { %15832 = vmatpush1.bf16.xpose.msra.mxu1 %v18293_v4  ;;  %13908 = vmatprep.subr.bf16.mxu0 %v18298_v5 }
 0xa4b   : > { %15825 = vmatprep.subr.bf16.mxu1 %v18298_v5 }
 0xa51   : > { %13909 = vmatpush1.bf16.xpose.msra.mxu0 %v18296_v6 }
 0xa52   : > { %15833 = vmatpush1.bf16.xpose.msra.mxu1 %v18296_v6 }
 0xa58   : > { %13927 = vmatmul.mubr.bf16.vlgmr.msra.gmra.mrb[64].mxu0 %v18299_v7 }
 0xa59   : > { %13935 = vmatmul.mubr.bf16.vlgmr.msra.gmra.mrb[64].mxu1 %v18302_v13 }
 0xa6b   : > { %v13634_v14 = vpop.f32.mrb[40].mxu0 }
 0xa6c   : > { %v13683_v9 = vpop.f32.mrb[40].mxu1  ;;  %v13635_v2 = vadd.f32 %v13634_v14, %v13586_v45  ;;  %v13636_v8 = vpop.f32.mrb[41].mxu0 }
 0xa6d   : > { %v13685_v10 = vpop.f32.mrb[41].mxu1  ;;  %v13637_v11 = vpop.f32.mrb[42].mxu0 }
 0xa6e   : > { %v13686_v12 = vpop.f32.mrb[42].mxu1  ;;  %v13684_v15 = vadd.f32 %v13683_v9, %v13635_v2  ;;  %v13638_v16 = vadd.f32 %v13637_v11, %v13589_v50  ;;  %v13639_v17 = vpop.f32.mrb[43].mxu0 }
 0xa6f   : > { %v13688_v18 = vpop.f32.mrb[43].mxu1 }
 0xa70   : > { %v13687_v19 = vadd.f32 %v13686_v12, %v13638_v16  ;;  %v14193_v16 = vld [vmem:[%s233_s29] ss:$0 sm:$0xff] }
 0xa73   : > { %v13642_v20 = vpop.f32.mrb[44].mxu0 }
 0xa74   : > { %v13691_v21 = vpop.f32.mrb[44].mxu1  ;;  %v13643_v22 = vadd.f32 %v13642_v20, %v13594_v60  ;;  %v13644_v23 = vpop.f32.mrb[45].mxu0 }
 0xa75   : > { %v13693_v24 = vpop.f32.mrb[45].mxu1  ;;  %v13645_v25 = vpop.f32.mrb[46].mxu0 }
 0xa76   : > { %v13694_v26 = vpop.f32.mrb[46].mxu1  ;;  %v13646_v27 = vadd.f32 %v13645_v25, %v13597_v63  ;;  %v13692_v28 = vadd.f32 %v13691_v21, %v13643_v22  ;;  %v13647_v29 = vpop.f32.mrb[47].mxu0 }
 0xa77   : > { %v13696_v30 = vpop.f32.mrb[47].mxu1 }
 0xa78   : > { %v13695_v31 = vadd.f32 %v13694_v26, %v13646_v27 }
 0xaab   : > { %v13732_v32 = vpop.f32.mrb[48].mxu0 }
 0xaac   : > { %v13781_v33 = vpop.f32.mrb[48].mxu1  ;;  %v13733_v34 = vadd.f32 %v13732_v32, %v13684_v15  ;;  %v13734_v35 = vpop.f32.mrb[49].mxu0 }
 0xaad   : > { %v13783_v36 = vpop.f32.mrb[49].mxu1  ;;  %v13735_v37 = vpop.f32.mrb[50].mxu0 }
 0xaae   : > { %v13784_v38 = vpop.f32.mrb[50].mxu1  ;;  %v13782_v39 = vadd.f32 %v13781_v33, %v13733_v34  ;;  %v13736_v40 = vadd.f32 %v13735_v37, %v13687_v19  ;;  %v13737_v41 = vpop.f32.mrb[51].mxu0 }
 0xaaf   : > { %v13786_v42 = vpop.f32.mrb[51].mxu1 }
 0xab0   : > { %v13785_v43 = vadd.f32 %v13784_v38, %v13736_v40 }
 0xab3   : > { %v13740_v44 = vpop.f32.mrb[52].mxu0 }
 0xab4   : > { %v13789_v45 = vpop.f32.mrb[52].mxu1  ;;  %v13741_v46 = vadd.f32 %v13740_v44, %v13692_v28  ;;  %v13742_v47 = vpop.f32.mrb[53].mxu0 }
 0xab5   : > { %v13791_v48 = vpop.f32.mrb[53].mxu1  ;;  %v13743_v49 = vpop.f32.mrb[54].mxu0 }
 0xab6   : > { %v13792_v50 = vpop.f32.mrb[54].mxu1  ;;  %v13744_v51 = vadd.f32 %v13743_v49, %v13695_v31  ;;  %v13790_v53 = vadd.f32 %v13789_v45, %v13741_v46  ;;  %v13745_v52 = vpop.f32.mrb[55].mxu0 }
 0xab7   : > { %v13794_v54 = vpop.f32.mrb[55].mxu1 }
 0xab8   : > { %v13793_v55 = vadd.f32 %v13792_v50, %v13744_v51 }
 0xaeb   : > { %v13830_v56 = vpop.f32.mrb[56].mxu0 }
 0xaec   : > { %v13879_v58 = vpop.f32.mrb[56].mxu1  ;;  %v13831_v59 = vadd.f32 %v13830_v56, %v13782_v39  ;;  %v13832_v0 = vpop.f32.mrb[57].mxu0 }
 0xaed   : > { %v13881_v60 = vpop.f32.mrb[57].mxu1  ;;  %v13833_v57 = vpop.f32.mrb[58].mxu0 }
 0xaee   : > { %v13882_v61 = vpop.f32.mrb[58].mxu1  ;;  %v13880_v62 = vadd.f32 %v13879_v58, %v13831_v59  ;;  %v13834_v63 = vadd.f32 %v13833_v57, %v13785_v43  ;;  %v13835_v1 = vpop.f32.mrb[59].mxu0 }
 0xaef   : > { %v13884_v3 = vpop.f32.mrb[59].mxu1 }
 0xaf0   : > { %v13883_v4 = vadd.f32 %v13882_v61, %v13834_v63 }
 0xaf3   : > { %v13838_v5 = vpop.f32.mrb[60].mxu0 }
 0xaf4   : > { %v13887_v6 = vpop.f32.mrb[60].mxu1  ;;  %v13839_v7 = vadd.f32 %v13838_v5, %v13790_v53  ;;  %v13840_v13 = vpop.f32.mrb[61].mxu0 }
 0xaf5   : > { %v13889_v14 = vpop.f32.mrb[61].mxu1  ;;  %v13841_v9 = vpop.f32.mrb[62].mxu0 }
 0xaf6   : > { %v13890_v2 = vpop.f32.mrb[62].mxu1  ;;  %v13842_v8 = vadd.f32 %v13841_v9, %v13793_v55  ;;  %v13888_v10 = vadd.f32 %v13887_v6, %v13839_v7  ;;  %v13843_v11 = vpop.f32.mrb[63].mxu0 }
 0xaf7   : > { %v13892_v12 = vpop.f32.mrb[63].mxu1 }
 0xaf8   : > { %v13891_v15 = vadd.f32 %v13890_v2, %v13842_v8 }
 0xb2b   : > { %v13928_v17 = vpop.f32.mrb[64].mxu0 }
 0xb2c   : > { %v13936_v18 = vpop.f32.mrb[64].mxu1  ;;  %v13929_v19 = vadd.f32 %v13928_v17, %v13880_v62  ;;  %v13930_v21 = vpop.f32.mrb[65].mxu0 }
 0xb2d   : > { %v13937_v20 = vadd.f32 %v13936_v18, %v13888_v10  ;;  %v13938_v22 = vpop.f32.mrb[65].mxu1  ;;  %v13931_v23 = vpop.f32.mrb[66].mxu0 }
 0xb2e   : > { %v13939_v24 = vpop.f32.mrb[66].mxu1  ;;  %v21135_v25 = vadd.f32 %v14193_v16, %v13929_v19  ;;  %v13932_v27 = vadd.f32 %v13931_v23, %v13883_v4  ;;  %v13933_v29 = vpop.f32.mrb[67].mxu0 }
 0xb2f   : > { %v21137_v26 = vadd.f32 %v14193_v16, %v13937_v20  ;;  %v13940_v28 = vadd.f32 %v13939_v24, %v13891_v15  ;;  %v13941_v30 = vpop.f32.mrb[67].mxu1 }
 0xb30   : > { %v13958_v31 = vmul.f32 %v21135_v25, %v21135_v25  ;;  %v21143_v33 = vadd.f32 %v14193_v16, %v13932_v27 }
 0xb31   : > { %v13960_v32 = vmul.f32 %v21137_v26, %v21137_v26  ;;  %v21145_v34 = vadd.f32 %v14193_v16, %v13940_v28 }
 0xb32   : > { %v13962_v35 = vrot.slane %v13958_v31, 4  ;;  %v13959_v37 = vmul.f32 %v21143_v33, %v21143_v33 }
 0xb33   : > { %v13974_v36 = vrot.slane %v13960_v32, 4  ;;  %v13961_v38 = vmul.f32 %v21145_v34, %v21145_v34 }
 0xb34   : > { %v13963_v39 = vadd.f32 %v13962_v35, %v13958_v31  ;;  %v13968_v41 = vrot.slane %v13959_v37, 4 }
 0xb35   : > { %v13975_v40 = vadd.f32 %v13974_v36, %v13960_v32  ;;  %v13980_v42 = vrot.slane %v13961_v38, 4 }
 0xb36   : > { %v13964_v43 = vrot.slane %v13963_v39, 2  ;;  %v13969_v45 = vadd.f32 %v13968_v41, %v13959_v37 }
 0xb37   : > { %v13976_v44 = vrot.slane %v13975_v40, 2  ;;  %v13981_v46 = vadd.f32 %v13980_v42, %v13961_v38 }
 0xb38   : > { %v13965_v47 = vadd.f32 %v13964_v43, %v13963_v39  ;;  %v13970_v49 = vrot.slane %v13969_v45, 2 }
 0xb39   : > { %v13977_v48 = vadd.f32 %v13976_v44, %v13975_v40  ;;  %v13982_v50 = vrot.slane %v13981_v46, 2 }
 0xb3a   : > { %v13966_v51 = vrot.slane %v13965_v47, 1  ;;  %v13971_v52 = vadd.f32 %v13970_v49, %v13969_v45 }
 0xb3b   : > { %v13978_v53 = vrot.slane %v13977_v48, 1  ;;  %v13983_v54 = vadd.f32 %v13982_v50, %v13981_v46 }
 0xb3c   : > { %v13967_v55 = vadd.f32 %v13966_v51, %v13965_v47  ;;  %v13972_v58 = vrot.slane %v13971_v52, 1 }
 0xb3d   : > { %v13979_v56 = vadd.f32 %v13978_v53, %v13977_v48  ;;  %v13984_v59 = vrot.slane %v13983_v54, 1 }
 0xb3e   : > { %18305 = vrsqrt.f32 %v13967_v55  ;;  %v13973_v0 = vadd.f32 %v13972_v58, %v13971_v52  ;;  %vm13988_vm0 = vcmp.eq.f32.partialorder %v13967_v55, inf  ;;  %vm13990_vm1 = vcmp.eq.f32.partialorder %v13967_v55, 0.0 }
 0xb3f   : > { %18307 = vrsqrt.f32 %v13979_v56  ;;  %v13985_v60 = vadd.f32 %v13984_v59, %v13983_v54  ;;  %v13991_v63 = vand.u32 2147483648, %v13967_v55  ;;  %v14014_v4 = vadd.f32 1.0, %v13967_v55 }
 0xb40   : > { %18309 = vrsqrt.f32 %v13973_v0  ;;  %vm14002_vm2 = vcmp.eq.f32.partialorder %v13979_v56, inf  ;;  %v14005_v5 = vand.u32 2147483648, %v13979_v56  ;;  %vm14004_vm3 = vcmp.eq.f32.partialorder %v13979_v56, 0.0 }
 0xb41   : > { %18311 = vrsqrt.f32 %v13985_v60  ;;  %v14016_v14 = vadd.f32 1.0, %v13979_v56  ;;  %vm13995_vm4 = vcmp.eq.f32.partialorder %v13973_v0, inf  ;;  %vm13997_vm5 = vcmp.eq.f32.partialorder %v13973_v0, 0.0 }
 0xb42   : > { %v13998_v12 = vand.u32 2147483648, %v13973_v0  ;;  %vm14009_vm6 = vcmp.eq.f32.partialorder %v13985_v60, inf  ;;  %v14012_v18 = vand.u32 2147483648, %v13985_v60  ;;  %vm14011_vm7 = vcmp.eq.f32.partialorder %v13985_v60, 0.0 }
 0xb43   : > { %v14015_v22 = vadd.f32 1.0, %v13973_v0  ;;  %v14017_v27 = vadd.f32 1.0, %v13985_v60 }
 0xb48   : > { %v18306_v57 = vpop.eup %18305 }
 0xb49   : > { %v18308_v61 = vpop.eup %18307  ;;  %v13987_v62 = vmul.f32 %v18306_v57, %v13967_v55 }
 0xb4a   : > { %v14001_v1 = vmul.f32 %v18308_v61, %v13979_v56  ;;  %v18310_v6 = vpop.eup %18309 }
 0xb4b   : > { %v13989_v3 = vsel %vm13988_vm0, %v13967_v55, %v13987_v62  ;;  %v18312_v9 = vpop.eup %18311  ;;  %v13994_v10 = vmul.f32 %v18310_v6, %v13973_v0 }
 0xb4c   : > { %v13992_v7 = vsel %vm13990_vm1, %v13991_v63, %v13989_v3  ;;  %v14003_v13 = vsel %vm14002_vm2, %v13979_v56, %v14001_v1  ;;  %v14008_v15 = vmul.f32 %v18312_v9, %v13985_v60 }
 0xb4d   : > { %v14018_v2 = vadd.f32 1e-08, %v13992_v7  ;;  %v14006_v8 = vsel %vm14004_vm3, %v14005_v5, %v14003_v13  ;;  %v13996_v17 = vsel %vm13995_vm4, %v13973_v0, %v13994_v10 }
 0xb4e   : > { %v14020_v11 = vadd.f32 1e-08, %v14006_v8  ;;  %v13999_v20 = vsel %vm13997_vm5, %v13998_v12, %v13996_v17  ;;  %v14010_v21 = vsel %vm14009_vm6, %v13985_v60, %v14008_v15 }
 0xb4f   : > { %v14022_v16 = vmul.f32 %v14018_v2, %v14014_v4  ;;  %v14019_v23 = vadd.f32 1e-08, %v13999_v20  ;;  %v14013_v24 = vsel %vm14011_vm7, %v14012_v18, %v14010_v21 }
 0xb50   : > { %v14024_v19 = vmul.f32 %v14020_v11, %v14016_v14  ;;  %v14021_v28 = vadd.f32 1e-08, %v14013_v24 }
 0xb51   : > { %18313 = vrcp.f32 %v14022_v16  ;;  %v14023_v29 = vmul.f32 %v14019_v23, %v14015_v22 }
 0xb52   : > { %18315 = vrcp.f32 %v14024_v19  ;;  %v14025_v30 = vmul.f32 %v14021_v28, %v14017_v27 }
 0xb53   : > { %18317 = vrcp.f32 %v14023_v29 }
 0xb54   : > { %18319 = vrcp.f32 %v14025_v30 }
 0xb5b   : > { %v18314_v31 = vpop.eup %18313 }
 0xb5c   : > { %v18316_v32 = vpop.eup %18315  ;;  %v14030_v35 = vmul.f32 %v18314_v31, %v13967_v55 }
 0xb5d   : > { %v14032_v36 = vmul.f32 %v18316_v32, %v13979_v56  ;;  %v18318_v38 = vpop.eup %18317  ;;  %14048 = sbr.rel (!%p18413_p3) target bundleno = 2924 (0xb6c), region = 44 }
 0xb5e   : > { %v14034_v37 = vmul.f32 %v14030_v35, %v21135_v25  ;;  %v18320_v40 = vpop.eup %18319  ;;  %v14031_v41 = vmul.f32 %v18318_v38, %v13973_v0 }
 0xb5f   : > { %v14036_v39 = vmul.f32 %v14032_v36, %v21137_v26  ;;  %v14033_v42 = vmul.f32 %v18320_v40, %v13985_v60 }
 0xb60   : > { %14038 = vst [vmem:[%s212_s6] sm:$0xff] %v14034_v37  ;;  %v14035_v43 = vmul.f32 %v14031_v41, %v21143_v33 }
 0xb61   : > { %14040 = vst [vmem:[%s212_s6 + $0x10] sm:$0xff] %v14036_v39  ;;  %v14037_v44 = vmul.f32 %v14033_v42, %v21145_v34 }
 0xb62   : > { %14039 = vst [vmem:[%s212_s6 + $0x8] sm:$0xff] %v14035_v43 }
 0xb63   : > { %14041 = vst [vmem:[%s212_s6 + $0x18] sm:$0xff] %v14037_v44 }
 0xb67   : > { %v14084_v25 = vld [vmem:[%s212_s6] sm:$0xff] }
 0xb68   : > { %v14088_v26 = vld [vmem:[%s212_s6 + $0x10] sm:$0xff]  ;;  %14085 = vst [vmem:[%s14050_s9] sm:$0xff] %v14084_v25 }
 0xb69   : > { %v14086_v45 = vld [vmem:[%s212_s6 + $0x8] sm:$0xff]  ;;  %14089 = vst [vmem:[%s14050_s9 + $0x20] sm:$0xff] %v14088_v26 }
 0xb6a   : > { %v14090_v46 = vld [vmem:[%s212_s6 + $0x18] sm:$0xff]  ;;  %14087 = vst [vmem:[%s14050_s9 + $0x10] sm:$0xff] %v14086_v45 }
 0xb6b   : > { %14091 = vst [vmem:[%s14050_s9 + $0x30] sm:$0xff] %v14090_v46 }
 0xb6c PF: > { %s13_s16 = sadd.s32 1, %s18359_s16   ;;  %s21182_s12 = smov %s18347_s13 }
 0xb6d   : > { %p10_p10 = scmp.ge.s32.totalorder %s13_s16, 4   ;;  %s21183_s13 = smov %s18422_s22 }
 0xb6e   : > { %s21184_s14 = smov %s18355_s15  ;;  %s21185_s15 = smov %s21187_s18 }
 0xb6f   :  { %12 = sbr.rel (!%p10_p10) target bundleno = 3 (0x3), region = 114 }

</bundles_post_ra>
